<compile_context>
chip_gen: v7x
topology: tpu7x:2x2x1
jax: 0.10.0
libtpu: 0.0.40
codegen_flags: <defaults>
</compile_context>

<pallas_src>
import functools

import jax
import jax.numpy as jnp
from jax import lax
from jax.experimental import pallas as pl
from jax.experimental.pallas import tpu as pltpu

_EPS = 1e-5  # nn.InstanceNorm2d default


# --------------------- fused ResBlock kernel (one image per grid step) ---------------------

def _resblock_kernel(x_ref, w1_ref, w2_ref, o_ref, xp_ref, acc_ref, *, eps):
    """Per grid step (one image):
      x_ref   : (1, H, W, C)   f32  input activations (also the residual)
      w1_ref  : (9, C, C)      bf16 conv1 weights, tap-major (ky*3+kx, cin, cout)
      w2_ref  : (9, C, C)      bf16 conv2 weights
      o_ref   : (1, H, W, C)   f32  output
      xp_ref  : (H+2, W+2, C)  bf16 VMEM scratch: zero-padded activations (shared by both convs)
      acc_ref : (H*W, C)       f32  VMEM scratch: conv accumulator
    """
    H = o_ref.shape[1]
    W = o_ref.shape[2]
    C = o_ref.shape[3]

    # Zero the pad scratch once per step (megacore-safe; see header). The 1px
    # border must be zero; the interior is fully overwritten before each conv.
    xp_ref[...] = jnp.zeros(xp_ref.shape, xp_ref.dtype)

    def conv3x3_instnorm(w_ref):
        # 3x3 conv as 9 accumulated K=C matmuls (no im2col scratch). The f32
        # accumulator lives in VMEM scratch, not registers (a 256x128 f32 tile
        # would be half the register file).
        for dy in range(3):
            for dx in range(3):
                t = dy * 3 + dx
                tap = xp_ref[dy:dy + H, dx:dx + W, :].reshape(H * W, C)  # bf16
                contrib = jnp.dot(tap, w_ref[t],
                                  preferred_element_type=jnp.float32)
                if t == 0:
                    acc_ref[...] = contrib
                else:
                    acc_ref[...] += contrib
        acc = acc_ref[...]                                   # (H*W, C) f32
        # InstanceNorm2d(affine=False), biased variance, eps=1e-5. The conv
        # bias is omitted: the mean subtraction cancels it exactly.
        mean = jnp.mean(acc, axis=0, keepdims=True)
        centered = acc - mean
        var = jnp.mean(centered * centered, axis=0, keepdims=True)
        return centered * lax.rsqrt(var + eps)

    x = x_ref[0]                                             # (H, W, C) f32

    # Block 1: conv3x3 + InstanceNorm + ReLU.
    xp_ref[1:H + 1, 1:W + 1, :] = x.astype(xp_ref.dtype)
    h = jnp.maximum(conv3x3_instnorm(w1_ref), 0.0)           # (H*W, C) f32

    # Block 2: conv3x3 + InstanceNorm (no activation); h is re-padded in VMEM,
    # never written to HBM. It is only ever consumed as a bf16 MXU operand.
    xp_ref[1:H + 1, 1:W + 1, :] = h.reshape(H, W, C).astype(xp_ref.dtype)
    y = conv3x3_instnorm(w2_ref)                             # (H*W, C) f32

    # Residual add in f32.
    o_ref[0] = (y.reshape(H, W, C) + x).astype(o_ref.dtype)


def resblock_fused(x_nhwc, w1, w2, *, eps=_EPS):
    """x: (N,H,W,C) f32; w1,w2: (3,3,Cin,Cout)=(3,3,C,C) HWIO f32 -> (N,H,W,C) f32."""
    N, H, W, C = x_nhwc.shape
    assert w1.shape == (3, 3, C, C) and w2.shape == (3, 3, C, C)
    assert C % 128 == 0, "channels are kept lane-aligned (C % 128 == 0)"

    # Tap-major weights: row t = ky*3 + kx holds the (Cin, Cout) slab.
    w1k = w1.reshape(9, C, C).astype(jnp.bfloat16)
    w2k = w2.reshape(9, C, C).astype(jnp.bfloat16)

    kernel = functools.partial(_resblock_kernel, eps=eps)

    return pl.pallas_call(
        kernel,
        out_shape=jax.ShapeDtypeStruct((N, H, W, C), jnp.float32),
        grid=(N,),
        in_specs=[
            pl.BlockSpec((1, H, W, C), lambda n: (n, 0, 0, 0)),
            pl.BlockSpec((9, C, C), lambda n: (0, 0, 0)),
            pl.BlockSpec((9, C, C), lambda n: (0, 0, 0)),
        ],
        out_specs=pl.BlockSpec((1, H, W, C), lambda n: (n, 0, 0, 0)),
        scratch_shapes=[
            pltpu.VMEM((H + 2, W + 2, C), jnp.bfloat16),   # padded activations
            pltpu.VMEM((H * W, C), jnp.float32),           # conv accumulator
        ],
        compiler_params=pltpu.CompilerParams(
            dimension_semantics=("parallel",),
        ),
    )(x_nhwc, w1k, w2k)


# ----------------------------- parameters & public forward -----------------------------

def init_resblock_params(key, dim):
    """Two Conv2dBlocks: weights in HWIO (3,3,Cin,Cout), bias (Cout,)."""
    params = []
    for _ in range(2):
        key, wk, bk = jax.random.split(key, 3)
        w = jax.random.normal(wk, (3, 3, dim, dim), jnp.float32) * jnp.sqrt(
            2.0 / (9.0 * dim))
        b = jax.random.normal(bk, (dim,), jnp.float32) * 0.1
        params.append((w, b))
    return params


@jax.jit
def resblock_forward(x_nchw, params):
    """Pallas ResBlock forward; NCHW in/out, matching the PyTorch module.
    Note: when chaining ResBlocks, hoist the NCHW<->NHWC transposes to the
    chain entry/exit instead of paying them per block."""
    (w1, b1), (w2, b2) = params
    del b1, b2  # mathematically cancelled by InstanceNorm2d(affine=False)
    x = jnp.transpose(x_nchw, (0, 2, 3, 1))          # NCHW -> NHWC
    out = resblock_fused(x, w1, w2)
    return jnp.transpose(out, (0, 3, 1, 2))          # NHWC -> NCHW


# ----------------------------- pure-JAX reference (for checking) -----------------------------

@jax.jit
def resblock_forward_ref(x_nchw, params):
    (w1, b1), (w2, b2) = params
    x = jnp.transpose(x_nchw, (0, 2, 3, 1))

    def block(h, w, b, act):
        y = lax.conv_general_dilated(
            h, w, window_strides=(1, 1), padding="SAME",
            dimension_numbers=("NHWC", "HWIO", "NHWC"),
            precision=lax.Precision.HIGHEST,
        ) + b
        mean = jnp.mean(y, axis=(1, 2), keepdims=True)
        var = jnp.var(y, axis=(1, 2), keepdims=True)   # biased, like InstanceNorm2d
        y = (y - mean) / jnp.sqrt(var + _EPS)
        if act:
            y = jnp.maximum(y, 0.0)
        return y

    h = block(x, w1, b1, True)
    h = block(h, w2, b2, False)
    out = h + x
    return jnp.transpose(out, (0, 3, 1, 2))


# ----------------------------- main -----------------------------

if __name__ == "__main__":
    key = jax.random.PRNGKey(0)
    pkey, xkey = jax.random.split(key)

    # Small shapes consistent with ResBlock(dim): batch=2, dim=128 (lane-aligned
    # channels), spatial 16x16.
    N, dim, H, W = 2, 128, 16, 16
    params = init_resblock_params(pkey, dim)
    x = jax.random.normal(xkey, (N, dim, H, W), jnp.float32)

    out = jax.block_until_ready(resblock_forward(x, params))
    assert out.shape == (N, dim, H, W), out.shape

    ref = jax.block_until_ready(resblock_forward_ref(x, params))
    max_err = float(jnp.max(jnp.abs(out - ref)))
    scale = float(jnp.max(jnp.abs(ref))) + 1e-6
    # bf16 MXU inputs with f32 accumulation vs f32-HIGHEST reference (and the
    # reference applies the conv biases, which cancel under InstanceNorm).
    if max_err > 5e-2 * max(1.0, scale):
        raise AssertionError(f"Pallas/XLA mismatch: max_err={max_err}, scale={scale}")

    print("KERNEL_OK")
</pallas_src>

<mosaic_0001>
module attributes {stable_mosaic.version = 11 : i64} {
  func.func @_resblock_kernel(%arg0: i32, %arg1: memref<1x16x16x128xf32, #tpu.memory_space<vmem>>, %arg2: memref<9x128x128xbf16, #tpu.memory_space<vmem>>, %arg3: memref<9x128x128xbf16, #tpu.memory_space<vmem>>, %arg4: memref<1x16x16x128xf32, #tpu.memory_space<vmem>>, %arg5: memref<18x18x128xbf16, #tpu.memory_space<vmem>>, %arg6: memref<256x128xf32, #tpu.memory_space<vmem>>) attributes {dimension_semantics = [#tpu.dimension_semantics<parallel>], iteration_bounds = array<i64: 2>, scalar_prefetch = 0 : i64, scratch_operands = 2 : i64, tpu.core_type = #tpu.core_type<tc>, window_params = [{transform_indices = @transform_0, window_bounds = array<i64: 1, 16, 16, 128>}, {pipeline_mode = #tpu.pipeline_mode<synchronous>, transform_indices = @transform_1, window_bounds = array<i64: 9, 128, 128>}, {pipeline_mode = #tpu.pipeline_mode<synchronous>, transform_indices = @transform_2, window_bounds = array<i64: 9, 128, 128>}, {transform_indices = @transform_3, window_bounds = array<i64: 1, 16, 16, 128>}]} {
    %cst = arith.constant 0.000000e+00 : bf16
    %0 = vector.broadcast %cst : bf16 to vector<18x18x128xbf16>
    %c0 = arith.constant 0 : index
    %c0_0 = arith.constant 0 : index
    %c0_1 = arith.constant 0 : index
    %1 = vector.load %arg5[%c0, %c0_0, %c0_1] : memref<18x18x128xbf16, #tpu.memory_space<vmem>>, vector<18x18x128xbf16>
    tpu.vector_store %arg5[%c0, %c0_0, %c0_1], %0 {strides = array<i32>} : memref<18x18x128xbf16, #tpu.memory_space<vmem>>, vector<18x18x128xbf16>,
    %c0_2 = arith.constant 0 : index
    %c0_3 = arith.constant 0 : index
    %c0_4 = arith.constant 0 : index
    %c0_5 = arith.constant 0 : index
    %2 = vector.load %arg1[%c0_2, %c0_3, %c0_4, %c0_5] : memref<1x16x16x128xf32, #tpu.memory_space<vmem>>, vector<1x16x16x128xf32>
    %3 = vector.shape_cast %2 : vector<1x16x16x128xf32> to vector<16x16x128xf32>
    %4 = arith.truncf %3 : vector<16x16x128xf32> to vector<16x16x128xbf16>
    %c1 = arith.constant 1 : index
    %c1_6 = arith.constant 1 : index
    %c0_7 = arith.constant 0 : index
    %5 = vector.load %arg5[%c1, %c1_6, %c0_7] : memref<18x18x128xbf16, #tpu.memory_space<vmem>>, vector<16x16x128xbf16>
    tpu.vector_store %arg5[%c1, %c1_6, %c0_7], %4 {strides = array<i32>} : memref<18x18x128xbf16, #tpu.memory_space<vmem>>, vector<16x16x128xbf16>,
    %c0_8 = arith.constant 0 : index
    %c0_9 = arith.constant 0 : index
    %c0_10 = arith.constant 0 : index
    %6 = vector.load %arg5[%c0_8, %c0_9, %c0_10] : memref<18x18x128xbf16, #tpu.memory_space<vmem>>, vector<16x16x128xbf16>
    %7 = vector.shape_cast %6 : vector<16x16x128xbf16> to vector<256x128xbf16>
    %c0_11 = arith.constant 0 : index
    %c0_12 = arith.constant 0 : index
    %c0_13 = arith.constant 0 : index
    %8 = vector.load %arg2[%c0_11, %c0_12, %c0_13] : memref<9x128x128xbf16, #tpu.memory_space<vmem>>, vector<1x128x128xbf16>
    %9 = vector.shape_cast %8 : vector<1x128x128xbf16> to vector<128x128xbf16>
    %cst_14 = arith.constant dense<0.000000e+00> : vector<256x128xf32>
    %10 = tpu.matmul %7, %9, %cst_14 {dimension_numbers = #tpu.dot_dimension_numbers<[1], [0], [0], [1], [0, 0, 1, 1], [], []>} : vector<256x128xbf16>, vector<128x128xbf16>, vector<256x128xf32> -> vector<256x128xf32>
    %c0_15 = arith.constant 0 : index
    %c0_16 = arith.constant 0 : index
    %11 = vector.load %arg6[%c0_15, %c0_16] : memref<256x128xf32, #tpu.memory_space<vmem>>, vector<256x128xf32>
    tpu.vector_store %arg6[%c0_15, %c0_16], %10 {strides = array<i32>} : memref<256x128xf32, #tpu.memory_space<vmem>>, vector<256x128xf32>,
    %c0_17 = arith.constant 0 : index
    %c1_18 = arith.constant 1 : index
    %c0_19 = arith.constant 0 : index
    %12 = vector.load %arg5[%c0_17, %c1_18, %c0_19] : memref<18x18x128xbf16, #tpu.memory_space<vmem>>, vector<16x16x128xbf16>
    %13 = vector.shape_cast %12 : vector<16x16x128xbf16> to vector<256x128xbf16>
    %c1_20 = arith.constant 1 : index
    %c0_21 = arith.constant 0 : index
    %c0_22 = arith.constant 0 : index
    %14 = vector.load %arg2[%c1_20, %c0_21, %c0_22] : memref<9x128x128xbf16, #tpu.memory_space<vmem>>, vector<1x128x128xbf16>
    %15 = vector.shape_cast %14 : vector<1x128x128xbf16> to vector<128x128xbf16>
    %cst_23 = arith.constant dense<0.000000e+00> : vector<256x128xf32>
    %16 = tpu.matmul %13, %15, %cst_23 {dimension_numbers = #tpu.dot_dimension_numbers<[1], [0], [0], [1], [0, 0, 1, 1], [], []>} : vector<256x128xbf16>, vector<128x128xbf16>, vector<256x128xf32> -> vector<256x128xf32>
    %c0_24 = arith.constant 0 : index
    %c0_25 = arith.constant 0 : index
    %17 = vector.load %arg6[%c0_24, %c0_25] : memref<256x128xf32, #tpu.memory_space<vmem>>, vector<256x128xf32>
    %18 = arith.addf %17, %16 : vector<256x128xf32>
    %c0_26 = arith.constant 0 : index
    %c0_27 = arith.constant 0 : index
    %19 = vector.load %arg6[%c0_26, %c0_27] : memref<256x128xf32, #tpu.memory_space<vmem>>, vector<256x128xf32>
    tpu.vector_store %arg6[%c0_26, %c0_27], %18 {strides = array<i32>} : memref<256x128xf32, #tpu.memory_space<vmem>>, vector<256x128xf32>,
    %c0_28 = arith.constant 0 : index
    %c2 = arith.constant 2 : index
    %c0_29 = arith.constant 0 : index
    %20 = vector.load %arg5[%c0_28, %c2, %c0_29] : memref<18x18x128xbf16, #tpu.memory_space<vmem>>, vector<16x16x128xbf16>
    %21 = vector.shape_cast %20 : vector<16x16x128xbf16> to vector<256x128xbf16>
    %c2_30 = arith.constant 2 : index
    %c0_31 = arith.constant 0 : index
    %c0_32 = arith.constant 0 : index
    %22 = vector.load %arg2[%c2_30, %c0_31, %c0_32] : memref<9x128x128xbf16, #tpu.memory_space<vmem>>, vector<1x128x128xbf16>
    %23 = vector.shape_cast %22 : vector<1x128x128xbf16> to vector<128x128xbf16>
    %cst_33 = arith.constant dense<0.000000e+00> : vector<256x128xf32>
    %24 = tpu.matmul %21, %23, %cst_33 {dimension_numbers = #tpu.dot_dimension_numbers<[1], [0], [0], [1], [0, 0, 1, 1], [], []>} : vector<256x128xbf16>, vector<128x128xbf16>, vector<256x128xf32> -> vector<256x128xf32>
    %c0_34 = arith.constant 0 : index
    %c0_35 = arith.constant 0 : index
    %25 = vector.load %arg6[%c0_34, %c0_35] : memref<256x128xf32, #tpu.memory_space<vmem>>, vector<256x128xf32>
    %26 = arith.addf %25, %24 : vector<256x128xf32>
    %c0_36 = arith.constant 0 : index
    %c0_37 = arith.constant 0 : index
    %27 = vector.load %arg6[%c0_36, %c0_37] : memref<256x128xf32, #tpu.memory_space<vmem>>, vector<256x128xf32>
    tpu.vector_store %arg6[%c0_36, %c0_37], %26 {strides = array<i32>} : memref<256x128xf32, #tpu.memory_space<vmem>>, vector<256x128xf32>,
    %c1_38 = arith.constant 1 : index
    %c0_39 = arith.constant 0 : index
    %c0_40 = arith.constant 0 : index
    %28 = vector.load %arg5[%c1_38, %c0_39, %c0_40] : memref<18x18x128xbf16, #tpu.memory_space<vmem>>, vector<16x16x128xbf16>
    %29 = vector.shape_cast %28 : vector<16x16x128xbf16> to vector<256x128xbf16>
    %c3 = arith.constant 3 : index
    %c0_41 = arith.constant 0 : index
    %c0_42 = arith.constant 0 : index
    %30 = vector.load %arg2[%c3, %c0_41, %c0_42] : memref<9x128x128xbf16, #tpu.memory_space<vmem>>, vector<1x128x128xbf16>
    %31 = vector.shape_cast %30 : vector<1x128x128xbf16> to vector<128x128xbf16>
    %cst_43 = arith.constant dense<0.000000e+00> : vector<256x128xf32>
    %32 = tpu.matmul %29, %31, %cst_43 {dimension_numbers = #tpu.dot_dimension_numbers<[1], [0], [0], [1], [0, 0, 1, 1], [], []>} : vector<256x128xbf16>, vector<128x128xbf16>, vector<256x128xf32> -> vector<256x128xf32>
    %c0_44 = arith.constant 0 : index
    %c0_45 = arith.constant 0 : index
    %33 = vector.load %arg6[%c0_44, %c0_45] : memref<256x128xf32, #tpu.memory_space<vmem>>, vector<256x128xf32>
    %34 = arith.addf %33, %32 : vector<256x128xf32>
    %c0_46 = arith.constant 0 : index
    %c0_47 = arith.constant 0 : index
    %35 = vector.load %arg6[%c0_46, %c0_47] : memref<256x128xf32, #tpu.memory_space<vmem>>, vector<256x128xf32>
    tpu.vector_store %arg6[%c0_46, %c0_47], %34 {strides = array<i32>} : memref<256x128xf32, #tpu.memory_space<vmem>>, vector<256x128xf32>,
    %c1_48 = arith.constant 1 : index
    %c1_49 = arith.constant 1 : index
    %c0_50 = arith.constant 0 : index
    %36 = vector.load %arg5[%c1_48, %c1_49, %c0_50] : memref<18x18x128xbf16, #tpu.memory_space<vmem>>, vector<16x16x128xbf16>
    %37 = vector.shape_cast %36 : vector<16x16x128xbf16> to vector<256x128xbf16>
    %c4 = arith.constant 4 : index
    %c0_51 = arith.constant 0 : index
    %c0_52 = arith.constant 0 : index
    %38 = vector.load %arg2[%c4, %c0_51, %c0_52] : memref<9x128x128xbf16, #tpu.memory_space<vmem>>, vector<1x128x128xbf16>
    %39 = vector.shape_cast %38 : vector<1x128x128xbf16> to vector<128x128xbf16>
    %cst_53 = arith.constant dense<0.000000e+00> : vector<256x128xf32>
    %40 = tpu.matmul %37, %39, %cst_53 {dimension_numbers = #tpu.dot_dimension_numbers<[1], [0], [0], [1], [0, 0, 1, 1], [], []>} : vector<256x128xbf16>, vector<128x128xbf16>, vector<256x128xf32> -> vector<256x128xf32>
    %c0_54 = arith.constant 0 : index
    %c0_55 = arith.constant 0 : index
    %41 = vector.load %arg6[%c0_54, %c0_55] : memref<256x128xf32, #tpu.memory_space<vmem>>, vector<256x128xf32>
    %42 = arith.addf %41, %40 : vector<256x128xf32>
    %c0_56 = arith.constant 0 : index
    %c0_57 = arith.constant 0 : index
    %43 = vector.load %arg6[%c0_56, %c0_57] : memref<256x128xf32, #tpu.memory_space<vmem>>, vector<256x128xf32>
    tpu.vector_store %arg6[%c0_56, %c0_57], %42 {strides = array<i32>} : memref<256x128xf32, #tpu.memory_space<vmem>>, vector<256x128xf32>,
    %c1_58 = arith.constant 1 : index
    %c2_59 = arith.constant 2 : index
    %c0_60 = arith.constant 0 : index
    %44 = vector.load %arg5[%c1_58, %c2_59, %c0_60] : memref<18x18x128xbf16, #tpu.memory_space<vmem>>, vector<16x16x128xbf16>
    %45 = vector.shape_cast %44 : vector<16x16x128xbf16> to vector<256x128xbf16>
    %c5 = arith.constant 5 : index
    %c0_61 = arith.constant 0 : index
    %c0_62 = arith.constant 0 : index
    %46 = vector.load %arg2[%c5, %c0_61, %c0_62] : memref<9x128x128xbf16, #tpu.memory_space<vmem>>, vector<1x128x128xbf16>
    %47 = vector.shape_cast %46 : vector<1x128x128xbf16> to vector<128x128xbf16>
    %cst_63 = arith.constant dense<0.000000e+00> : vector<256x128xf32>
    %48 = tpu.matmul %45, %47, %cst_63 {dimension_numbers = #tpu.dot_dimension_numbers<[1], [0], [0], [1], [0, 0, 1, 1], [], []>} : vector<256x128xbf16>, vector<128x128xbf16>, vector<256x128xf32> -> vector<256x128xf32>
    %c0_64 = arith.constant 0 : index
    %c0_65 = arith.constant 0 : index
    %49 = vector.load %arg6[%c0_64, %c0_65] : memref<256x128xf32, #tpu.memory_space<vmem>>, vector<256x128xf32>
    %50 = arith.addf %49, %48 : vector<256x128xf32>
    %c0_66 = arith.constant 0 : index
    %c0_67 = arith.constant 0 : index
    %51 = vector.load %arg6[%c0_66, %c0_67] : memref<256x128xf32, #tpu.memory_space<vmem>>, vector<256x128xf32>
    tpu.vector_store %arg6[%c0_66, %c0_67], %50 {strides = array<i32>} : memref<256x128xf32, #tpu.memory_space<vmem>>, vector<256x128xf32>,
    %c2_68 = arith.constant 2 : index
    %c0_69 = arith.constant 0 : index
    %c0_70 = arith.constant 0 : index
    %52 = vector.load %arg5[%c2_68, %c0_69, %c0_70] : memref<18x18x128xbf16, #tpu.memory_space<vmem>>, vector<16x16x128xbf16>
    %53 = vector.shape_cast %52 : vector<16x16x128xbf16> to vector<256x128xbf16>
    %c6 = arith.constant 6 : index
    %c0_71 = arith.constant 0 : index
    %c0_72 = arith.constant 0 : index
    %54 = vector.load %arg2[%c6, %c0_71, %c0_72] : memref<9x128x128xbf16, #tpu.memory_space<vmem>>, vector<1x128x128xbf16>
    %55 = vector.shape_cast %54 : vector<1x128x128xbf16> to vector<128x128xbf16>
    %cst_73 = arith.constant dense<0.000000e+00> : vector<256x128xf32>
    %56 = tpu.matmul %53, %55, %cst_73 {dimension_numbers = #tpu.dot_dimension_numbers<[1], [0], [0], [1], [0, 0, 1, 1], [], []>} : vector<256x128xbf16>, vector<128x128xbf16>, vector<256x128xf32> -> vector<256x128xf32>
    %c0_74 = arith.constant 0 : index
    %c0_75 = arith.constant 0 : index
    %57 = vector.load %arg6[%c0_74, %c0_75] : memref<256x128xf32, #tpu.memory_space<vmem>>, vector<256x128xf32>
    %58 = arith.addf %57, %56 : vector<256x128xf32>
    %c0_76 = arith.constant 0 : index
    %c0_77 = arith.constant 0 : index
    %59 = vector.load %arg6[%c0_76, %c0_77] : memref<256x128xf32, #tpu.memory_space<vmem>>, vector<256x128xf32>
    tpu.vector_store %arg6[%c0_76, %c0_77], %58 {strides = array<i32>} : memref<256x128xf32, #tpu.memory_space<vmem>>, vector<256x128xf32>,
    %c2_78 = arith.constant 2 : index
    %c1_79 = arith.constant 1 : index
    %c0_80 = arith.constant 0 : index
    %60 = vector.load %arg5[%c2_78, %c1_79, %c0_80] : memref<18x18x128xbf16, #tpu.memory_space<vmem>>, vector<16x16x128xbf16>
    %61 = vector.shape_cast %60 : vector<16x16x128xbf16> to vector<256x128xbf16>
    %c7 = arith.constant 7 : index
    %c0_81 = arith.constant 0 : index
    %c0_82 = arith.constant 0 : index
    %62 = vector.load %arg2[%c7, %c0_81, %c0_82] : memref<9x128x128xbf16, #tpu.memory_space<vmem>>, vector<1x128x128xbf16>
    %63 = vector.shape_cast %62 : vector<1x128x128xbf16> to vector<128x128xbf16>
    %cst_83 = arith.constant dense<0.000000e+00> : vector<256x128xf32>
    %64 = tpu.matmul %61, %63, %cst_83 {dimension_numbers = #tpu.dot_dimension_numbers<[1], [0], [0], [1], [0, 0, 1, 1], [], []>} : vector<256x128xbf16>, vector<128x128xbf16>, vector<256x128xf32> -> vector<256x128xf32>
    %c0_84 = arith.constant 0 : index
    %c0_85 = arith.constant 0 : index
    %65 = vector.load %arg6[%c0_84, %c0_85] : memref<256x128xf32, #tpu.memory_space<vmem>>, vector<256x128xf32>
    %66 = arith.addf %65, %64 : vector<256x128xf32>
    %c0_86 = arith.constant 0 : index
    %c0_87 = arith.constant 0 : index
    %67 = vector.load %arg6[%c0_86, %c0_87] : memref<256x128xf32, #tpu.memory_space<vmem>>, vector<256x128xf32>
    tpu.vector_store %arg6[%c0_86, %c0_87], %66 {strides = array<i32>} : memref<256x128xf32, #tpu.memory_space<vmem>>, vector<256x128xf32>,
    %c2_88 = arith.constant 2 : index
    %c2_89 = arith.constant 2 : index
    %c0_90 = arith.constant 0 : index
    %68 = vector.load %arg5[%c2_88, %c2_89, %c0_90] : memref<18x18x128xbf16, #tpu.memory_space<vmem>>, vector<16x16x128xbf16>
    %69 = vector.shape_cast %68 : vector<16x16x128xbf16> to vector<256x128xbf16>
    %c8 = arith.constant 8 : index
    %c0_91 = arith.constant 0 : index
    %c0_92 = arith.constant 0 : index
    %70 = vector.load %arg2[%c8, %c0_91, %c0_92] : memref<9x128x128xbf16, #tpu.memory_space<vmem>>, vector<1x128x128xbf16>
    %71 = vector.shape_cast %70 : vector<1x128x128xbf16> to vector<128x128xbf16>
    %cst_93 = arith.constant dense<0.000000e+00> : vector<256x128xf32>
    %72 = tpu.matmul %69, %71, %cst_93 {dimension_numbers = #tpu.dot_dimension_numbers<[1], [0], [0], [1], [0, 0, 1, 1], [], []>} : vector<256x128xbf16>, vector<128x128xbf16>, vector<256x128xf32> -> vector<256x128xf32>
    %c0_94 = arith.constant 0 : index
    %c0_95 = arith.constant 0 : index
    %73 = vector.load %arg6[%c0_94, %c0_95] : memref<256x128xf32, #tpu.memory_space<vmem>>, vector<256x128xf32>
    %74 = arith.addf %73, %72 : vector<256x128xf32>
    %c0_96 = arith.constant 0 : index
    %c0_97 = arith.constant 0 : index
    %75 = vector.load %arg6[%c0_96, %c0_97] : memref<256x128xf32, #tpu.memory_space<vmem>>, vector<256x128xf32>
    tpu.vector_store %arg6[%c0_96, %c0_97], %74 {strides = array<i32>} : memref<256x128xf32, #tpu.memory_space<vmem>>, vector<256x128xf32>,
    %c0_98 = arith.constant 0 : index
    %c0_99 = arith.constant 0 : index
    %76 = vector.load %arg6[%c0_98, %c0_99] : memref<256x128xf32, #tpu.memory_space<vmem>>, vector<256x128xf32>
    %cst_100 = arith.constant dense<0.000000e+00> : vector<128xf32>
    %77 = vector.multi_reduction <add>, %76, %cst_100 [0] : vector<256x128xf32> to vector<128xf32>
    %78 = vector.shape_cast %77 : vector<128xf32> to vector<1x128xf32>
    %cst_101 = arith.constant 2.560000e+02 : f32
    %79 = vector.broadcast %cst_101 : f32 to vector<1x128xf32>
    %80 = arith.divf %78, %79 : vector<1x128xf32>
    %81 = vector.broadcast %80 : vector<1x128xf32> to vector<256x128xf32>
    %82 = arith.subf %76, %81 : vector<256x128xf32>
    %83 = arith.mulf %82, %82 : vector<256x128xf32>
    %cst_102 = arith.constant dense<0.000000e+00> : vector<128xf32>
    %84 = vector.multi_reduction <add>, %83, %cst_102 [0] : vector<256x128xf32> to vector<128xf32>
    %85 = vector.shape_cast %84 : vector<128xf32> to vector<1x128xf32>
    %cst_103 = arith.constant 2.560000e+02 : f32
    %86 = vector.broadcast %cst_103 : f32 to vector<1x128xf32>
    %87 = arith.divf %85, %86 : vector<1x128xf32>
    %cst_104 = arith.constant 9.99999974E-6 : f32
    %88 = vector.broadcast %cst_104 : f32 to vector<1x128xf32>
    %89 = arith.addf %87, %88 : vector<1x128xf32>
    %90 = math.rsqrt %89 : vector<1x128xf32>
    %91 = vector.broadcast %90 : vector<1x128xf32> to vector<256x128xf32>
    %92 = arith.mulf %82, %91 : vector<256x128xf32>
    %cst_105 = arith.constant 0.000000e+00 : f32
    %93 = vector.broadcast %cst_105 : f32 to vector<256x128xf32>
    %94 = arith.maximumf %92, %93 : vector<256x128xf32>
    %95 = vector.shape_cast %94 : vector<256x128xf32> to vector<16x16x128xf32>
    %96 = arith.truncf %95 : vector<16x16x128xf32> to vector<16x16x128xbf16>
    %c1_106 = arith.constant 1 : index
    %c1_107 = arith.constant 1 : index
    %c0_108 = arith.constant 0 : index
    %97 = vector.load %arg5[%c1_106, %c1_107, %c0_108] : memref<18x18x128xbf16, #tpu.memory_space<vmem>>, vector<16x16x128xbf16>
    tpu.vector_store %arg5[%c1_106, %c1_107, %c0_108], %96 {strides = array<i32>} : memref<18x18x128xbf16, #tpu.memory_space<vmem>>, vector<16x16x128xbf16>,
    %c0_109 = arith.constant 0 : index
    %c0_110 = arith.constant 0 : index
    %c0_111 = arith.constant 0 : index
    %98 = vector.load %arg5[%c0_109, %c0_110, %c0_111] : memref<18x18x128xbf16, #tpu.memory_space<vmem>>, vector<16x16x128xbf16>
    %99 = vector.shape_cast %98 : vector<16x16x128xbf16> to vector<256x128xbf16>
    %c0_112 = arith.constant 0 : index
    %c0_113 = arith.constant 0 : index
    %c0_114 = arith.constant 0 : index
    %100 = vector.load %arg3[%c0_112, %c0_113, %c0_114] : memref<9x128x128xbf16, #tpu.memory_space<vmem>>, vector<1x128x128xbf16>
    %101 = vector.shape_cast %100 : vector<1x128x128xbf16> to vector<128x128xbf16>
    %cst_115 = arith.constant dense<0.000000e+00> : vector<256x128xf32>
    %102 = tpu.matmul %99, %101, %cst_115 {dimension_numbers = #tpu.dot_dimension_numbers<[1], [0], [0], [1], [0, 0, 1, 1], [], []>} : vector<256x128xbf16>, vector<128x128xbf16>, vector<256x128xf32> -> vector<256x128xf32>
    %c0_116 = arith.constant 0 : index
    %c0_117 = arith.constant 0 : index
    %103 = vector.load %arg6[%c0_116, %c0_117] : memref<256x128xf32, #tpu.memory_space<vmem>>, vector<256x128xf32>
    tpu.vector_store %arg6[%c0_116, %c0_117], %102 {strides = array<i32>} : memref<256x128xf32, #tpu.memory_space<vmem>>, vector<256x128xf32>,
    %c0_118 = arith.constant 0 : index
    %c1_119 = arith.constant 1 : index
    %c0_120 = arith.constant 0 : index
    %104 = vector.load %arg5[%c0_118, %c1_119, %c0_120] : memref<18x18x128xbf16, #tpu.memory_space<vmem>>, vector<16x16x128xbf16>
    %105 = vector.shape_cast %104 : vector<16x16x128xbf16> to vector<256x128xbf16>
    %c1_121 = arith.constant 1 : index
    %c0_122 = arith.constant 0 : index
    %c0_123 = arith.constant 0 : index
    %106 = vector.load %arg3[%c1_121, %c0_122, %c0_123] : memref<9x128x128xbf16, #tpu.memory_space<vmem>>, vector<1x128x128xbf16>
    %107 = vector.shape_cast %106 : vector<1x128x128xbf16> to vector<128x128xbf16>
    %cst_124 = arith.constant dense<0.000000e+00> : vector<256x128xf32>
    %108 = tpu.matmul %105, %107, %cst_124 {dimension_numbers = #tpu.dot_dimension_numbers<[1], [0], [0], [1], [0, 0, 1, 1], [], []>} : vector<256x128xbf16>, vector<128x128xbf16>, vector<256x128xf32> -> vector<256x128xf32>
    %c0_125 = arith.constant 0 : index
    %c0_126 = arith.constant 0 : index
    %109 = vector.load %arg6[%c0_125, %c0_126] : memref<256x128xf32, #tpu.memory_space<vmem>>, vector<256x128xf32>
    %110 = arith.addf %109, %108 : vector<256x128xf32>
    %c0_127 = arith.constant 0 : index
    %c0_128 = arith.constant 0 : index
    %111 = vector.load %arg6[%c0_127, %c0_128] : memref<256x128xf32, #tpu.memory_space<vmem>>, vector<256x128xf32>
    tpu.vector_store %arg6[%c0_127, %c0_128], %110 {strides = array<i32>} : memref<256x128xf32, #tpu.memory_space<vmem>>, vector<256x128xf32>,
    %c0_129 = arith.constant 0 : index
    %c2_130 = arith.constant 2 : index
    %c0_131 = arith.constant 0 : index
    %112 = vector.load %arg5[%c0_129, %c2_130, %c0_131] : memref<18x18x128xbf16, #tpu.memory_space<vmem>>, vector<16x16x128xbf16>
    %113 = vector.shape_cast %112 : vector<16x16x128xbf16> to vector<256x128xbf16>
    %c2_132 = arith.constant 2 : index
    %c0_133 = arith.constant 0 : index
    %c0_134 = arith.constant 0 : index
    %114 = vector.load %arg3[%c2_132, %c0_133, %c0_134] : memref<9x128x128xbf16, #tpu.memory_space<vmem>>, vector<1x128x128xbf16>
    %115 = vector.shape_cast %114 : vector<1x128x128xbf16> to vector<128x128xbf16>
    %cst_135 = arith.constant dense<0.000000e+00> : vector<256x128xf32>
    %116 = tpu.matmul %113, %115, %cst_135 {dimension_numbers = #tpu.dot_dimension_numbers<[1], [0], [0], [1], [0, 0, 1, 1], [], []>} : vector<256x128xbf16>, vector<128x128xbf16>, vector<256x128xf32> -> vector<256x128xf32>
    %c0_136 = arith.constant 0 : index
    %c0_137 = arith.constant 0 : index
    %117 = vector.load %arg6[%c0_136, %c0_137] : memref<256x128xf32, #tpu.memory_space<vmem>>, vector<256x128xf32>
    %118 = arith.addf %117, %116 : vector<256x128xf32>
    %c0_138 = arith.constant 0 : index
    %c0_139 = arith.constant 0 : index
    %119 = vector.load %arg6[%c0_138, %c0_139] : memref<256x128xf32, #tpu.memory_space<vmem>>, vector<256x128xf32>
    tpu.vector_store %arg6[%c0_138, %c0_139], %118 {strides = array<i32>} : memref<256x128xf32, #tpu.memory_space<vmem>>, vector<256x128xf32>,
    %c1_140 = arith.constant 1 : index
    %c0_141 = arith.constant 0 : index
    %c0_142 = arith.constant 0 : index
    %120 = vector.load %arg5[%c1_140, %c0_141, %c0_142] : memref<18x18x128xbf16, #tpu.memory_space<vmem>>, vector<16x16x128xbf16>
    %121 = vector.shape_cast %120 : vector<16x16x128xbf16> to vector<256x128xbf16>
    %c3_143 = arith.constant 3 : index
    %c0_144 = arith.constant 0 : index
    %c0_145 = arith.constant 0 : index
    %122 = vector.load %arg3[%c3_143, %c0_144, %c0_145] : memref<9x128x128xbf16, #tpu.memory_space<vmem>>, vector<1x128x128xbf16>
    %123 = vector.shape_cast %122 : vector<1x128x128xbf16> to vector<128x128xbf16>
    %cst_146 = arith.constant dense<0.000000e+00> : vector<256x128xf32>
    %124 = tpu.matmul %121, %123, %cst_146 {dimension_numbers = #tpu.dot_dimension_numbers<[1], [0], [0], [1], [0, 0, 1, 1], [], []>} : vector<256x128xbf16>, vector<128x128xbf16>, vector<256x128xf32> -> vector<256x128xf32>
    %c0_147 = arith.constant 0 : index
    %c0_148 = arith.constant 0 : index
    %125 = vector.load %arg6[%c0_147, %c0_148] : memref<256x128xf32, #tpu.memory_space<vmem>>, vector<256x128xf32>
    %126 = arith.addf %125, %124 : vector<256x128xf32>
    %c0_149 = arith.constant 0 : index
    %c0_150 = arith.constant 0 : index
    %127 = vector.load %arg6[%c0_149, %c0_150] : memref<256x128xf32, #tpu.memory_space<vmem>>, vector<256x128xf32>
    tpu.vector_store %arg6[%c0_149, %c0_150], %126 {strides = array<i32>} : memref<256x128xf32, #tpu.memory_space<vmem>>, vector<256x128xf32>,
    %c1_151 = arith.constant 1 : index
    %c1_152 = arith.constant 1 : index
    %c0_153 = arith.constant 0 : index
    %128 = vector.load %arg5[%c1_151, %c1_152, %c0_153] : memref<18x18x128xbf16, #tpu.memory_space<vmem>>, vector<16x16x128xbf16>
    %129 = vector.shape_cast %128 : vector<16x16x128xbf16> to vector<256x128xbf16>
    %c4_154 = arith.constant 4 : index
    %c0_155 = arith.constant 0 : index
    %c0_156 = arith.constant 0 : index
    %130 = vector.load %arg3[%c4_154, %c0_155, %c0_156] : memref<9x128x128xbf16, #tpu.memory_space<vmem>>, vector<1x128x128xbf16>
    %131 = vector.shape_cast %130 : vector<1x128x128xbf16> to vector<128x128xbf16>
    %cst_157 = arith.constant dense<0.000000e+00> : vector<256x128xf32>
    %132 = tpu.matmul %129, %131, %cst_157 {dimension_numbers = #tpu.dot_dimension_numbers<[1], [0], [0], [1], [0, 0, 1, 1], [], []>} : vector<256x128xbf16>, vector<128x128xbf16>, vector<256x128xf32> -> vector<256x128xf32>
    %c0_158 = arith.constant 0 : index
    %c0_159 = arith.constant 0 : index
    %133 = vector.load %arg6[%c0_158, %c0_159] : memref<256x128xf32, #tpu.memory_space<vmem>>, vector<256x128xf32>
    %134 = arith.addf %133, %132 : vector<256x128xf32>
    %c0_160 = arith.constant 0 : index
    %c0_161 = arith.constant 0 : index
    %135 = vector.load %arg6[%c0_160, %c0_161] : memref<256x128xf32, #tpu.memory_space<vmem>>, vector<256x128xf32>
    tpu.vector_store %arg6[%c0_160, %c0_161], %134 {strides = array<i32>} : memref<256x128xf32, #tpu.memory_space<vmem>>, vector<256x128xf32>,
    %c1_162 = arith.constant 1 : index
    %c2_163 = arith.constant 2 : index
    %c0_164 = arith.constant 0 : index
    %136 = vector.load %arg5[%c1_162, %c2_163, %c0_164] : memref<18x18x128xbf16, #tpu.memory_space<vmem>>, vector<16x16x128xbf16>
    %137 = vector.shape_cast %136 : vector<16x16x128xbf16> to vector<256x128xbf16>
    %c5_165 = arith.constant 5 : index
    %c0_166 = arith.constant 0 : index
    %c0_167 = arith.constant 0 : index
    %138 = vector.load %arg3[%c5_165, %c0_166, %c0_167] : memref<9x128x128xbf16, #tpu.memory_space<vmem>>, vector<1x128x128xbf16>
    %139 = vector.shape_cast %138 : vector<1x128x128xbf16> to vector<128x128xbf16>
    %cst_168 = arith.constant dense<0.000000e+00> : vector<256x128xf32>
    %140 = tpu.matmul %137, %139, %cst_168 {dimension_numbers = #tpu.dot_dimension_numbers<[1], [0], [0], [1], [0, 0, 1, 1], [], []>} : vector<256x128xbf16>, vector<128x128xbf16>, vector<256x128xf32> -> vector<256x128xf32>
    %c0_169 = arith.constant 0 : index
    %c0_170 = arith.constant 0 : index
    %141 = vector.load %arg6[%c0_169, %c0_170] : memref<256x128xf32, #tpu.memory_space<vmem>>, vector<256x128xf32>
    %142 = arith.addf %141, %140 : vector<256x128xf32>
    %c0_171 = arith.constant 0 : index
    %c0_172 = arith.constant 0 : index
    %143 = vector.load %arg6[%c0_171, %c0_172] : memref<256x128xf32, #tpu.memory_space<vmem>>, vector<256x128xf32>
    tpu.vector_store %arg6[%c0_171, %c0_172], %142 {strides = array<i32>} : memref<256x128xf32, #tpu.memory_space<vmem>>, vector<256x128xf32>,
    %c2_173 = arith.constant 2 : index
    %c0_174 = arith.constant 0 : index
    %c0_175 = arith.constant 0 : index
    %144 = vector.load %arg5[%c2_173, %c0_174, %c0_175] : memref<18x18x128xbf16, #tpu.memory_space<vmem>>, vector<16x16x128xbf16>
    %145 = vector.shape_cast %144 : vector<16x16x128xbf16> to vector<256x128xbf16>
    %c6_176 = arith.constant 6 : index
    %c0_177 = arith.constant 0 : index
    %c0_178 = arith.constant 0 : index
    %146 = vector.load %arg3[%c6_176, %c0_177, %c0_178] : memref<9x128x128xbf16, #tpu.memory_space<vmem>>, vector<1x128x128xbf16>
    %147 = vector.shape_cast %146 : vector<1x128x128xbf16> to vector<128x128xbf16>
    %cst_179 = arith.constant dense<0.000000e+00> : vector<256x128xf32>
    %148 = tpu.matmul %145, %147, %cst_179 {dimension_numbers = #tpu.dot_dimension_numbers<[1], [0], [0], [1], [0, 0, 1, 1], [], []>} : vector<256x128xbf16>, vector<128x128xbf16>, vector<256x128xf32> -> vector<256x128xf32>
    %c0_180 = arith.constant 0 : index
    %c0_181 = arith.constant 0 : index
    %149 = vector.load %arg6[%c0_180, %c0_181] : memref<256x128xf32, #tpu.memory_space<vmem>>, vector<256x128xf32>
    %150 = arith.addf %149, %148 : vector<256x128xf32>
    %c0_182 = arith.constant 0 : index
    %c0_183 = arith.constant 0 : index
    %151 = vector.load %arg6[%c0_182, %c0_183] : memref<256x128xf32, #tpu.memory_space<vmem>>, vector<256x128xf32>
    tpu.vector_store %arg6[%c0_182, %c0_183], %150 {strides = array<i32>} : memref<256x128xf32, #tpu.memory_space<vmem>>, vector<256x128xf32>,
    %c2_184 = arith.constant 2 : index
    %c1_185 = arith.constant 1 : index
    %c0_186 = arith.constant 0 : index
    %152 = vector.load %arg5[%c2_184, %c1_185, %c0_186] : memref<18x18x128xbf16, #tpu.memory_space<vmem>>, vector<16x16x128xbf16>
    %153 = vector.shape_cast %152 : vector<16x16x128xbf16> to vector<256x128xbf16>
    %c7_187 = arith.constant 7 : index
    %c0_188 = arith.constant 0 : index
    %c0_189 = arith.constant 0 : index
    %154 = vector.load %arg3[%c7_187, %c0_188, %c0_189] : memref<9x128x128xbf16, #tpu.memory_space<vmem>>, vector<1x128x128xbf16>
    %155 = vector.shape_cast %154 : vector<1x128x128xbf16> to vector<128x128xbf16>
    %cst_190 = arith.constant dense<0.000000e+00> : vector<256x128xf32>
    %156 = tpu.matmul %153, %155, %cst_190 {dimension_numbers = #tpu.dot_dimension_numbers<[1], [0], [0], [1], [0, 0, 1, 1], [], []>} : vector<256x128xbf16>, vector<128x128xbf16>, vector<256x128xf32> -> vector<256x128xf32>
    %c0_191 = arith.constant 0 : index
    %c0_192 = arith.constant 0 : index
    %157 = vector.load %arg6[%c0_191, %c0_192] : memref<256x128xf32, #tpu.memory_space<vmem>>, vector<256x128xf32>
    %158 = arith.addf %157, %156 : vector<256x128xf32>
    %c0_193 = arith.constant 0 : index
    %c0_194 = arith.constant 0 : index
    %159 = vector.load %arg6[%c0_193, %c0_194] : memref<256x128xf32, #tpu.memory_space<vmem>>, vector<256x128xf32>
    tpu.vector_store %arg6[%c0_193, %c0_194], %158 {strides = array<i32>} : memref<256x128xf32, #tpu.memory_space<vmem>>, vector<256x128xf32>,
    %c2_195 = arith.constant 2 : index
    %c2_196 = arith.constant 2 : index
    %c0_197 = arith.constant 0 : index
    %160 = vector.load %arg5[%c2_195, %c2_196, %c0_197] : memref<18x18x128xbf16, #tpu.memory_space<vmem>>, vector<16x16x128xbf16>
    %161 = vector.shape_cast %160 : vector<16x16x128xbf16> to vector<256x128xbf16>
    %c8_198 = arith.constant 8 : index
    %c0_199 = arith.constant 0 : index
    %c0_200 = arith.constant 0 : index
    %162 = vector.load %arg3[%c8_198, %c0_199, %c0_200] : memref<9x128x128xbf16, #tpu.memory_space<vmem>>, vector<1x128x128xbf16>
    %163 = vector.shape_cast %162 : vector<1x128x128xbf16> to vector<128x128xbf16>
    %cst_201 = arith.constant dense<0.000000e+00> : vector<256x128xf32>
    %164 = tpu.matmul %161, %163, %cst_201 {dimension_numbers = #tpu.dot_dimension_numbers<[1], [0], [0], [1], [0, 0, 1, 1], [], []>} : vector<256x128xbf16>, vector<128x128xbf16>, vector<256x128xf32> -> vector<256x128xf32>
    %c0_202 = arith.constant 0 : index
    %c0_203 = arith.constant 0 : index
    %165 = vector.load %arg6[%c0_202, %c0_203] : memref<256x128xf32, #tpu.memory_space<vmem>>, vector<256x128xf32>
    %166 = arith.addf %165, %164 : vector<256x128xf32>
    %c0_204 = arith.constant 0 : index
    %c0_205 = arith.constant 0 : index
    %167 = vector.load %arg6[%c0_204, %c0_205] : memref<256x128xf32, #tpu.memory_space<vmem>>, vector<256x128xf32>
    tpu.vector_store %arg6[%c0_204, %c0_205], %166 {strides = array<i32>} : memref<256x128xf32, #tpu.memory_space<vmem>>, vector<256x128xf32>,
    %c0_206 = arith.constant 0 : index
    %c0_207 = arith.constant 0 : index
    %168 = vector.load %arg6[%c0_206, %c0_207] : memref<256x128xf32, #tpu.memory_space<vmem>>, vector<256x128xf32>
    %cst_208 = arith.constant dense<0.000000e+00> : vector<128xf32>
    %169 = vector.multi_reduction <add>, %168, %cst_208 [0] : vector<256x128xf32> to vector<128xf32>
    %170 = vector.shape_cast %169 : vector<128xf32> to vector<1x128xf32>
    %cst_209 = arith.constant 2.560000e+02 : f32
    %171 = vector.broadcast %cst_209 : f32 to vector<1x128xf32>
    %172 = arith.divf %170, %171 : vector<1x128xf32>
    %173 = vector.broadcast %172 : vector<1x128xf32> to vector<256x128xf32>
    %174 = arith.subf %168, %173 : vector<256x128xf32>
    %175 = arith.mulf %174, %174 : vector<256x128xf32>
    %cst_210 = arith.constant dense<0.000000e+00> : vector<128xf32>
    %176 = vector.multi_reduction <add>, %175, %cst_210 [0] : vector<256x128xf32> to vector<128xf32>
    %177 = vector.shape_cast %176 : vector<128xf32> to vector<1x128xf32>
    %cst_211 = arith.constant 2.560000e+02 : f32
    %178 = vector.broadcast %cst_211 : f32 to vector<1x128xf32>
    %179 = arith.divf %177, %178 : vector<1x128xf32>
    %cst_212 = arith.constant 9.99999974E-6 : f32
    %180 = vector.broadcast %cst_212 : f32 to vector<1x128xf32>
    %181 = arith.addf %179, %180 : vector<1x128xf32>
    %182 = math.rsqrt %181 : vector<1x128xf32>
    %183 = vector.broadcast %182 : vector<1x128xf32> to vector<256x128xf32>
    %184 = arith.mulf %174, %183 : vector<256x128xf32>
    %185 = vector.shape_cast %184 : vector<256x128xf32> to vector<16x16x128xf32>
    %186 = arith.addf %185, %3 : vector<16x16x128xf32>
    %c0_213 = arith.constant 0 : index
    %c0_214 = arith.constant 0 : index
    %c0_215 = arith.constant 0 : index
    %c0_216 = arith.constant 0 : index
    %187 = vector.load %arg4[%c0_213, %c0_214, %c0_215, %c0_216] : memref<1x16x16x128xf32, #tpu.memory_space<vmem>>, vector<1x16x16x128xf32>
    %188 = vector.shape_cast %187 : vector<1x16x16x128xf32> to vector<16x16x128xf32>
    %189 = vector.shape_cast %186 : vector<16x16x128xf32> to vector<1x16x16x128xf32>
    tpu.vector_store %arg4[%c0_213, %c0_214, %c0_215, %c0_216], %189 {strides = array<i32>} : memref<1x16x16x128xf32, #tpu.memory_space<vmem>>, vector<1x16x16x128xf32>,
    return
  }
  func.func @transform_0(%arg0: i32) -> (i32, i32, i32, i32) {
    %c0_i32 = arith.constant 0 : i32
    %c0_i32_0 = arith.constant 0 : i32
    %c0_i32_1 = arith.constant 0 : i32
    %c0_i32_2 = arith.constant 0 : i32
    return %arg0, %c0_i32, %c0_i32_0, %c0_i32_1 : i32, i32, i32, i32
  }
  func.func @transform_1(%arg0: i32) -> (i32, i32, i32) {
    %c0_i32 = arith.constant 0 : i32
    %c0_i32_0 = arith.constant 0 : i32
    %c0_i32_1 = arith.constant 0 : i32
    %c0_i32_2 = arith.constant 0 : i32
    return %c0_i32, %c0_i32_0, %c0_i32_1 : i32, i32, i32
  }
  func.func @transform_2(%arg0: i32) -> (i32, i32, i32) {
    %c0_i32 = arith.constant 0 : i32
    %c0_i32_0 = arith.constant 0 : i32
    %c0_i32_1 = arith.constant 0 : i32
    %c0_i32_2 = arith.constant 0 : i32
    return %c0_i32, %c0_i32_0, %c0_i32_1 : i32, i32, i32
  }
  func.func @transform_3(%arg0: i32) -> (i32, i32, i32, i32) {
    %c0_i32 = arith.constant 0 : i32
    %c0_i32_0 = arith.constant 0 : i32
    %c0_i32_1 = arith.constant 0 : i32
    %c0_i32_2 = arith.constant 0 : i32
    return %arg0, %c0_i32, %c0_i32_0, %c0_i32_1 : i32, i32, i32, i32
  }
}

</mosaic_0001>

<bundles_post_ra>
// kernel: resblock_forward.1
= control target key start
LH: loop header
LB: loop body
LE: loop exit
PB: predicated region body
PF: predicated region fallthrough
CT: control target
= control target key end

     0   :  { %8 = vsyncpa [#allocation5], 0  ;;  %s19239_s0 = inlined_call_operand.vmem [shape: f32[2,16,16,128], index: 0, kind: input, shape index: {}]   ;;  %s19240_s1 = inlined_call_operand.vmem [shape: bf16[9,128,128], index: 1, kind: input, shape index: {}]   ;;  %s19241_s2 = inlined_call_operand.vmem [shape: bf16[9,128,128], index: 2, kind: input, shape index: {}]   ;;  %s19242_s3 = inlined_call_operand.hbm [shape: f32[2,16,16,128], index: 3, kind: output, shape index: {}]  }
   0x1   :  { %10 = vsyncpa [#allocation5 + $0x1], 0  ;;  %s16095_s12 = smov 0   ;;  %s16097_s13 = smov 0  }
   0x2   :  { %s16099_s14 = smov 0   ;;  %s16101_s15 = smov 0  }
   0x3 LB: > { %s16116_s16 = sadd.s32 4294967295, %s16069_s15   ;;  %s12955_s17 = sadd.s32 4294967294, %s16069_s15   ;;  %s16069_s15 = sphi %s16101_s15, %s19315_s15   ;;  %s16065_s14 = sphi %s16099_s14, %s19314_s14   ;;  %s16061_s13 = sphi %s16097_s13, %s19313_s13   ;;  %s16057_s12 = sphi %s16095_s12, %s19312_s12  }
   0x4   : > { %s16120_s18 = sadd.s32 1, %s16069_s15   ;;  %s91_s19 = sadd.s32 1, %s16065_s14 }
   0x5   : > { %s88_s20 = ssub.s32 %s16069_s15, %s16120_s18  ;;  %p101_p0 = scmp.ne.s32.totalorder %s16065_s14, %s16061_s13 }
   0x6   : > { %p89_p1 = scmp.eq.s32.totalorder %s88_s20, 0  ;;  %p102_p2 = scmp.eq.s32.totalorder %s16116_s16, 1 }
   0x7   : > { %p107_p3 = scmp.ne.s32.totalorder %s16061_s13, %s16057_s12  ;;  %p108_p4 = scmp.eq.s32.totalorder %s12955_s17, 1 }
   0x8   : > { %s16131_s21 = scalar_select %p89_p1, %s16065_s14, %s91_s19  }
   0x9   : > { %p16133_p5 = por %p102_p2, %p101_p0  ;;  %p16137_p6 = por %p108_p4, %p107_p3 }
   0xa   : > { %p12958_p7 = scmp.ge.s32.totalorder %s16069_s15, 1  ;;  %p140_p8 = scmp.lt.s32.totalorder %s16069_s15, 3 }
   0xc   : > { %p141_p9 = pnand %p12958_p7, %p140_p8 }
   0xe   : > { %144 = sbr.rel (%p141_p9) target bundleno = 1982 (0x7be), region = 32 }
  0x15   : > { %v15731_v0 = vld [vmem:[%s19240_s1] sm:$0xff]   ;;  %v16149_v1 = vld [vmem:[%s19240_s1 + $0x8] sm:$0xff]   ;;  %v16071_v2 = vmov 0   ;;  %p164_p10 = scmp.lt.s32.totalorder %s16116_s16, 1  ;;  %v15733_v3 = vld [vmem:[%s19240_s1 + $0x10] sm:$0xff]   ;;  %vm676_vm2 = vcmask 1043456  }
  0x16   : > { %170 = vst [vmem:[#allocation2] sm:$0xf] %v16071_v2  ;;  %171 = vst [vmem:[#allocation2 + $0x4] sm:$0xf] %v16071_v2  ;;  %14313 = vmatprep.subr.bf16.mxu0 %v15731_v0  ;;  %v15734_v4 = vld [vmem:[%s19240_s1 + $0x18] sm:$0xff]   ;;  %vm683_vm3 = vcmask 1040384  }
  0x17   : > { %172 = vst [vmem:[#allocation2 + $0x8] sm:$0x1] %v16071_v2  ;;  %173 = vst [vmem:[#allocation2 + $0xc] sm:$0xf] %v16071_v2  ;;  %14314 = vmatpush3.bf16.msra.mxu0 %v15731_v0  ;;  %s165_s28 = scalar_select %p164_p10, %s16116_s16, 1  ;;  %v15735_v10 = vld [vmem:[%s19240_s1 + $0x20] sm:$0xff]  }
  0x18   : > { %174 = vst [vmem:[#allocation2 + $0x10] sm:$0xf] %v16071_v2  ;;  %175 = vst [vmem:[#allocation2 + $0x14] sm:$0x1] %v16071_v2  ;;  %14315 = vmatprep.subr.bf16.mxu0 %v16149_v1  ;;  %vm352_vm0 = vsmask.f32 256 }
  0x19   : > { %176 = vst [vmem:[#allocation2 + $0x18] sm:$0xf] %v16071_v2  ;;  %177 = vst [vmem:[#allocation2 + $0x1c] sm:$0xf] %v16071_v2  ;;  %s13815_s4 = sshll.u32 %s165_s28, 8  ;;  %v19259_v11 = vmov 0 }
  0x1a   : > { %178 = vst [vmem:[#allocation2 + $0x20] sm:$0x1] %v16071_v2  ;;  %179 = vst [vmem:[#allocation2 + $0x24] sm:$0xf] %v16071_v2  ;;  %s16160_s7 = scalar_lea.vmem %s19239_s0, %s13815_s4  ;;  %vm353_vm1 = vsmask.f32 4368 }
  0x1b   : > { %180 = vst [vmem:[#allocation2 + $0x28] sm:$0xf] %v16071_v2  ;;  %181 = vst [vmem:[#allocation2 + $0x2c] sm:$0x1] %v16071_v2  ;;  %14316 = vmatpush3.bf16.msra.mxu0 %v16149_v1  ;;  %v224_v6 = vld [vmem:[%s16160_s7] sm:$0xff]  ;;  %v225_v7 = vld [vmem:[%s16160_s7 + $0x8] sm:$0xff] }
  0x1c   : > { %182 = vst [vmem:[#allocation2 + $0x30] sm:$0xf] %v16071_v2  ;;  %183 = vst [vmem:[#allocation2 + $0x34] sm:$0xf] %v16071_v2  ;;  %14317 = vmatprep.subr.bf16.mxu0 %v15733_v3  ;;  %v13816_v8 = vpack.c.bf16 %v224_v6, %v224_v6  ;;  %v13817_v9 = vpack.c.bf16 %v225_v7, %v225_v7  ;;  %vm677_vm4 = vsmask.f32 7938 }
  0x1d   : > { %184 = vst [vmem:[#allocation2 + $0x38] sm:$0x1] %v16071_v2  ;;  %185 = vst [vmem:[#allocation2 + $0x3c] sm:$0xf] %v16071_v2  ;;  %v15739_v5 = vld [vmem:[#allocation2] sm:$0xff]   ;;  %v226_v16 = vld [vmem:[%s16160_s7 + $0x10] sm:$0xff] }
  0x1e   : > { %186 = vst [vmem:[#allocation2 + $0x40] sm:$0xf] %v16071_v2  ;;  %187 = vst [vmem:[#allocation2 + $0x44] sm:$0x1] %v16071_v2  ;;  %14329 = vmatprep.mubr.bf16.mxu0 %v15739_v5  ;;  %v356_v12 = vshrl.u32 %v13816_v8, 16  ;;  %v359_v13 = vshll.u32 %v13816_v8, 16  ;;  %v13818_v19 = vpack.c.bf16 %v226_v16, %v226_v16 }
  0x1f   : > { %188 = vst [vmem:[#allocation2 + $0x48] sm:$0xf] %v16071_v2  ;;  %189 = vst [vmem:[#allocation2 + $0x4c] sm:$0xf] %v16071_v2  ;;  %14318 = vmatpush3.bf16.msra.mxu0 %v15733_v3  ;;  %v364_v14 = vshrl.u32 %v13817_v9, 16  ;;  %v367_v15 = vshll.u32 %v13817_v9, 16 }
  0x20   : > { %190 = vst [vmem:[#allocation2 + $0x50] sm:$0x1] %v16071_v2  ;;  %191 = vst [vmem:[#allocation2 + $0x54] sm:$0xf] %v16071_v2  ;;  %14319 = vmatprep.subr.bf16.mxu0 %v15734_v4  ;;  %v679_v17 = vld [vmem:[#allocation2 + $0xc] sm:$0xf] }
  0x21   : > { %192 = vst [vmem:[#allocation2 + $0x58] sm:$0xf] %v16071_v2  ;;  %193 = vst [vmem:[#allocation2 + $0x5c] sm:$0x1] %v16071_v2  ;;  %v227_v18 = vld [vmem:[%s16160_s7 + $0x18] sm:$0xff]  ;;  %v228_v20 = vld [vmem:[%s16160_s7 + $0x20] sm:$0xff] }
  0x22   : > { %194 = vst [vmem:[#allocation2 + $0x60] sm:$0xf] %v16071_v2  ;;  %195 = vst [vmem:[#allocation2 + $0x64] sm:$0xf] %v16071_v2  ;;  %v358_v21 = vrot.slane %v356_v12, 7  ;;  %v366_v22 = vrot.slane %v364_v14, 7  ;;  %v13819_v25 = vpack.c.bf16 %v227_v18, %v227_v18  ;;  %v13820_v27 = vpack.c.bf16 %v228_v20, %v228_v20 }
  0x23   : > { %196 = vst [vmem:[#allocation2 + $0x68] sm:$0x1] %v16071_v2  ;;  %197 = vst [vmem:[#allocation2 + $0x6c] sm:$0xf] %v16071_v2  ;;  %v19262_v23 = vmov 0  ;;  %v229_v26 = vld [vmem:[%s16160_s7 + $0x28] sm:$0xff]  ;;  %14320 = vmatpush3.bf16.msra.mxu0 %v15734_v4 }
  0x24   : > { %198 = vst [vmem:[#allocation2 + $0x70] sm:$0xf] %v16071_v2  ;;  %199 = vst [vmem:[#allocation2 + $0x74] sm:$0x1] %v16071_v2  ;;  %v685_v24 = vld [vmem:[#allocation2 + $0x14] sm:$0x1]  ;;  %v13821_v31 = vpack.c.bf16 %v229_v26, %v229_v26  ;;  %14321 = vmatprep.subr.bf16.mxu0 %v15735_v10  ;;  %v361_v33 = vor.u32 %v359_v13, %v358_v21  ;;  %v369_v35 = vor.u32 %v367_v15, %v366_v22 }
  0x25   : > { %200 = vst [vmem:[#allocation2 + $0x78] sm:$0xf] %v16071_v2  ;;  %201 = vst [vmem:[#allocation2 + $0x7c] sm:$0xf] %v16071_v2  ;;  %v19265_v28 = vmov 0  ;;  %v373_v29 = vshrl.u32 %v13818_v19, 16 }
  0x26   : > { %202 = vst [vmem:[#allocation2 + $0x80] sm:$0x1] %v16071_v2  ;;  %203 = vst [vmem:[#allocation2 + $0x84] sm:$0xf] %v16071_v2  ;;  %v376_v30 = vshll.u32 %v13818_v19, 16  ;;  %v15736_v32 = vld [vmem:[%s19240_s1 + $0x28] sm:$0xff]  }
  0x27   : > { %204 = vst [vmem:[#allocation2 + $0x88] sm:$0xf] %v16071_v2  ;;  %205 = vst [vmem:[#allocation2 + $0x8c] sm:$0x1] %v16071_v2  ;;  %v362_v34 = vrot.slane %v358_v21, 4  ;;  %v371_v36 = vrot.slane %v366_v22, 4  ;;  %14322 = vmatpush3.bf16.msra.mxu0 %v15735_v10 }
  0x28   : > { %206 = vst [vmem:[#allocation2 + $0x90] sm:$0xf] %v16071_v2  ;;  %207 = vst [vmem:[#allocation2 + $0x94] sm:$0xf] %v16071_v2  ;;  %v375_v37 = vrot.slane %v373_v29, 7  ;;  %v381_v38 = vshrl.u32 %v13819_v25, 16  ;;  %14323 = vmatprep.subr.bf16.mxu0 %v15736_v32 }
  0x29   : > { %208 = vst [vmem:[#allocation2 + $0x98] sm:$0x1] %v16071_v2  ;;  %209 = vst [vmem:[#allocation2 + $0x9c] sm:$0xf] %v16071_v2  ;;  %v384_v39 = vshll.u32 %v13819_v25, 16  ;;  %v390_v40 = vshrl.u32 %v13820_v27, 16 }
  0x2a   : > { %210 = vst [vmem:[#allocation2 + $0xa0] sm:$0xf] %v16071_v2  ;;  %211 = vst [vmem:[#allocation2 + $0xa4] sm:$0x1] %v16071_v2  ;;  %v230_v41 = vld [vmem:[%s16160_s7 + $0x30] sm:$0xff]  ;;  %v231_v42 = vld [vmem:[%s16160_s7 + $0x38] sm:$0xff]  ;;  %v378_v49 = vor.u32 %v376_v30, %v375_v37 }
  0x2b   : > { %212 = vst [vmem:[#allocation2 + $0xa8] sm:$0xf] %v16071_v2  ;;  %213 = vst [vmem:[#allocation2 + $0xac] sm:$0xf] %v16071_v2  ;;  %v688_v46 = vld [vmem:[#allocation2 + $0x18] sm:$0xf]  ;;  %v13822_v56 = vpack.c.bf16 %v230_v41, %v230_v41  ;;  %v13823_v57 = vpack.c.bf16 %v231_v42, %v231_v42  ;;  %14324 = vmatpush3.bf16.msra.mxu0 %v15736_v32 }
  0x2c   : > { %214 = vst [vmem:[#allocation2 + $0xb0] sm:$0x1] %v16071_v2  ;;  %215 = vst [vmem:[#allocation2 + $0xb4] sm:$0xf] %v16071_v2  ;;  %v393_v47 = vshll.u32 %v13820_v27, 16  ;;  %v15737_v48 = vld [vmem:[%s19240_s1 + $0x30] sm:$0xff]  }
  0x2d   : > { %216 = vst [vmem:[#allocation2 + $0xb8] sm:$0xf] %v16071_v2  ;;  %217 = vst [vmem:[#allocation2 + $0xbc] sm:$0x1] %v16071_v2  ;;  %v379_v50 = vrot.slane %v375_v37, 4  ;;  %v16206_v51 = vrot.slane %v381_v38, 7  ;;  %14325 = vmatprep.subr.bf16.mxu0 %v15737_v48 }
  0x2e   : > { %218 = vst [vmem:[#allocation2 + $0xc0] sm:$0xf] %v16071_v2  ;;  %219 = vst [vmem:[#allocation2 + $0xc4] sm:$0xf] %v16071_v2  ;;  %v392_v52 = vrot.slane %v390_v40, 7  ;;  %v398_v53 = vshrl.u32 %v13821_v31, 16 }
  0x2f   : > { %220 = vst [vmem:[#allocation2 + $0xc8] sm:$0x1] %v16071_v2  ;;  %221 = vst [vmem:[#allocation2 + $0xcc] sm:$0xf] %v16071_v2  ;;  %v401_v54 = vshll.u32 %v13821_v31, 16  ;;  %v232_v58 = vld [vmem:[%s16160_s7 + $0x40] sm:$0xff]  ;;  %v386_v60 = vor.u32 %v384_v39, %v16206_v51  ;;  %14326 = vmatpush3.bf16.msra.mxu0 %v15737_v48 }
  0x30   : > { %222 = vst [vmem:[#allocation2 + $0xd0] sm:$0xf] %v16071_v2  ;;  %223 = vst [vmem:[#allocation2 + $0xd4] sm:$0x1] %v16071_v2  ;;  %v695_v55 = vld [vmem:[#allocation2 + $0x24] sm:$0xf]  ;;  %v395_v62 = vor.u32 %v393_v47, %v392_v52  ;;  %v13824_v13 = vpack.c.bf16 %v232_v58, %v232_v58 }
  0x31   : > { %vm16172_vm5 = vmor %vm352_vm0, %vm353_vm1  ;;  %v233_v59 = vld [vmem:[%s16160_s7 + $0x48] sm:$0xff]  ;;  %v234_v63 = vld [vmem:[%s16160_s7 + $0x50] sm:$0xff]  ;;  %v396_v1 = vrot.slane %v392_v52, 4  ;;  %v16215_v2 = vrot.slane %v398_v53, 7  ;;  %v407_v3 = vshrl.u32 %v13822_v56, 16  ;;  %v410_v4 = vshll.u32 %v13822_v56, 16 }
  0x32   : > { %v19260_v11 = vsel %vm16172_vm5, 4294967295, %v19259_v11  ;;  %vm16181_vm6 = vmand %vm676_vm2, %vm677_vm4  ;;  %v370_v43 = vsel %vm16172_vm5, %v362_v34, %v369_v35  ;;  %v235_v0 = vld [vmem:[%s16160_s7 + $0x58] sm:$0xff]  ;;  %v387_v5 = vsel %vm16172_vm5, %v379_v50, %v386_v60  ;;  %v415_v7 = vshrl.u32 %v13823_v57, 16  ;;  %v236_v14 = vld [vmem:[%s16160_s7 + $0x60] sm:$0xff]  ;;  %s161_s27 = sand.u32 1, %s16061_s13   ;;  %s13880_s30 = sshll.u32 %s16116_s16, 12 }
  0x33   : > { %19261 = vst [vmem:[#allocation7_spill] sm:$0xff] %v19260_v11  ;;  %v19263_v23 = vsel %vm16181_vm6, 4294967295, %v19262_v23  ;;  %vm16188_vm7 = vmand %vm683_vm3, %vm352_vm0  ;;  %v680_v44 = vsel %vm16181_vm6, %v361_v33, %v679_v17  ;;  %v689_v61 = vsel %vm16181_vm6, %v378_v49, %v688_v46  ;;  %v696_v6 = vsel %vm16181_vm6, %v395_v62, %v695_v55  ;;  %v15738_v9 = vld [vmem:[%s19240_s1 + $0x38] sm:$0xff]   ;;  %v702_v16 = vld [vmem:[#allocation2 + $0x30] sm:$0xf]  ;;  %s12959_s28 = sshll.u32 %s161_s27, 8  ;;  %s19170_s8 = scalar_lea.hbm %s19242_s3, %s13880_s30 }
  0x34   : > { %19264 = vst [vmem:[#allocation8_spill] sm:$0xff] %v19263_v23  ;;  %v19266_v28 = vsel %vm16188_vm7, 4294967295, %v19265_v28  ;;  %v686_v45 = vsel %vm16188_vm7, %v371_v36, %v685_v24  ;;  %681 = vst [vmem:[#allocation2 + $0xc] sm:$0xf] %v680_v44  ;;  %v418_v8 = vshll.u32 %v13823_v57, 16  ;;  %v403_v10 = vor.u32 %v401_v54, %v16215_v2  ;;  %v15741_v25 = vld [vmem:[%s19240_s1 + $0x40] sm:$0xff]   ;;  %14327 = vmatprep.subr.bf16.mxu0 %v15738_v9 }
  0x35   : > { %19267 = vst [vmem:[#allocation9_spill] sm:$0xff] %v19266_v28  ;;  %682 = vst [vmem:[#allocation2 + $0x10] sm:$0xf] %v370_v43  ;;  %v409_v12 = vrot.slane %v407_v3, 7  ;;  %v16226_v15 = vrot.slane %v415_v7, 7  ;;  %v13825_v17 = vpack.c.bf16 %v233_v59, %v233_v59  ;;  %v13826_v18 = vpack.c.bf16 %v234_v63, %v234_v63  ;;  %v237_v30 = vld [vmem:[%s16160_s7 + $0x68] sm:$0xff]  ;;  %14328 = vmatpush3.bf16.msra.mxu0 %v15738_v9 }
  0x36   : > { %687 = vst [vmem:[#allocation2 + $0x14] sm:$0x1] %v686_v45  ;;  %690 = vst [vmem:[#allocation2 + $0x18] sm:$0xf] %v689_v61  ;;  %v13827_v19 = vpack.c.bf16 %v235_v0, %v235_v0  ;;  %v388_v20 = vrot.slane %v16206_v51, 4  ;;  %v404_v21 = vsel %vm16172_vm5, %v396_v1, %v403_v10  ;;  %v424_v27 = vshrl.u32 %v13824_v13, 16  ;;  %14361 = vmatprep.subr.bf16.mxu0 %v15741_v25 }
  0x37   : > { %691 = vst [vmem:[#allocation2 + $0x1c] sm:$0xf] %v387_v5  ;;  %697 = vst [vmem:[#allocation2 + $0x24] sm:$0xf] %v696_v6  ;;  %v412_v22 = vor.u32 %v410_v4, %v409_v12  ;;  %v413_v24 = vrot.slane %v409_v12, 4  ;;  %v420_v26 = vor.u32 %v418_v8, %v16226_v15  ;;  %v427_v29 = vshll.u32 %v13824_v13, 16 }
  0x38   : > { %698 = vst [vmem:[#allocation2 + $0x28] sm:$0xf] %v404_v21  ;;  %v13828_v31 = vpack.c.bf16 %v236_v14, %v236_v14  ;;  %v432_v33 = vshrl.u32 %v13825_v17, 16  ;;  %v435_v34 = vshll.u32 %v13825_v17, 16  ;;  %v709_v35 = vld [vmem:[#allocation2 + $0x3c] sm:$0xf]  ;;  %v13829_v48 = vpack.c.bf16 %v237_v30, %v237_v30 }
  0x39   : > { %v703_v32 = vsel %vm16181_vm6, %v412_v22, %v702_v16  ;;  %v441_v36 = vshrl.u32 %v13826_v18, 16  ;;  %v238_v37 = vld [vmem:[%s16160_s7 + $0x70] sm:$0xff]  ;;  %v421_v38 = vsel %vm16172_vm5, %v413_v24, %v420_v26  ;;  %v426_v39 = vrot.slane %v424_v27, 7  ;;  %v239_v42 = vld [vmem:[%s16160_s7 + $0x78] sm:$0xff]  ;;  %v716_v47 = vld [vmem:[#allocation2 + $0x48] sm:$0xf] }
  0x3a   : > { %704 = vst [vmem:[#allocation2 + $0x30] sm:$0xf] %v703_v32  ;;  %v444_v40 = vshll.u32 %v13826_v18, 16  ;;  %v449_v41 = vshrl.u32 %v13827_v19, 16  ;;  %705 = vst [vmem:[#allocation2 + $0x34] sm:$0xf] %v421_v38  ;;  %v13830_v53 = vpack.c.bf16 %v238_v37, %v238_v37  ;;  %v13831_v58 = vpack.c.bf16 %v239_v42, %v239_v42 }
  0x3b   : > { %v16242_v44 = vrot.slane %v432_v33, 7  ;;  %v443_v45 = vrot.slane %v441_v36, 7  ;;  %v452_v46 = vshll.u32 %v13827_v19, 16  ;;  %v429_v50 = vor.u32 %v427_v29, %v426_v39  ;;  %v15744_v54 = vld [vmem:[%s19240_s1 + $0x48] sm:$0xff]   ;;  %v723_v4 = vld [vmem:[#allocation2 + $0x54] sm:$0xf] }
  0x3c   : > { %v15740_v43 = vld [vmem:[#allocation2 + $0xc] sm:$0xff]   ;;  %v430_v52 = vrot.slane %v426_v39, 4  ;;  %v16250_v60 = vrot.slane %v449_v41, 7  ;;  %v458_v61 = vshrl.u32 %v13828_v31, 16  ;;  %v461_v62 = vshll.u32 %v13828_v31, 16  ;;  %v240_v10 = vld [vmem:[%s16160_s7 + $0x80] sm:$0xff] }
  0x3d   : > { %v437_v55 = vor.u32 %v435_v34, %v16242_v44  ;;  %v446_v56 = vor.u32 %v444_v40, %v443_v45  ;;  %v447_v57 = vrot.slane %v443_v45, 4  ;;  %v710_v59 = vsel %vm16181_vm6, %v429_v50, %v709_v35  ;;  %14330 = vmatmul.mubr.bf16.vlgmr.msra.gmra.mrb[0].mxu0 %v15740_v43  ;;  %v15747_v6 = vld [vmem:[%s19240_s1 + $0x50] sm:$0xff]   ;;  %v241_v12 = vld [vmem:[%s16160_s7 + $0x88] sm:$0xff]  ;;  %v730_v24 = vld [vmem:[#allocation2 + $0x60] sm:$0xf]  ;;  %s19065_s29 = scalar_lea.vmem [#allocation4], %s12959_s28 }
  0x3e   : > { %v15742_v49 = vld [vmem:[#allocation2 + $0x18] sm:$0xff]   ;;  %711 = vst [vmem:[#allocation2 + $0x3c] sm:$0xf] %v710_v59  ;;  %v466_v1 = vshrl.u32 %v13829_v48, 16  ;;  %v469_v3 = vshll.u32 %v13829_v48, 16  ;;  %14362 = vmatpush3.bf16.msra.mxu0 %v15741_v25  ;;  %v405_v5 = vrot.slane %v16215_v2, 4  ;;  %v454_v7 = vor.u32 %v452_v46, %v16250_v60 }
  0x3f   : > { %v438_v63 = vsel %vm16172_vm5, %v430_v52, %v437_v55  ;;  %v717_v0 = vsel %vm16181_vm6, %v446_v56, %v716_v47  ;;  %14333 = vmatprep.mubr.bf16.mxu0 %v15742_v49  ;;  %v460_v8 = vrot.slane %v458_v61, 7  ;;  %v475_v9 = vshrl.u32 %v13830_v53, 16  ;;  %14363 = vmatprep.subr.bf16.mxu0 %v15744_v54  ;;  %v15743_v25 = vld [vmem:[#allocation2 + $0x24] sm:$0xff]   ;;  %v242_v31 = vld [vmem:[%s16160_s7 + $0x90] sm:$0xff]  ;;  %v243_v37 = vld [vmem:[%s16160_s7 + $0x98] sm:$0xff]  ;;  %s12893_s4 = sshll.u32 %s19065_s29, 4  ;;  %s19174_s4 = int_to_ptr.vmem [resolvable:$true] %s12893_s4 }
  0x40   : > { %712 = vst [vmem:[#allocation2 + $0x40] sm:$0xf] %v438_v63  ;;  %718 = vst [vmem:[#allocation2 + $0x48] sm:$0xf] %v717_v0  ;;  %v16263_v13 = vrot.slane %v466_v1, 7  ;;  %v478_v14 = vshll.u32 %v13830_v53, 16  ;;  %v455_v18 = vsel %vm16172_vm5, %v447_v57, %v454_v7  ;;  %v13832_v30 = vpack.c.bf16 %v240_v10, %v240_v10 }
  0x41   : > { %v483_v16 = vshrl.u32 %v13831_v58, 16  ;;  %v486_v17 = vshll.u32 %v13831_v58, 16  ;;  %v463_v19 = vor.u32 %v461_v62, %v460_v8  ;;  %v464_v21 = vrot.slane %v460_v8, 4  ;;  %719 = vst [vmem:[#allocation2 + $0x4c] sm:$0xf] %v455_v18  ;;  %v15745_v32 = vld [vmem:[#allocation2 + $0x30] sm:$0xff]  }
  0x42   : > { %v477_v22 = vrot.slane %v475_v9, 7  ;;  %v422_v26 = vrot.slane %v16226_v15, 4  ;;  %v471_v27 = vor.u32 %v469_v3, %v16263_v13  ;;  %14364 = vmatpush3.bf16.msra.mxu0 %v15744_v54  ;;  %v13833_v36 = vpack.c.bf16 %v241_v12, %v241_v12  ;;  %v15750_v40 = vld [vmem:[%s19240_s1 + $0x58] sm:$0xff]   ;;  %v244_v43 = vld [vmem:[%s16160_s7 + $0xa0] sm:$0xff]  ;;  %v245_v45 = vld [vmem:[%s16160_s7 + $0xa8] sm:$0xff]  ;;  %s19198_s16 = scalar_lea.sflag [#allocation5], %s161_s27 }
  0x43   : > { %v16269_v29 = vrot.slane %v483_v16, 7  ;;  %v724_v33 = vsel %vm16181_vm6, %v463_v19, %v723_v4  ;;  %v439_v38 = vrot.slane %v16242_v44, 4  ;;  %14365 = vmatprep.subr.bf16.mxu0 %v15747_v6  ;;  %v492_v42 = vshrl.u32 %v13832_v30, 16  ;;  %v246_v55 = vld [vmem:[%s16160_s7 + $0xb0] sm:$0xff]  ;;  %v737_v58 = vld [vmem:[#allocation2 + $0x6c] sm:$0xf] }
  0x44   : > { %v480_v34 = vor.u32 %v478_v14, %v477_v22  ;;  %v481_v35 = vrot.slane %v477_v22, 4  ;;  %v472_v39 = vsel %vm16172_vm5, %v464_v21, %v471_v27  ;;  %725 = vst [vmem:[#allocation2 + $0x54] sm:$0xf] %v724_v33  ;;  %v495_v47 = vshll.u32 %v13832_v30, 16  ;;  %v15753_v0 = vld [vmem:[%s19240_s1 + $0x60] sm:$0xff]   ;;  %v247_v8 = vld [vmem:[%s16160_s7 + $0xb8] sm:$0xff] }
  0x45   : > { %v488_v41 = vor.u32 %v486_v17, %v16269_v29  ;;  %726 = vst [vmem:[#allocation2 + $0x58] sm:$0xf] %v472_v39  ;;  %v500_v48 = vshrl.u32 %v13833_v36, 16  ;;  %v503_v49 = vshll.u32 %v13833_v36, 16  ;;  %14334 = vmatmul.mubr.bf16.gmra.mrb[4].mxu0 %v15743_v25  ;;  %v494_v52 = vrot.slane %v492_v42, 7  ;;  %v15756_v33 = vld [vmem:[%s19240_s1 + $0x68] sm:$0xff]  }
  0x46   : > { %v731_v46 = vsel %vm16181_vm6, %v480_v34, %v730_v24  ;;  %v13834_v53 = vpack.c.bf16 %v242_v31, %v242_v31  ;;  %v13835_v54 = vpack.c.bf16 %v243_v37, %v243_v37  ;;  %14337 = vmatprep.mubr.bf16.mxu0 %v15745_v32  ;;  %14366 = vmatpush3.bf16.msra.mxu0 %v15747_v6  ;;  %v456_v56 = vrot.slane %v16250_v60, 4  ;;  %v744_v16 = vld [vmem:[#allocation2 + $0x78] sm:$0xf]  ;;  %v751_v27 = vld [vmem:[#allocation2 + $0x84] sm:$0xf]  ;;  %s16072_s9 = smov [#allocation4]  }
  0x47   : > { %v489_v50 = vsel %vm16172_vm5, %v481_v35, %v488_v41  ;;  %732 = vst [vmem:[#allocation2 + $0x60] sm:$0xf] %v731_v46  ;;  %v16290_v57 = vrot.slane %v500_v48, 7  ;;  %v13836_v59 = vpack.c.bf16 %v244_v43, %v244_v43  ;;  %v13837_v61 = vpack.c.bf16 %v245_v45, %v245_v45  ;;  %14367 = vmatprep.subr.bf16.mxu0 %v15750_v40  ;;  %v15746_v10 = vld [vmem:[#allocation2 + $0x3c] sm:$0xff]   ;;  %v249_v46 = vld [vmem:[%s16160_s7 + $0xc8] sm:$0xff]  ;;  %s16011_s10 = sshll.u32 %s16072_s9, 4  ;;  %s16012_s10 = int_to_ptr.vmem [resolvable:$false] %s16011_s10 }
  0x48   : > { %733 = vst [vmem:[#allocation2 + $0x64] sm:$0xf] %v489_v50  ;;  %v497_v62 = vor.u32 %v495_v47, %v494_v52  ;;  %v498_v63 = vrot.slane %v494_v52, 4  ;;  %v509_v1 = vshrl.u32 %v13834_v53, 16  ;;  %v512_v3 = vshll.u32 %v13834_v53, 16  ;;  %v15748_v19 = vld [vmem:[#allocation2 + $0x48] sm:$0xff]   ;;  %p16014_p0 = scmp.lt.s32.totalorder %s19174_s4, %s16012_s10 }
  0x49   : > { %v505_v4 = vor.u32 %v503_v49, %v16290_v57  ;;  %v517_v6 = vshrl.u32 %v13835_v54, 16  ;;  %v520_v7 = vshll.u32 %v13835_v54, 16  ;;  %v13838_v9 = vpack.c.bf16 %v246_v55, %v246_v55  ;;  %v250_v52 = vld [vmem:[%s16160_s7 + $0xd0] sm:$0xff]  ;;  %s16013_s11 = scalar_lea.vmem %s16012_s10, 8192 }
  0x4a   : > { %v738_v12 = vsel %vm16181_vm6, %v497_v62, %v737_v58  ;;  %v511_v14 = vrot.slane %v509_v1, 7  ;;  %v526_v17 = vshrl.u32 %v13836_v59, 16  ;;  %v529_v18 = vshll.u32 %v13836_v59, 16  ;;  %14368 = vmatpush3.bf16.msra.mxu0 %v15750_v40  ;;  %v248_v40 = vld [vmem:[%s16160_s7 + $0xc0] sm:$0xff]  ;;  %v758_v58 = vld [vmem:[#allocation2 + $0x90] sm:$0xf] }
  0x4b   : > { %v506_v21 = vsel %vm16172_vm5, %v498_v63, %v505_v4  ;;  %739 = vst [vmem:[#allocation2 + $0x6c] sm:$0xf] %v738_v12  ;;  %v16301_v22 = vrot.slane %v517_v6, 7  ;;  %v534_v24 = vshrl.u32 %v13837_v61, 16  ;;  %v537_v25 = vshll.u32 %v13837_v61, 16  ;;  %14369 = vmatprep.subr.bf16.mxu0 %v15753_v0  ;;  %v15759_v61 = vld [vmem:[%s19240_s1 + $0x70] sm:$0xff]  }
  0x4c   : > { %740 = vst [vmem:[#allocation2 + $0x70] sm:$0xf] %v506_v21  ;;  %v514_v30 = vor.u32 %v512_v3, %v511_v14  ;;  %v515_v31 = vrot.slane %v511_v14, 4  ;;  %v528_v32 = vrot.slane %v526_v17, 7  ;;  %v13839_v34 = vpack.c.bf16 %v247_v8, %v247_v8  ;;  %v251_v62 = vld [vmem:[%s16160_s7 + $0xd8] sm:$0xff] }
  0x4d   : > { %v473_v35 = vrot.slane %v16263_v13, 4  ;;  %v522_v36 = vor.u32 %v520_v7, %v16301_v22  ;;  %v16308_v37 = vrot.slane %v534_v24, 7  ;;  %v543_v39 = vshrl.u32 %v13838_v9, 16  ;;  %14338 = vmatmul.mubr.bf16.gmra.mrb[8].mxu0 %v15746_v10  ;;  %v15749_v4 = vld [vmem:[#allocation2 + $0x54] sm:$0xff]   ;;  %v765_v17 = vld [vmem:[#allocation2 + $0x9c] sm:$0xf] }
  0x4e   : > { %v745_v41 = vsel %vm16181_vm6, %v514_v30, %v744_v16  ;;  %v531_v42 = vor.u32 %v529_v18, %v528_v32  ;;  %v532_v43 = vrot.slane %v528_v32, 4  ;;  %v546_v45 = vshll.u32 %v13838_v9, 16  ;;  %14341 = vmatprep.mubr.bf16.mxu0 %v15748_v19  ;;  %14370 = vmatpush3.bf16.msra.mxu0 %v15753_v0  ;;  %v252_v19 = vld [vmem:[%s16160_s7 + $0xe0] sm:$0xff]  ;;  %v15762_v30 = vld [vmem:[%s19240_s1 + $0x78] sm:$0xff]  }
  0x4f   : > { %v490_v47 = vrot.slane %v16269_v29, 4  ;;  %v523_v48 = vsel %vm16172_vm5, %v515_v31, %v522_v36  ;;  %746 = vst [vmem:[#allocation2 + $0x78] sm:$0xf] %v745_v41  ;;  %v539_v49 = vor.u32 %v537_v25, %v16308_v37  ;;  %v545_v50 = vrot.slane %v543_v39, 7  ;;  %14371 = vmatprep.subr.bf16.mxu0 %v15756_v33  ;;  %v15751_v10 = vld [vmem:[#allocation2 + $0x60] sm:$0xff]   ;;  %v253_v36 = vld [vmem:[%s16160_s7 + $0xe8] sm:$0xff] }
  0x50   : > { %747 = vst [vmem:[#allocation2 + $0x7c] sm:$0xf] %v523_v48  ;;  %v752_v53 = vsel %vm16181_vm6, %v531_v42, %v751_v27  ;;  %v551_v54 = vshrl.u32 %v13839_v34, 16  ;;  %v554_v55 = vshll.u32 %v13839_v34, 16  ;;  %v13840_v59 = vpack.c.bf16 %v248_v40, %v248_v40  ;;  %v772_v48 = vld [vmem:[#allocation2 + $0xa8] sm:$0xf] }
  0x51   : > { %v540_v63 = vsel %vm16172_vm5, %v532_v43, %v539_v49  ;;  %753 = vst [vmem:[#allocation2 + $0x84] sm:$0xf] %v752_v53  ;;  %v548_v0 = vor.u32 %v546_v45, %v545_v50  ;;  %v549_v1 = vrot.slane %v545_v50, 4  ;;  %v13841_v3 = vpack.c.bf16 %v249_v46, %v249_v46 }
  0x52   : > { %754 = vst [vmem:[#allocation2 + $0x88] sm:$0xf] %v540_v63  ;;  %v16327_v6 = vrot.slane %v551_v54, 7  ;;  %v560_v7 = vshrl.u32 %v13840_v59, 16  ;;  %v563_v8 = vshll.u32 %v13840_v59, 16  ;;  %v13842_v9 = vpack.c.bf16 %v250_v52, %v250_v52  ;;  %14372 = vmatpush3.bf16.msra.mxu0 %v15756_v33 }
  0x53   : > { %v759_v12 = vsel %vm16181_vm6, %v548_v0, %v758_v58  ;;  %v568_v14 = vshrl.u32 %v13841_v3, 16  ;;  %v571_v16 = vshll.u32 %v13841_v3, 16  ;;  %v13843_v18 = vpack.c.bf16 %v251_v62, %v251_v62  ;;  %14373 = vmatprep.subr.bf16.mxu0 %v15759_v61  ;;  %v16351_v58 = vld [vmem:[%s19240_s1 + $0x80] sm:$0xff]  }
  0x54   : > { %v507_v21 = vrot.slane %v16290_v57, 4  ;;  %v556_v24 = vor.u32 %v554_v55, %v16327_v6  ;;  %760 = vst [vmem:[#allocation2 + $0x90] sm:$0xf] %v759_v12  ;;  %v562_v25 = vrot.slane %v560_v7, 7  ;;  %v577_v27 = vshrl.u32 %v13842_v9, 16 }
  0x55   : > { %v16337_v31 = vrot.slane %v568_v14, 7  ;;  %v580_v32 = vshll.u32 %v13842_v9, 16  ;;  %v585_v33 = vshrl.u32 %v13843_v18, 16  ;;  %v588_v34 = vshll.u32 %v13843_v18, 16  ;;  %14342 = vmatmul.mubr.bf16.gmra.mrb[12].mxu0 %v15749_v4  ;;  %v1178_v55 = vld [vmem:[#allocation2] sm:$0xf] }
  0x56   : > { %v557_v39 = vsel %vm16172_vm5, %v549_v1, %v556_v24  ;;  %v565_v40 = vor.u32 %v563_v8, %v562_v25  ;;  %v566_v41 = vrot.slane %v562_v25, 4  ;;  %v579_v42 = vrot.slane %v577_v27, 7  ;;  %14345 = vmatprep.mubr.bf16.mxu0 %v15751_v10  ;;  %14374 = vmatpush3.bf16.msra.mxu0 %v15759_v61  ;;  %v1179_v0 = vld [vmem:[#allocation2 + $0x4] sm:$0xf]  ;;  %v15752_v1 = vld [vmem:[#allocation2 + $0x6c] sm:$0xff]  }
  0x57   : > { %v524_v43 = vrot.slane %v16301_v22, 4  ;;  %761 = vst [vmem:[#allocation2 + $0x94] sm:$0xf] %v557_v39  ;;  %v573_v45 = vor.u32 %v571_v16, %v16337_v31  ;;  %v16344_v46 = vrot.slane %v585_v33, 7  ;;  %v13844_v49 = vpack.c.bf16 %v252_v19, %v252_v19  ;;  %14375 = vmatprep.subr.bf16.mxu0 %v15762_v30  ;;  %v779_v9 = vld [vmem:[#allocation2 + $0xb4] sm:$0xf] }
  0x58   : > { %v766_v50 = vsel %vm16181_vm6, %v565_v40, %v765_v17  ;;  %v582_v52 = vor.u32 %v580_v32, %v579_v42  ;;  %v583_v53 = vrot.slane %v579_v42, 4  ;;  %v13845_v54 = vpack.c.bf16 %v253_v36, %v253_v36  ;;  %v1181_v10 = vld [vmem:[#allocation2 + $0xc] sm:$0xf]  ;;  %v15754_v12 = vld [vmem:[#allocation2 + $0x78] sm:$0xff]   ;;  %v1180_v17 = vld [vmem:[#allocation2 + $0x8] sm:$0x1] }
  0x59   : > { %v541_v59 = vrot.slane %v16308_v37, 4  ;;  %v574_v61 = vsel %vm16172_vm5, %v566_v41, %v573_v45  ;;  %767 = vst [vmem:[#allocation2 + $0x9c] sm:$0xf] %v766_v50  ;;  %v590_v62 = vor.u32 %v588_v34, %v16344_v46  ;;  %v594_v63 = vshrl.u32 %v13844_v49, 16  ;;  %v1182_v33 = vld [vmem:[#allocation2 + $0x10] sm:$0xf] }
  0x5a   : > { %768 = vst [vmem:[#allocation2 + $0xa0] sm:$0xf] %v574_v61  ;;  %v773_v3 = vsel %vm16181_vm6, %v582_v52, %v772_v48  ;;  %v597_v4 = vshll.u32 %v13844_v49, 16  ;;  %v602_v7 = vshrl.u32 %v13845_v54, 16  ;;  %v605_v8 = vshll.u32 %v13845_v54, 16  ;;  %14376 = vmatpush3.bf16.msra.mxu0 %v15762_v30 }
  0x5b   : > { %v591_v14 = vsel %vm16172_vm5, %v583_v53, %v590_v62  ;;  %774 = vst [vmem:[#allocation2 + $0xa8] sm:$0xf] %v773_v3  ;;  %v596_v16 = vrot.slane %v594_v63, 7  ;;  %vm1226_vm8 = vsmask.f32 3328  ;;  %v1230_v18 = vshrl.u32 %v1178_v55, 16  ;;  %14409 = vmatprep.subr.bf16.mxu0 %v16351_v58 }
  0x5c   : > { %vm1227_vm9 = vsmask.f32 7440  ;;  %v1233_v19 = vshll.u32 %v1178_v55, 16  ;;  %v558_v24 = vrot.slane %v16327_v6, 4  ;;  %775 = vst [vmem:[#allocation2 + $0xac] sm:$0xf] %v591_v14 }
  0x5d   : > { %v16362_v25 = vrot.slane %v602_v7, 7  ;;  %v1239_v27 = vshll.u32 %v1179_v0, 16  ;;  %v1243_v32 = vshrl.u32 %v1179_v0, 16  ;;  %v599_v34 = vor.u32 %v597_v4, %v596_v16  ;;  %v692_v30 = vld [vmem:[#allocation2 + $0x20] sm:$0x1]  ;;  %14346 = vmatmul.mubr.bf16.gmra.mrb[16].mxu0 %v15752_v1  ;;  %v15755_v55 = vld [vmem:[#allocation2 + $0x84] sm:$0xff]   ;;  %vm16385_vm10 = vmor %vm1226_vm8, %vm1227_vm9 }
  0x5e   : > { %v600_v36 = vrot.slane %v596_v16, 4  ;;  %v1232_v39 = vrot.slane %v1230_v18, 4  ;;  %v1235_v40 = vrot.slane %v1233_v19, 5  ;;  %v1183_v48 = vld [vmem:[#allocation2 + $0x14] sm:$0x1]  ;;  %14349 = vmatprep.mubr.bf16.mxu0 %v15754_v12  ;;  %v575_v50 = vrot.slane %v16337_v31, 4 }
  0x5f   : > { %v607_v41 = vor.u32 %v605_v8, %v16362_v25  ;;  %v16366_v42 = vrot.slane %v1239_v27, 5  ;;  %v1245_v45 = vrot.slane %v1243_v32, 4  ;;  %v1184_v49 = vld [vmem:[#allocation2 + $0x18] sm:$0xf]  ;;  %v780_v52 = vsel %vm16181_vm6, %v599_v34, %v779_v9  ;;  %v1185_v54 = vld [vmem:[#allocation2 + $0x1c] sm:$0xf] }
  0x60   : > { %v1254_v53 = vshrl.u32 %v1181_v10, 16  ;;  %781 = vst [vmem:[#allocation2 + $0xb4] sm:$0xf] %v780_v52  ;;  %v1249_v62 = vshll.u32 %v1180_v17, 16  ;;  %v1257_v63 = vshll.u32 %v1181_v10, 16  ;;  %v1263_v0 = vshll.u32 %v1182_v33, 16 }
  0x61   : > { %v608_v61 = vsel %vm16172_vm5, %v600_v36, %v607_v41  ;;  %v1236_v1 = vor.u32 %v1235_v40, %v1232_v39  ;;  %v1267_v4 = vshrl.u32 %v1182_v33, 16  ;;  %v693_v7 = vsel %vm16188_vm7, %v388_v20, %v692_v30  ;;  %v699_v8 = vld [vmem:[#allocation2 + $0x2c] sm:$0x1]  ;;  %v15757_v9 = vld [vmem:[#allocation2 + $0x90] sm:$0xff]   ;;  %v1187_v20 = vld [vmem:[#allocation2 + $0x24] sm:$0xf] }
  0x62   : > { %782 = vst [vmem:[#allocation2 + $0xb8] sm:$0xf] %v608_v61  ;;  %v1256_v3 = vrot.slane %v1254_v53, 4  ;;  %v592_v12 = vrot.slane %v16344_v46, 4  ;;  %v1246_v14 = vor.u32 %v1245_v45, %v16366_v42  ;;  %v1259_v16 = vrot.slane %v1257_v63, 5 }
  0x63   : > { %v16379_v18 = vrot.slane %v1263_v0, 5  ;;  %694 = vst [vmem:[#allocation2 + $0x20] sm:$0x1] %v693_v7  ;;  %v1269_v10 = vrot.slane %v1267_v4, 4  ;;  %v1273_v17 = vshll.u32 %v1183_v48, 16  ;;  %v1278_v19 = vshrl.u32 %v1184_v49, 16 }
  0x64   : > { %v1281_v27 = vshll.u32 %v1184_v49, 16  ;;  %v609_v32 = vrot.slane %v16362_v25, 4  ;;  %v1251_v51 = vrot.slane %v1249_v62, 5  ;;  %v1260_v33 = vor.u32 %v1259_v16, %v1256_v3  ;;  %v1188_v41 = vld [vmem:[#allocation2 + $0x28] sm:$0xf] }
  0x65   : > { %v1287_v34 = vshll.u32 %v1185_v54, 16  ;;  %v1237_v36 = vrot.slane %v1236_v1, 4  ;;  %v1270_v39 = vor.u32 %v1269_v10, %v16379_v18  ;;  %v1280_v40 = vrot.slane %v1278_v19, 4  ;;  %14350 = vmatmul.mubr.bf16.gmra.mrb[20].mxu0 %v15755_v55  ;;  %v706_v61 = vld [vmem:[#allocation2 + $0x38] sm:$0x1]  ;;  %v15758_v1 = vld [vmem:[#allocation2 + $0x9c] sm:$0xff]  }
  0x66   : > { %v1283_v30 = vrot.slane %v1281_v27, 5  ;;  %v19268_v45 = vmov 0  ;;  %v1247_v48 = vrot.slane %v1246_v14, 4  ;;  %v1291_v52 = vshrl.u32 %v1185_v54, 16  ;;  %14353 = vmatprep.mubr.bf16.mxu0 %v15757_v9  ;;  %v1190_v10 = vld [vmem:[#allocation2 + $0x30] sm:$0xf] }
  0x67   : > { %v19269_v45 = vsel %vm16385_vm10, 4294967295, %v19268_v45  ;;  %v16389_v49 = vrot.slane %v1287_v34, 5  ;;  %v700_v53 = vsel %vm16188_vm7, %v405_v5, %v699_v8  ;;  %v1261_v62 = vrot.slane %v1260_v33, 4  ;;  %v1191_v5 = vld [vmem:[#allocation2 + $0x34] sm:$0xf]  ;;  %v15760_v27 = vld [vmem:[#allocation2 + $0xa8] sm:$0xff]  }
  0x68   : > { %19270 = vst [vmem:[#allocation10_spill] sm:$0xff] %v19269_v45  ;;  %v1275_v63 = vrot.slane %v1273_v17, 5  ;;  %701 = vst [vmem:[#allocation2 + $0x2c] sm:$0x1] %v700_v53  ;;  %v1302_v55 = vshrl.u32 %v1187_v20, 16  ;;  %v1305_v0 = vshll.u32 %v1187_v20, 16  ;;  %v1242_v54 = vsel %vm16385_vm10, %v1237_v36, %v16366_v42 }
  0x69   : > { %v1271_v3 = vrot.slane %v1270_v39, 4  ;;  %v1293_v4 = vrot.slane %v1291_v52, 4  ;;  %v1311_v7 = vshll.u32 %v1188_v41, 16  ;;  %v1315_v14 = vshrl.u32 %v1188_v41, 16  ;;  %v713_v36 = vld [vmem:[#allocation2 + $0x44] sm:$0x1] }
  0x6a   : > { %v1186_v2 = vld [vmem:[#allocation2 + $0x20] sm:$0x1]  ;;  %v1284_v16 = vor.u32 %v1283_v30, %v1280_v40  ;;  %v1252_v8 = vsel %vm16385_vm10, %v1247_v48, %v1251_v51  ;;  %v1304_v17 = vrot.slane %v1302_v55, 4  ;;  %v1307_v19 = vrot.slane %v1305_v0, 5  ;;  %v1193_v55 = vld [vmem:[#allocation2 + $0x3c] sm:$0xf] }
  0x6b   : > { %v1294_v9 = vor.u32 %v1293_v4, %v16389_v49  ;;  %v1297_v33 = vshll.u32 %v1186_v2, 16  ;;  %v16401_v34 = vrot.slane %v1311_v7, 5  ;;  %v1317_v20 = vrot.slane %v1315_v14, 4  ;;  %v720_v14 = vld [vmem:[#allocation2 + $0x50] sm:$0x1] }
  0x6c   : > { %v707_v42 = vsel %vm16188_vm7, %v422_v26, %v706_v61  ;;  %v1266_v39 = vsel %vm16385_vm10, %v1261_v62, %v16379_v18  ;;  %v1276_v51 = vsel %vm16385_vm10, %v1271_v3, %v1275_v63  ;;  %v1326_v40 = vshrl.u32 %v1190_v10, 16  ;;  %v1194_v62 = vld [vmem:[#allocation2 + $0x40] sm:$0xf]  ;;  %v769_v6 = vld [vmem:[#allocation2 + $0xa4] sm:$0x1] }
  0x6d   : > { %708 = vst [vmem:[#allocation2 + $0x38] sm:$0x1] %v707_v42  ;;  %v1329_v30 = vshll.u32 %v1190_v10, 16  ;;  %v13034_v41 = vcombine.low %v1242_v54, %v1252_v8  ;;  %v1285_v48 = vrot.slane %v1284_v16, 4  ;;  %v1335_v52 = vshll.u32 %v1191_v5, 16  ;;  %14354 = vmatmul.mubr.bf16.gmra.mrb[24].mxu0 %v15758_v1 }
  0x6e   : > { %v1339_v53 = vshrl.u32 %v1191_v5, 16  ;;  %v1308_v0 = vor.u32 %v1307_v19, %v1304_v17  ;;  %v1328_v26 = vrot.slane %v1326_v40, 4  ;;  %v714_v18 = vsel %vm16188_vm7, %v439_v38, %v713_v36  ;;  %14357 = vmatprep.mubr.bf16.mxu0 %v15760_v27  ;;  %v1196_v38 = vld [vmem:[#allocation2 + $0x48] sm:$0xf]  ;;  %v15761_v17 = vld [vmem:[#allocation2 + $0xb4] sm:$0xff]  }
  0x6f   : > { %v1189_v15 = vld [vmem:[#allocation2 + $0x2c] sm:$0x1]  ;;  %v1331_v61 = vrot.slane %v1329_v30, 5  ;;  %v16416_v63 = vcombine.low %v1266_v39, %v1276_v51  ;;  %v1295_v3 = vrot.slane %v1294_v9, 4  ;;  %v1299_v4 = vrot.slane %v1297_v33, 5 }
  0x70   : > { %v1318_v7 = vor.u32 %v1317_v20, %v16401_v34  ;;  %715 = vst [vmem:[#allocation2 + $0x44] sm:$0x1] %v714_v18  ;;  %v1321_v1 = vshll.u32 %v1189_v15, 16  ;;  %v16419_v54 = vrot.slane %v1335_v52, 5  ;;  %v1341_v2 = vrot.slane %v1339_v53, 4 }
  0x71   : > { %v1350_v16 = vshrl.u32 %v1193_v55, 16  ;;  %v1332_v10 = vor.u32 %v1331_v61, %v1328_v26  ;;  %v1353_v44 = vshll.u32 %v1193_v55, 16  ;;  %v1359_v5 = vshll.u32 %v1194_v62, 16  ;;  %v1197_v20 = vld [vmem:[#allocation2 + $0x4c] sm:$0xf] }
  0x72   : > { %v1363_v8 = vshrl.u32 %v1194_v62, 16  ;;  %v1290_v9 = vsel %vm16385_vm10, %v1285_v48, %v16389_v49  ;;  %v1309_v19 = vrot.slane %v1308_v0, 4  ;;  %v1342_v27 = vor.u32 %v1341_v2, %v16419_v54  ;;  %v727_v42 = vld [vmem:[#allocation2 + $0x5c] sm:$0x1]  ;;  %v1199_v55 = vld [vmem:[#allocation2 + $0x54] sm:$0xf] }
  0x73   : > { %v721_v33 = vsel %vm16188_vm7, %v456_v56, %v720_v14  ;;  %v1300_v36 = vsel %vm16385_vm10, %v1295_v3, %v1299_v4  ;;  %v1319_v39 = vrot.slane %v1318_v7, 4  ;;  %v1352_v40 = vrot.slane %v1350_v16, 4  ;;  %v1200_v2 = vld [vmem:[#allocation2 + $0x58] sm:$0xf] }
  0x74   : > { %v1192_v51 = vld [vmem:[#allocation2 + $0x38] sm:$0x1]  ;;  %v1355_v30 = vrot.slane %v1353_v44, 5  ;;  %722 = vst [vmem:[#allocation2 + $0x50] sm:$0x1] %v721_v33  ;;  %v1323_v52 = vrot.slane %v1321_v1, 5  ;;  %v728_v3 = vsel %vm16188_vm7, %v473_v35, %v727_v42  ;;  %v13036_v4 = vcombine.low %v1290_v9, %v1300_v36 }
  0x75   : > { %v1345_v49 = vshll.u32 %v1192_v51, 16  ;;  %v16431_v48 = vrot.slane %v1359_v5, 5  ;;  %v1365_v53 = vrot.slane %v1363_v8, 4  ;;  %v1333_v60 = vrot.slane %v1332_v10, 4  ;;  %14358 = vmatmul.mubr.bf16.gmra.mrb[28].mxu0 %v15761_v17  ;;  %729 = vst [vmem:[#allocation2 + $0x5c] sm:$0x1] %v728_v3 }
  0x76   : > { %v1343_v15 = vrot.slane %v1342_v27, 4  ;;  %v1374_v0 = vshrl.u32 %v1196_v38, 16  ;;  %v1377_v56 = vshll.u32 %v1196_v38, 16  ;;  %v1383_v18 = vshll.u32 %v1197_v20, 16  ;;  %14377 = vmatprep.mubr.bf16.mxu0 %v13034_v41  ;;  %v734_v27 = vld [vmem:[#allocation2 + $0x68] sm:$0x1] }
  0x77   : > { %v1347_v26 = vrot.slane %v1345_v49, 5  ;;  %v1195_v61 = vld [vmem:[#allocation2 + $0x44] sm:$0x1]  ;;  %v1387_v62 = vshrl.u32 %v1197_v20, 16  ;;  %v1314_v7 = vsel %vm16385_vm10, %v1309_v19, %v16401_v34  ;;  %v1356_v14 = vor.u32 %v1355_v30, %v1352_v40 }
  0x78   : > { %v1376_v1 = vrot.slane %v1374_v0, 4  ;;  %v1366_v16 = vor.u32 %v1365_v53, %v16431_v48  ;;  %v1379_v10 = vrot.slane %v1377_v56, 5  ;;  %v16441_v44 = vrot.slane %v1383_v18, 5  ;;  %v1203_v49 = vld [vmem:[#allocation2 + $0x64] sm:$0xf] }
  0x79   : > { %v1389_v5 = vrot.slane %v1387_v62, 4  ;;  %v1324_v13 = vsel %vm16385_vm10, %v1319_v39, %v1323_v52  ;;  %v1338_v35 = vsel %vm16385_vm10, %v1333_v60, %v16419_v54  ;;  %v1369_v41 = vshll.u32 %v1195_v61, 16  ;;  %v1202_v39 = vld [vmem:[#allocation2 + $0x60] sm:$0xf]  ;;  %v15764_v54 = vld [vmem:[%s19240_s1 + $0x88] sm:$0xff]  }
  0x7a   : > { %v1398_v8 = vshrl.u32 %v1199_v55, 16  ;;  %v1348_v34 = vsel %vm16385_vm10, %v1343_v15, %v1347_v26  ;;  %v1380_v17 = vor.u32 %v1379_v10, %v1376_v1  ;;  %v1401_v9 = vshll.u32 %v1199_v55, 16  ;;  %v741_v0 = vld [vmem:[#allocation2 + $0x74] sm:$0x1] }
  0x7b   : > { %v1198_v38 = vld [vmem:[#allocation2 + $0x50] sm:$0x1]  ;;  %v1407_v19 = vshll.u32 %v1200_v2, 16  ;;  %v1390_v33 = vor.u32 %v1389_v5, %v16441_v44  ;;  %v1411_v36 = vshrl.u32 %v1200_v2, 16  ;;  %v13037_v51 = vcombine.low %v1314_v7, %v1324_v13 }
  0x7c   : > { %v1393_v20 = vshll.u32 %v1198_v38, 16  ;;  %v1400_v42 = vrot.slane %v1398_v8, 4  ;;  %v16454_v40 = vrot.slane %v1356_v14, 4  ;;  %v16456_v30 = vrot.slane %v1366_v16, 4  ;;  %v1201_v26 = vld [vmem:[#allocation2 + $0x5c] sm:$0x1] }
  0x7d   : > { %v1403_v52 = vrot.slane %v1401_v9, 5  ;;  %v16458_v53 = vrot.slane %v1369_v41, 5  ;;  %v16460_v55 = vrot.slane %v1407_v19, 5  ;;  %v1413_v60 = vrot.slane %v1411_v36, 4  ;;  %14378 = vmatmul.mubr.bf16.vlgmr.msra.gmra.mrb[0].mxu0 %v16416_v63  ;;  %v15765_v63 = vld [vmem:[%s19240_s1 + $0x90] sm:$0xff]   ;;  %v15766_v36 = vld [vmem:[%s19240_s1 + $0x98] sm:$0xff]  }
  0x7e   : > { %v735_v15 = vsel %vm16188_vm7, %v490_v47, %v734_v27  ;;  %v13038_v56 = vcombine.low %v1338_v35, %v1348_v34  ;;  %v1422_v18 = vshrl.u32 %v1202_v39, 16  ;;  %v1425_v62 = vshll.u32 %v1202_v39, 16  ;;  %14410 = vmatpush3.bf16.msra.mxu0 %v16351_v58  ;;  %14381 = vmatprep.mubr.bf16.mxu0 %v13036_v4  ;;  %v1205_v47 = vld [vmem:[#allocation2 + $0x6c] sm:$0xf]  ;;  %v1206_v58 = vld [vmem:[#allocation2 + $0x70] sm:$0xf] }
  0x7f   : > { %v1404_v61 = vor.u32 %v1403_v52, %v1400_v42  ;;  %736 = vst [vmem:[#allocation2 + $0x68] sm:$0x1] %v735_v15  ;;  %v16468_v3 = vrot.slane %v1380_v17, 4  ;;  %v16470_v7 = vrot.slane %v1390_v33, 4  ;;  %v16472_v29 = vrot.slane %v1393_v20, 5  ;;  %14411 = vmatprep.subr.bf16.mxu0 %v15764_v54 }
  0x80   : > { %v1431_v14 = vshll.u32 %v1203_v49, 16  ;;  %v1414_v1 = vor.u32 %v1413_v60, %v16460_v55  ;;  %v1417_v2 = vshll.u32 %v1201_v26, 16  ;;  %v1424_v16 = vrot.slane %v1422_v18, 4  ;;  %v748_v41 = vld [vmem:[#allocation2 + $0x80] sm:$0x1] }
  0x81   : > { %v1427_v10 = vrot.slane %v1425_v62, 5  ;;  %v1362_v4 = vsel %vm16385_vm10, %v16454_v40, %v16431_v48  ;;  %v1372_v5 = vsel %vm16385_vm10, %v16456_v30, %v16458_v53  ;;  %v1435_v35 = vshrl.u32 %v1203_v49, 16  ;;  %v1208_v9 = vld [vmem:[#allocation2 + $0x78] sm:$0xf]  ;;  %v1209_v19 = vld [vmem:[#allocation2 + $0x7c] sm:$0xf] }
  0x82   : > { %v16486_v13 = vrot.slane %v1431_v14, 5  ;;  %v1405_v8 = vrot.slane %v1404_v61, 4  ;;  %v742_v38 = vsel %vm16188_vm7, %v507_v21, %v741_v0  ;;  %v1446_v17 = vshrl.u32 %v1205_v47, 16  ;;  %14412 = vmatpush3.bf16.msra.mxu0 %v15764_v54  ;;  %v755_v0 = vld [vmem:[#allocation2 + $0x8c] sm:$0x1] }
  0x83   : > { %v1428_v34 = vor.u32 %v1427_v10, %v1424_v16  ;;  %v1386_v48 = vsel %vm16385_vm10, %v16468_v3, %v16441_v44  ;;  %v1437_v27 = vrot.slane %v1435_v35, 4  ;;  %743 = vst [vmem:[#allocation2 + $0x74] sm:$0x1] %v742_v38  ;;  %v1449_v33 = vshll.u32 %v1205_v47, 16  ;;  %14413 = vmatprep.subr.bf16.mxu0 %v15765_v63  ;;  %v1211_v62 = vld [vmem:[#allocation2 + $0x84] sm:$0xf] }
  0x84   : > { %v1455_v20 = vshll.u32 %v1206_v58, 16  ;;  %v1396_v57 = vsel %vm16385_vm10, %v16470_v7, %v16472_v29  ;;  %v1415_v21 = vrot.slane %v1414_v1, 4  ;;  %v1419_v42 = vrot.slane %v1417_v2, 5  ;;  %v762_v1 = vld [vmem:[#allocation2 + $0x98] sm:$0x1] }
  0x85   : > { %v1459_v39 = vshrl.u32 %v1206_v58, 16  ;;  %v1438_v44 = vor.u32 %v1437_v27, %v16486_v13  ;;  %v1448_v40 = vrot.slane %v1446_v17, 4  ;;  %v1451_v30 = vrot.slane %v1449_v33, 5  ;;  %14382 = vmatmul.mubr.bf16.gmra.mrb[4].mxu0 %v13037_v51 }
  0x86   : > { %v1204_v54 = vld [vmem:[#allocation2 + $0x68] sm:$0x1]  ;;  %v749_v52 = vsel %vm16188_vm7, %v524_v43, %v748_v41  ;;  %v1410_v49 = vsel %vm16385_vm10, %v1405_v8, %v16460_v55  ;;  %v1429_v53 = vrot.slane %v1428_v34, 4  ;;  %v1470_v15 = vshrl.u32 %v1208_v9, 16  ;;  %14385 = vmatprep.mubr.bf16.mxu0 %v13038_v56  ;;  %14414 = vmatpush3.bf16.msra.mxu0 %v15765_v63  ;;  %v15767_v55 = vld [vmem:[%s19240_s1 + $0xa0] sm:$0xff]  }
  0x87   : > { %v1441_v60 = vshll.u32 %v1204_v54, 16  ;;  %750 = vst [vmem:[#allocation2 + $0x80] sm:$0x1] %v749_v52  ;;  %v16511_v26 = vrot.slane %v1455_v20, 5  ;;  %v1461_v61 = vrot.slane %v1459_v39, 4  ;;  %v1473_v18 = vshll.u32 %v1208_v9, 16  ;;  %14415 = vmatprep.subr.bf16.mxu0 %v15766_v36 }
  0x88   : > { %v1479_v22 = vshll.u32 %v1209_v19, 16  ;;  %v1420_v43 = vsel %vm16385_vm10, %v1415_v21, %v1419_v42  ;;  %v1439_v51 = vrot.slane %v1438_v44, 4  ;;  %v1472_v3 = vrot.slane %v1470_v15, 4  ;;  %v1212_v63 = vld [vmem:[#allocation2 + $0x88] sm:$0xf] }
  0x89   : > { %v1483_v7 = vshrl.u32 %v1209_v19, 16  ;;  %v1443_v29 = vrot.slane %v1441_v60, 5  ;;  %v1452_v56 = vor.u32 %v1451_v30, %v1448_v40  ;;  %v1475_v14 = vrot.slane %v1473_v18, 5  ;;  %v15768_v9 = vld [vmem:[%s19240_s1 + $0xa8] sm:$0xff]   ;;  %v15769_v60 = vld [vmem:[%s19240_s1 + $0xb0] sm:$0xff]  }
  0x8a   : > { %v756_v47 = vsel %vm16188_vm7, %v541_v59, %v755_v0  ;;  %v13039_v2 = vcombine.low %v1362_v4, %v1372_v5  ;;  %v1207_v16 = vld [vmem:[#allocation2 + $0x74] sm:$0x1]  ;;  %v16522_v10 = vrot.slane %v1479_v22, 5  ;;  %v1494_v35 = vshrl.u32 %v1211_v62, 16  ;;  %14416 = vmatpush3.bf16.msra.mxu0 %v15766_v36  ;;  %v1214_v59 = vld [vmem:[#allocation2 + $0x90] sm:$0xf] }
  0x8b   : > { %v1485_v58 = vrot.slane %v1483_v7, 4  ;;  %757 = vst [vmem:[#allocation2 + $0x8c] sm:$0x1] %v756_v47  ;;  %v13040_v41 = vcombine.low %v1386_v48, %v1396_v57  ;;  %v16524_v8 = vcombine.low %v1410_v49, %v1420_v43  ;;  %v1434_v37 = vsel %vm16385_vm10, %v1429_v53, %v16486_v13  ;;  %14417 = vmatprep.subr.bf16.mxu0 %v15767_v55  ;;  %v1215_v36 = vld [vmem:[#allocation2 + $0x94] sm:$0xf] }
  0x8c   : > { %v1462_v34 = vor.u32 %v1461_v61, %v16511_v26  ;;  %v1465_v38 = vshll.u32 %v1207_v16, 16  ;;  %v1476_v4 = vor.u32 %v1475_v14, %v1472_v3  ;;  %v1497_v5 = vshll.u32 %v1211_v62, 16  ;;  %v1217_v53 = vld [vmem:[#allocation2 + $0x9c] sm:$0xf]  ;;  %v1218_v3 = vld [vmem:[#allocation2 + $0xa0] sm:$0xf] }
  0x8d   : > { %v1503_v17 = vshll.u32 %v1212_v63, 16  ;;  %v1444_v19 = vsel %vm16385_vm10, %v1439_v51, %v1443_v29  ;;  %v16535_v48 = vrot.slane %v1452_v56, 4  ;;  %v1507_v33 = vshrl.u32 %v1212_v63, 16  ;;  %14386 = vmatmul.mubr.bf16.gmra.mrb[8].mxu0 %v13039_v2  ;;  %v776_v2 = vld [vmem:[#allocation2 + $0xb0] sm:$0x1]  ;;  %v15770_v16 = vld [vmem:[%s19240_s1 + $0xb8] sm:$0xff]  }
  0x8e   : > { %v1210_v27 = vld [vmem:[#allocation2 + $0x80] sm:$0x1]  ;;  %v763_v13 = vsel %vm16188_vm7, %v558_v24, %v762_v1  ;;  %v1486_v20 = vor.u32 %v1485_v58, %v16522_v10  ;;  %v1496_v21 = vrot.slane %v1494_v35, 4  ;;  %v1499_v42 = vrot.slane %v1497_v5, 5  ;;  %14389 = vmatprep.mubr.bf16.mxu0 %v13040_v41  ;;  %14418 = vmatpush3.bf16.msra.mxu0 %v15767_v55  ;;  %v7036_v45 = vld [vmem:[#allocation2 + $0x74] sm:$0x1] }
  0x8f   : > { %v1489_v57 = vshll.u32 %v1210_v27, 16  ;;  %764 = vst [vmem:[#allocation2 + $0x98] sm:$0x1] %v763_v13  ;;  %v16542_v39 = vrot.slane %v1462_v34, 4  ;;  %v16544_v54 = vrot.slane %v1503_v17, 5  ;;  %v1509_v44 = vrot.slane %v1507_v33, 4  ;;  %14419 = vmatprep.subr.bf16.mxu0 %v15768_v9 }
  0x90   : > { %v1518_v40 = vshrl.u32 %v1214_v59, 16  ;;  %v13042_v30 = vcombine.low %v1434_v37, %v1444_v19  ;;  %v1467_v52 = vrot.slane %v1465_v38, 5  ;;  %v1477_v24 = vrot.slane %v1476_v4, 4  ;;  %v1220_v38 = vld [vmem:[#allocation2 + $0xa8] sm:$0xf] }
  0x91   : > { %v1521_v49 = vshll.u32 %v1214_v59, 16  ;;  %v1458_v15 = vsel %vm16385_vm10, %v16535_v48, %v16511_v26  ;;  %v1527_v18 = vshll.u32 %v1215_v36, 16  ;;  %v1531_v22 = vshrl.u32 %v1215_v36, 16  ;;  %v1221_v19 = vld [vmem:[#allocation2 + $0xac] sm:$0xf] }
  0x92   : > { %v1213_v0 = vld [vmem:[#allocation2 + $0x8c] sm:$0x1]  ;;  %v1520_v61 = vrot.slane %v1518_v40, 4  ;;  %v1487_v62 = vrot.slane %v1486_v20, 4  ;;  %v1491_v43 = vrot.slane %v1489_v57, 5  ;;  %v1500_v51 = vor.u32 %v1499_v42, %v1496_v21  ;;  %14420 = vmatpush3.bf16.msra.mxu0 %v15768_v9 }
  0x93   : > { %v1523_v55 = vrot.slane %v1521_v49, 5  ;;  %v1510_v7 = vor.u32 %v1509_v44, %v16544_v54  ;;  %v1513_v29 = vshll.u32 %v1213_v0, 16  ;;  %v16554_v56 = vrot.slane %v1527_v18, 5  ;;  %14421 = vmatprep.subr.bf16.mxu0 %v15769_v60  ;;  %v783_v36 = vld [vmem:[#allocation2 + $0xbc] sm:$0x1] }
  0x94   : > { %v1533_v14 = vrot.slane %v1531_v22, 4  ;;  %v1468_v26 = vsel %vm16385_vm10, %v16542_v39, %v1467_v52  ;;  %v1482_v47 = vsel %vm16385_vm10, %v1477_v24, %v16522_v10  ;;  %v770_v1 = vsel %vm16188_vm7, %v575_v50, %v769_v6  ;;  %v1223_v52 = vld [vmem:[#allocation2 + $0xb4] sm:$0xf]  ;;  %v1224_v24 = vld [vmem:[#allocation2 + $0xb8] sm:$0xf] }
  0x95   : > { %v1524_v63 = vor.u32 %v1523_v55, %v1520_v61  ;;  %771 = vst [vmem:[#allocation2 + $0xa4] sm:$0x1] %v770_v1  ;;  %v1542_v41 = vshrl.u32 %v1217_v53, 16  ;;  %v1545_v37 = vshll.u32 %v1217_v53, 16  ;;  %v1551_v34 = vshll.u32 %v1218_v3, 16  ;;  %14390 = vmatmul.mubr.bf16.gmra.mrb[12].mxu0 %v16524_v8  ;;  %v16578_v8 = vld [vmem:[%s19240_s1 + $0xc0] sm:$0xff]  }
  0x96   : > { %v1216_v58 = vld [vmem:[#allocation2 + $0x98] sm:$0x1]  ;;  %v1534_v35 = vor.u32 %v1533_v14, %v16554_v56  ;;  %v1492_v31 = vsel %vm16385_vm10, %v1487_v62, %v1491_v43  ;;  %v1501_v10 = vrot.slane %v1500_v51, 4  ;;  %v1555_v59 = vshrl.u32 %v1218_v3, 16  ;;  %14393 = vmatprep.mubr.bf16.mxu0 %v13042_v30  ;;  %14422 = vmatpush3.bf16.msra.mxu0 %v15769_v60  ;;  %v3075_v11 = vld [vmem:[#allocation2 + $0x80] sm:$0x1] }
  0x97   : > { %v1537_v50 = vshll.u32 %v1216_v58, 16  ;;  %v1511_v4 = vrot.slane %v1510_v7, 4  ;;  %v1515_v5 = vrot.slane %v1513_v29, 5  ;;  %v1525_v17 = vrot.slane %v1524_v63, 4  ;;  %14423 = vmatprep.subr.bf16.mxu0 %v15770_v16 }
  0x98   : > { %v1535_v9 = vrot.slane %v1534_v35, 4  ;;  %v1544_v27 = vrot.slane %v1542_v41, 4  ;;  %v1547_v33 = vrot.slane %v1545_v37, 5  ;;  %v16573_v13 = vrot.slane %v1551_v34, 5 }
  0x99   : > { %v1539_v48 = vrot.slane %v1537_v50, 5  ;;  %v1557_v20 = vrot.slane %v1555_v59, 4  ;;  %v777_v57 = vsel %vm16188_vm7, %v592_v12, %v776_v2  ;;  %v1566_v21 = vshrl.u32 %v1220_v38, 16  ;;  %v1999_v50 = vld [vmem:[#allocation2] sm:$0xe] }
  0x9a   : > { %v1569_v42 = vshll.u32 %v1220_v38, 16  ;;  %v13043_v39 = vcombine.low %v1458_v15, %v1468_v26  ;;  %778 = vst [vmem:[#allocation2 + $0xb0] sm:$0x1] %v777_v57  ;;  %v1575_v44 = vshll.u32 %v1221_v19, 16  ;;  %v1579_v40 = vshrl.u32 %v1221_v19, 16  ;;  %14424 = vmatpush3.bf16.msra.mxu0 %v15770_v16 }
  0x9b   : > { %v13044_v6 = vcombine.low %v1482_v47, %v1492_v31  ;;  %v1568_v30 = vrot.slane %v1566_v21, 4  ;;  %v784_v46 = vsel %vm16188_vm7, %v609_v32, %v783_v36  ;;  %14457 = vmatprep.subr.bf16.mxu0 %v16578_v8  ;;  %v1506_v12 = vsel %vm16385_vm10, %v1501_v10, %v16544_v54  ;;  %v2000_v31 = vld [vmem:[#allocation2 + $0x4] sm:$0xf]  ;;  %v2006_v36 = vld [vmem:[#allocation2 + $0x1c] sm:$0xf] }
  0x9c   : > { %v1219_v49 = vld [vmem:[#allocation2 + $0xa4] sm:$0x1]  ;;  %v1571_v53 = vrot.slane %v1569_v42, 5  ;;  %v1577_v60 = vrot.slane %v1575_v44, 5  ;;  %v1581_v0 = vrot.slane %v1579_v40, 4  ;;  %v1516_v15 = vsel %vm16385_vm10, %v1511_v4, %v1515_v5 }
  0x9d   : > { %v1530_v61 = vsel %vm16385_vm10, %v1525_v17, %v16554_v56  ;;  %785 = vst [vmem:[#allocation2 + $0xbc] sm:$0x1] %v784_v46  ;;  %14394 = vmatmul.mubr.bf16.gmra.mrb[16].mxu0 %v13043_v39  ;;  %v1540_v25 = vsel %vm16385_vm10, %v1535_v9, %v1539_v48  ;;  %v1548_v18 = vor.u32 %v1547_v33, %v1544_v27  ;;  %v1561_v22 = vshll.u32 %v1219_v49, 16  ;;  %v2001_v48 = vld [vmem:[#allocation2 + $0x8] sm:$0x1] }
  0x9e   : > { %v1558_v32 = vor.u32 %v1557_v20, %v16573_v13  ;;  %14397 = vmatprep.mubr.bf16.mxu0 %v13044_v6  ;;  %v1590_v62 = vshrl.u32 %v1223_v52, 16  ;;  %v1593_v43 = vshll.u32 %v1223_v52, 16  ;;  %v1599_v54 = vshll.u32 %v1224_v24, 16  ;;  %v2004_v52 = vld [vmem:[#allocation2 + $0x14] sm:$0x1] }
  0x9f   : > { %v1603_v51 = vshrl.u32 %v1224_v24, 16  ;;  %v1572_v55 = vor.u32 %v1571_v53, %v1568_v30  ;;  %v1582_v3 = vor.u32 %v1581_v0, %v1577_v60  ;;  %v13045_v7 = vcombine.low %v1506_v12, %v1516_v15  ;;  %v2002_v30 = vld [vmem:[#allocation2 + $0xc] sm:$0xe]  ;;  %v2005_v46 = vld [vmem:[#allocation2 + $0x18] sm:$0xe] }
  0xa0   : > { %v13046_v29 = vcombine.low %v1530_v61, %v1540_v25  ;;  %v1549_v56 = vrot.slane %v1548_v18, 4  ;;  %v1559_v26 = vrot.slane %v1558_v32, 4  ;;  %v1563_v47 = vrot.slane %v1561_v22, 5  ;;  %v2007_v12 = vld [vmem:[#allocation2 + $0x20] sm:$0x1] }
  0xa1   : > { %v1222_v14 = vld [vmem:[#allocation2 + $0xb0] sm:$0x1]  ;;  %v1592_v1 = vrot.slane %v1590_v62, 4  ;;  %v1595_v2 = vrot.slane %v1593_v43, 5  ;;  %v1601_v16 = vrot.slane %v1599_v54, 5  ;;  %v1605_v58 = vrot.slane %v1603_v51, 4 }
  0xa2   : > { %v1585_v63 = vshll.u32 %v1222_v14, 16  ;;  %v1573_v35 = vrot.slane %v1572_v55, 4  ;;  %v1583_v41 = vrot.slane %v1582_v3, 4  ;;  %v1554_v10 = vsel %vm16385_vm10, %v1549_v56, %v16573_v13  ;;  %v2003_v13 = vld [vmem:[#allocation2 + $0x10] sm:$0xf] }
  0xa3   : > { %v1564_v59 = vsel %vm16385_vm10, %v1559_v26, %v1563_v47  ;;  %v1596_v38 = vor.u32 %v1595_v2, %v1592_v1  ;;  %v1606_v4 = vor.u32 %v1605_v58, %v1601_v16  ;;  %v2100_v19 = vrot.slane %v2000_v31, 5  ;;  %v2009_v32 = vld [vmem:[#allocation2 + $0x28] sm:$0xf]  ;;  %v2008_v51 = vld [vmem:[#allocation2 + $0x24] sm:$0xe] }
  0xa4   : > { %v1587_v37 = vrot.slane %v1585_v63, 5  ;;  %v1225_v34 = vld [vmem:[#allocation2 + $0xbc] sm:$0x1]  ;;  %v1578_v17 = vsel %vm16385_vm10, %v1573_v35, %v1577_v60  ;;  %v13047_v27 = vcombine.low %v1554_v10, %v1564_v59  ;;  %vm2095_vm11 = vcmask 1042432   ;;  %v2010_v55 = vld [vmem:[#allocation2 + $0x2c] sm:$0x1] }
  0xa5   : > { %14398 = vmatmul.mubr.bf16.gmra.mrb[20].mxu0 %v13045_v7  ;;  %v1609_v5 = vshll.u32 %v1225_v34, 16  ;;  %vm2096_vm12 = vcmask 1046532   ;;  %v13058_v33 = vrot.slane %v1999_v50, 9  ;;  %v1597_v57 = vrot.slane %v1596_v38, 4  ;;  %v2012_v3 = vld [vmem:[#allocation2 + $0x34] sm:$0xf] }
  0xa6   : > { %14401 = vmatprep.mubr.bf16.mxu0 %v13046_v29  ;;  %v1588_v9 = vsel %vm16385_vm10, %v1583_v41, %v1587_v37  ;;  %v1607_v21 = vrot.slane %v1606_v4, 4  ;;  %v2102_v39 = vrot.slane %v2100_v19, 4  ;;  %v2103_v44 = vrot.slane %v2001_v48, 5  ;;  %vm16609_vm13 = vmor %vm2095_vm11, %vm2096_vm12  ;;  %v2011_v7 = vld [vmem:[#allocation2 + $0x30] sm:$0xe] }
  0xa7   : > { %v13048_v20 = vcombine.low %v1578_v17, %v1588_v9  ;;  %v1611_v42 = vrot.slane %v1609_v5, 5  ;;  %v19271_v40 = vmov 0  ;;  %v2107_v6 = vrot.slane %v2003_v13, 5  ;;  %v2013_v29 = vld [vmem:[#allocation2 + $0x38] sm:$0x1] }
  0xa8   : > { %v19272_v40 = vsel %vm16609_vm13, 4294967295, %v19271_v40  ;;  %v1602_v24 = vsel %vm16385_vm10, %v1597_v57, %v1601_v16  ;;  %v2114_v53 = vrot.slane %v2006_v36, 5  ;;  %v2101_v60 = vsel %vm16609_vm13, %v13058_v33, %v2100_v19  ;;  %v16621_v14 = vld [vmem:[#allocation2 + $0x40] sm:$0xf]  ;;  %v16627_v47 = vld [vmem:[#allocation2 + $0x3c] sm:$0xe] }
  0xa9   : > { %19273 = vst [vmem:[#allocation11_spill] sm:$0xff] %v19272_v40  ;;  %v1612_v49 = vsel %vm16385_vm10, %v1607_v21, %v1611_v42  ;;  %v2104_v0 = vsel %vm16609_vm13, %v2102_v39, %v2103_v44  ;;  %v13059_v15 = vrot.slane %v2002_v30, 9  ;;  %v2109_v61 = vrot.slane %v2107_v6, 4  ;;  %v16629_v63 = vld [vmem:[#allocation2 + $0x44] sm:$0x1] }
  0xaa   : > { %v2110_v25 = vrot.slane %v2004_v52, 5  ;;  %v13049_v18 = vcombine.low %v1602_v24, %v1612_v49  ;;  %v13090_v22 = vcombine.low %v2101_v60, %v2104_v0  ;;  %v13060_v62 = vrot.slane %v2005_v46, 9  ;;  %v16631_v1 = vld [vmem:[#allocation2 + $0x4c] sm:$0xf]  ;;  %v2017_v37 = vld [vmem:[#allocation2 + $0x48] sm:$0xe] }
  0xab   : > { %v2116_v43 = vrot.slane %v2114_v53, 4  ;;  %v2117_v54 = vrot.slane %v2007_v12, 5  ;;  %v2108_v56 = vsel %vm16609_vm13, %v13059_v15, %v2107_v6  ;;  %v2121_v2 = vrot.slane %v2009_v32, 5  ;;  %v2019_v34 = vld [vmem:[#allocation2 + $0x50] sm:$0x1] }
  0xac   : > { %v2111_v26 = vsel %vm16609_vm13, %v2109_v61, %v2110_v25  ;;  %v2128_v16 = vrot.slane %v2012_v3, 5  ;;  %v2115_v58 = vsel %vm16609_vm13, %v13060_v62, %v2114_v53  ;;  %v2135_v41 = vrot.slane %v16621_v14, 5  ;;  %v16638_v59 = vld [vmem:[#allocation2 + $0x54] sm:$0xe]  ;;  %v16640_v38 = vld [vmem:[#allocation2 + $0x58] sm:$0xf] }
  0xad   : > { %14402 = vmatmul.mubr.bf16.gmra.mrb[24].mxu0 %v13047_v27  ;;  %v2118_v35 = vsel %vm16609_vm13, %v2116_v43, %v2117_v54  ;;  %v13091_v31 = vcombine.low %v2108_v56, %v2111_v26  ;;  %v13061_v10 = vrot.slane %v2008_v51, 9  ;;  %v2124_v50 = vrot.slane %v2010_v55, 5  ;;  %v16644_v19 = vld [vmem:[#allocation2 + $0x5c] sm:$0x1]  ;;  %v16646_v48 = vld [vmem:[#allocation2 + $0x60] sm:$0xe] }
  0xae   : > { %14405 = vmatprep.mubr.bf16.mxu0 %v13048_v20  ;;  %v13062_v4 = vrot.slane %v2011_v7, 9  ;;  %v2131_v5 = vrot.slane %v2013_v29, 5  ;;  %v13063_v17 = vrot.slane %v16627_v47, 9  ;;  %v2142_v9 = vrot.slane %v16631_v1, 5  ;;  %v16648_v27 = vld [vmem:[#allocation2 + $0x64] sm:$0xf] }
  0xaf   : > { %v13092_v33 = vcombine.low %v2115_v58, %v2118_v35  ;;  %v2123_v13 = vrot.slane %v2121_v2, 4  ;;  %v15772_v20 = vld [vmem:[%s19240_s1 + $0xc8] sm:$0xff]   ;;  %v2130_v57 = vrot.slane %v2128_v16, 4  ;;  %v2138_v21 = vrot.slane %v16629_v63, 5  ;;  %v254_v52 = vld [vmem:[%s16160_s7 + $0xf0] sm:$0xff]  ;;  %v255_v51 = vld [vmem:[%s16160_s7 + $0xf8] sm:$0xff] }
  0xb0   : > { %v16654_v42 = vld [vmem:[#allocation2 + $0x68] sm:$0x1]  ;;  %v2137_v36 = vrot.slane %v2135_v41, 4  ;;  %v13064_v39 = vrot.slane %v2017_v37, 9  ;;  %v2145_v44 = vrot.slane %v2019_v34, 5  ;;  %v2149_v6 = vrot.slane %v16640_v38, 5 }
  0xb1   : > { %v13065_v30 = vrot.slane %v16638_v59, 9  ;;  %v2144_v24 = vrot.slane %v2142_v9, 4  ;;  %v2156_v49 = vrot.slane %v16648_v27, 5  ;;  %v2122_v53 = vsel %vm16609_vm13, %v13061_v10, %v2121_v2  ;;  %v15773_v60 = vld [vmem:[%s19240_s1 + $0xd0] sm:$0xff]   ;;  %v15775_v55 = vld [vmem:[%s19240_s1 + $0xe0] sm:$0xff]   ;;  %v15776_v63 = vld [vmem:[%s19240_s1 + $0xe8] sm:$0xff]  }
  0xb2   : > { %v2152_v0 = vrot.slane %v16644_v19, 5  ;;  %v13066_v46 = vrot.slane %v16646_v48, 9  ;;  %v2125_v12 = vsel %vm16609_vm13, %v2123_v13, %v2124_v50  ;;  %v2151_v15 = vrot.slane %v2149_v6, 4  ;;  %v2027_v47 = vld [vmem:[#allocation2 + $0x70] sm:$0xf] }
  0xb3   : > { %v2159_v61 = vrot.slane %v16654_v42, 5  ;;  %v13846_v25 = vpack.c.bf16 %v254_v52, %v254_v52  ;;  %v2132_v32 = vsel %vm16609_vm13, %v2130_v57, %v2131_v5  ;;  %v13093_v43 = vcombine.low %v2122_v53, %v2125_v12  ;;  %v2030_v2 = vld [vmem:[#allocation2 + $0x7c] sm:$0xf]  ;;  %v786_v37 = vld [vmem:[#allocation2 + $0xc0] sm:$0xf]  ;;  %v15777_v48 = vld [vmem:[%s19240_s1 + $0xf0] sm:$0xff]  }
  0xb4   : > { %v2136_v3 = vsel %vm16609_vm13, %v13063_v17, %v2135_v41  ;;  %v2139_v7 = vsel %vm16609_vm13, %v2137_v36, %v2138_v21  ;;  %v2143_v29 = vsel %vm16609_vm13, %v13064_v39, %v2142_v9  ;;  %v2146_v14 = vsel %vm16609_vm13, %v2144_v24, %v2145_v44  ;;  %v2026_v50 = vld [vmem:[#allocation2 + $0x6c] sm:$0xe]  ;;  %v2028_v9 = vld [vmem:[#allocation2 + $0x74] sm:$0x1]  ;;  %v2031_v13 = vld [vmem:[#allocation2 + $0x80] sm:$0x1] }
  0xb5   : > { %14406 = vmatmul.mubr.bf16.gmra.mrb[28].mxu0 %v13049_v18  ;;  %v2129_v18 = vsel %vm16609_vm13, %v13062_v4, %v2128_v16  ;;  %v611_v62 = vshrl.u32 %v13846_v25, 16  ;;  %v13847_v56 = vpack.c.bf16 %v255_v51, %v255_v51  ;;  %v13095_v26 = vcombine.low %v2136_v3, %v2139_v7  ;;  %v2033_v44 = vld [vmem:[#allocation2 + $0x88] sm:$0xf]  ;;  %v2036_v53 = vld [vmem:[#allocation2 + $0x94] sm:$0xf] }
  0xb6   : > { %14425 = vmatprep.mubr.bf16.mxu0 %v13090_v22  ;;  %v2158_v22 = vrot.slane %v2156_v49, 4  ;;  %v13094_v54 = vcombine.low %v2129_v18, %v2132_v32  ;;  %v13096_v1 = vcombine.low %v2143_v29, %v2146_v14  ;;  %v614_v58 = vshll.u32 %v13846_v25, 16  ;;  %v2034_v25 = vld [vmem:[#allocation2 + $0x8c] sm:$0x1]  ;;  %v16725_v32 = vld [vmem:[%s19240_s1 + $0x100] sm:$0xff]  }
  0xb7   : > { %v613_v16 = vrot.slane %v611_v62, 7  ;;  %v619_v35 = vshrl.u32 %v13847_v56, 16  ;;  %v622_v41 = vshll.u32 %v13847_v56, 16  ;;  %v2150_v34 = vsel %vm16609_vm13, %v13065_v30, %v2149_v6  ;;  %v2037_v62 = vld [vmem:[#allocation2 + $0x98] sm:$0x1] }
  0xb8   : > { %v2153_v10 = vsel %vm16609_vm13, %v2151_v15, %v2152_v0  ;;  %v2163_v59 = vrot.slane %v2027_v47, 5  ;;  %v2157_v5 = vsel %vm16609_vm13, %v13066_v46, %v2156_v49  ;;  %v2160_v17 = vsel %vm16609_vm13, %v2158_v22, %v2159_v61  ;;  %v15778_v49 = vld [vmem:[%s19240_s1 + $0xf8] sm:$0xff]   ;;  %v2032_v46 = vld [vmem:[#allocation2 + $0x84] sm:$0xe]  ;;  %v2035_v22 = vld [vmem:[#allocation2 + $0x90] sm:$0xe] }
  0xb9   : > { %v617_v38 = vrot.slane %v613_v16, 4  ;;  %v16697_v4 = vrot.slane %v619_v35, 7  ;;  %v2170_v19 = vrot.slane %v2030_v2, 5  ;;  %v13097_v57 = vcombine.low %v2150_v34, %v2153_v10  ;;  %v2042_v56 = vld [vmem:[#allocation2 + $0xac] sm:$0xf] }
  0xba   : > { %v13067_v21 = vrot.slane %v2026_v50, 9  ;;  %v13098_v42 = vcombine.low %v2157_v5, %v2160_v17  ;;  %v2165_v36 = vrot.slane %v2163_v59, 4  ;;  %v2166_v39 = vrot.slane %v2028_v9, 5  ;;  %v2045_v9 = vld [vmem:[#allocation2 + $0xb8] sm:$0xf] }
  0xbb   : > { %v2172_v52 = vrot.slane %v2170_v19, 4  ;;  %v2173_v24 = vrot.slane %v2031_v13, 5  ;;  %v2177_v12 = vrot.slane %v2033_v44, 5  ;;  %v2184_v18 = vrot.slane %v2036_v53, 5  ;;  %v3047_v53 = vld [vmem:[#allocation2 + $0x10] sm:$0xf] }
  0xbc   : > { %v2167_v0 = vsel %vm16609_vm13, %v2165_v36, %v2166_v39  ;;  %v13069_v51 = vrot.slane %v2032_v46, 9  ;;  %v2180_v3 = vrot.slane %v2034_v25, 5  ;;  %v13070_v7 = vrot.slane %v2035_v22, 9  ;;  %v15787_v22 = vld [vmem:[%s19240_s1 + $0x110] sm:$0xff]  }
  0xbd   : > { %14426 = vmatmul.mubr.bf16.vlgmr.msra.gmra.mrb[0].mxu0 %v13091_v31  ;;  %v616_v31 = vor.u32 %v614_v58, %v613_v16  ;;  %v2174_v61 = vsel %vm16609_vm13, %v2172_v52, %v2173_v24  ;;  %v2186_v29 = vrot.slane %v2184_v18, 4  ;;  %v2187_v14 = vrot.slane %v2037_v62, 5  ;;  %v2038_v16 = vld [vmem:[#allocation2 + $0x9c] sm:$0xe]  ;;  %v2040_v58 = vld [vmem:[#allocation2 + $0xa4] sm:$0x1] }
  0xbe   : > { %14458 = vmatpush3.bf16.msra.mxu0 %v16578_v8  ;;  %14429 = vmatprep.mubr.bf16.mxu0 %v13092_v33  ;;  %v15774_v8 = vld [vmem:[%s19240_s1 + $0xd8] sm:$0xff]   ;;  %v2198_v35 = vrot.slane %v2042_v56, 5  ;;  %v13071_v10 = vrot.slane %v2038_v16, 9  ;;  %v15779_v24 = vld [vmem:[#allocation2 + $0xc] sm:$0xff]   ;;  %v3108_v25 = vshrl.u32 %v3047_v53, 16 }
  0xbf   : > { %14459 = vmatprep.subr.bf16.mxu0 %v15772_v20  ;;  %v787_v27 = vsel %vm16181_vm6, %v616_v31, %v786_v37  ;;  %v2029_v33 = vld [vmem:[#allocation2 + $0x78] sm:$0xe]  ;;  %v2188_v2 = vsel %vm16609_vm13, %v2186_v29, %v2187_v14  ;;  %v2043_v37 = vld [vmem:[#allocation2 + $0xb0] sm:$0x1]  ;;  %v3050_v62 = vld [vmem:[#allocation2 + $0x1c] sm:$0xf] }
  0xc0   : > { %788 = vst [vmem:[#allocation2 + $0xc0] sm:$0xf] %v787_v27  ;;  %v13068_v30 = vrot.slane %v2029_v33, 9  ;;  %v2200_v5 = vrot.slane %v2198_v35, 4  ;;  %v2201_v17 = vrot.slane %v2043_v37, 5  ;;  %v2205_v27 = vrot.slane %v2045_v9, 5 }
  0xc1   : > { %v3128_v14 = vshll.u32 %v3050_v62, 16  ;;  %v3132_v56 = vshrl.u32 %v3050_v62, 16  ;;  %v15790_v16 = vld [vmem:[%s19240_s1 + $0x118] sm:$0xff]   ;;  %v3054_v9 = vld [vmem:[#allocation2 + $0x2c] sm:$0x1] }
  0xc2   : > { %14460 = vmatpush3.bf16.msra.mxu0 %v15772_v20  ;;  %v624_v20 = vor.u32 %v622_v41, %v16697_v4  ;;  %v2171_v15 = vsel %vm16609_vm13, %v13068_v30, %v2170_v19  ;;  %v2041_v41 = vld [vmem:[#allocation2 + $0xa8] sm:$0xe]  ;;  %v2202_v13 = vsel %vm16609_vm13, %v2200_v5, %v2201_v17  ;;  %v2207_v39 = vrot.slane %v2205_v27, 4 }
  0xc3   : > { %14461 = vmatprep.subr.bf16.mxu0 %v15773_v60  ;;  %v3134_v5 = vrot.slane %v3132_v56, 4 }
  0xc4   : > { %v625_v6 = vsel %vm16172_vm5, %v617_v38, %v624_v20  ;;  %v13072_v38 = vrot.slane %v2041_v41, 9  ;;  %v2044_v20 = vld [vmem:[#allocation2 + $0xb4] sm:$0xe]  ;;  %v3055_v41 = vld [vmem:[#allocation2 + $0x30] sm:$0xf] }
  0xc5   : > { %14430 = vmatmul.mubr.bf16.gmra.mrb[4].mxu0 %v13093_v43  ;;  %789 = vst [vmem:[#allocation2 + $0xc4] sm:$0xf] %v625_v6  ;;  %v13073_v36 = vrot.slane %v2044_v20, 9 }
  0xc6   : > { %14433 = vmatprep.mubr.bf16.mxu0 %v13094_v54  ;;  %14462 = vmatpush3.bf16.msra.mxu0 %v15773_v60  ;;  %v2164_v60 = vsel %vm16609_vm13, %v13067_v21, %v2163_v59  ;;  %v13100_v54 = vcombine.low %v2171_v15, %v2174_v61  ;;  %v2194_v59 = vrot.slane %v2040_v58, 5  ;;  %v2199_v33 = vsel %vm16609_vm13, %v13072_v38, %v2198_v35  ;;  %v15784_v15 = vld [vmem:[%s19240_s1 + $0x108] sm:$0xff]  }
  0xc7   : > { %14463 = vmatprep.subr.bf16.mxu0 %v15774_v8  ;;  %v13099_v43 = vcombine.low %v2164_v60, %v2167_v0  ;;  %v2206_v6 = vsel %vm16609_vm13, %v13073_v36, %v2205_v27  ;;  %v15780_v60 = vld [vmem:[#allocation2 + $0x18] sm:$0xff]   ;;  %v15782_v0 = vld [vmem:[#allocation2 + $0x24] sm:$0xff]   ;;  %v3104_v61 = vshll.u32 %v3047_v53, 16  ;;  %v16761_v38 = vrot.slane %v3128_v14, 5 }
  0xc8   : > { %v3167_v27 = vshrl.u32 %v3055_v41, 16  ;;  %v3162_v53 = vshll.u32 %v3054_v9, 16  ;;  %v3060_v14 = vld [vmem:[#allocation2 + $0x44] sm:$0x1] }
  0xc9   : > { %v3210_v9 = vshll.u32 %v3060_v14, 16 }
  0xca   : > { %14464 = vmatpush3.bf16.msra.mxu0 %v15774_v8  ;;  %v2039_v8 = vld [vmem:[#allocation2 + $0xa0] sm:$0xf] }
  0xcb   : > { %14465 = vmatprep.subr.bf16.mxu0 %v15775_v55 }
  0xcd   : > { %14434 = vmatmul.mubr.bf16.gmra.mrb[8].mxu0 %v13095_v26  ;;  %v2178_v26 = vsel %vm16609_vm13, %v13069_v51, %v2177_v12  ;;  %v3052_v51 = vld [vmem:[#allocation2 + $0x24] sm:$0xf] }
  0xce   : > { %14437 = vmatprep.mubr.bf16.mxu0 %v13096_v1  ;;  %14466 = vmatpush3.bf16.msra.mxu0 %v15775_v55  ;;  %v2179_v55 = vrot.slane %v2177_v12, 4  ;;  %v2185_v1 = vsel %vm16609_vm13, %v13070_v7, %v2184_v18  ;;  %v3049_v18 = vld [vmem:[#allocation2 + $0x18] sm:$0xf] }
  0xcf   : > { %14467 = vmatprep.subr.bf16.mxu0 %v15776_v63  ;;  %v13102_v31 = vcombine.low %v2185_v1, %v2188_v2  ;;  %v3119_v7 = vshrl.u32 %v3049_v18, 16  ;;  %v3122_v29 = vshll.u32 %v3049_v18, 16  ;;  %v3143_v1 = vshrl.u32 %v3052_v51, 16  ;;  %v3057_v18 = vld [vmem:[#allocation2 + $0x38] sm:$0x1] }
  0xd0   : > { %v2181_v47 = vsel %vm16609_vm13, %v2179_v55, %v2180_v3  ;;  %v16755_v55 = vrot.slane %v3104_v61, 5  ;;  %v3110_v3 = vrot.slane %v3108_v25, 4  ;;  %v3146_v2 = vshll.u32 %v3052_v51, 16  ;;  %v3061_v61 = vld [vmem:[#allocation2 + $0x48] sm:$0xf] }
  0xd1   : > { %v13101_v34 = vcombine.low %v2178_v26, %v2181_v47  ;;  %v3053_v26 = vld [vmem:[#allocation2 + $0x28] sm:$0xf]  ;;  %v15783_v47 = vld [vmem:[#allocation2 + $0x30] sm:$0xff]   ;;  %v3121_v37 = vrot.slane %v3119_v7, 4  ;;  %v3215_v56 = vshrl.u32 %v3061_v61, 16 }
  0xd2   : > { %14468 = vmatpush3.bf16.msra.mxu0 %v15776_v63  ;;  %v2191_v63 = vrot.slane %v2039_v8, 5  ;;  %v790_v25 = vld [vmem:[#allocation2 + $0xc8] sm:$0x1] }
  0xd3   : > { %14469 = vmatprep.subr.bf16.mxu0 %v15777_v48 }
  0xd4   : > { %v2193_v50 = vrot.slane %v2191_v63, 4  ;;  %v2192_v19 = vsel %vm16609_vm13, %v13071_v10, %v2191_v63  ;;  %v3051_v63 = vld [vmem:[#allocation2 + $0x20] sm:$0x1]  ;;  %v3156_v10 = vshrl.u32 %v3053_v26, 16 }
  0xd5   : > { %14438 = vmatmul.mubr.bf16.gmra.mrb[12].mxu0 %v13097_v57  ;;  %v2046_v57 = vld [vmem:[#allocation2 + $0xbc] sm:$0x1]  ;;  %v3138_v17 = vshll.u32 %v3051_v63, 16  ;;  %v15799_v63 = vld [vmem:[%s19240_s1 + $0x130] sm:$0xff]  }
  0xd6   : > { %14441 = vmatprep.mubr.bf16.mxu0 %v13098_v42  ;;  %14470 = vmatpush3.bf16.msra.mxu0 %v15777_v48  ;;  %v2195_v48 = vsel %vm16609_vm13, %v2193_v50, %v2194_v59  ;;  %v13104_v42 = vcombine.low %v2199_v33, %v2202_v13  ;;  %v2208_v44 = vrot.slane %v2046_v57, 5  ;;  %v3056_v50 = vld [vmem:[#allocation2 + $0x34] sm:$0xf]  ;;  %v3111_v59 = vor.u32 %v3110_v3, %v16755_v55 }
  0xd7   : > { %14471 = vmatprep.subr.bf16.mxu0 %v15778_v49  ;;  %v13103_v21 = vcombine.low %v2192_v19, %v2195_v48  ;;  %v3145_v19 = vrot.slane %v3143_v1, 4  ;;  %v3148_v48 = vrot.slane %v3146_v2, 5  ;;  %v3170_v33 = vshll.u32 %v3055_v41, 16 }
  0xd8   : > { %v2209_v30 = vsel %vm16609_vm13, %v2207_v39, %v2208_v44  ;;  %v626_v13 = vrot.slane %v16697_v4, 4  ;;  %v3176_v20 = vshll.u32 %v3056_v50, 16  ;;  %v3180_v57 = vshrl.u32 %v3056_v50, 16  ;;  %v15789_v50 = vld [vmem:[#allocation2 + $0x60] sm:$0xff]  }
  0xd9   : > { %v13105_v52 = vcombine.low %v2206_v6, %v2209_v30  ;;  %v3158_v6 = vrot.slane %v3156_v10, 4  ;;  %v3058_v30 = vld [vmem:[#allocation2 + $0x3c] sm:$0xf]  ;;  %v16775_v4 = vrot.slane %v3138_v17, 5  ;;  %v3065_v10 = vld [vmem:[#allocation2 + $0x58] sm:$0xf] }
  0xda   : > { %14472 = vmatpush3.bf16.msra.mxu0 %v15778_v49  ;;  %v3046_v49 = vld [vmem:[#allocation2 + $0xc] sm:$0xf]  ;;  %v3182_v62 = vrot.slane %v3180_v57, 4 }
  0xdb   : > { %14505 = vmatprep.subr.bf16.mxu0 %v16725_v32  ;;  %v3095_v46 = vshrl.u32 %v3046_v49, 16  ;;  %v3098_v12 = vshll.u32 %v3046_v49, 16  ;;  %v16773_v49 = vrot.slane %v3111_v59, 4 }
  0xdd   : > { %14442 = vmatmul.mubr.bf16.gmra.mrb[16].mxu0 %v13099_v43  ;;  %v3048_v43 = vld [vmem:[#allocation2 + $0x14] sm:$0x1]  ;;  %v3097_v8 = vrot.slane %v3095_v46, 4  ;;  %v3149_v46 = vor.u32 %v3148_v48, %v3145_v19  ;;  %v3063_v19 = vld [vmem:[#allocation2 + $0x50] sm:$0x1]  ;;  %v3217_v48 = vrot.slane %v3215_v56, 4 }
  0xde   : > { %14445 = vmatprep.mubr.bf16.mxu0 %v13100_v54  ;;  %v3100_v54 = vrot.slane %v3098_v12, 5  ;;  %v3114_v35 = vshll.u32 %v3048_v43, 16  ;;  %v3169_v12 = vrot.slane %v3167_v27, 4  ;;  %v3191_v43 = vshrl.u32 %v3058_v30, 16 }
  0xdf   : > { %v16793_v2 = vrot.slane %v3149_v46, 4 }
  0xe0   : > { %v3101_v58 = vor.u32 %v3100_v54, %v3097_v8  ;;  %v16767_v36 = vrot.slane %v3114_v35, 5  ;;  %v3194_v8 = vshll.u32 %v3058_v30, 16  ;;  %v15796_v54 = vld [vmem:[%s19240_s1 + $0x128] sm:$0xff]  }
  0xe5   : > { %14446 = vmatmul.mubr.bf16.gmra.mrb[20].mxu0 %v13101_v34  ;;  %v3124_v34 = vrot.slane %v3122_v29, 5 }
  0xe6   : > { %14449 = vmatprep.mubr.bf16.mxu0 %v13102_v31  ;;  %v3152_v31 = vshll.u32 %v3053_v26, 16  ;;  %v3218_v26 = vshll.u32 %v3061_v61, 16 }
  0xe7   : > { %v3125_v39 = vor.u32 %v3124_v34, %v3121_v37  ;;  %v3193_v37 = vrot.slane %v3191_v43, 4  ;;  %v3196_v34 = vrot.slane %v3194_v8, 5  ;;  %v3234_v8 = vshll.u32 %v3063_v19, 16 }
  0xe8   : > { %v16769_v44 = vrot.slane %v3152_v31, 5  ;;  %v3064_v31 = vld [vmem:[#allocation2 + $0x54] sm:$0xf]  ;;  %v3220_v27 = vrot.slane %v3218_v26, 5  ;;  %v3069_v26 = vld [vmem:[#allocation2 + $0x68] sm:$0x1] }
  0xe9   : > { %v16783_v51 = vrot.slane %v3125_v39, 4  ;;  %v3239_v57 = vshrl.u32 %v3064_v31, 16  ;;  %v3252_v39 = vshrl.u32 %v3065_v10, 16 }
  0xea   : > { %v3159_v3 = vor.u32 %v3158_v6, %v16769_v44  ;;  %v15791_v6 = vld [vmem:[#allocation2 + $0x6c] sm:$0xff]  }
  0xeb   : > { %v3254_v56 = vrot.slane %v3252_v39, 4 }
  0xec   : > { %v16798_v59 = vrot.slane %v3159_v3, 4  ;;  %v3066_v3 = vld [vmem:[#allocation2 + $0x5c] sm:$0x1] }
  0xed   : > { %14450 = vmatmul.mubr.bf16.gmra.mrb[24].mxu0 %v13103_v21  ;;  %v15786_v21 = vld [vmem:[#allocation2 + $0x48] sm:$0xff]  }
  0xee   : > { %14453 = vmatprep.mubr.bf16.mxu0 %v13104_v42  ;;  %v15793_v42 = vld [vmem:[%s19240_s1 + $0x120] sm:$0xff]  }
  0xf5   : > { %14454 = vmatmul.mubr.bf16.gmra.mrb[28].mxu0 %v13105_v52  ;;  %v15788_v52 = vld [vmem:[#allocation2 + $0x54] sm:$0xff]  }
  0xf6   : > { %14473 = vmatprep.mubr.bf16.mxu0 %v15779_v24  ;;  %v16771_v24 = vrot.slane %v3101_v58, 4  ;;  %v3062_v58 = vld [vmem:[#allocation2 + $0x4c] sm:$0xf] }
  0xfd   : > { %14474 = vmatmul.mubr.bf16.vlgmr.msra.gmra.mrb[0].mxu0 %v15780_v60  ;;  %v3059_v60 = vld [vmem:[#allocation2 + $0x40] sm:$0xf] }
  0xfe   : > { %14506 = vmatpush3.bf16.msra.mxu0 %v16725_v32  ;;  %14477 = vmatprep.mubr.bf16.mxu0 %v15782_v0  ;;  %v15785_v32 = vld [vmem:[#allocation2 + $0x3c] sm:$0xff]   ;;  %v3135_v0 = vor.u32 %v3134_v5, %v16761_v38  ;;  %v3200_v7 = vshll.u32 %v3059_v60, 16  ;;  %v3204_v29 = vshrl.u32 %v3059_v60, 16  ;;  %v3197_v60 = vor.u32 %v3196_v34, %v3193_v37 }
  0xff   : > { %14507 = vmatprep.subr.bf16.mxu0 %v15784_v15 }
 0x100   : > { %v16791_v1 = vrot.slane %v3135_v0, 4  ;;  %v16800_v5 = vrot.slane %v3200_v7, 5  ;;  %v3206_v17 = vrot.slane %v3204_v29, 4  ;;  %v15802_v0 = vld [vmem:[%s19240_s1 + $0x138] sm:$0xff]   ;;  %v3241_v7 = vrot.slane %v3239_v57, 4 }
 0x101   : > { %v16823_v37 = vrot.slane %v3197_v60, 4  ;;  %v3072_v60 = vld [vmem:[#allocation2 + $0x74] sm:$0x1] }
 0x102   : > { %14508 = vmatpush3.bf16.msra.mxu0 %v15784_v15  ;;  %v3172_v15 = vrot.slane %v3170_v33, 5  ;;  %v3224_v33 = vshll.u32 %v3062_v58, 16  ;;  %v3207_v46 = vor.u32 %v3206_v17, %v16800_v5  ;;  %v15792_v17 = vld [vmem:[#allocation2 + $0x78] sm:$0xff]  }
 0x103   : > { %14509 = vmatprep.subr.bf16.mxu0 %v15787_v22 }
 0x104   : > { %v3173_v35 = vor.u32 %v3172_v15, %v3169_v12  ;;  %v16812_v12 = vrot.slane %v3210_v9, 5  ;;  %v3068_v15 = vld [vmem:[#allocation2 + $0x64] sm:$0xf]  ;;  %v16825_v34 = vrot.slane %v3207_v46, 4 }
 0x105   : > { %14478 = vmatmul.mubr.bf16.gmra.mrb[4].mxu0 %v15783_v47  ;;  %v791_v47 = vsel %vm16188_vm7, %v626_v13, %v790_v25  ;;  %v3228_v13 = vshrl.u32 %v3062_v58, 16 }
 0x106   : > { %14481 = vmatprep.mubr.bf16.mxu0 %v15785_v32  ;;  %14510 = vmatpush3.bf16.msra.mxu0 %v15787_v22  ;;  %v16778_v22 = vrot.slane %v3176_v20, 5  ;;  %v16795_v32 = vrot.slane %v3162_v53, 5  ;;  %792 = vst [vmem:[#allocation2 + $0xc8] sm:$0x1] %v791_v47  ;;  %v3067_v20 = vld [vmem:[#allocation2 + $0x60] sm:$0xf] }
 0x107   : > { %14511 = vmatprep.subr.bf16.mxu0 %v15790_v16  ;;  %v16802_v30 = vrot.slane %v3173_v35, 4  ;;  %v3263_v61 = vshrl.u32 %v3067_v20, 16  ;;  %v3266_v25 = vshll.u32 %v3067_v20, 16  ;;  %v3230_v43 = vrot.slane %v3228_v13, 4 }
 0x108   : > { %v3183_v41 = vor.u32 %v3182_v62, %v16778_v22  ;;  %v16814_v62 = vrot.slane %v3224_v33, 5  ;;  %v3272_v47 = vshll.u32 %v3068_v15, 16  ;;  %v3282_v20 = vshll.u32 %v3069_v26, 16 }
 0x109   : > { %v3265_v58 = vrot.slane %v3263_v61, 4  ;;  %v3268_v35 = vrot.slane %v3266_v25, 5  ;;  %v3074_v25 = vld [vmem:[#allocation2 + $0x7c] sm:$0xf] }
 0x10a   : > { %14512 = vmatpush3.bf16.msra.mxu0 %v15790_v16  ;;  %v3186_v16 = vshll.u32 %v3057_v18, 16  ;;  %v3221_v18 = vor.u32 %v3220_v27, %v3217_v48  ;;  %v3258_v48 = vshll.u32 %v3066_v3, 16  ;;  %v15794_v27 = vld [vmem:[#allocation2 + $0x84] sm:$0xff]   ;;  %v16833_v33 = vrot.slane %v3272_v47, 5 }
 0x10b   : > { %14513 = vmatprep.subr.bf16.mxu0 %v15793_v42  ;;  %v3076_v3 = vld [vmem:[#allocation2 + $0x84] sm:$0xf] }
 0x10c   : > { %v16806_v53 = vrot.slane %v3186_v16, 5  ;;  %v3276_v16 = vshrl.u32 %v3068_v15, 16  ;;  %v16830_v9 = vrot.slane %v3221_v18, 4  ;;  %19274 = vst [vmem:[#allocation12_spill] sm:$0xff] %v16833_v33  ;;  %v16840_v61 = vrot.slane %v3258_v48, 5 }
 0x10d   : > { %14482 = vmatmul.mubr.bf16.gmra.mrb[8].mxu0 %v15786_v21  ;;  %v3242_v21 = vshll.u32 %v3064_v31, 16  ;;  %v3231_v31 = vor.u32 %v3230_v43, %v16814_v62  ;;  %v3335_v48 = vshrl.u32 %v3076_v3, 16 }
 0x10e   : > { %14485 = vmatprep.mubr.bf16.mxu0 %v15788_v52  ;;  %14514 = vmatpush3.bf16.msra.mxu0 %v15793_v42  ;;  %v3248_v42 = vshll.u32 %v3065_v10, 16  ;;  %v16804_v52 = vrot.slane %v3183_v41, 4  ;;  %v3070_v41 = vld [vmem:[#allocation2 + $0x6c] sm:$0xf]  ;;  %v16828_v10 = vrot.slane %v3234_v8, 5  ;;  %v3278_v13 = vrot.slane %v3276_v16, 4 }
 0x10f   : > { %14515 = vmatprep.subr.bf16.mxu0 %v15796_v54  ;;  %v3244_v29 = vrot.slane %v3242_v21, 5  ;;  %v3287_v57 = vshrl.u32 %v3070_v41, 16  ;;  %v3269_v21 = vor.u32 %v3268_v35, %v3265_v58  ;;  %v16845_v8 = vrot.slane %v3282_v20, 5  ;;  %v3079_v58 = vld [vmem:[#allocation2 + $0x90] sm:$0xf]  ;;  %v15797_v35 = vld [vmem:[#allocation2 + $0x9c] sm:$0xff]  }
 0x110   : > { %v16821_v14 = vrot.slane %v3248_v42, 5  ;;  %v3290_v42 = vshll.u32 %v3070_v41, 16  ;;  %v3279_v43 = vor.u32 %v3278_v13, %v16833_v33  ;;  %v3359_v23 = vshrl.u32 %v3079_v58, 16 }
 0x111   : > { %19276 = vst [vmem:[#allocation14_spill] sm:$0xff] %v16845_v8  ;;  %v3289_v26 = vrot.slane %v3287_v57, 4  ;;  %v3362_v28 = vshll.u32 %v3079_v58, 16 }
 0x112   : > { %14516 = vmatpush3.bf16.msra.mxu0 %v15796_v54  ;;  %v16819_v54 = vld [vmem:[%s19240_s1 + $0x140] sm:$0xff]   ;;  %v3255_v19 = vor.u32 %v3254_v56, %v16821_v14  ;;  %v16847_v56 = vrot.slane %v3269_v21, 4  ;;  %v3292_v47 = vrot.slane %v3290_v42, 5  ;;  %v16851_v21 = vrot.slane %v3279_v43, 4 }
 0x113   : > { %14517 = vmatprep.subr.bf16.mxu0 %v15799_v63 }
 0x114   : > { %v16842_v18 = vrot.slane %v3255_v19, 4  ;;  %19277 = vst [vmem:[#allocation15_spill] sm:$0xff] %v16847_v56  ;;  %v3324_v19 = vshrl.u32 %v3074_v25, 16  ;;  %19279 = vst [vmem:[#allocation17_spill] sm:$0xff] %v16851_v21  ;;  %v3293_v57 = vor.u32 %v3292_v47, %v3289_v26  ;;  %v3081_v26 = vld [vmem:[#allocation2 + $0x98] sm:$0x1] }
 0x115   : > { %14486 = vmatmul.mubr.bf16.gmra.mrb[12].mxu0 %v15789_v50  ;;  %v3071_v50 = vld [vmem:[#allocation2 + $0x70] sm:$0xf]  ;;  %v15798_v47 = vld [vmem:[#allocation2 + $0xa8] sm:$0xff]   ;;  %v15800_v21 = vld [vmem:[#allocation2 + $0xb4] sm:$0xff]   ;;  %v3378_v56 = vshll.u32 %v3081_v26, 16 }
 0x116   : > { %14489 = vmatprep.mubr.bf16.mxu0 %v15791_v6  ;;  %14518 = vmatpush3.bf16.msra.mxu0 %v15799_v63  ;;  %v3245_v63 = vor.u32 %v3244_v29, %v3241_v7  ;;  %v3296_v39 = vshll.u32 %v3071_v50, 16  ;;  %v16836_v6 = vrot.slane %v3231_v31, 4  ;;  %v3300_v46 = vshrl.u32 %v3071_v50, 16  ;;  %19275 = vst [vmem:[#allocation13_spill] sm:$0xff] %v16842_v18  ;;  %v3077_v7 = vld [vmem:[#allocation2 + $0x88] sm:$0xf] }
 0x117   : > { %14519 = vmatprep.subr.bf16.mxu0 %v15802_v0  ;;  %v15795_v29 = vld [vmem:[#allocation2 + $0x90] sm:$0xff]   ;;  %v3306_v31 = vshll.u32 %v3072_v60, 16  ;;  %v3344_v13 = vshll.u32 %v3077_v7, 16  ;;  %v3348_v20 = vshrl.u32 %v3077_v7, 16  ;;  %v3337_v7 = vrot.slane %v3335_v48, 4 }
 0x118   : > { %v16838_v15 = vrot.slane %v3245_v63, 4  ;;  %v16849_v16 = vrot.slane %v3296_v39, 5  ;;  %v3302_v41 = vrot.slane %v3300_v46, 4  ;;  %v3320_v63 = vshll.u32 %v3074_v25, 16  ;;  %v3078_v46 = vld [vmem:[#allocation2 + $0x8c] sm:$0x1] }
 0x119   : > { %v16854_v39 = vrot.slane %v3306_v31, 5  ;;  %v3326_v25 = vrot.slane %v3324_v19, 4  ;;  %v16858_v58 = vrot.slane %v3344_v13, 5  ;;  %v3350_v43 = vrot.slane %v3348_v20, 4 }
 0x11a   : > { %14520 = vmatpush3.bf16.msra.mxu0 %v15802_v0  ;;  %v3073_v0 = vld [vmem:[#allocation2 + $0x78] sm:$0xf]  ;;  %19278 = vst [vmem:[#allocation16_spill] sm:$0xff] %v16849_v16  ;;  %v3303_v42 = vor.u32 %v3302_v41, %v16849_v16  ;;  %v16856_v40 = vrot.slane %v3320_v63, 5  ;;  %v3361_v41 = vrot.slane %v3359_v23, 4  ;;  %v3364_v31 = vrot.slane %v3362_v28, 5 }
 0x11b   : > { %14553 = vmatprep.subr.bf16.mxu0 %v16819_v54  ;;  %v3311_v50 = vshrl.u32 %v3073_v0, 16  ;;  %19280 = vst [vmem:[#allocation18_spill] sm:$0xff] %v16854_v39  ;;  %v3082_v39 = vld [vmem:[#allocation2 + $0x9c] sm:$0xf]  ;;  %v3083_v16 = vld [vmem:[#allocation2 + $0xa0] sm:$0xf]  ;;  %v3351_v20 = vor.u32 %v3350_v43, %v16858_v58 }
 0x11c   : > { %v3354_v63 = vshll.u32 %v3078_v46, 16  ;;  %v3383_v23 = vshrl.u32 %v3082_v39, 16  ;;  %v3365_v28 = vor.u32 %v3364_v31, %v3361_v41  ;;  %v3386_v33 = vshll.u32 %v3082_v39, 16 }
 0x11d   : > { %14490 = vmatmul.mubr.bf16.gmra.mrb[16].mxu0 %v15792_v17  ;;  %v3314_v17 = vshll.u32 %v3073_v0, 16  ;;  %v3313_v60 = vrot.slane %v3311_v50, 4  ;;  %v16862_v50 = vrot.slane %v3303_v42, 4  ;;  %v3392_v18 = vshll.u32 %v3083_v16, 16 }
 0x11e   : > { %14493 = vmatprep.mubr.bf16.mxu0 %v15794_v27  ;;  %v3338_v27 = vshll.u32 %v3076_v3, 16  ;;  %v3080_v3 = vld [vmem:[#allocation2 + $0x94] sm:$0xf]  ;;  %v3385_v43 = vrot.slane %v3383_v23, 4  ;;  %v3388_v26 = vrot.slane %v3386_v33, 5  ;;  %v3131_v33 = vsel %vm16385_vm10, %v16783_v51, %v16761_v38  ;;  %v15804_v38 = vld [vmem:[%s19240_s1 + $0x148] sm:$0xff]  }
 0x11f   : > { %v3316_v0 = vrot.slane %v3314_v17, 5  ;;  %v3330_v17 = vshll.u32 %v3075_v11, 16  ;;  %v3368_v48 = vshll.u32 %v3080_v3, 16  ;;  %v3117_v11 = vsel %vm16385_vm10, %v16773_v49, %v16767_v36  ;;  %v3085_v49 = vld [vmem:[#allocation2 + $0xa8] sm:$0xf] }
 0x120   : > { %v3340_v8 = vrot.slane %v3338_v27, 5  ;;  %v3372_v27 = vshrl.u32 %v3080_v3, 16  ;;  %v16888_v36 = vrot.slane %v3378_v56, 5  ;;  %v3389_v51 = vor.u32 %v3388_v26, %v3385_v43  ;;  %v3089_v43 = vld [vmem:[#allocation2 + $0xb8] sm:$0xf] }
 0x121   : > { %v3317_v19 = vor.u32 %v3316_v0, %v3313_v60  ;;  %v16874_v42 = vrot.slane %v3330_v17, 5  ;;  %v16880_v39 = vrot.slane %v3368_v48, 5  ;;  %v3086_v17 = vld [vmem:[#allocation2 + $0xac] sm:$0xf] }
 0x122   : > { %v3341_v13 = vor.u32 %v3340_v8, %v3337_v7  ;;  %v3396_v8 = vshrl.u32 %v3083_v16, 16  ;;  %v3374_v0 = vrot.slane %v3372_v27, 4  ;;  %v15801_v16 = vld [vmem:[#allocation2 + $0xc0] sm:$0xff]   ;;  %v16890_v7 = vrot.slane %v3365_v28, 4 }
 0x123   : > { %v16876_v46 = vrot.slane %v3317_v19, 4  ;;  %v3407_v19 = vshrl.u32 %v3085_v49, 16  ;;  %v3420_v23 = vshrl.u32 %v3086_v17, 16  ;;  %v3155_v28 = vsel %vm16385_vm10, %v16793_v2, %v16769_v44 }
 0x124   : > { %v16882_v3 = vrot.slane %v3341_v13, 4  ;;  %v3398_v41 = vrot.slane %v3396_v8, 4  ;;  %v3416_v13 = vshll.u32 %v3086_v17, 16  ;;  %v3088_v8 = vld [vmem:[#allocation2 + $0xb4] sm:$0xf]  ;;  %v3179_v44 = vsel %vm16385_vm10, %v16802_v30, %v16778_v22 }
 0x125   : > { %14494 = vmatmul.mubr.bf16.gmra.mrb[20].mxu0 %v15795_v29  ;;  %v16860_v29 = vrot.slane %v3293_v57, 4  ;;  %v3107_v57 = vsel %vm16385_vm10, %v16771_v24, %v16755_v55  ;;  %v16884_v55 = vrot.slane %v3351_v20, 4  ;;  %v16886_v24 = vrot.slane %v3354_v63, 5 }
 0x126   : > { %14497 = vmatprep.mubr.bf16.mxu0 %v15797_v35  ;;  %v3327_v35 = vor.u32 %v3326_v25, %v16856_v40  ;;  %v3084_v25 = vld [vmem:[#allocation2 + $0xa4] sm:$0x1]  ;;  %v13170_v48 = vcombine.low %v3107_v57, %v3117_v11  ;;  %v3409_v27 = vrot.slane %v3407_v19, 4  ;;  %v3165_v57 = vsel %vm16385_vm10, %v16798_v59, %v16795_v32  ;;  %v15805_v32 = vld [vmem:[%s19240_s1 + $0x150] sm:$0xff]  }
 0x127   : > { %v3402_v31 = vshll.u32 %v3084_v25, 16  ;;  %v3189_v2 = vsel %vm16385_vm10, %v16804_v52, %v16806_v53  ;;  %v16930_v59 = vrot.slane %v3389_v51, 4  ;;  %v3431_v30 = vshrl.u32 %v3088_v8, 16  ;;  %v19284_v51 = vld [vmem:[#allocation14_spill] sm:$0xff] }
 0x128   : > { %v16878_v60 = vrot.slane %v3327_v35, 4  ;;  %v3410_v35 = vshll.u32 %v3085_v49, 16  ;;  %v16935_v49 = vrot.slane %v3416_v13, 5  ;;  %v3203_v52 = vsel %vm16385_vm10, %v16823_v37, %v16800_v5  ;;  %v15807_v5 = vld [vmem:[%s19240_s1 + $0x160] sm:$0xff]   ;;  %v19281_v13 = vld [vmem:[#allocation13_spill] sm:$0xff] }
 0x129   : > { %v16897_v56 = vrot.slane %v3402_v31, 5  ;;  %v3213_v53 = vsel %vm16385_vm10, %v16825_v34, %v16812_v12  ;;  %v13173_v26 = vcombine.low %v3179_v44, %v3189_v2  ;;  %v3434_v12 = vshll.u32 %v3088_v8, 16  ;;  %v19286_v44 = vld [vmem:[#allocation16_spill] sm:$0xff] }
 0x12a   : > { %v3412_v20 = vrot.slane %v3410_v35, 5  ;;  %v13174_v31 = vcombine.low %v3203_v52, %v3213_v53  ;;  %v3440_v34 = vshll.u32 %v3089_v43, 16  ;;  %v3237_v19 = vsel %vm16385_vm10, %v16836_v6, %v16828_v10  ;;  %v15808_v10 = vld [vmem:[%s19240_s1 + $0x168] sm:$0xff]   ;;  %v15810_v52 = vld [vmem:[%s19240_s1 + $0x178] sm:$0xff]  }
 0x12b   : > { %v3433_v35 = vrot.slane %v3431_v30, 4  ;;  %v3299_v2 = vsel %vm16385_vm10, %v16860_v29, %v19286_v44 }
 0x12d   : > { %14498 = vmatmul.mubr.bf16.gmra.mrb[24].mxu0 %v15798_v47  ;;  %v16892_v47 = vrot.slane %v3392_v18, 5  ;;  %v3141_v18 = vsel %vm16385_vm10, %v16791_v1, %v16775_v4  ;;  %v3087_v1 = vld [vmem:[#allocation2 + $0xb0] sm:$0x1] }
 0x12e   : > { %14501 = vmatprep.mubr.bf16.mxu0 %v15800_v21  ;;  %v3375_v21 = vor.u32 %v3374_v0, %v16880_v39  ;;  %v13171_v11 = vcombine.low %v3131_v33, %v3141_v18  ;;  %v13172_v0 = vcombine.low %v3155_v28, %v3165_v57  ;;  %v3426_v22 = vshll.u32 %v3087_v1, 16  ;;  %v3091_v18 = vld [vmem:[#allocation2 + $0xc0] sm:$0xf] }
 0x12f   : > { %v3399_v4 = vor.u32 %v3398_v41, %v16892_v47  ;;  %v3413_v41 = vor.u32 %v3412_v20, %v3409_v27  ;;  %v3251_v27 = vsel %vm16385_vm10, %v16838_v15, %v16821_v14  ;;  %v3261_v33 = vsel %vm16385_vm10, %v19281_v13, %v16840_v61  ;;  %v15809_v15 = vld [vmem:[%s19240_s1 + $0x170] sm:$0xff]   ;;  %v19282_v57 = vld [vmem:[#allocation12_spill] sm:$0xff] }
 0x130   : > { %v16895_v63 = vrot.slane %v3375_v21, 4  ;;  %v16953_v17 = vrot.slane %v3426_v22, 5  ;;  %v3227_v21 = vsel %vm16385_vm10, %v16830_v9, %v16814_v62  ;;  %v3090_v62 = vld [vmem:[#allocation2 + $0xbc] sm:$0x1]  ;;  %v13176_v20 = vcombine.low %v3251_v27, %v3261_v33  ;;  %v3092_v22 = vld [vmem:[#allocation2 + $0xc4] sm:$0xf] }
 0x131   : > { %v16932_v25 = vrot.slane %v3399_v4, 4  ;;  %v16951_v37 = vrot.slane %v3413_v41, 4  ;;  %v13175_v9 = vcombine.low %v3227_v21, %v3237_v19  ;;  %v3436_v61 = vrot.slane %v3434_v12, 5  ;;  %v19285_v4 = vld [vmem:[#allocation17_spill] sm:$0xff] }
 0x132   : > { %v3450_v28 = vshll.u32 %v3090_v62, 16  ;;  %v3285_v1 = vsel %vm16385_vm10, %v19285_v4, %v19284_v51  ;;  %v3464_v29 = vshll.u32 %v3092_v22, 16  ;;  %v3468_v41 = vshrl.u32 %v3092_v22, 16  ;;  %v3871_v51 = vld [vmem:[#allocation2 + $0x28] sm:$0xf] }
 0x133   : > { %v3347_v21 = vsel %vm16385_vm10, %v16882_v3, %v16858_v58  ;;  %v3357_v19 = vsel %vm16385_vm10, %v16884_v55, %v16886_v24  ;;  %v3371_v3 = vsel %vm16385_vm10, %v16890_v7, %v16880_v39  ;;  %v3381_v55 = vsel %vm16385_vm10, %v16895_v63, %v16888_v36  ;;  %v3874_v22 = vld [vmem:[#allocation2 + $0x34] sm:$0xf] }
 0x134   : > { %v3466_v13 = vrot.slane %v3464_v29, 5  ;;  %v3470_v58 = vrot.slane %v3468_v41, 4  ;;  %v3395_v62 = vsel %vm16385_vm10, %v16930_v59, %v16892_v47  ;;  %v13181_v39 = vcombine.low %v3371_v3, %v3381_v55  ;;  %v3877_v41 = vld [vmem:[#allocation2 + $0x40] sm:$0xf]  ;;  %v15812_v55 = vld [vmem:[%s19240_s1 + $0x188] sm:$0xff]  }
 0x135   : > { %14502 = vmatmul.mubr.bf16.gmra.mrb[28].mxu0 %v15801_v16  ;;  %v3422_v16 = vrot.slane %v3420_v23, 4  ;;  %v16980_v23 = vrot.slane %v3440_v34, 5  ;;  %v3419_v47 = vsel %vm16385_vm10, %v16951_v37, %v16935_v49  ;;  %v3869_v37 = vld [vmem:[#allocation2 + $0x20] sm:$0x1] }
 0x136   : > { %14521 = vmatprep.mubr.bf16.mxu0 %v13170_v48  ;;  %v3444_v48 = vshrl.u32 %v3089_v43, 16  ;;  %v3437_v43 = vor.u32 %v3436_v61, %v3433_v35  ;;  %v3093_v35 = vld [vmem:[#allocation2 + $0xc8] sm:$0x1] }
 0x137   : > { %v3423_v6 = vor.u32 %v3422_v16, %v16935_v49  ;;  %v3474_v24 = vshll.u32 %v3093_v35, 16  ;;  %v3867_v49 = vld [vmem:[#allocation2 + $0x18] sm:$0xe]  ;;  %v3876_v35 = vld [vmem:[#allocation2 + $0x3c] sm:$0xe] }
 0x138   : > { %v3446_v8 = vrot.slane %v3444_v48, 4  ;;  %v3438_v12 = vrot.slane %v3437_v43, 4  ;;  %v3865_v48 = vld [vmem:[#allocation2 + $0x10] sm:$0xf]  ;;  %v3972_v43 = vrot.slane %v3869_v37, 5 }
 0x139   : > { %v16975_v14 = vrot.slane %v3423_v6, 4  ;;  %v3962_v33 = vrot.slane %v3865_v48, 5  ;;  %v3866_v6 = vld [vmem:[#allocation2 + $0x14] sm:$0x1]  ;;  %v3878_v48 = vld [vmem:[#allocation2 + $0x44] sm:$0x1] }
 0x13a   : > { %v3965_v61 = vrot.slane %v3866_v6, 5  ;;  %v3885_v37 = vld [vmem:[#allocation2 + $0x60] sm:$0xe] }
 0x13d   : > { %14522 = vmatmul.mubr.bf16.vlgmr.msra.gmra.mrb[0].mxu0 %v13171_v11  ;;  %v19283_v11 = vld [vmem:[#allocation15_spill] sm:$0xff] }
 0x13e   : > { %14554 = vmatpush3.bf16.msra.mxu0 %v16819_v54  ;;  %14525 = vmatprep.mubr.bf16.mxu0 %v13172_v0  ;;  %v15806_v54 = vld [vmem:[%s19240_s1 + $0x158] sm:$0xff]   ;;  %v3455_v0 = vshrl.u32 %v3091_v18, 16 }
 0x13f   : > { %14555 = vmatprep.subr.bf16.mxu0 %v15804_v38 }
 0x140   : > { %v3457_v34 = vrot.slane %v3455_v0, 4 }
 0x142   : > { %14556 = vmatpush3.bf16.msra.mxu0 %v15804_v38  ;;  %v3275_v38 = vsel %vm16385_vm10, %v19283_v11, %v19282_v57 }
 0x143   : > { %14557 = vmatprep.subr.bf16.mxu0 %v15805_v32  ;;  %v13177_v30 = vcombine.low %v3275_v38, %v3285_v1  ;;  %v3868_v38 = vld [vmem:[#allocation2 + $0x1c] sm:$0xf] }
 0x144   : > { %v3969_v1 = vrot.slane %v3868_v38, 5 }
 0x145   : > { %14526 = vmatmul.mubr.bf16.gmra.mrb[4].mxu0 %v13173_v26  ;;  %v3452_v26 = vrot.slane %v3450_v28, 5  ;;  %v3443_v28 = vsel %vm16385_vm10, %v3438_v12, %v16980_v23  ;;  %v3873_v12 = vld [vmem:[#allocation2 + $0x30] sm:$0xe] }
 0x146   : > { %14529 = vmatprep.mubr.bf16.mxu0 %v13174_v31  ;;  %14558 = vmatpush3.bf16.msra.mxu0 %v15805_v32  ;;  %v19287_v32 = vld [vmem:[#allocation18_spill] sm:$0xff]  ;;  %v3323_v31 = vsel %vm16385_vm10, %v16876_v46, %v16856_v40  ;;  %v3447_v46 = vor.u32 %v3446_v8, %v16980_v23  ;;  %v3976_v8 = vrot.slane %v3871_v51, 5 }
 0x147   : > { %14559 = vmatprep.subr.bf16.mxu0 %v15806_v54  ;;  %v3309_v16 = vsel %vm16385_vm10, %v16862_v50, %v19287_v32  ;;  %v17004_v50 = vld [vmem:[%s19240_s1 + $0x180] sm:$0xff]   ;;  %v3872_v32 = vld [vmem:[#allocation2 + $0x2c] sm:$0x1] }
 0x148   : > { %v13178_v53 = vcombine.low %v3299_v2, %v3309_v16  ;;  %v3870_v2 = vld [vmem:[#allocation2 + $0x24] sm:$0xe]  ;;  %v3979_v29 = vrot.slane %v3872_v32, 5 }
 0x149   : > { %v15815_v32 = vld [vmem:[%s19240_s1 + $0x1a0] sm:$0xff]  }
 0x14a   : > { %14560 = vmatpush3.bf16.msra.mxu0 %v15806_v54  ;;  %v3458_v54 = vshll.u32 %v3091_v18, 16 }
 0x14b   : > { %14561 = vmatprep.subr.bf16.mxu0 %v15807_v5 }
 0x14c   : > { %v3460_v27 = vrot.slane %v3458_v54, 5  ;;  %v3978_v54 = vrot.slane %v3976_v8, 4 }
 0x14d   : > { %14530 = vmatmul.mubr.bf16.gmra.mrb[8].mxu0 %v13175_v9  ;;  %v3405_v9 = vsel %vm16385_vm10, %v16932_v25, %v16897_v56  ;;  %v3429_v56 = vsel %vm16385_vm10, %v16975_v14, %v16953_v17  ;;  %v3476_v25 = vrot.slane %v3474_v24, 5  ;;  %v13198_v24 = vrot.slane %v3876_v35, 9 }
 0x14e   : > { %14533 = vmatprep.mubr.bf16.mxu0 %v13176_v20  ;;  %14562 = vmatpush3.bf16.msra.mxu0 %v15807_v5  ;;  %v3333_v5 = vsel %vm16385_vm10, %v16878_v60, %v16874_v42  ;;  %v13180_v42 = vcombine.low %v3347_v21, %v3357_v19  ;;  %v3448_v60 = vrot.slane %v3447_v46, 4  ;;  %v3461_v7 = vor.u32 %v3460_v27, %v3457_v34  ;;  %v3880_v27 = vld [vmem:[#allocation2 + $0x4c] sm:$0xf] }
 0x14f   : > { %14563 = vmatprep.subr.bf16.mxu0 %v15808_v10  ;;  %v13179_v40 = vcombine.low %v3323_v31, %v3333_v5  ;;  %v13182_v18 = vcombine.low %v3395_v62, %v3405_v9  ;;  %v3471_v20 = vor.u32 %v3470_v58, %v3466_v13  ;;  %v13183_v11 = vcombine.low %v3419_v47, %v3429_v56  ;;  %v3883_v9 = vld [vmem:[#allocation2 + $0x58] sm:$0xf] }
 0x150   : > { %v3462_v36 = vrot.slane %v3461_v7, 4  ;;  %v3453_v57 = vsel %vm16385_vm10, %v3448_v60, %v3452_v26  ;;  %v13196_v26 = vrot.slane %v3870_v2, 9  ;;  %v3983_v34 = vrot.slane %v3874_v22, 5  ;;  %v3890_v22 = vld [vmem:[#allocation2 + $0x74] sm:$0x1] }
 0x151   : > { %v3472_v59 = vrot.slane %v3471_v20, 4  ;;  %v13184_v4 = vcombine.low %v3443_v28, %v3453_v57  ;;  %v3980_v19 = vsel %vm16609_vm13, %v3978_v54, %v3979_v29  ;;  %v3990_v46 = vrot.slane %v3877_v41, 5  ;;  %v3886_v57 = vld [vmem:[#allocation2 + $0x64] sm:$0xf]  ;;  %v3892_v54 = vld [vmem:[#allocation2 + $0x7c] sm:$0xf] }
 0x152   : > { %14564 = vmatpush3.bf16.msra.mxu0 %v15808_v10  ;;  %v3864_v10 = vld [vmem:[#allocation2 + $0xc] sm:$0xe]  ;;  %v3467_v17 = vsel %vm16385_vm10, %v3462_v36, %v3466_v13  ;;  %v3977_v21 = vsel %vm16609_vm13, %v13196_v26, %v3976_v8  ;;  %v13197_v60 = vrot.slane %v3873_v12, 9  ;;  %v3985_v58 = vrot.slane %v3983_v34, 4  ;;  %v3881_v36 = vld [vmem:[#allocation2 + $0x50] sm:$0x1] }
 0x153   : > { %14565 = vmatprep.subr.bf16.mxu0 %v15809_v15  ;;  %v13194_v63 = vrot.slane %v3864_v10, 9  ;;  %v3477_v14 = vsel %vm16385_vm10, %v3472_v59, %v3476_v25  ;;  %v13228_v13 = vcombine.low %v3977_v21, %v3980_v19  ;;  %v3993_v62 = vrot.slane %v3878_v48, 5  ;;  %v3895_v12 = vld [vmem:[#allocation2 + $0x88] sm:$0xf]  ;;  %v3891_v19 = vld [vmem:[#allocation2 + $0x78] sm:$0xe] }
 0x154   : > { %v13185_v16 = vcombine.low %v3467_v17, %v3477_v14  ;;  %v3984_v10 = vsel %vm16609_vm13, %v13197_v60, %v3983_v34  ;;  %v3997_v7 = vrot.slane %v3880_v27, 5  ;;  %v4000_v28 = vrot.slane %v3881_v36, 5  ;;  %v3887_v17 = vld [vmem:[#allocation2 + $0x68] sm:$0x1]  ;;  %v3893_v48 = vld [vmem:[#allocation2 + $0x80] sm:$0x1] }
 0x155   : > { %14534 = vmatmul.mubr.bf16.gmra.mrb[12].mxu0 %v13177_v30  ;;  %v3963_v0 = vsel %vm16609_vm13, %v13194_v63, %v3962_v33  ;;  %v4004_v63 = vrot.slane %v3883_v9, 5  ;;  %v4011_v8 = vrot.slane %v3886_v57, 5  ;;  %v4014_v26 = vrot.slane %v3887_v17, 5  ;;  %v15817_v60 = vld [vmem:[%s19240_s1 + $0x1b0] sm:$0xff]   ;;  %v3894_v27 = vld [vmem:[#allocation2 + $0x84] sm:$0xe] }
 0x156   : > { %14537 = vmatprep.mubr.bf16.mxu0 %v13178_v53  ;;  %14566 = vmatpush3.bf16.msra.mxu0 %v15809_v15  ;;  %v3964_v15 = vrot.slane %v3962_v33, 4  ;;  %v3971_v53 = vrot.slane %v3969_v1, 4  ;;  %v3992_v33 = vrot.slane %v3990_v46, 4  ;;  %v3999_v25 = vrot.slane %v3997_v7, 4 }
 0x157   : > { %14567 = vmatprep.subr.bf16.mxu0 %v15810_v52  ;;  %v4006_v38 = vrot.slane %v4004_v63, 4  ;;  %v13204_v9 = vrot.slane %v3894_v27, 9 }
 0x158   : > { %v3966_v44 = vsel %vm16609_vm13, %v3964_v15, %v3965_v61  ;;  %v3973_v5 = vsel %vm16609_vm13, %v3971_v53, %v3972_v43  ;;  %v3994_v20 = vsel %vm16609_vm13, %v3992_v33, %v3993_v62  ;;  %v3882_v15 = vld [vmem:[#allocation2 + $0x54] sm:$0xe]  ;;  %v3884_v61 = vld [vmem:[#allocation2 + $0x5c] sm:$0x1]  ;;  %v13201_v53 = vrot.slane %v3885_v37, 9 }
 0x159   : > { %v13226_v30 = vcombine.low %v3963_v0, %v3966_v44  ;;  %v4007_v51 = vrot.slane %v3884_v61, 5  ;;  %v4013_v43 = vrot.slane %v4011_v8, 4  ;;  %v4028_v62 = vrot.slane %v3893_v48, 5  ;;  %v3911_v48 = vld [vmem:[#allocation2 + $0xc8] sm:$0x1] }
 0x15a   : > { %14568 = vmatpush3.bf16.msra.mxu0 %v15810_v52  ;;  %v13195_v52 = vrot.slane %v3867_v49, 9  ;;  %v3889_v49 = vld [vmem:[#allocation2 + $0x70] sm:$0xf]  ;;  %v4012_v34 = vsel %vm16609_vm13, %v13201_v53, %v4011_v8 }
 0x15b   : > { %14601 = vmatprep.subr.bf16.mxu0 %v17004_v50  ;;  %v4008_v44 = vsel %vm16609_vm13, %v4006_v38, %v4007_v51  ;;  %v4018_v2 = vrot.slane %v3889_v49, 5  ;;  %v4015_v21 = vsel %vm16609_vm13, %v4013_v43, %v4014_v26 }
 0x15c   : > { %v3970_v31 = vsel %vm16609_vm13, %v13195_v52, %v3969_v1  ;;  %v4001_v1 = vsel %vm16609_vm13, %v3999_v25, %v4000_v28  ;;  %v3902_v25 = vld [vmem:[#allocation2 + $0xa4] sm:$0x1] }
 0x15d   : > { %14538 = vmatmul.mubr.bf16.gmra.mrb[16].mxu0 %v13179_v40  ;;  %v3875_v40 = vld [vmem:[#allocation2 + $0x38] sm:$0x1]  ;;  %v4020_v41 = vrot.slane %v4018_v2, 4  ;;  %v4049_v17 = vrot.slane %v3902_v25, 5  ;;  %v17170_v25 = vld [vmem:[%s19240_s1 + $0x200] sm:$0xff]  }
 0x15e   : > { %14541 = vmatprep.mubr.bf16.mxu0 %v13180_v42  ;;  %v13227_v42 = vcombine.low %v3970_v31, %v3973_v5  ;;  %v3986_v3 = vrot.slane %v3875_v40, 5  ;;  %v4021_v31 = vrot.slane %v3890_v22, 5  ;;  %v15816_v5 = vld [vmem:[%s19240_s1 + $0x1a8] sm:$0xff]   ;;  %v4025_v40 = vrot.slane %v3892_v54, 5 }
 0x160   : > { %v3987_v6 = vsel %vm16609_vm13, %v3985_v58, %v3986_v3  ;;  %v4022_v35 = vsel %vm16609_vm13, %v4020_v41, %v4021_v31  ;;  %v13233_v58 = vcombine.low %v4012_v34, %v4015_v21  ;;  %v3898_v3 = vld [vmem:[#allocation2 + $0x94] sm:$0xf]  ;;  %v4027_v33 = vrot.slane %v4025_v40, 4 }
 0x161   : > { %v13229_v47 = vcombine.low %v3984_v10, %v3987_v6 }
 0x162   : > { %v4029_v36 = vsel %vm16609_vm13, %v4027_v33, %v4028_v62  ;;  %v15819_v33 = vld [vmem:[#allocation2 + $0x18] sm:$0xff]   ;;  %v15820_v62 = vld [vmem:[#allocation2 + $0x24] sm:$0xff]  }
 0x165   : > { %14542 = vmatmul.mubr.bf16.gmra.mrb[20].mxu0 %v13181_v39  ;;  %v3879_v39 = vld [vmem:[#allocation2 + $0x48] sm:$0xe] }
 0x166   : > { %14545 = vmatprep.mubr.bf16.mxu0 %v13182_v18  ;;  %v3991_v18 = vsel %vm16609_vm13, %v13198_v24, %v3990_v46  ;;  %v13199_v59 = vrot.slane %v3879_v39, 9  ;;  %v13203_v24 = vrot.slane %v3891_v19, 9  ;;  %v15818_v39 = vld [vmem:[%s19240_s1 + $0x1b8] sm:$0xff]  }
 0x167   : > { %v13230_v56 = vcombine.low %v3991_v18, %v3994_v20  ;;  %v3897_v18 = vld [vmem:[#allocation2 + $0x90] sm:$0xe] }
 0x168   : > { %v3998_v14 = vsel %vm16609_vm13, %v13199_v59, %v3997_v7  ;;  %v3901_v7 = vld [vmem:[#allocation2 + $0xa0] sm:$0xf]  ;;  %v4026_v20 = vsel %vm16609_vm13, %v13203_v24, %v4025_v40  ;;  %v3900_v59 = vld [vmem:[#allocation2 + $0x9c] sm:$0xe] }
 0x169   : > { %v13235_v28 = vcombine.low %v4026_v20, %v4029_v36  ;;  %v13206_v49 = vrot.slane %v3900_v59, 9  ;;  %v15833_v20 = vld [vmem:[%s19240_s1 + $0x1e0] sm:$0xff]   ;;  %v15826_v36 = vld [vmem:[#allocation2 + $0x54] sm:$0xff]  }
 0x16a   : > { %v4909_v59 = vld [vmem:[#allocation2 + $0x18] sm:$0xf] }
 0x16d   : > { %14546 = vmatmul.mubr.bf16.gmra.mrb[24].mxu0 %v13183_v11  ;;  %v13200_v11 = vrot.slane %v3882_v15, 9 }
 0x16e   : > { %14549 = vmatprep.mubr.bf16.mxu0 %v13184_v4  ;;  %v15814_v4 = vld [vmem:[%s19240_s1 + $0x198] sm:$0xff]  }
 0x16f   : > { %v4005_v0 = vsel %vm16609_vm13, %v13200_v11, %v4004_v63  ;;  %v4039_v63 = vrot.slane %v3898_v3, 5  ;;  %v13205_v11 = vrot.slane %v3897_v18, 9  ;;  %v15830_v18 = vld [vmem:[%s19240_s1 + $0x1d8] sm:$0xff]  }
 0x170   : > { %v13232_v52 = vcombine.low %v4005_v0, %v4008_v44  ;;  %v3905_v44 = vld [vmem:[#allocation2 + $0xb0] sm:$0x1] }
 0x171   : > { %v4041_v38 = vrot.slane %v4039_v63, 4  ;;  %v4040_v8 = vsel %vm16609_vm13, %v13205_v11, %v4039_v63  ;;  %v15836_v63 = vld [vmem:[%s19240_s1 + $0x1e8] sm:$0xff]   ;;  %v15834_v11 = vld [vmem:[#allocation2 + $0x90] sm:$0xff]  }
 0x175   : > { %14550 = vmatmul.mubr.bf16.gmra.mrb[28].mxu0 %v13185_v16  ;;  %v3888_v16 = vld [vmem:[#allocation2 + $0x6c] sm:$0xe] }
 0x176   : > { %14569 = vmatprep.mubr.bf16.mxu0 %v13226_v30  ;;  %v13231_v30 = vcombine.low %v3998_v14, %v4001_v1  ;;  %v13202_v29 = vrot.slane %v3888_v16, 9  ;;  %v3907_v14 = vld [vmem:[#allocation2 + $0xb8] sm:$0xf]  ;;  %v3903_v1 = vld [vmem:[#allocation2 + $0xa8] sm:$0xe] }
 0x177   : > { %v13207_v43 = vrot.slane %v3903_v1, 9 }
 0x178   : > { %v4019_v46 = vsel %vm16609_vm13, %v13202_v29, %v4018_v2  ;;  %v4056_v29 = vrot.slane %v3905_v44, 5 }
 0x17d   : > { %14570 = vmatmul.mubr.bf16.vlgmr.msra.gmra.mrb[0].mxu0 %v13227_v42  ;;  %v4032_v42 = vrot.slane %v3895_v12, 5  ;;  %v3910_v12 = vld [vmem:[#allocation2 + $0xc4] sm:$0xf] }
 0x17e   : > { %14602 = vmatpush3.bf16.msra.mxu0 %v17004_v50  ;;  %14573 = vmatprep.mubr.bf16.mxu0 %v13228_v13  ;;  %v15813_v50 = vld [vmem:[%s19240_s1 + $0x190] sm:$0xff]   ;;  %v3896_v13 = vld [vmem:[#allocation2 + $0x8c] sm:$0x1]  ;;  %v4067_v19 = vrot.slane %v3910_v12, 5 }
 0x17f   : > { %14603 = vmatprep.subr.bf16.mxu0 %v15812_v55  ;;  %v4034_v10 = vrot.slane %v4032_v42, 4  ;;  %v4035_v6 = vrot.slane %v3896_v13, 5  ;;  %v4033_v15 = vsel %vm16609_vm13, %v13204_v9, %v4032_v42  ;;  %v15822_v9 = vld [vmem:[#allocation2 + $0x30] sm:$0xff]  }
 0x180   : > { %v4069_v13 = vrot.slane %v4067_v19, 4 }
 0x181   : > { %v4036_v61 = vsel %vm16609_vm13, %v4034_v10, %v4035_v6  ;;  %v15824_v10 = vld [vmem:[%s19240_s1 + $0x1c8] sm:$0xff]   ;;  %v15827_v6 = vld [vmem:[%s19240_s1 + $0x1d0] sm:$0xff]  }
 0x182   : > { %14604 = vmatpush3.bf16.msra.mxu0 %v15812_v55  ;;  %v13234_v55 = vcombine.low %v4019_v46, %v4022_v35  ;;  %v13236_v57 = vcombine.low %v4033_v15, %v4036_v61  ;;  %v3909_v35 = vld [vmem:[#allocation2 + $0xc0] sm:$0xe]  ;;  %v15839_v15 = vld [vmem:[%s19240_s1 + $0x1f0] sm:$0xff]  }
 0x183   : > { %14605 = vmatprep.subr.bf16.mxu0 %v15813_v50  ;;  %v13209_v27 = vrot.slane %v3909_v35, 9  ;;  %v15829_v61 = vld [vmem:[#allocation2 + $0x6c] sm:$0xff]   ;;  %v4918_v35 = vld [vmem:[#allocation2 + $0x3c] sm:$0xf] }
 0x185   : > { %14574 = vmatmul.mubr.bf16.gmra.mrb[4].mxu0 %v13229_v47  ;;  %v4046_v47 = vrot.slane %v3901_v7, 5  ;;  %v4068_v3 = vsel %vm16609_vm13, %v13209_v27, %v4067_v19  ;;  %v15825_v7 = vld [vmem:[#allocation2 + $0x48] sm:$0xff]  }
 0x186   : > { %14577 = vmatprep.mubr.bf16.mxu0 %v13230_v56  ;;  %14606 = vmatpush3.bf16.msra.mxu0 %v15813_v50  ;;  %v3899_v50 = vld [vmem:[#allocation2 + $0x98] sm:$0x1]  ;;  %v15821_v56 = vld [vmem:[%s19240_s1 + $0x1c0] sm:$0xff]  }
 0x187   : > { %14607 = vmatprep.subr.bf16.mxu0 %v15814_v4  ;;  %v4042_v51 = vrot.slane %v3899_v50, 5  ;;  %v4048_v37 = vrot.slane %v4046_v47, 4  ;;  %v4047_v16 = vsel %vm16609_vm13, %v13206_v49, %v4046_v47  ;;  %v15828_v50 = vld [vmem:[#allocation2 + $0x60] sm:$0xff]   ;;  %v15831_v47 = vld [vmem:[#allocation2 + $0x78] sm:$0xff]  }
 0x189   : > { %v4043_v0 = vsel %vm16609_vm13, %v4041_v38, %v4042_v51  ;;  %v4050_v22 = vsel %vm16609_vm13, %v4048_v37, %v4049_v17  ;;  %v4958_v38 = vshrl.u32 %v4909_v59, 16  ;;  %v4961_v51 = vshll.u32 %v4909_v59, 16  ;;  %v4913_v17 = vld [vmem:[#allocation2 + $0x28] sm:$0xf] }
 0x18a   : > { %14608 = vmatpush3.bf16.msra.mxu0 %v15814_v4  ;;  %v3904_v4 = vld [vmem:[#allocation2 + $0xac] sm:$0xf]  ;;  %v13237_v53 = vcombine.low %v4040_v8, %v4043_v0  ;;  %v13238_v26 = vcombine.low %v4047_v16, %v4050_v22  ;;  %v4995_v16 = vshrl.u32 %v4913_v17, 16  ;;  %v4915_v22 = vld [vmem:[#allocation2 + $0x30] sm:$0xf] }
 0x18b   : > { %14609 = vmatprep.subr.bf16.mxu0 %v15815_v32  ;;  %v4053_v2 = vrot.slane %v3904_v4, 5  ;;  %v4912_v4 = vld [vmem:[#allocation2 + $0x24] sm:$0xf]  ;;  %v4960_v8 = vrot.slane %v4958_v38, 4  ;;  %v4963_v0 = vrot.slane %v4961_v51, 5 }
 0x18c   : > { %v4985_v1 = vshll.u32 %v4912_v4, 16  ;;  %v4997_v19 = vrot.slane %v4995_v16, 4 }
 0x18d   : > { %14578 = vmatmul.mubr.bf16.gmra.mrb[8].mxu0 %v13231_v30  ;;  %v4060_v30 = vrot.slane %v3907_v14, 5  ;;  %v4055_v54 = vrot.slane %v4053_v2, 4  ;;  %v4054_v34 = vsel %vm16609_vm13, %v13207_v43, %v4053_v2  ;;  %v4982_v14 = vshrl.u32 %v4912_v4, 16 }
 0x18e   : > { %14581 = vmatprep.mubr.bf16.mxu0 %v13232_v52  ;;  %14610 = vmatpush3.bf16.msra.mxu0 %v15815_v32  ;;  %v3906_v32 = vld [vmem:[#allocation2 + $0xb4] sm:$0xe]  ;;  %v3908_v52 = vld [vmem:[#allocation2 + $0xbc] sm:$0x1]  ;;  %v4987_v43 = vrot.slane %v4985_v1, 5 }
 0x18f   : > { %14611 = vmatprep.subr.bf16.mxu0 %v15816_v5  ;;  %v13208_v41 = vrot.slane %v3906_v32, 9  ;;  %v4062_v31 = vrot.slane %v4060_v30, 4  ;;  %v4057_v21 = vsel %vm16609_vm13, %v4055_v54, %v4056_v29  ;;  %v4991_v32 = vshll.u32 %v4913_v17, 16  ;;  %v15837_v54 = vld [vmem:[#allocation2 + $0xa8] sm:$0xff]   ;;  %v4925_v1 = vld [vmem:[#allocation2 + $0x58] sm:$0xf] }
 0x190   : > { %v13239_v42 = vcombine.low %v4054_v34, %v4057_v21  ;;  %v4964_v29 = vor.u32 %v4963_v0, %v4960_v8  ;;  %v4914_v34 = vld [vmem:[#allocation2 + $0x2c] sm:$0x1]  ;;  %v4920_v8 = vld [vmem:[#allocation2 + $0x44] sm:$0x1] }
 0x191   : > { %v4061_v40 = vsel %vm16609_vm13, %v13208_v41, %v4060_v30  ;;  %v4911_v30 = vld [vmem:[#allocation2 + $0x20] sm:$0x1]  ;;  %v5006_v41 = vshrl.u32 %v4915_v22, 16  ;;  %v17176_v21 = vrot.slane %v4991_v32, 5  ;;  %v5001_v27 = vshll.u32 %v4914_v34, 16 }
 0x192   : > { %14612 = vmatpush3.bf16.msra.mxu0 %v15816_v5  ;;  %v4063_v5 = vrot.slane %v3908_v52, 5  ;;  %v15835_v52 = vld [vmem:[#allocation2 + $0x9c] sm:$0xff]   ;;  %v4977_v12 = vshll.u32 %v4911_v30, 16 }
 0x193   : > { %14613 = vmatprep.subr.bf16.mxu0 %v15817_v60 }
 0x194   : > { %v4064_v46 = vsel %vm16609_vm13, %v4062_v31, %v4063_v5  ;;  %v5009_v31 = vshll.u32 %v4915_v22, 16  ;;  %v4923_v22 = vld [vmem:[#allocation2 + $0x50] sm:$0x1] }
 0x195   : > { %14582 = vmatmul.mubr.bf16.gmra.mrb[12].mxu0 %v13233_v58  ;;  %v4070_v58 = vrot.slane %v3911_v48, 5 }
 0x196   : > { %14585 = vmatprep.mubr.bf16.mxu0 %v13234_v55  ;;  %14614 = vmatpush3.bf16.msra.mxu0 %v15817_v60  ;;  %v13240_v60 = vcombine.low %v4061_v40, %v4064_v46 }
 0x197   : > { %14615 = vmatprep.subr.bf16.mxu0 %v15818_v39  ;;  %v4071_v55 = vsel %vm16609_vm13, %v4069_v13, %v4070_v58  ;;  %v5008_v13 = vrot.slane %v5006_v41, 4  ;;  %v5011_v58 = vrot.slane %v5009_v31, 5  ;;  %v4927_v41 = vld [vmem:[#allocation2 + $0x60] sm:$0xf]  ;;  %v4928_v31 = vld [vmem:[#allocation2 + $0x64] sm:$0xf] }
 0x198   : > { %v13241_v24 = vcombine.low %v4068_v3, %v4071_v55  ;;  %v4921_v3 = vld [vmem:[#allocation2 + $0x48] sm:$0xf] }
 0x19a   : > { %14616 = vmatpush3.bf16.msra.mxu0 %v15818_v39  ;;  %v15823_v39 = vld [vmem:[#allocation2 + $0x3c] sm:$0xff]  }
 0x19b   : > { %14649 = vmatprep.subr.bf16.mxu0 %v15821_v56 }
 0x19d   : > { %14586 = vmatmul.mubr.bf16.gmra.mrb[16].mxu0 %v13235_v28  ;;  %v4910_v28 = vld [vmem:[#allocation2 + $0x1c] sm:$0xf] }
 0x19e   : > { %14589 = vmatprep.mubr.bf16.mxu0 %v13236_v57  ;;  %v15832_v57 = vld [vmem:[#allocation2 + $0x84] sm:$0xff]   ;;  %v4967_v49 = vshll.u32 %v4910_v28, 16  ;;  %v4971_v37 = vshrl.u32 %v4910_v28, 16 }
 0x1a0   : > { %v17173_v44 = vrot.slane %v4967_v49, 5  ;;  %v4973_v2 = vrot.slane %v4971_v37, 4 }
 0x1a2   : > { %v4974_v5 = vor.u32 %v4973_v2, %v17173_v44 }
 0x1a4   : > { %v4975_v55 = vrot.slane %v4974_v5, 4 }
 0x1a5   : > { %14590 = vmatmul.mubr.bf16.gmra.mrb[20].mxu0 %v13237_v53  ;;  %v4984_v53 = vrot.slane %v4982_v14, 4 }
 0x1a6   : > { %14593 = vmatprep.mubr.bf16.mxu0 %v13238_v26  ;;  %v4916_v26 = vld [vmem:[#allocation2 + $0x34] sm:$0xf] }
 0x1a7   : > { %v5015_v40 = vshll.u32 %v4916_v26, 16  ;;  %v5019_v46 = vshrl.u32 %v4916_v26, 16  ;;  %v4988_v48 = vor.u32 %v4987_v43, %v4984_v53 }
 0x1ad   : > { %14594 = vmatmul.mubr.bf16.gmra.mrb[24].mxu0 %v13239_v42  ;;  %v4919_v42 = vld [vmem:[#allocation2 + $0x40] sm:$0xf] }
 0x1ae   : > { %14597 = vmatprep.mubr.bf16.mxu0 %v13240_v60  ;;  %v4965_v60 = vrot.slane %v4964_v29, 4  ;;  %v5091_v29 = vshrl.u32 %v4925_v1, 16 }
 0x1b5   : > { %14598 = vmatmul.mubr.bf16.gmra.mrb[28].mxu0 %v13241_v24  ;;  %v4979_v24 = vrot.slane %v4977_v12, 5 }
 0x1b6   : > { %14617 = vmatprep.mubr.bf16.mxu0 %v15819_v33  ;;  %v4998_v33 = vor.u32 %v4997_v19, %v17176_v21  ;;  %v5049_v19 = vshll.u32 %v4920_v8, 16 }
 0x1b7   : > { %v4980_v38 = vsel %vm16385_vm10, %v4975_v55, %v4979_v24 }
 0x1b8   : > { %v17190_v51 = vrot.slane %v4998_v33, 4  ;;  %v5093_v33 = vrot.slane %v5091_v29, 4  ;;  %v4936_v29 = vld [vmem:[#allocation2 + $0x84] sm:$0xf] }
 0x1bd   : > { %14618 = vmatmul.mubr.bf16.vlgmr.msra.gmra.mrb[0].mxu0 %v15820_v62  ;;  %v5030_v62 = vshrl.u32 %v4918_v35, 16 }
 0x1be   : > { %14650 = vmatpush3.bf16.msra.mxu0 %v15821_v56  ;;  %14621 = vmatprep.mubr.bf16.mxu0 %v15822_v9  ;;  %v15842_v56 = vld [vmem:[%s19240_s1 + $0x1f8] sm:$0xff]   ;;  %v4922_v9 = vld [vmem:[#allocation2 + $0x4c] sm:$0xf] }
 0x1bf   : > { %14651 = vmatprep.subr.bf16.mxu0 %v15824_v10  ;;  %v5063_v59 = vshll.u32 %v4922_v9, 16  ;;  %v5067_v28 = vshrl.u32 %v4922_v9, 16  ;;  %v5032_v37 = vrot.slane %v5030_v62, 4 }
 0x1c1   : > { %v17195_v30 = vrot.slane %v5063_v59, 5 }
 0x1c2   : > { %14652 = vmatpush3.bf16.msra.mxu0 %v15824_v10  ;;  %v4917_v10 = vld [vmem:[#allocation2 + $0x38] sm:$0x1] }
 0x1c3   : > { %14653 = vmatprep.subr.bf16.mxu0 %v15827_v6  ;;  %v5025_v4 = vshll.u32 %v4917_v10, 16 }
 0x1c5   : > { %14622 = vmatmul.mubr.bf16.gmra.mrb[4].mxu0 %v15823_v39  ;;  %v5021_v39 = vrot.slane %v5019_v46, 4  ;;  %v5027_v12 = vrot.slane %v5025_v4, 5 }
 0x1c6   : > { %14625 = vmatprep.mubr.bf16.mxu0 %v15825_v7  ;;  %14654 = vmatpush3.bf16.msra.mxu0 %v15827_v6  ;;  %v17179_v6 = vrot.slane %v5015_v40, 5  ;;  %v5033_v7 = vshll.u32 %v4918_v35, 16  ;;  %v15841_v40 = vld [vmem:[#allocation2 + $0xcc] sm:$0xff]  }
 0x1c7   : > { %14655 = vmatprep.subr.bf16.mxu0 %v15830_v18 }
 0x1c8   : > { %v5022_v49 = vor.u32 %v5021_v39, %v17179_v6  ;;  %v5035_v17 = vrot.slane %v5033_v7, 5  ;;  %v17214_v39 = vrot.slane %v5049_v19, 5 }
 0x1ca   : > { %14656 = vmatpush3.bf16.msra.mxu0 %v15830_v18  ;;  %v5039_v18 = vshll.u32 %v4919_v42, 16  ;;  %v5023_v5 = vrot.slane %v5022_v49, 4  ;;  %v5036_v34 = vor.u32 %v5035_v17, %v5032_v37 }
 0x1cb   : > { %14657 = vmatprep.subr.bf16.mxu0 %v15833_v20 }
 0x1cc   : > { %v17193_v14 = vrot.slane %v5039_v18, 5  ;;  %v17212_v10 = vrot.slane %v5036_v34, 4  ;;  %v5028_v7 = vsel %vm16385_vm10, %v5023_v5, %v5027_v12  ;;  %v4937_v34 = vld [vmem:[#allocation2 + $0x88] sm:$0xf] }
 0x1cd   : > { %14626 = vmatmul.mubr.bf16.gmra.mrb[8].mxu0 %v15826_v36  ;;  %v17181_v36 = vrot.slane %v4988_v48, 4  ;;  %v5073_v48 = vshll.u32 %v4923_v22, 16 }
 0x1ce   : > { %14629 = vmatprep.mubr.bf16.mxu0 %v15828_v50  ;;  %14658 = vmatpush3.bf16.msra.mxu0 %v15833_v20  ;;  %v15838_v20 = vld [vmem:[#allocation2 + $0xb4] sm:$0xff]   ;;  %v5043_v50 = vshrl.u32 %v4919_v42, 16  ;;  %v5042_v37 = vsel %vm16385_vm10, %v17212_v10, %v17193_v14 }
 0x1cf   : > { %14659 = vmatprep.subr.bf16.mxu0 %v15836_v63  ;;  %v4994_v26 = vsel %vm16385_vm10, %v17181_v36, %v17176_v21 }
 0x1d0   : > { %v5045_v0 = vrot.slane %v5043_v50, 4  ;;  %v4930_v50 = vld [vmem:[#allocation2 + $0x6c] sm:$0xf] }
 0x1d1   : > { %v5126_v4 = vshrl.u32 %v4930_v50, 16  ;;  %v5129_v49 = vshll.u32 %v4930_v50, 16 }
 0x1d2   : > { %14660 = vmatpush3.bf16.msra.mxu0 %v15836_v63  ;;  %v5054_v63 = vshrl.u32 %v4921_v3, 16  ;;  %v5046_v46 = vor.u32 %v5045_v0, %v17193_v14  ;;  %v4933_v0 = vld [vmem:[#allocation2 + $0x78] sm:$0xf] }
 0x1d3   : > { %14661 = vmatprep.subr.bf16.mxu0 %v15839_v15  ;;  %v5128_v19 = vrot.slane %v5126_v4, 4 }
 0x1d4   : > { %v5056_v2 = vrot.slane %v5054_v63, 4  ;;  %v17218_v18 = vrot.slane %v5046_v46, 4 }
 0x1d5   : > { %14630 = vmatmul.mubr.bf16.gmra.mrb[12].mxu0 %v15829_v61  ;;  %v15840_v61 = vld [vmem:[#allocation2 + $0xc0] sm:$0xff]  }
 0x1d6   : > { %14633 = vmatprep.mubr.bf16.mxu0 %v15831_v47  ;;  %14662 = vmatpush3.bf16.msra.mxu0 %v15839_v15  ;;  %v5057_v15 = vshll.u32 %v4921_v3, 16  ;;  %v17183_v47 = vrot.slane %v5001_v27, 5  ;;  %v5102_v27 = vshrl.u32 %v4927_v41, 16  ;;  %v5115_v3 = vshrl.u32 %v4928_v31, 16 }
 0x1d7   : > { %14663 = vmatprep.subr.bf16.mxu0 %v15842_v56  ;;  %v5052_v17 = vsel %vm16385_vm10, %v17218_v18, %v17214_v39  ;;  %v4935_v18 = vld [vmem:[#allocation2 + $0x80] sm:$0x1] }
 0x1d8   : > { %v5059_v32 = vrot.slane %v5057_v15, 5  ;;  %v5004_v62 = vsel %vm16385_vm10, %v17190_v51, %v17183_v47  ;;  %v5104_v63 = vrot.slane %v5102_v27, 4  ;;  %v4931_v47 = vld [vmem:[#allocation2 + $0x70] sm:$0xf] }
 0x1d9   : > { %v5139_v8 = vshrl.u32 %v4931_v47, 16  ;;  %v15845_v27 = vld [vmem:[%s19240_s1 + $0x210] sm:$0xff]  }
 0x1da   : > { %14664 = vmatpush3.bf16.msra.mxu0 %v15842_v56  ;;  %v5012_v56 = vor.u32 %v5011_v58, %v5008_v13  ;;  %v5060_v35 = vor.u32 %v5059_v32, %v5056_v2  ;;  %v5105_v13 = vshll.u32 %v4927_v41, 16  ;;  %v5111_v58 = vshll.u32 %v4928_v31, 16  ;;  %v4934_v2 = vld [vmem:[#allocation2 + $0x7c] sm:$0xf]  ;;  %v15844_v32 = vld [vmem:[%s19240_s1 + $0x208] sm:$0xff]  }
 0x1db   : > { %14697 = vmatprep.subr.bf16.mxu0 %v17170_v25  ;;  %v5150_v41 = vshrl.u32 %v4933_v0, 16  ;;  %v5153_v31 = vshll.u32 %v4933_v0, 16  ;;  %v5159_v5 = vshll.u32 %v4934_v2, 16  ;;  %v5163_v12 = vshrl.u32 %v4934_v2, 16 }
 0x1dc   : > { %v5107_v15 = vrot.slane %v5105_v13, 5  ;;  %v5174_v13 = vshrl.u32 %v4936_v29, 16 }
 0x1dd   : > { %14634 = vmatmul.mubr.bf16.gmra.mrb[16].mxu0 %v15832_v57  ;;  %v4924_v57 = vld [vmem:[#allocation2 + $0x54] sm:$0xf] }
 0x1de   : > { %14637 = vmatprep.mubr.bf16.mxu0 %v15834_v11  ;;  %v4970_v11 = vsel %vm16385_vm10, %v4965_v60, %v17173_v44  ;;  %v5078_v16 = vshrl.u32 %v4924_v57, 16  ;;  %v5013_v44 = vrot.slane %v5012_v56, 4  ;;  %v5081_v53 = vshll.u32 %v4924_v57, 16  ;;  %v4926_v60 = vld [vmem:[#allocation2 + $0x5c] sm:$0x1] }
 0x1df   : > { %v13306_v43 = vcombine.low %v4970_v11, %v4980_v38  ;;  %v5097_v36 = vshll.u32 %v4926_v60, 16  ;;  %v5061_v56 = vrot.slane %v5060_v35, 4  ;;  %v4929_v11 = vld [vmem:[#allocation2 + $0x68] sm:$0x1]  ;;  %v13307_v38 = vcombine.low %v4994_v26, %v5004_v62 }
 0x1e0   : > { %v5080_v42 = vrot.slane %v5078_v16, 4  ;;  %v5083_v55 = vrot.slane %v5081_v53, 5  ;;  %v5018_v9 = vsel %vm16385_vm10, %v5013_v44, %v17179_v6  ;;  %v5117_v6 = vrot.slane %v5115_v3, 4 }
 0x1e1   : > { %v13308_v51 = vcombine.low %v5018_v9, %v5028_v7  ;;  %v17236_v16 = vrot.slane %v5097_v36, 5  ;;  %v5108_v44 = vor.u32 %v5107_v15, %v5104_v63  ;;  %v5066_v14 = vsel %vm16385_vm10, %v5061_v56, %v17195_v30  ;;  %v15846_v15 = vld [vmem:[%s19240_s1 + $0x218] sm:$0xff]  }
 0x1e2   : > { %v5183_v3 = vshll.u32 %v4937_v34, 16  ;;  %v17253_v62 = vrot.slane %v5159_v5, 5  ;;  %v5165_v9 = vrot.slane %v5163_v12, 4  ;;  %v4943_v5 = vld [vmem:[#allocation2 + $0xa0] sm:$0xf] }
 0x1e3   : > { %v5109_v35 = vrot.slane %v5108_v44, 4  ;;  %v15847_v44 = vld [vmem:[%s19240_s1 + $0x220] sm:$0xff]   ;;  %v4945_v12 = vld [vmem:[#allocation2 + $0xa8] sm:$0xf] }
 0x1e5   : > { %14638 = vmatmul.mubr.bf16.gmra.mrb[20].mxu0 %v15835_v52  ;;  %v5069_v52 = vrot.slane %v5067_v28, 4  ;;  %v5084_v28 = vor.u32 %v5083_v55, %v5080_v42  ;;  %v5152_v55 = vrot.slane %v5150_v41, 4 }
 0x1e6   : > { %14641 = vmatprep.mubr.bf16.mxu0 %v15837_v54  ;;  %v5087_v54 = vshll.u32 %v4925_v1, 16  ;;  %v5135_v1 = vshll.u32 %v4931_v47, 16  ;;  %v5176_v47 = vrot.slane %v5174_v13, 4  ;;  %v5231_v13 = vshll.u32 %v4943_v5, 16 }
 0x1e7   : > { %v5070_v21 = vor.u32 %v5069_v52, %v17195_v30  ;;  %v5121_v52 = vshll.u32 %v4929_v11, 16  ;;  %v5141_v30 = vrot.slane %v5139_v8, 4 }
 0x1e8   : > { %v17203_v24 = vrot.slane %v5087_v54, 5  ;;  %v4932_v54 = vld [vmem:[#allocation2 + $0x74] sm:$0x1]  ;;  %v17247_v46 = vrot.slane %v5135_v1, 5 }
 0x1e9   : > { %v5071_v59 = vrot.slane %v5070_v21, 4  ;;  %v5123_v42 = vrot.slane %v5121_v52, 5  ;;  %v5145_v60 = vshll.u32 %v4932_v54, 16  ;;  %v5187_v21 = vshrl.u32 %v4937_v34, 16 }
 0x1ea   : > { %v5094_v57 = vor.u32 %v5093_v33, %v17203_v24  ;;  %v5155_v33 = vrot.slane %v5153_v31, 5  ;;  %v5142_v7 = vor.u32 %v5141_v30, %v17247_v46 }
 0x1eb   : > { %v17266_v63 = vrot.slane %v5145_v60, 5 }
 0x1ec   : > { %v5095_v26 = vrot.slane %v5094_v57, 4  ;;  %v5156_v11 = vor.u32 %v5155_v33, %v5152_v55 }
 0x1ed   : > { %14642 = vmatmul.mubr.bf16.gmra.mrb[24].mxu0 %v15838_v20  ;;  %v17220_v20 = vrot.slane %v5073_v48, 5 }
 0x1ee   : > { %14645 = vmatprep.mubr.bf16.mxu0 %v15840_v61  ;;  %v17222_v61 = vrot.slane %v5111_v58, 5  ;;  %v5177_v58 = vshll.u32 %v4936_v29, 16  ;;  %v5100_v36 = vsel %vm16385_vm10, %v5095_v26, %v17236_v16  ;;  %v4941_v26 = vld [vmem:[#allocation2 + $0x98] sm:$0x1] }
 0x1ef   : > { %v5076_v53 = vsel %vm16385_vm10, %v5071_v59, %v17220_v20  ;;  %v17271_v59 = vrot.slane %v5183_v3, 5  ;;  %v5246_v3 = vshrl.u32 %v4945_v12, 16 }
 0x1f0   : > { %v5118_v22 = vor.u32 %v5117_v6, %v17222_v61  ;;  %v13310_v10 = vcombine.low %v5066_v14, %v5076_v53  ;;  %v5114_v50 = vsel %vm16385_vm10, %v5109_v35, %v17222_v61  ;;  %v4939_v6 = vld [vmem:[#allocation2 + $0x90] sm:$0xf]  ;;  %v5179_v56 = vrot.slane %v5177_v58, 5  ;;  %v4946_v35 = vld [vmem:[#allocation2 + $0xac] sm:$0xf] }
 0x1f1   : > { %v5166_v61 = vor.u32 %v5165_v9, %v17253_v62  ;;  %v5157_v14 = vrot.slane %v5156_v11, 4  ;;  %v5235_v58 = vshrl.u32 %v4943_v5, 16  ;;  %v5255_v9 = vshll.u32 %v4946_v35, 16 }
 0x1f2   : > { %v5119_v48 = vrot.slane %v5118_v22, 4  ;;  %v5180_v2 = vor.u32 %v5179_v56, %v5176_v47  ;;  %v4942_v22 = vld [vmem:[#allocation2 + $0x9c] sm:$0xf]  ;;  %v5248_v47 = vrot.slane %v5246_v3, 4 }
 0x1f3   : > { %v5167_v53 = vrot.slane %v5166_v61, 4  ;;  %v5225_v30 = vshll.u32 %v4942_v22, 16  ;;  %v5162_v55 = vsel %vm16385_vm10, %v5157_v14, %v17253_v62  ;;  %v17313_v11 = vrot.slane %v5255_v9, 5  ;;  %v4948_v61 = vld [vmem:[#allocation2 + $0xb4] sm:$0xf] }
 0x1f4   : > { %v5124_v57 = vsel %vm16385_vm10, %v5119_v48, %v5123_v42  ;;  %v5181_v48 = vrot.slane %v5180_v2, 4 }
 0x1f5   : > { %14646 = vmatmul.mubr.bf16.gmra.mrb[28].mxu0 %v15841_v40  ;;  %v5131_v40 = vrot.slane %v5129_v49, 5  ;;  %v17278_v49 = vrot.slane %v5142_v7, 4  ;;  %v13312_v52 = vcombine.low %v5114_v50, %v5124_v57  ;;  %v4944_v50 = vld [vmem:[#allocation2 + $0xa4] sm:$0x1]  ;;  %v4947_v57 = vld [vmem:[#allocation2 + $0xb0] sm:$0x1] }
 0x1f6   : > { %14665 = vmatprep.mubr.bf16.mxu0 %v13306_v43  ;;  %v17245_v43 = vrot.slane %v5084_v28, 4  ;;  %v4940_v28 = vld [vmem:[#allocation2 + $0x94] sm:$0xf]  ;;  %v5265_v2 = vshll.u32 %v4947_v57, 16 }
 0x1f7   : > { %v5132_v39 = vor.u32 %v5131_v40, %v5128_v19  ;;  %v5207_v1 = vshll.u32 %v4940_v28, 16  ;;  %v5211_v8 = vshrl.u32 %v4940_v28, 16  ;;  %v5148_v29 = vsel %vm16385_vm10, %v17278_v49, %v17266_v63  ;;  %v15849_v63 = vld [vmem:[%s19240_s1 + $0x230] sm:$0xff]  }
 0x1f8   : > { %v5090_v20 = vsel %vm16385_vm10, %v17245_v43, %v17203_v24  ;;  %v5189_v24 = vrot.slane %v5187_v21, 4  ;;  %v5222_v40 = vshrl.u32 %v4942_v22, 16  ;;  %v5249_v21 = vshll.u32 %v4945_v12, 16 }
 0x1f9   : > { %v17276_v4 = vrot.slane %v5132_v39, 4  ;;  %v13311_v0 = vcombine.low %v5090_v20, %v5100_v36  ;;  %v17292_v34 = vrot.slane %v5207_v1, 5  ;;  %v5213_v19 = vrot.slane %v5211_v8, 4  ;;  %v15850_v1 = vld [vmem:[%s19240_s1 + $0x238] sm:$0xff]  }
 0x1fa   : > { %v5224_v7 = vrot.slane %v5222_v40, 4  ;;  %v5186_v20 = vsel %vm16385_vm10, %v5181_v48, %v17271_v59  ;;  %v5251_v56 = vrot.slane %v5249_v21, 5  ;;  %v5241_v49 = vshll.u32 %v4944_v50, 16 }
 0x1fb   : > { %v5138_v54 = vsel %vm16385_vm10, %v17276_v4, %v17247_v46  ;;  %v5217_v46 = vshll.u32 %v4941_v26, 16  ;;  %v5214_v39 = vor.u32 %v5213_v19, %v17292_v34 }
 0x1fd   : > { %14666 = vmatmul.mubr.bf16.vlgmr.msra.gmra.mrb[0].mxu0 %v13307_v38  ;;  %v5169_v38 = vshll.u32 %v4935_v18, 16  ;;  %v5227_v18 = vrot.slane %v5225_v30, 5  ;;  %v5219_v62 = vrot.slane %v5217_v46, 5  ;;  %v5267_v30 = vrot.slane %v5265_v2, 5 }
 0x1fe   : > { %14698 = vmatpush3.bf16.msra.mxu0 %v17170_v25  ;;  %14669 = vmatprep.mubr.bf16.mxu0 %v13308_v51  ;;  %v13309_v25 = vcombine.low %v5042_v37, %v5052_v17  ;;  %v4938_v51 = vld [vmem:[#allocation2 + $0x8c] sm:$0x1]  ;;  %v5198_v37 = vshrl.u32 %v4939_v6, 16  ;;  %v5201_v17 = vshll.u32 %v4939_v6, 16  ;;  %v5237_v6 = vrot.slane %v5235_v58, 4 }
 0x1ff   : > { %14699 = vmatprep.subr.bf16.mxu0 %v15844_v32  ;;  %v5193_v16 = vshll.u32 %v4938_v51, 16  ;;  %v5171_v43 = vrot.slane %v5169_v38, 5  ;;  %v5215_v51 = vrot.slane %v5214_v39, 4  ;;  %v5228_v4 = vor.u32 %v5227_v18, %v5224_v7  ;;  %v4953_v39 = vld [vmem:[#allocation2 + $0xc8] sm:$0x1] }
 0x200   : > { %v5200_v41 = vrot.slane %v5198_v37, 4  ;;  %v5203_v31 = vrot.slane %v5201_v17, 5  ;;  %v4949_v37 = vld [vmem:[#allocation2 + $0xb8] sm:$0xf] }
 0x201   : > { %v5195_v60 = vrot.slane %v5193_v16, 5  ;;  %v5172_v33 = vsel %vm16385_vm10, %v5167_v53, %v5171_v43  ;;  %v4951_v16 = vld [vmem:[#allocation2 + $0xc0] sm:$0xf]  ;;  %v5279_v14 = vshll.u32 %v4949_v37, 16  ;;  %v5283_v53 = vshrl.u32 %v4949_v37, 16 }
 0x202   : > { %14700 = vmatpush3.bf16.msra.mxu0 %v15844_v32  ;;  %v5190_v32 = vor.u32 %v5189_v24, %v17271_v59  ;;  %v13313_v24 = vcombine.low %v5138_v54, %v5148_v29  ;;  %v13314_v28 = vcombine.low %v5162_v55, %v5172_v33  ;;  %v5220_v26 = vsel %vm16385_vm10, %v5215_v51, %v5219_v62  ;;  %v4955_v33 = vld [vmem:[#allocation2 + $0xd0] sm:$0xf] }
 0x203   : > { %14701 = vmatprep.subr.bf16.mxu0 %v15845_v27  ;;  %v5229_v54 = vrot.slane %v5228_v4, 4  ;;  %v5243_v29 = vrot.slane %v5241_v49, 5  ;;  %v5281_v46 = vrot.slane %v5279_v14, 5 }
 0x204   : > { %v5191_v42 = vrot.slane %v5190_v32, 4  ;;  %v5270_v32 = vshrl.u32 %v4948_v61, 16 }
 0x205   : > { %14670 = vmatmul.mubr.bf16.gmra.mrb[4].mxu0 %v13309_v25  ;;  %v5259_v25 = vshrl.u32 %v4946_v35, 16 }
 0x206   : > { %14673 = vmatprep.mubr.bf16.mxu0 %v13310_v10  ;;  %14702 = vmatpush3.bf16.msra.mxu0 %v15845_v27  ;;  %v15848_v27 = vld [vmem:[%s19240_s1 + $0x228] sm:$0xff]   ;;  %v5204_v10 = vor.u32 %v5203_v31, %v5200_v41  ;;  %v5196_v36 = vsel %vm16385_vm10, %v5191_v42, %v5195_v60  ;;  %v5294_v41 = vshrl.u32 %v4951_v16, 16  ;;  %v5297_v31 = vshll.u32 %v4951_v16, 16  ;;  %v4950_v42 = vld [vmem:[#allocation2 + $0xbc] sm:$0x1] }
 0x207   : > { %14703 = vmatprep.subr.bf16.mxu0 %v15846_v15  ;;  %v5261_v59 = vrot.slane %v5259_v25, 4  ;;  %v13315_v17 = vcombine.low %v5186_v20, %v5196_v36  ;;  %v5272_v35 = vrot.slane %v5270_v32, 4 }
 0x208   : > { %v5205_v38 = vrot.slane %v5204_v10, 4  ;;  %v5296_v58 = vrot.slane %v5294_v41, 4  ;;  %v5299_v3 = vrot.slane %v5297_v31, 5  ;;  %v5289_v10 = vshll.u32 %v4950_v42, 16 }
 0x209   : > { %v5262_v22 = vor.u32 %v5261_v59, %v17313_v11 }
 0x20a   : > { %14704 = vmatpush3.bf16.msra.mxu0 %v15846_v15  ;;  %v17311_v15 = vrot.slane %v5231_v13, 5  ;;  %v5210_v43 = vsel %vm16385_vm10, %v5205_v38, %v17292_v34  ;;  %v5285_v34 = vrot.slane %v5283_v53, 4  ;;  %v4954_v13 = vld [vmem:[#allocation2 + $0xcc] sm:$0xf]  ;;  %v5727_v53 = vld [vmem:[#allocation2 + $0x18] sm:$0xe] }
 0x20b   : > { %14705 = vmatprep.subr.bf16.mxu0 %v15847_v44  ;;  %v5263_v48 = vrot.slane %v5262_v22, 4  ;;  %v5318_v62 = vshrl.u32 %v4954_v13, 16  ;;  %v5321_v50 = vshll.u32 %v4954_v13, 16 }
 0x20c   : > { %v5238_v8 = vor.u32 %v5237_v6, %v17311_v15  ;;  %v5234_v9 = vsel %vm16385_vm10, %v5229_v54, %v17311_v15  ;;  %v5286_v36 = vor.u32 %v5285_v34, %v5281_v46  ;;  %v5331_v15 = vshrl.u32 %v4955_v33, 16  ;;  %v5730_v34 = vld [vmem:[#allocation2 + $0x24] sm:$0xe] }
 0x20d   : > { %14674 = vmatmul.mubr.bf16.gmra.mrb[8].mxu0 %v13311_v0  ;;  %v5252_v0 = vor.u32 %v5251_v56, %v5248_v47  ;;  %v5268_v18 = vsel %vm16385_vm10, %v5263_v48, %v5267_v30  ;;  %v5300_v6 = vor.u32 %v5299_v3, %v5296_v58  ;;  %v5313_v56 = vshll.u32 %v4953_v39, 16  ;;  %v5734_v30 = vld [vmem:[#allocation2 + $0x34] sm:$0xf]  ;;  %v5733_v58 = vld [vmem:[#allocation2 + $0x30] sm:$0xe] }
 0x20e   : > { %14677 = vmatprep.mubr.bf16.mxu0 %v13312_v52  ;;  %14706 = vmatpush3.bf16.msra.mxu0 %v15847_v44  ;;  %v4952_v44 = vld [vmem:[#allocation2 + $0xc4] sm:$0xf]  ;;  %v5273_v52 = vshll.u32 %v4948_v61, 16  ;;  %v5239_v19 = vrot.slane %v5238_v8, 4  ;;  %v5287_v59 = vrot.slane %v5286_v36, 4  ;;  %v5291_v61 = vrot.slane %v5289_v10, 5 }
 0x20f   : > { %14707 = vmatprep.subr.bf16.mxu0 %v15848_v27  ;;  %v5303_v5 = vshll.u32 %v4952_v44, 16  ;;  %v5307_v12 = vshrl.u32 %v4952_v44, 16  ;;  %v5253_v40 = vrot.slane %v5252_v0, 4  ;;  %v5320_v38 = vrot.slane %v5318_v62, 4  ;;  %v5728_v8 = vld [vmem:[#allocation2 + $0x1c] sm:$0xf] }
 0x210   : > { %v5275_v60 = vrot.slane %v5273_v52, 5  ;;  %v5244_v25 = vsel %vm16385_vm10, %v5239_v19, %v5243_v29  ;;  %v5333_v4 = vrot.slane %v5331_v15, 4  ;;  %v5301_v49 = vrot.slane %v5300_v6, 4  ;;  %v5735_v3 = vld [vmem:[#allocation2 + $0x38] sm:$0x1] }
 0x211   : > { %v5305_v21 = vrot.slane %v5303_v5, 5  ;;  %v5309_v55 = vrot.slane %v5307_v12, 4  ;;  %v5258_v7 = vsel %vm16385_vm10, %v5253_v40, %v17313_v11  ;;  %v5323_v11 = vrot.slane %v5321_v50, 5  ;;  %v5731_v40 = vld [vmem:[#allocation2 + $0x28] sm:$0xf] }
 0x212   : > { %14708 = vmatpush3.bf16.msra.mxu0 %v15848_v27  ;;  %v13316_v27 = vcombine.low %v5210_v43, %v5220_v26  ;;  %v5276_v20 = vor.u32 %v5275_v60, %v5272_v35  ;;  %v5292_v2 = vsel %vm16385_vm10, %v5287_v59, %v5291_v61  ;;  %v5825_v14 = vrot.slane %v5728_v8, 5  ;;  %v5729_v43 = vld [vmem:[#allocation2 + $0x20] sm:$0x1]  ;;  %v5736_v6 = vld [vmem:[#allocation2 + $0x3c] sm:$0xe] }
 0x213   : > { %14709 = vmatprep.subr.bf16.mxu0 %v15849_v63  ;;  %v5310_v47 = vor.u32 %v5309_v55, %v5305_v21  ;;  %v5324_v32 = vor.u32 %v5323_v11, %v5320_v38  ;;  %v5306_v22 = vsel %vm16385_vm10, %v5301_v49, %v5305_v21  ;;  %v13330_v5 = vrot.slane %v5727_v53, 9 }
 0x214   : > { %v5277_v57 = vrot.slane %v5276_v20, 4  ;;  %v5827_v12 = vrot.slane %v5825_v14, 4  ;;  %v5828_v19 = vrot.slane %v5729_v43, 5  ;;  %v5832_v42 = vrot.slane %v5731_v40, 5  ;;  %v5740_v20 = vld [vmem:[#allocation2 + $0x4c] sm:$0xf] }
 0x215   : > { %14678 = vmatmul.mubr.bf16.gmra.mrb[12].mxu0 %v13313_v24  ;;  %v13317_v24 = vcombine.low %v5234_v9, %v5244_v25  ;;  %v5311_v37 = vrot.slane %v5310_v47, 4  ;;  %v5325_v29 = vrot.slane %v5324_v32, 4  ;;  %v5826_v60 = vsel %vm16609_vm13, %v13330_v5, %v5825_v14  ;;  %v5738_v47 = vld [vmem:[#allocation2 + $0x44] sm:$0x1]  ;;  %v5747_v14 = vld [vmem:[#allocation2 + $0x68] sm:$0x1] }
 0x216   : > { %14681 = vmatprep.mubr.bf16.mxu0 %v13314_v28  ;;  %14710 = vmatpush3.bf16.msra.mxu0 %v15849_v63  ;;  %v5327_v63 = vshll.u32 %v4955_v33, 16  ;;  %v13318_v28 = vcombine.low %v5258_v7, %v5268_v18  ;;  %v5282_v0 = vsel %vm16385_vm10, %v5277_v57, %v5281_v46  ;;  %v5829_v46 = vsel %vm16609_vm13, %v5827_v12, %v5828_v19  ;;  %v5737_v18 = vld [vmem:[#allocation2 + $0x40] sm:$0xf]  ;;  %v5749_v12 = vld [vmem:[#allocation2 + $0x70] sm:$0xf] }
 0x217   : > { %14711 = vmatprep.subr.bf16.mxu0 %v15850_v1  ;;  %v13319_v26 = vcombine.low %v5282_v0, %v5292_v2  ;;  %v5839_v13 = vrot.slane %v5734_v30, 5  ;;  %v13362_v55 = vcombine.low %v5826_v60, %v5829_v46  ;;  %v13331_v33 = vrot.slane %v5730_v34, 9  ;;  %v5752_v19 = vld [vmem:[#allocation2 + $0x7c] sm:$0xf]  ;;  %v5748_v60 = vld [vmem:[#allocation2 + $0x6c] sm:$0xe] }
 0x218   : > { %v5329_v51 = vrot.slane %v5327_v63, 5  ;;  %v5834_v9 = vrot.slane %v5832_v42, 4  ;;  %v13332_v10 = vrot.slane %v5733_v58, 9  ;;  %v5842_v7 = vrot.slane %v5735_v3, 5  ;;  %v5750_v46 = vld [vmem:[#allocation2 + $0x74] sm:$0x1] }
 0x219   : > { %v5841_v39 = vrot.slane %v5839_v13, 4  ;;  %v5833_v36 = vsel %vm16609_vm13, %v13331_v33, %v5832_v42  ;;  %v5846_v50 = vrot.slane %v5737_v18, 5  ;;  %v13333_v61 = vrot.slane %v5736_v6, 9 }
 0x21a   : > { %14712 = vmatpush3.bf16.msra.mxu0 %v15850_v1  ;;  %v4956_v1 = vld [vmem:[#allocation2 + $0xd4] sm:$0x1]  ;;  %v5334_v16 = vor.u32 %v5333_v4, %v5329_v51  ;;  %v5330_v35 = vsel %vm16385_vm10, %v5325_v29, %v5329_v51  ;;  %v5840_v63 = vsel %vm16609_vm13, %v13332_v10, %v5839_v13  ;;  %v5849_v11 = vrot.slane %v5738_v47, 5  ;;  %v5753_v13 = vld [vmem:[#allocation2 + $0x80] sm:$0x1] }
 0x21b   : > { %v5337_v44 = vshll.u32 %v4956_v1, 16  ;;  %v5843_v15 = vsel %vm16609_vm13, %v5841_v39, %v5842_v7  ;;  %v5848_v38 = vrot.slane %v5846_v50, 4  ;;  %v5847_v1 = vsel %vm16609_vm13, %v13333_v61, %v5846_v50  ;;  %v5755_v39 = vld [vmem:[#allocation2 + $0x88] sm:$0xf]  ;;  %v5758_v7 = vld [vmem:[#allocation2 + $0x94] sm:$0xf] }
 0x21c   : > { %v5335_v41 = vrot.slane %v5334_v16, 4  ;;  %v13364_v59 = vcombine.low %v5840_v63, %v5843_v15  ;;  %v5742_v16 = vld [vmem:[#allocation2 + $0x54] sm:$0xe]  ;;  %v5870_v5 = vrot.slane %v5747_v14, 5  ;;  %v5881_v34 = vrot.slane %v5752_v19, 5 }
 0x21d   : > { %14682 = vmatmul.mubr.bf16.gmra.mrb[16].mxu0 %v13315_v17  ;;  %v5315_v17 = vrot.slane %v5313_v56, 5  ;;  %v5339_v31 = vrot.slane %v5337_v44, 5  ;;  %v5853_v56 = vrot.slane %v5740_v20, 5  ;;  %v5850_v8 = vsel %vm16609_vm13, %v5848_v38, %v5849_v11  ;;  %v5744_v44 = vld [vmem:[#allocation2 + $0x5c] sm:$0x1] }
 0x21e   : > { %14685 = vmatprep.mubr.bf16.mxu0 %v13316_v27  ;;  %v5732_v27 = vld [vmem:[#allocation2 + $0x2c] sm:$0x1]  ;;  %v13365_v53 = vcombine.low %v5847_v1, %v5850_v8  ;;  %v5863_v29 = vrot.slane %v5744_v44, 5  ;;  %v5877_v33 = vrot.slane %v5750_v46, 5  ;;  %v5884_v10 = vrot.slane %v5753_v13, 5 }
 0x21f   : > { %v5316_v52 = vsel %vm16385_vm10, %v5311_v37, %v5315_v17  ;;  %v5340_v48 = vsel %vm16385_vm10, %v5335_v41, %v5339_v31  ;;  %v5835_v25 = vrot.slane %v5732_v27, 5  ;;  %v5855_v4 = vrot.slane %v5853_v56, 4  ;;  %v5743_v37 = vld [vmem:[#allocation2 + $0x58] sm:$0xf]  ;;  %v5746_v17 = vld [vmem:[#allocation2 + $0x64] sm:$0xf] }
 0x220   : > { %v13320_v54 = vcombine.low %v5306_v22, %v5316_v52  ;;  %v13321_v21 = vcombine.low %v5330_v35, %v5340_v48  ;;  %v5860_v0 = vrot.slane %v5743_v37, 5  ;;  %v5867_v22 = vrot.slane %v5746_v17, 5  ;;  %v5745_v52 = vld [vmem:[#allocation2 + $0x60] sm:$0xe]  ;;  %v5751_v27 = vld [vmem:[#allocation2 + $0x78] sm:$0xe] }
 0x221   : > { %v5836_v62 = vsel %vm16609_vm13, %v5834_v9, %v5835_v25  ;;  %v13336_v41 = vrot.slane %v5745_v52, 9  ;;  %v5874_v35 = vrot.slane %v5749_v12, 5  ;;  %v13338_v9 = vrot.slane %v5751_v27, 9  ;;  %v5754_v63 = vld [vmem:[#allocation2 + $0x84] sm:$0xe] }
 0x222   : > { %v13363_v57 = vcombine.low %v5833_v36, %v5836_v62  ;;  %v5869_v31 = vrot.slane %v5867_v22, 4  ;;  %v5883_v25 = vrot.slane %v5881_v34, 4  ;;  %v5888_v36 = vrot.slane %v5755_v39, 5  ;;  %v5756_v15 = vld [vmem:[#allocation2 + $0x8c] sm:$0x1] }
 0x223   : > { %v5868_v48 = vsel %vm16609_vm13, %v13336_v41, %v5867_v22  ;;  %v5882_v62 = vsel %vm16609_vm13, %v13338_v9, %v5881_v34  ;;  %v5895_v6 = vrot.slane %v5758_v7, 5  ;;  %v5757_v47 = vld [vmem:[#allocation2 + $0x90] sm:$0xe]  ;;  %v5891_v61 = vrot.slane %v5756_v15, 5  ;;  %v5763_v44 = vld [vmem:[#allocation2 + $0xa8] sm:$0xe] }
 0x224   : > { %v5871_v42 = vsel %vm16609_vm13, %v5869_v31, %v5870_v5  ;;  %v5885_v50 = vsel %vm16609_vm13, %v5883_v25, %v5884_v10  ;;  %v13340_v38 = vrot.slane %v5757_v47, 9  ;;  %v5765_v22 = vld [vmem:[#allocation2 + $0xb0] sm:$0x1]  ;;  %v5767_v31 = vld [vmem:[#allocation2 + $0xb8] sm:$0xf] }
 0x225   : > { %14686 = vmatmul.mubr.bf16.gmra.mrb[20].mxu0 %v13317_v24  ;;  %v5739_v24 = vld [vmem:[#allocation2 + $0x48] sm:$0xe]  ;;  %v13368_v3 = vcombine.low %v5868_v48, %v5871_v42  ;;  %v5897_v11 = vrot.slane %v5895_v6, 4  ;;  %v5912_v41 = vrot.slane %v5765_v22, 5  ;;  %v5770_v5 = vld [vmem:[#allocation2 + $0xc4] sm:$0xf] }
 0x226   : > { %14689 = vmatprep.mubr.bf16.mxu0 %v13318_v28  ;;  %v5741_v28 = vld [vmem:[#allocation2 + $0x50] sm:$0x1]  ;;  %v13334_v51 = vrot.slane %v5739_v24, 9  ;;  %v5896_v8 = vsel %vm16609_vm13, %v13340_v38, %v5895_v6  ;;  %v5766_v48 = vld [vmem:[#allocation2 + $0xb4] sm:$0xe] }
 0x227   : > { %v5856_v49 = vrot.slane %v5741_v28, 5  ;;  %v13370_v28 = vcombine.low %v5882_v62, %v5885_v50  ;;  %v5768_v42 = vld [vmem:[#allocation2 + $0xbc] sm:$0x1]  ;;  %v5769_v46 = vld [vmem:[#allocation2 + $0xc0] sm:$0xe] }
 0x228   : > { %v5854_v2 = vsel %vm16609_vm13, %v13334_v51, %v5853_v56  ;;  %v5759_v56 = vld [vmem:[#allocation2 + $0x98] sm:$0x1]  ;;  %v5771_v34 = vld [vmem:[#allocation2 + $0xc8] sm:$0x1]  ;;  %v5773_v25 = vld [vmem:[#allocation2 + $0xd0] sm:$0xf] }
 0x229   : > { %v5857_v32 = vsel %vm16609_vm13, %v5855_v4, %v5856_v49  ;;  %v5898_v51 = vrot.slane %v5759_v56, 5  ;;  %v5761_v4 = vld [vmem:[#allocation2 + $0xa0] sm:$0xf]  ;;  %v5764_v49 = vld [vmem:[#allocation2 + $0xac] sm:$0xf]  ;;  %v5926_v9 = vrot.slane %v5771_v34, 5 }
 0x22a   : > { %v13366_v43 = vcombine.low %v5854_v2, %v5857_v32  ;;  %v5902_v1 = vrot.slane %v5761_v4, 5  ;;  %v5760_v2 = vld [vmem:[#allocation2 + $0x9c] sm:$0xe]  ;;  %v5762_v32 = vld [vmem:[#allocation2 + $0xa4] sm:$0x1]  ;;  %v5930_v7 = vrot.slane %v5773_v25, 5 }
 0x22b   : > { %v5774_v62 = vld [vmem:[#allocation2 + $0xd4] sm:$0x1] }
 0x22c   : > { %v5932_v6 = vrot.slane %v5930_v7, 4  ;;  %v5933_v47 = vrot.slane %v5774_v62, 5 }
 0x22d   : > { %14690 = vmatmul.mubr.bf16.gmra.mrb[24].mxu0 %v13319_v26  ;;  %v13335_v26 = vrot.slane %v5742_v16, 9  ;;  %v5909_v16 = vrot.slane %v5764_v49, 5 }
 0x22e   : > { %14693 = vmatprep.mubr.bf16.mxu0 %v13320_v54  ;;  %v5862_v54 = vrot.slane %v5860_v0, 4 }
 0x22f   : > { %v5861_v40 = vsel %vm16609_vm13, %v13335_v26, %v5860_v0  ;;  %v5899_v0 = vsel %vm16609_vm13, %v5897_v11, %v5898_v51  ;;  %v5905_v26 = vrot.slane %v5762_v32, 5 }
 0x230   : > { %v5864_v30 = vsel %vm16609_vm13, %v5862_v54, %v5863_v29  ;;  %v13372_v14 = vcombine.low %v5896_v8, %v5899_v0  ;;  %v13342_v54 = vrot.slane %v5763_v44, 9  ;;  %v5911_v29 = vrot.slane %v5909_v16, 4 }
 0x231   : > { %v13367_v58 = vcombine.low %v5861_v40, %v5864_v30  ;;  %v5916_v40 = vrot.slane %v5767_v31, 5 }
 0x232   : > { %v5910_v30 = vsel %vm16609_vm13, %v13342_v54, %v5909_v16 }
 0x235   : > { %14694 = vmatmul.mubr.bf16.gmra.mrb[28].mxu0 %v13321_v21  ;;  %v13337_v21 = vrot.slane %v5748_v60, 9  ;;  %v5923_v60 = vrot.slane %v5770_v5, 5 }
 0x236   : > { %14713 = vmatprep.mubr.bf16.mxu0 %v13362_v55  ;;  %v5876_v55 = vrot.slane %v5874_v35, 4 }
 0x237   : > { %v5875_v18 = vsel %vm16609_vm13, %v13337_v21, %v5874_v35  ;;  %v5913_v35 = vsel %vm16609_vm13, %v5911_v29, %v5912_v41  ;;  %v5919_v21 = vrot.slane %v5768_v42, 5 }
 0x238   : > { %v5878_v20 = vsel %vm16609_vm13, %v5876_v55, %v5877_v33  ;;  %v13374_v13 = vcombine.low %v5910_v30, %v5913_v35  ;;  %v13344_v55 = vrot.slane %v5769_v46, 9  ;;  %v5925_v33 = vrot.slane %v5923_v60, 4 }
 0x239   : > { %v13369_v24 = vcombine.low %v5875_v18, %v5878_v20 }
 0x23a   : > { %v5924_v18 = vsel %vm16609_vm13, %v13344_v55, %v5923_v60  ;;  %v5927_v20 = vsel %vm16609_vm13, %v5925_v33, %v5926_v9 }
 0x23d   : > { %14714 = vmatmul.mubr.bf16.vlgmr.msra.gmra.mrb[0].mxu0 %v13363_v57  ;;  %v13339_v57 = vrot.slane %v5754_v63, 9  ;;  %v13376_v63 = vcombine.low %v5924_v18, %v5927_v20 }
 0x23e   : > { %14717 = vmatprep.mubr.bf16.mxu0 %v13364_v59  ;;  %v5890_v59 = vrot.slane %v5888_v36, 4 }
 0x23f   : > { %v5889_v37 = vsel %vm16609_vm13, %v13339_v57, %v5888_v36  ;;  %v5772_v36 = vld [vmem:[#allocation2 + $0xcc] sm:$0xe] }
 0x240   : > { %v5892_v17 = vsel %vm16609_vm13, %v5890_v59, %v5891_v61  ;;  %v13345_v15 = vrot.slane %v5772_v36, 9 }
 0x241   : > { %v13371_v52 = vcombine.low %v5889_v37, %v5892_v17 }
 0x242   : > { %v5931_v56 = vsel %vm16609_vm13, %v13345_v15, %v5930_v7 }
 0x245   : > { %14718 = vmatmul.mubr.bf16.gmra.mrb[4].mxu0 %v13365_v53  ;;  %v13341_v53 = vrot.slane %v5760_v2, 9 }
 0x246   : > { %14721 = vmatprep.mubr.bf16.mxu0 %v13366_v43  ;;  %v5904_v43 = vrot.slane %v5902_v1, 4 }
 0x247   : > { %v5903_v12 = vsel %vm16609_vm13, %v13341_v53, %v5902_v1 }
 0x248   : > { %v5906_v19 = vsel %vm16609_vm13, %v5904_v43, %v5905_v26 }
 0x249   : > { %v13373_v27 = vcombine.low %v5903_v12, %v5906_v19 }
 0x24d   : > { %14722 = vmatmul.mubr.bf16.gmra.mrb[8].mxu0 %v13367_v58  ;;  %v13343_v58 = vrot.slane %v5766_v48, 9 }
 0x24e   : > { %14725 = vmatprep.mubr.bf16.mxu0 %v13368_v3  ;;  %v5918_v3 = vrot.slane %v5916_v40, 4 }
 0x24f   : > { %v5917_v10 = vsel %vm16609_vm13, %v13343_v58, %v5916_v40 }
 0x250   : > { %v5920_v39 = vsel %vm16609_vm13, %v5918_v3, %v5919_v21 }
 0x251   : > { %v13375_v50 = vcombine.low %v5917_v10, %v5920_v39 }
 0x255   : > { %14726 = vmatmul.mubr.bf16.gmra.mrb[12].mxu0 %v13369_v24  ;;  %v5934_v24 = vsel %vm16609_vm13, %v5932_v6, %v5933_v47 }
 0x256   : > { %14729 = vmatprep.mubr.bf16.mxu0 %v13370_v28  ;;  %v13377_v28 = vcombine.low %v5931_v56, %v5934_v24 }
 0x25d   : > { %14730 = vmatmul.mubr.bf16.gmra.mrb[16].mxu0 %v13371_v52 }
 0x25e   : > { %14733 = vmatprep.mubr.bf16.mxu0 %v13372_v14 }
 0x265   : > { %14734 = vmatmul.mubr.bf16.gmra.mrb[20].mxu0 %v13373_v27 }
 0x266   : > { %14737 = vmatprep.mubr.bf16.mxu0 %v13374_v13 }
 0x26d   : > { %14738 = vmatmul.mubr.bf16.gmra.mrb[24].mxu0 %v13375_v50 }
 0x26e   : > { %14741 = vmatprep.mubr.bf16.mxu0 %v13376_v63 }
 0x275   : > { %14742 = vmatmul.mubr.bf16.gmra.mrb[28].mxu0 %v13377_v28 }
 0x310   : > { %v17411_v57 = vpop.f32.mrb[0].mxu0 }
 0x311   : > { %v17413_v59 = vpop.f32.mrb[1].mxu0 }
 0x312   : > { %v17415_v61 = vpop.f32.mrb[2].mxu0 }
 0x313   : > { %v17417_v38 = vpop.f32.mrb[3].mxu0 }
 0x314   : > { %v6353_v11 = vadd.f32 %v17417_v38, %v17413_v59 }
 0x316   : > { %v6354_v51 = vadd.f32 %v17411_v57, %v6353_v11 }
 0x318   : > { %v17422_v4 = vpop.f32.mrb[4].mxu0  ;;  %v6355_v49 = vadd.f32 %v17415_v61, %v6354_v51 }
 0x319   : > { %v17425_v37 = vpop.f32.mrb[5].mxu0 }
 0x31a   : > { %v6356_v17 = vadd.f32 %v6355_v49, %v17425_v37  ;;  %v17428_v1 = vpop.f32.mrb[6].mxu0 }
 0x31b   : > { %v17430_v8 = vpop.f32.mrb[7].mxu0 }
 0x31c   : > { %v6357_v0 = vadd.f32 %v6356_v17, %v17430_v8 }
 0x31e   : > { %v6358_v2 = vadd.f32 %v17422_v4, %v6357_v0 }
 0x320   : > { %v17434_v32 = vpop.f32.mrb[8].mxu0  ;;  %v6359_v16 = vadd.f32 %v17428_v1, %v6358_v2 }
 0x321   : > { %v6130_v44 = vpop.f32.mrb[9].mxu0 }
 0x322   : > { %v6360_v22 = vadd.f32 %v6359_v16, %v6130_v44  ;;  %v17437_v52 = vpop.f32.mrb[10].mxu0 }
 0x323   : > { %v6133_v14 = vpop.f32.mrb[11].mxu0 }
 0x324   : > { %v6361_v53 = vadd.f32 %v6360_v22, %v6133_v14 }
 0x326   : > { %v6362_v43 = vadd.f32 %v17434_v32, %v6361_v53 }
 0x328   : > { %v14727_v26 = vpop.f32.mrb[12].mxu0  ;;  %v6363_v54 = vadd.f32 %v17437_v52, %v6362_v43 }
 0x329   : > { %v6146_v29 = vpop.f32.mrb[13].mxu0 }
 0x32a   : > { %v6364_v41 = vadd.f32 %v6363_v54, %v6146_v29  ;;  %v14728_v31 = vpop.f32.mrb[14].mxu0 }
 0x32b   : > { %v6149_v5 = vpop.f32.mrb[15].mxu0 }
 0x32c   : > { %v6365_v12 = vadd.f32 %v6364_v41, %v6149_v5 }
 0x32e   : > { %v6366_v19 = vadd.f32 %v14727_v26, %v6365_v12 }
 0x330   : > { %v14731_v40 = vpop.f32.mrb[16].mxu0  ;;  %v6367_v30 = vadd.f32 %v14728_v31, %v6366_v19 }
 0x331   : > { %v6162_v35 = vpop.f32.mrb[17].mxu0 }
 0x332   : > { %v6368_v48 = vadd.f32 %v6367_v30, %v6162_v35  ;;  %v14732_v42 = vpop.f32.mrb[18].mxu0 }
 0x333   : > { %v6165_v60 = vpop.f32.mrb[19].mxu0 }
 0x334   : > { %v6369_v46 = vadd.f32 %v6368_v48, %v6165_v60 }
 0x336   : > { %v6370_v34 = vadd.f32 %v14731_v40, %v6369_v46 }
 0x338   : > { %v14735_v27 = vpop.f32.mrb[20].mxu0  ;;  %v6371_v13 = vadd.f32 %v14732_v42, %v6370_v34 }
 0x339   : > { %v6178_v58 = vpop.f32.mrb[21].mxu0 }
 0x33a   : > { %v6372_v3 = vadd.f32 %v6371_v13, %v6178_v58  ;;  %v14736_v21 = vpop.f32.mrb[22].mxu0 }
 0x33b   : > { %v6181_v55 = vpop.f32.mrb[23].mxu0 }
 0x33c   : > { %v6373_v33 = vadd.f32 %v6372_v3, %v6181_v55 }
 0x33e   : > { %v6374_v9 = vadd.f32 %v14735_v27, %v6373_v33 }
 0x340   : > { %v14739_v25 = vpop.f32.mrb[24].mxu0  ;;  %v6375_v10 = vadd.f32 %v14736_v21, %v6374_v9 }
 0x341   : > { %v6194_v39 = vpop.f32.mrb[25].mxu0 }
 0x342   : > { %v6376_v7 = vadd.f32 %v6375_v10, %v6194_v39  ;;  %v14740_v18 = vpop.f32.mrb[26].mxu0 }
 0x343   : > { %v6197_v20 = vpop.f32.mrb[27].mxu0 }
 0x344   : > { %v6377_v36 = vadd.f32 %v6376_v7, %v6197_v20 }
 0x346   : > { %v6378_v62 = vadd.f32 %v14739_v25, %v6377_v36 }
 0x348   : > { %v14743_v50 = vpop.f32.mrb[28].mxu0  ;;  %v6379_v63 = vadd.f32 %v14740_v18, %v6378_v62 }
 0x349   : > { %v6210_v15 = vpop.f32.mrb[29].mxu0 }
 0x34a   : > { %v6380_v6 = vadd.f32 %v6379_v63, %v6210_v15  ;;  %v14744_v47 = vpop.f32.mrb[30].mxu0 }
 0x34b   : > { %v6213_v56 = vpop.f32.mrb[31].mxu0 }
 0x34c   : > { %v6381_v24 = vadd.f32 %v6380_v6, %v6213_v56 }
 0x34e   : > { %v6382_v28 = vadd.f32 %v14743_v50, %v6381_v24 }
 0x350   : > { %v6383_v11 = vadd.f32 %v14744_v47, %v6382_v28  ;;  %v15852_v28 = vld [vmem:[%s19241_s2 + $0x8] sm:$0xff]  }
 0x352   : > { %v6384_v51 = vrot.slane %v6383_v11, 4 }
 0x354   : > { %v6385_v49 = vadd.f32 %v6384_v51, %v6383_v11 }
 0x356   : > { %v6386_v17 = vrot.slane %v6385_v49, 2 }
 0x358   : > { %v6387_v0 = vadd.f32 %v6386_v17, %v6385_v49 }
 0x35a   : > { %v6388_v2 = vrot.slane %v6387_v0, 1 }
 0x35c   : > { %v6389_v16 = vadd.f32 %v6388_v2, %v6387_v0  ;;  %v15853_v0 = vld [vmem:[%s19241_s2 + $0x10] sm:$0xff]  }
 0x35e   : > { %v6391_v22 = vmul.f32 0.00390625, %v6389_v16 }
 0x360   : > { %v17442_v53 = vsub.f32 %v17413_v59, %v6391_v22  ;;  %v17445_v43 = vsub.f32 %v17417_v38, %v6391_v22  ;;  %v17448_v54 = vsub.f32 %v17411_v57, %v6391_v22  ;;  %v17451_v41 = vsub.f32 %v17415_v61, %v6391_v22 }
 0x361   : > { %v17454_v12 = vsub.f32 %v17425_v37, %v6391_v22  ;;  %v17457_v19 = vsub.f32 %v17430_v8, %v6391_v22  ;;  %v17460_v30 = vsub.f32 %v17422_v4, %v6391_v22  ;;  %v17463_v59 = vsub.f32 %v17428_v1, %v6391_v22 }
 0x362   : > { %v17465_v38 = vsub.f32 %v6130_v44, %v6391_v22  ;;  %v17467_v48 = vsub.f32 %v6133_v14, %v6391_v22  ;;  %v17470_v57 = vsub.f32 %v17434_v32, %v6391_v22  ;;  %v17473_v61 = vsub.f32 %v17437_v52, %v6391_v22 }
 0x363   : > { %v17475_v37 = vsub.f32 %v6146_v29, %v6391_v22  ;;  %v17477_v8 = vsub.f32 %v6149_v5, %v6391_v22  ;;  %v17479_v46 = vsub.f32 %v14727_v26, %v6391_v22  ;;  %v17481_v4 = vsub.f32 %v14728_v31, %v6391_v22 }
 0x364   : > { %v17483_v1 = vsub.f32 %v6162_v35, %v6391_v22  ;;  %v17485_v44 = vsub.f32 %v6165_v60, %v6391_v22  ;;  %v17487_v14 = vsub.f32 %v14731_v40, %v6391_v22  ;;  %v17489_v34 = vsub.f32 %v14732_v42, %v6391_v22 }
 0x365   : > { %v17491_v32 = vsub.f32 %v6178_v58, %v6391_v22  ;;  %v17493_v52 = vsub.f32 %v6181_v55, %v6391_v22  ;;  %v17495_v29 = vsub.f32 %v14735_v27, %v6391_v22  ;;  %v17497_v5 = vsub.f32 %v14736_v21, %v6391_v22 }
 0x366   : > { %v17499_v26 = vsub.f32 %v6194_v39, %v6391_v22  ;;  %v17501_v31 = vsub.f32 %v6197_v20, %v6391_v22  ;;  %v17503_v35 = vsub.f32 %v14739_v25, %v6391_v22  ;;  %v17505_v60 = vsub.f32 %v14740_v18, %v6391_v22 }
 0x367   : > { %v17507_v40 = vsub.f32 %v6210_v15, %v6391_v22  ;;  %v17509_v42 = vsub.f32 %v6213_v56, %v6391_v22  ;;  %v17511_v13 = vsub.f32 %v14743_v50, %v6391_v22  ;;  %v17513_v58 = vsub.f32 %v14744_v47, %v6391_v22  ;;  %v15851_v15 = vld [vmem:[%s19241_s2] sm:$0xff]  }
 0x368   : > { %v6424_v27 = vmul.f32 %v17442_v53, %v17442_v53  ;;  %v6425_v3 = vmul.f32 %v17445_v43, %v17445_v43  ;;  %v6426_v21 = vmul.f32 %v17448_v54, %v17448_v54  ;;  %v6427_v33 = vmul.f32 %v17451_v41, %v17451_v41  ;;  %14745 = vmatprep.subr.bf16.mxu1 %v15851_v15 }
 0x369   : > { %v6428_v25 = vmul.f32 %v17454_v12, %v17454_v12  ;;  %v6429_v39 = vmul.f32 %v17457_v19, %v17457_v19  ;;  %v6430_v18 = vmul.f32 %v17460_v30, %v17460_v30  ;;  %v6431_v36 = vmul.f32 %v17463_v59, %v17463_v59  ;;  %14746 = vmatpush3.bf16.msra.mxu1 %v15851_v15  ;;  %v15857_v15 = vld [vmem:[%s19241_s2 + $0x30] sm:$0xff]  }
 0x36a   : > { %v6456_v55 = vadd.f32 %v6425_v3, %v6424_v27  ;;  %v6432_v50 = vmul.f32 %v17465_v38, %v17465_v38  ;;  %v6433_v6 = vmul.f32 %v17467_v48, %v17467_v48  ;;  %v6434_v56 = vmul.f32 %v17470_v57, %v17470_v57  ;;  %14747 = vmatprep.subr.bf16.mxu1 %v15852_v28  ;;  %v15854_v3 = vld [vmem:[%s19241_s2 + $0x18] sm:$0xff]  }
 0x36b   : > { %v6435_v11 = vmul.f32 %v17473_v61, %v17473_v61  ;;  %v6436_v49 = vmul.f32 %v17475_v37, %v17475_v37  ;;  %v6437_v2 = vmul.f32 %v17477_v8, %v17477_v8  ;;  %v6438_v22 = vmul.f32 %v17479_v46, %v17479_v46 }
 0x36c   : > { %v6457_v9 = vadd.f32 %v6456_v55, %v6426_v21  ;;  %v6439_v21 = vmul.f32 %v17481_v4, %v17481_v4 }
 0x36d   : > { %14748 = vmatpush3.bf16.msra.mxu1 %v15852_v28  ;;  %v6446_v28 = vmul.f32 %v17495_v29, %v17495_v29 }
 0x36e   : > { %v6458_v10 = vadd.f32 %v6457_v9, %v6427_v33  ;;  %14749 = vmatprep.subr.bf16.mxu1 %v15853_v0  ;;  %v6440_v33 = vmul.f32 %v17483_v1, %v17483_v1 }
 0x370   : > { %v6459_v7 = vadd.f32 %v6458_v10, %v6428_v25  ;;  %v15855_v25 = vld [vmem:[%s19241_s2 + $0x20] sm:$0xff]   ;;  %v6441_v10 = vmul.f32 %v17485_v44, %v17485_v44 }
 0x371   : > { %14750 = vmatpush3.bf16.msra.mxu1 %v15853_v0  ;;  %v6448_v0 = vmul.f32 %v17499_v26, %v17499_v26 }
 0x372   : > { %v6460_v20 = vadd.f32 %v6459_v7, %v6429_v39  ;;  %14751 = vmatprep.subr.bf16.mxu1 %v15854_v3  ;;  %v6442_v7 = vmul.f32 %v17487_v14, %v17487_v14 }
 0x374   : > { %v6461_v62 = vadd.f32 %v6460_v20, %v6430_v18  ;;  %v15856_v20 = vld [vmem:[%s19241_s2 + $0x28] sm:$0xff]  }
 0x375   : > { %14752 = vmatpush3.bf16.msra.mxu1 %v15854_v3 }
 0x376   : > { %v6462_v63 = vadd.f32 %v6461_v62, %v6431_v36  ;;  %14753 = vmatprep.subr.bf16.mxu1 %v15855_v25  ;;  %v6443_v36 = vmul.f32 %v17489_v34, %v17489_v34 }
 0x378   : > { %v6463_v47 = vadd.f32 %v6462_v63, %v6432_v50  ;;  %v6444_v50 = vmul.f32 %v17491_v32, %v17491_v32 }
 0x379   : > { %14754 = vmatpush3.bf16.msra.mxu1 %v15855_v25  ;;  %v6453_v25 = vmul.f32 %v17509_v42, %v17509_v42 }
 0x37a   : > { %v6464_v24 = vadd.f32 %v6463_v47, %v6433_v6  ;;  %14755 = vmatprep.subr.bf16.mxu1 %v15856_v20  ;;  %v15858_v6 = vld [vmem:[%s19241_s2 + $0x38] sm:$0xff]   ;;  %v15859_v47 = vld [vmem:[#allocation2] sm:$0xff]  }
 0x37b   : > { %14761 = vmatprep.mubr.bf16.mxu1 %v15859_v47 }
 0x37c   : > { %v6465_v51 = vadd.f32 %v6464_v24, %v6434_v56  ;;  %v6445_v56 = vmul.f32 %v17493_v52, %v17493_v52 }
 0x37d   : > { %14756 = vmatpush3.bf16.msra.mxu1 %v15856_v20 }
 0x37e   : > { %v6466_v17 = vadd.f32 %v6465_v51, %v6435_v11  ;;  %14757 = vmatprep.subr.bf16.mxu1 %v15857_v15  ;;  %v17588_v51 = vld [vmem:[%s19241_s2 + $0x40] sm:$0xff]  }
 0x37f   : > { %19289 = vst [vmem:[#allocation13_spill] sm:$0xff] %v17588_v51 }
 0x380   : > { %v6467_v16 = vadd.f32 %v6466_v17, %v6436_v49  ;;  %v6447_v49 = vmul.f32 %v17497_v5, %v17497_v5 }
 0x381   : > { %14758 = vmatpush3.bf16.msra.mxu1 %v15857_v15 }
 0x382   : > { %v6468_v27 = vadd.f32 %v6467_v16, %v6437_v2  ;;  %14759 = vmatprep.subr.bf16.mxu1 %v15858_v6  ;;  %v6449_v16 = vmul.f32 %v17501_v31, %v17501_v31 }
 0x384   : > { %v6469_v55 = vadd.f32 %v6468_v27, %v6438_v22  ;;  %v6450_v27 = vmul.f32 %v17503_v35, %v17503_v35 }
 0x385   : > { %14760 = vmatpush3.bf16.msra.mxu1 %v15858_v6 }
 0x386   : > { %v6470_v9 = vadd.f32 %v6469_v55, %v6439_v21  ;;  %14793 = vmatprep.subr.bf16.mxu1 %v17588_v51  ;;  %v6451_v21 = vmul.f32 %v17505_v60, %v17505_v60 }
 0x388   : > { %v6471_v39 = vadd.f32 %v6470_v9, %v6440_v33  ;;  %v6452_v33 = vmul.f32 %v17507_v40, %v17507_v40 }
 0x38a   : > { %v6472_v18 = vadd.f32 %v6471_v39, %v6441_v10  ;;  %v6454_v39 = vmul.f32 %v17511_v13, %v17511_v13 }
 0x38c   : > { %v6473_v62 = vadd.f32 %v6472_v18, %v6442_v7  ;;  %v6455_v18 = vmul.f32 %v17513_v58, %v17513_v58 }
 0x38e   : > { %v6474_v63 = vadd.f32 %v6473_v62, %v6443_v36 }
 0x390   : > { %v6475_v24 = vadd.f32 %v6474_v63, %v6444_v50 }
 0x392   : > { %v6476_v11 = vadd.f32 %v6475_v24, %v6445_v56 }
 0x394   : > { %v6477_v17 = vadd.f32 %v6476_v11, %v6446_v28 }
 0x396   : > { %v6478_v2 = vadd.f32 %v6477_v17, %v6447_v49 }
 0x398   : > { %v6479_v22 = vadd.f32 %v6478_v2, %v6448_v0 }
 0x39a   : > { %v6480_v3 = vadd.f32 %v6479_v22, %v6449_v16 }
 0x39c   : > { %v6481_v55 = vadd.f32 %v6480_v3, %v6450_v27 }
 0x39e   : > { %v6482_v9 = vadd.f32 %v6481_v55, %v6451_v21 }
 0x3a0   : > { %v6483_v10 = vadd.f32 %v6482_v9, %v6452_v33 }
 0x3a2   : > { %v6484_v7 = vadd.f32 %v6483_v10, %v6453_v25 }
 0x3a4   : > { %v6485_v20 = vadd.f32 %v6484_v7, %v6454_v39 }
 0x3a6   : > { %v6486_v36 = vadd.f32 %v6485_v20, %v6455_v18 }
 0x3a8   : > { %v6487_v62 = vrot.slane %v6486_v36, 4 }
 0x3aa   : > { %v6488_v50 = vadd.f32 %v6487_v62, %v6486_v36 }
 0x3ac   : > { %v6489_v63 = vrot.slane %v6488_v50, 2 }
 0x3ae   : > { %v6490_v15 = vadd.f32 %v6489_v63, %v6488_v50 }
 0x3b0   : > { %v6491_v6 = vrot.slane %v6490_v15, 1 }
 0x3b2   : > { %v6492_v47 = vadd.f32 %v6491_v6, %v6490_v15 }
 0x3b4   : > { %v6493_v56 = vmul.f32 0.00390625, %v6492_v47 }
 0x3b6   : > { %v6494_v24 = vadd.f32 1e-05, %v6493_v56 }
 0x3b8   : > { %15971 = vrsqrt.f32 %v6494_v24 }
 0x3c2   : > { %v15972_v28 = vpop.eup %15971 }
 0x3c3   : > { %v6524_v11 = vmul.f32 %v15972_v28, %v17507_v40  ;;  %v6525_v49 = vmul.f32 %v15972_v28, %v17509_v42  ;;  %v17612_v17 = vmul.f32 %v15972_v28, %v17442_v53  ;;  %v17615_v0 = vmul.f32 %v15972_v28, %v17445_v43 }
 0x3c4   : > { %v17618_v2 = vmul.f32 %v15972_v28, %v17448_v54  ;;  %v17621_v16 = vmul.f32 %v15972_v28, %v17451_v41  ;;  %v17624_v22 = vmul.f32 %v15972_v28, %v17454_v12  ;;  %v17627_v27 = vmul.f32 %v15972_v28, %v17457_v19 }
 0x3c5   : > { %v6556_v40 = vmax.f32 %v6524_v11, 0.0  ;;  %v6557_v42 = vmax.f32 %v6525_v49, 0.0  ;;  %v17630_v53 = vmul.f32 %v15972_v28, %v17460_v30  ;;  %v17633_v43 = vmul.f32 %v15972_v28, %v17463_v59 }
 0x3c6   : > { %v17636_v54 = vmul.f32 %v15972_v28, %v17465_v38  ;;  %v17639_v41 = vmul.f32 %v15972_v28, %v17467_v48  ;;  %v17642_v12 = vmul.f32 %v15972_v28, %v17470_v57  ;;  %v17645_v19 = vmul.f32 %v15972_v28, %v17473_v61 }
 0x3c7   : > { %v17647_v3 = vpack.c.bf16 %v6556_v40, %v6556_v40  ;;  %v13877_v21 = vpack.c.bf16 %v6557_v42, %v6557_v42  ;;  %v17650_v30 = vmul.f32 %v15972_v28, %v17475_v37  ;;  %v17653_v59 = vmul.f32 %v15972_v28, %v17477_v8 }
 0x3c8   : > { %v17656_v38 = vmul.f32 %v15972_v28, %v17479_v46  ;;  %v17659_v48 = vmul.f32 %v15972_v28, %v17481_v4  ;;  %v17662_v57 = vmul.f32 %v15972_v28, %v17483_v1  ;;  %v17665_v61 = vmul.f32 %v15972_v28, %v17485_v44 }
 0x3c9   : > { %v6895_v55 = vshrl.u32 %v17647_v3, 16  ;;  %v6903_v33 = vshrl.u32 %v13877_v21, 16  ;;  %v6906_v37 = vshll.u32 %v13877_v21, 16  ;;  %v17669_v9 = vmul.f32 %v15972_v28, %v17487_v14 }
 0x3ca   : > { %v17672_v8 = vmul.f32 %v15972_v28, %v17489_v34  ;;  %v17675_v46 = vmul.f32 %v15972_v28, %v17491_v32  ;;  %v17678_v4 = vmul.f32 %v15972_v28, %v17493_v52  ;;  %v17681_v1 = vmul.f32 %v15972_v28, %v17495_v29  ;;  %v7078_v34 = vld [vmem:[#allocation2 + $0xbc] sm:$0x1] }
 0x3cb   : > { %v17683_v44 = vrot.slane %v6895_v55, 7  ;;  %v6905_v25 = vrot.slane %v6903_v33, 7  ;;  %v17686_v10 = vmul.f32 %v15972_v28, %v17497_v5  ;;  %v17689_v14 = vmul.f32 %v15972_v28, %v17499_v26 }
 0x3cc   : > { %v17692_v39 = vmul.f32 %v15972_v28, %v17501_v31  ;;  %v17695_v32 = vmul.f32 %v15972_v28, %v17503_v35  ;;  %v17698_v52 = vmul.f32 %v15972_v28, %v17505_v60  ;;  %v17701_v29 = vmul.f32 %v15972_v28, %v17511_v13  ;;  %v15870_v13 = vld [vmem:[%s19241_s2 + $0x58] sm:$0xff]  }
 0x3cd   : > { %v6901_v7 = vrot.slane %v17683_v44, 4  ;;  %v6908_v5 = vor.u32 %v6906_v37, %v6905_v25  ;;  %v6910_v18 = vrot.slane %v6905_v25, 4  ;;  %v17705_v26 = vmul.f32 %v15972_v28, %v17513_v58 }
 0x3ce   : > { %v6898_v20 = vshll.u32 %v17647_v3, 16  ;;  %v6528_v31 = vmax.f32 %v17612_v17, 0.0  ;;  %v6529_v35 = vmax.f32 %v17615_v0, 0.0  ;;  %v6530_v36 = vmax.f32 %v17618_v2, 0.0  ;;  %v7008_v3 = vld [vmem:[#allocation2 + $0x44] sm:$0x1] }
 0x3cf   : > { %v6909_v62 = vsel %vm16172_vm5, %v6901_v7, %v6908_v5  ;;  %v7079_v50 = vsel %vm16188_vm7, %v6910_v18, %v7078_v34  ;;  %v6531_v63 = vmax.f32 %v17621_v16, 0.0  ;;  %v6532_v15 = vmax.f32 %v17624_v22, 0.0 }
 0x3d0   : > { %7080 = vst [vmem:[#allocation2 + $0xbc] sm:$0x1] %v7079_v50  ;;  %7077 = vst [vmem:[#allocation2 + $0xb8] sm:$0xf] %v6909_v62  ;;  %v6533_v58 = vmax.f32 %v17627_v27, 0.0  ;;  %v6534_v6 = vmax.f32 %v17630_v53, 0.0 }
 0x3d1   : > { %v6535_v47 = vmax.f32 %v17633_v43, 0.0  ;;  %v6536_v56 = vmax.f32 %v17636_v54, 0.0  ;;  %v6537_v24 = vmax.f32 %v17639_v41, 0.0  ;;  %v6538_v28 = vmax.f32 %v17642_v12, 0.0 }
 0x3d2   : > { %v6539_v11 = vmax.f32 %v17645_v19, 0.0  ;;  %v6540_v49 = vmax.f32 %v17650_v30, 0.0  ;;  %v6541_v17 = vmax.f32 %v17653_v59, 0.0  ;;  %v6542_v0 = vmax.f32 %v17656_v38, 0.0 }
 0x3d3   : > { %v6543_v2 = vmax.f32 %v17659_v48, 0.0  ;;  %v6544_v16 = vmax.f32 %v17662_v57, 0.0  ;;  %v6545_v22 = vmax.f32 %v17665_v61, 0.0  ;;  %v6546_v27 = vmax.f32 %v17669_v9, 0.0 }
 0x3d4   : > { %v6547_v40 = vmax.f32 %v17672_v8, 0.0  ;;  %v6548_v42 = vmax.f32 %v17675_v46, 0.0  ;;  %v6549_v53 = vmax.f32 %v17678_v4, 0.0  ;;  %v6550_v43 = vmax.f32 %v17681_v1, 0.0 }
 0x3d5   : > { %v6551_v54 = vmax.f32 %v17686_v10, 0.0  ;;  %v6552_v41 = vmax.f32 %v17689_v14, 0.0  ;;  %v6553_v12 = vmax.f32 %v17692_v39, 0.0  ;;  %v6554_v19 = vmax.f32 %v17695_v32, 0.0 }
 0x3d6   : > { %v6555_v21 = vmax.f32 %v17698_v52, 0.0  ;;  %v6558_v30 = vmax.f32 %v17701_v29, 0.0  ;;  %v6559_v59 = vmax.f32 %v17705_v26, 0.0  ;;  %v13848_v38 = vpack.c.bf16 %v6528_v31, %v6528_v31 }
 0x3d7   : > { %v13849_v48 = vpack.c.bf16 %v6529_v35, %v6529_v35  ;;  %v13850_v57 = vpack.c.bf16 %v6530_v36, %v6530_v36  ;;  %v13851_v61 = vpack.c.bf16 %v6531_v63, %v6531_v63  ;;  %v13852_v55 = vpack.c.bf16 %v6532_v15, %v6532_v15 }
 0x3d8   : > { %v13853_v33 = vpack.c.bf16 %v6533_v58, %v6533_v58  ;;  %v17742_v37 = vpack.c.bf16 %v6534_v6, %v6534_v6  ;;  %v17744_v9 = vpack.c.bf16 %v6535_v47, %v6535_v47  ;;  %v17746_v8 = vpack.c.bf16 %v6536_v56, %v6536_v56 }
 0x3d9   : > { %v17748_v46 = vpack.c.bf16 %v6537_v24, %v6537_v24  ;;  %v17750_v4 = vpack.c.bf16 %v6538_v28, %v6538_v28  ;;  %v17752_v1 = vpack.c.bf16 %v6539_v11, %v6539_v11  ;;  %v17754_v25 = vpack.c.bf16 %v6540_v49, %v6540_v49 }
 0x3da   : > { %v17756_v10 = vpack.c.bf16 %v6541_v17, %v6541_v17  ;;  %v17758_v14 = vpack.c.bf16 %v6542_v0, %v6542_v0  ;;  %v17760_v34 = vpack.c.bf16 %v6543_v2, %v6543_v2  ;;  %v17762_v39 = vpack.c.bf16 %v6544_v16, %v6544_v16 }
 0x3db   : > { %v17764_v32 = vpack.c.bf16 %v6545_v22, %v6545_v22  ;;  %v17766_v52 = vpack.c.bf16 %v6546_v27, %v6546_v27  ;;  %v17768_v29 = vpack.c.bf16 %v6547_v40, %v6547_v40  ;;  %v17770_v7 = vpack.c.bf16 %v6548_v42, %v6548_v42 }
 0x3dc   : > { %v17772_v5 = vpack.c.bf16 %v6549_v53, %v6549_v53  ;;  %v17774_v18 = vpack.c.bf16 %v6550_v43, %v6550_v43  ;;  %v17776_v26 = vpack.c.bf16 %v6551_v54, %v6551_v54  ;;  %v17778_v31 = vpack.c.bf16 %v6552_v41, %v6552_v41 }
 0x3dd   : > { %v17780_v35 = vpack.c.bf16 %v6553_v12, %v6553_v12  ;;  %v17782_v36 = vpack.c.bf16 %v6554_v19, %v6554_v19  ;;  %v17784_v62 = vpack.c.bf16 %v6555_v21, %v6555_v21  ;;  %v17786_v50 = vpack.c.bf16 %v6558_v30, %v6558_v30  ;;  %v15867_v19 = vld [vmem:[%s19241_s2 + $0x50] sm:$0xff]  }
 0x3de   : > { %v17788_v63 = vpack.c.bf16 %v6559_v59, %v6559_v59  ;;  %v6657_v15 = vshrl.u32 %v13848_v38, 16  ;;  %v6660_v58 = vshll.u32 %v13848_v38, 16  ;;  %v6665_v6 = vshrl.u32 %v13849_v48, 16 }
 0x3df   : > { %v6668_v47 = vshll.u32 %v13849_v48, 16  ;;  %v6674_v56 = vshrl.u32 %v13850_v57, 16  ;;  %v6677_v28 = vshll.u32 %v13850_v57, 16  ;;  %v6682_v11 = vshrl.u32 %v13851_v61, 16 }
 0x3e0   : > { %v6659_v24 = vrot.slane %v6657_v15, 7  ;;  %v6685_v49 = vshll.u32 %v13851_v61, 16  ;;  %v17790_v17 = vrot.slane %v6665_v6, 7  ;;  %v6691_v2 = vshrl.u32 %v13852_v55, 16 }
 0x3e1   : > { %v6676_v0 = vrot.slane %v6674_v56, 7  ;;  %v6694_v16 = vshll.u32 %v13852_v55, 16  ;;  %v17794_v40 = vrot.slane %v6682_v11, 7  ;;  %v6699_v42 = vshrl.u32 %v13853_v33, 16 }
 0x3e2   : > { %v17792_v22 = vor.u32 %v6660_v58, %v6659_v24  ;;  %v6663_v27 = vrot.slane %v6659_v24, 4  ;;  %v6670_v53 = vor.u32 %v6668_v47, %v17790_v17  ;;  %v6693_v21 = vrot.slane %v6691_v2, 7 }
 0x3e3   : > { %v17798_v54 = vor.u32 %v6677_v28, %v6676_v0  ;;  %v6680_v41 = vrot.slane %v6676_v0, 4  ;;  %v6687_v12 = vor.u32 %v6685_v49, %v17794_v40  ;;  %v17802_v30 = vrot.slane %v6699_v42, 7 }
 0x3e4   : > { %v6671_v59 = vsel %vm16172_vm5, %v6663_v27, %v6670_v53  ;;  %v6702_v38 = vshll.u32 %v13853_v33, 16  ;;  %v6708_v48 = vshrl.u32 %v17742_v37, 16  ;;  %v6711_v57 = vshll.u32 %v17742_v37, 16 }
 0x3e5   : > { %v6688_v61 = vsel %vm16172_vm5, %v6680_v41, %v6687_v12  ;;  %v17810_v55 = vor.u32 %v6694_v16, %v6693_v21  ;;  %v6697_v15 = vrot.slane %v6693_v21, 4  ;;  %6979 = vst [vmem:[#allocation2 + $0x10] sm:$0xf] %v6671_v59  ;;  %v6716_v56 = vshrl.u32 %v17744_v9, 16 }
 0x3e6   : > { %v6704_v6 = vor.u32 %v6702_v38, %v17802_v30  ;;  %v6710_v47 = vrot.slane %v6708_v48, 7  ;;  %v6719_v33 = vshll.u32 %v17744_v9, 16  ;;  %6986 = vst [vmem:[#allocation2 + $0x1c] sm:$0xf] %v6688_v61  ;;  %v6725_v24 = vshrl.u32 %v17746_v8, 16 }
 0x3e7   : > { %v6728_v37 = vshll.u32 %v17746_v8, 16  ;;  %v6733_v28 = vshrl.u32 %v17748_v46, 16  ;;  %v6736_v11 = vshll.u32 %v17748_v46, 16  ;;  %v17824_v16 = vrot.slane %v6716_v56, 7  ;;  %v7018_v48 = vld [vmem:[#allocation2 + $0x54] sm:$0xf] }
 0x3e8   : > { %v6705_v49 = vsel %vm16172_vm5, %v6697_v15, %v6704_v6  ;;  %v17822_v0 = vor.u32 %v6711_v57, %v6710_v47  ;;  %v6714_v2 = vrot.slane %v6710_v47, 4  ;;  %v6727_v27 = vrot.slane %v6725_v24, 7  ;;  %v7022_v46 = vld [vmem:[#allocation2 + $0x5c] sm:$0x1] }
 0x3e9   : > { %v17826_v42 = vrot.slane %v6733_v28, 7  ;;  %v6742_v9 = vshrl.u32 %v17750_v4, 16  ;;  %v6745_v53 = vshll.u32 %v17750_v4, 16  ;;  %6993 = vst [vmem:[#allocation2 + $0x28] sm:$0xf] %v6705_v49  ;;  %v6721_v8 = vor.u32 %v6719_v33, %v17824_v16 }
 0x3ea   : > { %v6750_v41 = vshrl.u32 %v17752_v1, 16  ;;  %v6753_v12 = vshll.u32 %v17752_v1, 16  ;;  %v17834_v21 = vor.u32 %v6728_v37, %v6727_v27  ;;  %v6731_v59 = vrot.slane %v6727_v27, 4  ;;  %v7015_v28 = vld [vmem:[#allocation2 + $0x50] sm:$0x1] }
 0x3eb   : > { %v6738_v38 = vor.u32 %v6736_v11, %v17826_v42  ;;  %v6722_v57 = vsel %vm16172_vm5, %v6714_v2, %v6721_v8  ;;  %v6744_v4 = vrot.slane %v6742_v9, 7  ;;  %v6759_v15 = vshrl.u32 %v17754_v25, 16 }
 0x3ec   : > { %v17840_v61 = vrot.slane %v6750_v41, 7  ;;  %v6762_v1 = vshll.u32 %v17754_v25, 16  ;;  %v6767_v47 = vshrl.u32 %v17756_v10, 16  ;;  %v6770_v56 = vshll.u32 %v17756_v10, 16  ;;  %7000 = vst [vmem:[#allocation2 + $0x34] sm:$0xf] %v6722_v57 }
 0x3ed   : > { %v6739_v6 = vsel %vm16172_vm5, %v6731_v59, %v6738_v38  ;;  %v17848_v33 = vor.u32 %v6745_v53, %v6744_v4  ;;  %v6748_v24 = vrot.slane %v6744_v4, 4  ;;  %v6761_v11 = vrot.slane %v6759_v15, 7  ;;  %v17943_v59 = vld [vmem:[#allocation2 + $0x30] sm:$0xf] }
 0x3ee   : > { %v6755_v37 = vor.u32 %v6753_v12, %v17840_v61  ;;  %7007 = vst [vmem:[#allocation2 + $0x40] sm:$0xf] %v6739_v6  ;;  %v17852_v49 = vrot.slane %v6767_v47, 7  ;;  %v6776_v2 = vshrl.u32 %v17758_v14, 16  ;;  %v6779_v25 = vshll.u32 %v17758_v14, 16 }
 0x3ef   : > { %v6784_v10 = vshrl.u32 %v17760_v34, 16  ;;  %v6787_v9 = vshll.u32 %v17760_v34, 16  ;;  %v6793_v53 = vshrl.u32 %v17762_v39, 16  ;;  %v17861_v8 = vor.u32 %v6762_v1, %v6761_v11 }
 0x3f0   : > { %v6756_v27 = vsel %vm16172_vm5, %v6748_v24, %v6755_v37  ;;  %v6765_v41 = vrot.slane %v6761_v11, 4  ;;  %v6772_v12 = vor.u32 %v6770_v56, %v17852_v49  ;;  %v6778_v38 = vrot.slane %v6776_v2, 7  ;;  %v17949_v37 = vld [vmem:[#allocation2 + $0x48] sm:$0xf] }
 0x3f1   : > { %7014 = vst [vmem:[#allocation2 + $0x4c] sm:$0xf] %v6756_v27  ;;  %v17865_v57 = vrot.slane %v6784_v10, 7  ;;  %v6795_v14 = vrot.slane %v6793_v53, 7  ;;  %v6796_v4 = vshll.u32 %v17762_v39, 16  ;;  %v6801_v34 = vshrl.u32 %v17764_v32, 16 }
 0x3f2   : > { %v6773_v15 = vsel %vm16172_vm5, %v6765_v41, %v6772_v12  ;;  %v6804_v6 = vshll.u32 %v17764_v32, 16  ;;  %v6810_v1 = vshrl.u32 %v17766_v52, 16  ;;  %v17873_v47 = vor.u32 %v6779_v25, %v6778_v38  ;;  %v6980_v41 = vld [vmem:[#allocation2 + $0x14] sm:$0x1] }
 0x3f3   : > { %v6782_v56 = vrot.slane %v6778_v38, 4  ;;  %v6789_v24 = vor.u32 %v6787_v9, %v17865_v57  ;;  %7021 = vst [vmem:[#allocation2 + $0x58] sm:$0xf] %v6773_v15  ;;  %v17877_v11 = vor.u32 %v6796_v4, %v6795_v14  ;;  %v6799_v39 = vrot.slane %v6795_v14, 4 }
 0x3f4   : > { %v17879_v2 = vrot.slane %v6801_v34, 7  ;;  %v6812_v27 = vrot.slane %v6810_v1, 7  ;;  %v6813_v32 = vshll.u32 %v17766_v52, 16  ;;  %v6818_v25 = vshrl.u32 %v17768_v29, 16 }
 0x3f5   : > { %v6790_v10 = vsel %vm16172_vm5, %v6782_v56, %v6789_v24  ;;  %v6821_v53 = vshll.u32 %v17768_v29, 16  ;;  %v6827_v38 = vshrl.u32 %v17770_v7, 16  ;;  %v6830_v15 = vshll.u32 %v17770_v7, 16 }
 0x3f6   : > { %v6806_v9 = vor.u32 %v6804_v6, %v17879_v2  ;;  %v6816_v12 = vrot.slane %v6812_v27, 4  ;;  %7028 = vst [vmem:[#allocation2 + $0x64] sm:$0xf] %v6790_v10  ;;  %v17889_v14 = vor.u32 %v6813_v32, %v6812_v27  ;;  %v17891_v4 = vrot.slane %v6818_v25, 7 }
 0x3f7   : > { %v6835_v52 = vshrl.u32 %v17772_v5, 16  ;;  %v6829_v29 = vrot.slane %v6827_v38, 7  ;;  %v6838_v6 = vshll.u32 %v17772_v5, 16  ;;  %v6844_v1 = vshrl.u32 %v17774_v18, 16 }
 0x3f8   : > { %v6807_v34 = vsel %vm16172_vm5, %v6799_v39, %v6806_v9  ;;  %v6823_v56 = vor.u32 %v6821_v53, %v17891_v4  ;;  %v6847_v10 = vshll.u32 %v17774_v18, 16  ;;  %v6852_v39 = vshrl.u32 %v17776_v26, 16  ;;  %v6987_v53 = vld [vmem:[#allocation2 + $0x20] sm:$0x1] }
 0x3f9   : > { %v17901_v27 = vrot.slane %v6835_v52, 7  ;;  %7035 = vst [vmem:[#allocation2 + $0x70] sm:$0xf] %v6807_v34  ;;  %v17904_v7 = vor.u32 %v6830_v15, %v6829_v29  ;;  %v6833_v32 = vrot.slane %v6829_v29, 4  ;;  %v6846_v25 = vrot.slane %v6844_v1, 7 }
 0x3fa   : > { %v6824_v5 = vsel %vm16172_vm5, %v6816_v12, %v6823_v56  ;;  %v6855_v38 = vshll.u32 %v17776_v26, 16  ;;  %v17914_v18 = vrot.slane %v6852_v39, 7  ;;  %v6861_v15 = vshrl.u32 %v17778_v31, 16 }
 0x3fb   : > { %v6840_v9 = vor.u32 %v6838_v6, %v17901_v27  ;;  %v17912_v52 = vor.u32 %v6847_v10, %v6846_v25  ;;  %v6850_v24 = vrot.slane %v6846_v25, 4  ;;  %7042 = vst [vmem:[#allocation2 + $0x7c] sm:$0xf] %v6824_v5  ;;  %v6864_v29 = vshll.u32 %v17778_v31, 16  ;;  %v6976_v25 = vld [vmem:[#allocation2 + $0xc] sm:$0xf] }
 0x3fc   : > { %v6869_v12 = vshrl.u32 %v17780_v35, 16  ;;  %v6872_v6 = vshll.u32 %v17780_v35, 16  ;;  %v6857_v1 = vor.u32 %v6855_v38, %v17914_v18  ;;  %v6863_v56 = vrot.slane %v6861_v15, 7 }
 0x3fd   : > { %v6841_v34 = vsel %vm16172_vm5, %v6833_v32, %v6840_v9  ;;  %v6878_v10 = vshrl.u32 %v17782_v36, 16  ;;  %v6881_v5 = vshll.u32 %v17782_v36, 16  ;;  %v6886_v32 = vshrl.u32 %v17784_v62, 16  ;;  %v6983_v9 = vld [vmem:[#allocation2 + $0x18] sm:$0xf] }
 0x3fe   : > { %7049 = vst [vmem:[#allocation2 + $0x88] sm:$0xf] %v6841_v34  ;;  %v17925_v39 = vrot.slane %v6869_v12, 7  ;;  %v6889_v31 = vshll.u32 %v17784_v62, 16  ;;  %v6858_v35 = vsel %vm16172_vm5, %v6850_v24, %v6857_v1  ;;  %v17932_v38 = vor.u32 %v6864_v29, %v6863_v56  ;;  %v6990_v34 = vld [vmem:[#allocation2 + $0x24] sm:$0xf] }
 0x3ff   : > { %v6867_v15 = vrot.slane %v6863_v56, 4  ;;  %v6880_v26 = vrot.slane %v6878_v10, 7  ;;  %v17936_v36 = vrot.slane %v6886_v32, 7  ;;  %v17941_v62 = vor.u32 %v6898_v20, %v17683_v44  ;;  %7056 = vst [vmem:[#allocation2 + $0x94] sm:$0xf] %v6858_v35 }
 0x400   : > { %v6874_v12 = vor.u32 %v6872_v6, %v17925_v39  ;;  %v7001_v24 = vld [vmem:[#allocation2 + $0x38] sm:$0x1]  ;;  %v6994_v29 = vld [vmem:[#allocation2 + $0x2c] sm:$0x1]  ;;  %v6912_v10 = vshrl.u32 %v17786_v50, 16  ;;  %v6915_v6 = vshll.u32 %v17786_v50, 16  ;;  %v6977_v43 = vsel %vm16181_vm6, %v17792_v22, %v6976_v25 }
 0x401   : > { %19292 = vst [vmem:[#allocation12_spill] sm:$0xff] %v17941_v62  ;;  %v17945_v1 = vor.u32 %v6881_v5, %v6880_v26  ;;  %v6884_v56 = vrot.slane %v6880_v26, 4  ;;  %v17951_v32 = vld [vmem:[#allocation2 + $0x3c] sm:$0xf]  ;;  %v6891_v20 = vor.u32 %v6889_v31, %v17936_v36  ;;  %v6920_v5 = vshrl.u32 %v17788_v63, 16 }
 0x402   : > { %v6875_v44 = vsel %vm16172_vm5, %v6867_v15, %v6874_v12  ;;  %v17958_v26 = vld [vmem:[#allocation2 + $0x60] sm:$0xf]  ;;  %v6914_v50 = vrot.slane %v6912_v10, 7  ;;  %v6923_v58 = vshll.u32 %v17788_v63, 16  ;;  %v19294_v23 = vrot.slane %v17790_v17, 4 }
 0x403   : > { %7063 = vst [vmem:[#allocation2 + $0xa0] sm:$0xf] %v6875_v44  ;;  %v7029_v15 = vld [vmem:[#allocation2 + $0x68] sm:$0x1]  ;;  %v17968_v12 = vld [vmem:[#allocation2 + $0x78] sm:$0xf]  ;;  %v6892_v10 = vsel %vm16172_vm5, %v6884_v56, %v6891_v20  ;;  %v6984_v63 = vsel %vm16181_vm6, %v17798_v54, %v6983_v9  ;;  %v6991_v20 = vsel %vm16181_vm6, %v17810_v55, %v6990_v34  ;;  %v6998_v55 = vsel %vm16181_vm6, %v17822_v0, %v17943_v59 }
 0x404   : > { %v6981_v31 = vsel %vm16188_vm7, %v19294_v23, %v6980_v41  ;;  %v7032_v35 = vld [vmem:[#allocation2 + $0x6c] sm:$0xf]  ;;  %v17972_v51 = vrot.slane %v6920_v5, 7  ;;  %v19295_v17 = vrot.slane %v17794_v40, 4  ;;  %6978 = vst [vmem:[#allocation2 + $0xc] sm:$0xf] %v6977_v43  ;;  %v17981_v62 = vor.u32 %v6915_v6, %v6914_v50 }
 0x405   : > { %6982 = vst [vmem:[#allocation2 + $0x14] sm:$0x1] %v6981_v31  ;;  %v7043_v22 = vld [vmem:[#allocation2 + $0x80] sm:$0x1]  ;;  %v7053_v41 = vld [vmem:[#allocation2 + $0x90] sm:$0xf] }
 0x406   : > { %v6988_v23 = vsel %vm16188_vm7, %v19295_v17, %v6987_v53  ;;  %v7046_v25 = vld [vmem:[#allocation2 + $0x84] sm:$0xf]  ;;  %v7050_v44 = vld [vmem:[#allocation2 + $0x8c] sm:$0x1]  ;;  %v6918_v56 = vrot.slane %v6914_v50, 4  ;;  %v19296_v54 = vrot.slane %v17802_v30, 4  ;;  %v6925_v6 = vor.u32 %v6923_v58, %v17972_v51 }
 0x407   : > { %6989 = vst [vmem:[#allocation2 + $0x20] sm:$0x1] %v6988_v23  ;;  %6985 = vst [vmem:[#allocation2 + $0x18] sm:$0xf] %v6984_v63  ;;  %v7057_v43 = vld [vmem:[#allocation2 + $0x98] sm:$0x1] }
 0x408   : > { %v6995_v40 = vsel %vm16188_vm7, %v19296_v54, %v6994_v29  ;;  %7070 = vst [vmem:[#allocation2 + $0xac] sm:$0xf] %v6892_v10  ;;  %v7067_v53 = vld [vmem:[#allocation2 + $0xa8] sm:$0xf]  ;;  %v7060_v9 = vld [vmem:[#allocation2 + $0x9c] sm:$0xf]  ;;  %v6926_v17 = vsel %vm16172_vm5, %v6918_v56, %v6925_v6 }
 0x409   : > { %v7064_v5 = vld [vmem:[#allocation2 + $0xa4] sm:$0x1]  ;;  %v6927_v50 = vrot.slane %v17972_v51, 4  ;;  %6996 = vst [vmem:[#allocation2 + $0x2c] sm:$0x1] %v6995_v40  ;;  %v19297_v30 = vrot.slane %v17824_v16, 4  ;;  %v7005_v51 = vsel %vm16181_vm6, %v17834_v21, %v17951_v32  ;;  %v7012_v16 = vsel %vm16181_vm6, %v17848_v33, %v17949_v37 }
 0x40a   : > { %6992 = vst [vmem:[#allocation2 + $0x24] sm:$0xf] %v6991_v20  ;;  %v7071_v29 = vld [vmem:[#allocation2 + $0xb0] sm:$0x1]  ;;  %v7081_v31 = vld [vmem:[#allocation2 + $0xc0] sm:$0xf]  ;;  %v7047_v37 = vsel %vm16181_vm6, %v17904_v7, %v7046_v25 }
 0x40b   : > { %v7002_v34 = vsel %vm16188_vm7, %v19297_v30, %v7001_v24  ;;  %v7074_v10 = vld [vmem:[#allocation2 + $0xb4] sm:$0xf]  ;;  %v7085_v63 = vld [vmem:[#allocation2 + $0xc8] sm:$0x1]  ;;  %v19298_v58 = vrot.slane %v17826_v42, 4  ;;  %v19299_v59 = vrot.slane %v17840_v61, 4  ;;  %v7019_v42 = vsel %vm16181_vm6, %v17861_v8, %v7018_v48 }
 0x40c   : > { %7003 = vst [vmem:[#allocation2 + $0x38] sm:$0x1] %v7002_v34  ;;  %6999 = vst [vmem:[#allocation2 + $0x30] sm:$0xf] %v6998_v55  ;;  %v19300_v21 = vrot.slane %v17852_v49, 4  ;;  %v7026_v61 = vsel %vm16181_vm6, %v17873_v47, %v17958_v26  ;;  %v19301_v60 = vrot.slane %v17865_v57, 4  ;;  %v7033_v48 = vsel %vm16181_vm6, %v17877_v11, %v7032_v35 }
 0x40d   : > { %v7009_v0 = vsel %vm16188_vm7, %v19298_v58, %v7008_v3  ;;  %v7016_v24 = vsel %vm16188_vm7, %v19299_v59, %v7015_v28  ;;  %7006 = vst [vmem:[#allocation2 + $0x3c] sm:$0xf] %v7005_v51  ;;  %7013 = vst [vmem:[#allocation2 + $0x48] sm:$0xf] %v7012_v16  ;;  %v19302_v49 = vrot.slane %v17879_v2, 4  ;;  %v7040_v8 = vsel %vm16181_vm6, %v17889_v14, %v17968_v12  ;;  %v15860_v3 = vld [vmem:[#allocation2 + $0xc] sm:$0xff]  }
 0x40e   : > { %7010 = vst [vmem:[#allocation2 + $0x44] sm:$0x1] %v7009_v0  ;;  %7017 = vst [vmem:[#allocation2 + $0x50] sm:$0x1] %v7016_v24  ;;  %v7023_v33 = vsel %vm16188_vm7, %v19300_v21, %v7022_v46  ;;  %v7030_v28 = vsel %vm16188_vm7, %v19301_v60, %v7029_v15  ;;  %v19303_v57 = vrot.slane %v17891_v4, 4  ;;  %v7054_v2 = vsel %vm16181_vm6, %v17912_v52, %v7053_v41  ;;  %v19308_v35 = vld [vmem:[#allocation12_spill] sm:$0xff] }
 0x40f   : > { %7024 = vst [vmem:[#allocation2 + $0x5c] sm:$0x1] %v7023_v33  ;;  %v7037_v46 = vsel %vm16188_vm7, %v19302_v49, %v7036_v45  ;;  %7084 = vst [vmem:[#allocation2 + $0xc4] sm:$0xf] %v6926_v17  ;;  %v19304_v45 = vrot.slane %v17901_v27, 4  ;;  %v19305_v14 = vrot.slane %v17914_v18, 4  ;;  %v7061_v27 = vsel %vm16181_vm6, %v17932_v38, %v7060_v9  ;;  %14762 = vmatmul.mubr.bf16.vlgmr.msra.gmra.mrb[0].mxu1 %v15860_v3 }
 0x410   : > { %7020 = vst [vmem:[#allocation2 + $0x54] sm:$0xf] %v7019_v42  ;;  %7027 = vst [vmem:[#allocation2 + $0x60] sm:$0xf] %v7026_v61  ;;  %v7044_v47 = vsel %vm16188_vm7, %v19303_v57, %v7043_v22  ;;  %v19306_v7 = vrot.slane %v17925_v39, 4  ;;  %v7068_v52 = vsel %vm16181_vm6, %v17945_v1, %v7067_v53  ;;  %v15864_v18 = vld [vmem:[%s19241_s2 + $0x48] sm:$0xff]   ;;  %v7075_v26 = vsel %vm16181_vm6, %v19308_v35, %v7074_v10 }
 0x411   : > { %7031 = vst [vmem:[#allocation2 + $0x68] sm:$0x1] %v7030_v28  ;;  %7038 = vst [vmem:[#allocation2 + $0x74] sm:$0x1] %v7037_v46  ;;  %v7051_v11 = vsel %vm16188_vm7, %v19304_v45, %v7050_v44  ;;  %v7058_v4 = vsel %vm16188_vm7, %v19305_v14, %v7057_v43  ;;  %v19307_v38 = vrot.slane %v17936_v36, 4  ;;  %v7082_v1 = vsel %vm16181_vm6, %v17981_v62, %v7081_v31  ;;  %v15862_v12 = vld [vmem:[#allocation2 + $0x18] sm:$0xff]  }
 0x412   : > { %7034 = vst [vmem:[#allocation2 + $0x6c] sm:$0xf] %v7033_v48  ;;  %7041 = vst [vmem:[#allocation2 + $0x78] sm:$0xf] %v7040_v8  ;;  %v7065_v32 = vsel %vm16188_vm7, %v19306_v7, %v7064_v5  ;;  %v7086_v15 = vsel %vm16188_vm7, %v6927_v50, %v7085_v63  ;;  %14765 = vmatprep.mubr.bf16.mxu1 %v15862_v12  ;;  %v19309_v36 = vld [vmem:[#allocation13_spill] sm:$0xff]  ;;  %v15873_v22 = vld [vmem:[%s19241_s2 + $0x60] sm:$0xff]  }
 0x413   : > { %7045 = vst [vmem:[#allocation2 + $0x80] sm:$0x1] %v7044_v47  ;;  %7052 = vst [vmem:[#allocation2 + $0x8c] sm:$0x1] %v7051_v11  ;;  %v7072_v39 = vsel %vm16188_vm7, %v19307_v38, %v7071_v29  ;;  %14794 = vmatpush3.bf16.msra.mxu1 %v19309_v36  ;;  %v15863_v62 = vld [vmem:[#allocation2 + $0x24] sm:$0xff]   ;;  %v15865_v23 = vld [vmem:[#allocation2 + $0x30] sm:$0xff]  }
 0x414   : > { %7048 = vst [vmem:[#allocation2 + $0x84] sm:$0xf] %v7047_v37  ;;  %7055 = vst [vmem:[#allocation2 + $0x90] sm:$0xf] %v7054_v2  ;;  %14795 = vmatprep.subr.bf16.mxu1 %v15864_v18  ;;  %v15866_v41 = vld [vmem:[#allocation2 + $0x3c] sm:$0xff]   ;;  %v15876_v25 = vld [vmem:[%s19241_s2 + $0x68] sm:$0xff]  }
 0x415   : > { %7059 = vst [vmem:[#allocation2 + $0x98] sm:$0x1] %v7058_v4  ;;  %7066 = vst [vmem:[#allocation2 + $0xa4] sm:$0x1] %v7065_v32  ;;  %v15868_v44 = vld [vmem:[#allocation2 + $0x48] sm:$0xff]   ;;  %v15879_v56 = vld [vmem:[%s19241_s2 + $0x70] sm:$0xff]  }
 0x416   : > { %7062 = vst [vmem:[#allocation2 + $0x9c] sm:$0xf] %v7061_v27  ;;  %7069 = vst [vmem:[#allocation2 + $0xa8] sm:$0xf] %v7068_v52  ;;  %v15882_v54 = vld [vmem:[%s19241_s2 + $0x78] sm:$0xff]   ;;  %v18109_v43 = vld [vmem:[%s19241_s2 + $0x80] sm:$0xff]  }
 0x417   : > { %7073 = vst [vmem:[#allocation2 + $0xb0] sm:$0x1] %v7072_v39  ;;  %7087 = vst [vmem:[#allocation2 + $0xc8] sm:$0x1] %v7086_v15  ;;  %14796 = vmatpush3.bf16.msra.mxu1 %v15864_v18  ;;  %v15869_v20 = vld [vmem:[#allocation2 + $0x54] sm:$0xff]   ;;  %v15871_v40 = vld [vmem:[#allocation2 + $0x60] sm:$0xff]  }
 0x418   : > { %7076 = vst [vmem:[#allocation2 + $0xb4] sm:$0xf] %v7075_v26  ;;  %7083 = vst [vmem:[#allocation2 + $0xc0] sm:$0xf] %v7082_v1  ;;  %14797 = vmatprep.subr.bf16.mxu1 %v15867_v19  ;;  %14766 = vmatmul.mubr.bf16.gmra.mrb[4].mxu1 %v15863_v62  ;;  %v7473_v53 = vld [vmem:[#allocation2] sm:$0xf] }
 0x419   : > { %14769 = vmatprep.mubr.bf16.mxu1 %v15865_v23  ;;  %v7474_v9 = vld [vmem:[#allocation2 + $0x4] sm:$0xf]  ;;  %v15872_v5 = vld [vmem:[#allocation2 + $0x6c] sm:$0xff]   ;;  %v7522_v6 = vshrl.u32 %v7473_v53, 16  ;;  %v7525_v50 = vshll.u32 %v7473_v53, 16  ;;  %v15874_v34 = vld [vmem:[#allocation2 + $0x78] sm:$0xff]  }
 0x41a   : > { %v7531_v55 = vshll.u32 %v7474_v9, 16  ;;  %v7535_v30 = vshrl.u32 %v7474_v9, 16  ;;  %v7476_v29 = vld [vmem:[#allocation2 + $0xc] sm:$0xf]  ;;  %v7477_v58 = vld [vmem:[#allocation2 + $0x10] sm:$0xf] }
 0x41b   : > { %14798 = vmatpush3.bf16.msra.mxu1 %v15867_v19  ;;  %v7524_v31 = vrot.slane %v7522_v6, 4  ;;  %v7527_v10 = vrot.slane %v7525_v50, 5  ;;  %v7475_v0 = vld [vmem:[#allocation2 + $0x8] sm:$0x1]  ;;  %v7546_v16 = vshrl.u32 %v7476_v29, 16  ;;  %v7549_v59 = vshll.u32 %v7476_v29, 16 }
 0x41c   : > { %14799 = vmatprep.subr.bf16.mxu1 %v15870_v13  ;;  %v18112_v63 = vrot.slane %v7531_v55, 5  ;;  %v7537_v51 = vrot.slane %v7535_v30, 4  ;;  %v7479_v24 = vld [vmem:[#allocation2 + $0x18] sm:$0xf]  ;;  %v7480_v17 = vld [vmem:[#allocation2 + $0x1c] sm:$0xf] }
 0x41d   : > { %v7555_v42 = vshll.u32 %v7477_v58, 16  ;;  %v7559_v21 = vshrl.u32 %v7477_v58, 16  ;;  %v15875_v33 = vld [vmem:[#allocation2 + $0x84] sm:$0xff]   ;;  %v7528_v61 = vor.u32 %v7527_v10, %v7524_v31  ;;  %v7541_v28 = vshll.u32 %v7475_v0, 16  ;;  %v15877_v48 = vld [vmem:[#allocation2 + $0x90] sm:$0xff]   ;;  %v15878_v62 = vld [vmem:[#allocation2 + $0x9c] sm:$0xff]  }
 0x41e   : > { %v7538_v60 = vor.u32 %v7537_v51, %v18112_v63  ;;  %v7548_v49 = vrot.slane %v7546_v16, 4  ;;  %v7551_v46 = vrot.slane %v7549_v59, 5  ;;  %v7570_v8 = vshrl.u32 %v7479_v24, 16  ;;  %v7478_v47 = vld [vmem:[#allocation2 + $0x14] sm:$0x1] }
 0x41f   : > { %14800 = vmatpush3.bf16.msra.mxu1 %v15870_v13  ;;  %v7579_v57 = vshll.u32 %v7480_v17, 16  ;;  %v7573_v37 = vshll.u32 %v7479_v24, 16  ;;  %v7583_v45 = vshrl.u32 %v7480_v17, 16  ;;  %v18115_v11 = vrot.slane %v7555_v42, 5  ;;  %v7482_v14 = vld [vmem:[#allocation2 + $0x24] sm:$0xf] }
 0x420   : > { %14801 = vmatprep.subr.bf16.mxu1 %v15873_v22  ;;  %14770 = vmatmul.mubr.bf16.gmra.mrb[8].mxu1 %v15866_v41  ;;  %v7561_v2 = vrot.slane %v7559_v21, 4  ;;  %v7483_v4 = vld [vmem:[#allocation2 + $0x28] sm:$0xf]  ;;  %v7529_v27 = vrot.slane %v7528_v61, 4  ;;  %v7539_v7 = vrot.slane %v7538_v60, 4  ;;  %v7543_v32 = vrot.slane %v7541_v28, 5 }
 0x421   : > { %14773 = vmatprep.mubr.bf16.mxu1 %v15868_v44  ;;  %v7481_v52 = vld [vmem:[#allocation2 + $0x20] sm:$0x1]  ;;  %v7552_v3 = vor.u32 %v7551_v46, %v7548_v49  ;;  %v7565_v18 = vshll.u32 %v7478_v47, 16  ;;  %v7572_v38 = vrot.slane %v7570_v8, 4  ;;  %v18117_v39 = vrot.slane %v7579_v57, 5  ;;  %v15880_v44 = vld [vmem:[#allocation2 + $0xa8] sm:$0xff]  }
 0x422   : > { %v7485_v35 = vld [vmem:[#allocation2 + $0x30] sm:$0xf]  ;;  %v7575_v26 = vrot.slane %v7573_v37, 5  ;;  %v7585_v1 = vrot.slane %v7583_v45, 4  ;;  %v7594_v15 = vshrl.u32 %v7482_v14, 16  ;;  %v7597_v12 = vshll.u32 %v7482_v14, 16 }
 0x423   : > { %14802 = vmatpush3.bf16.msra.mxu1 %v15873_v22  ;;  %v7562_v36 = vor.u32 %v7561_v2, %v18115_v11  ;;  %v7589_v19 = vshll.u32 %v7481_v52, 16  ;;  %v7486_v13 = vld [vmem:[#allocation2 + $0x34] sm:$0xf]  ;;  %v7603_v23 = vshll.u32 %v7483_v4, 16  ;;  %v7607_v22 = vshrl.u32 %v7483_v4, 16 }
 0x424   : > { %14803 = vmatprep.subr.bf16.mxu1 %v15876_v25  ;;  %v7618_v41 = vshrl.u32 %v7485_v35, 16  ;;  %v18127_v53 = vrot.slane %v7565_v18, 5  ;;  %v7576_v9 = vor.u32 %v7575_v26, %v7572_v38  ;;  %v7596_v6 = vrot.slane %v7594_v15, 4  ;;  %v7488_v55 = vld [vmem:[#allocation2 + $0x3c] sm:$0xf]  ;;  %v15881_v21 = vld [vmem:[#allocation2 + $0xb4] sm:$0xff]  }
 0x425   : > { %v7599_v50 = vrot.slane %v7597_v12, 5  ;;  %v7563_v30 = vrot.slane %v7562_v36, 4  ;;  %v7484_v29 = vld [vmem:[#allocation2 + $0x2c] sm:$0x1]  ;;  %v7627_v31 = vshll.u32 %v7486_v13, 16  ;;  %v7631_v10 = vshrl.u32 %v7486_v13, 16 }
 0x426   : > { %v7609_v51 = vrot.slane %v7607_v22, 4  ;;  %v7620_v58 = vrot.slane %v7618_v41, 4  ;;  %v7489_v16 = vld [vmem:[#allocation2 + $0x40] sm:$0xf]  ;;  %v7642_v59 = vshrl.u32 %v7488_v55, 16  ;;  %v7645_v24 = vshll.u32 %v7488_v55, 16 }
 0x427   : > { %14804 = vmatpush3.bf16.msra.mxu1 %v15876_v25  ;;  %v7621_v25 = vshll.u32 %v7485_v35, 16  ;;  %v7491_v17 = vld [vmem:[#allocation2 + $0x48] sm:$0xf]  ;;  %v7492_v42 = vld [vmem:[#allocation2 + $0x4c] sm:$0xf]  ;;  %v7600_v60 = vor.u32 %v7599_v50, %v7596_v6  ;;  %v7613_v28 = vshll.u32 %v7484_v29, 16  ;;  %v7568_v52 = vsel %vm16385_vm10, %v7563_v30, %v18127_v53 }
 0x428   : > { %14805 = vmatprep.subr.bf16.mxu1 %v15879_v56  ;;  %14774 = vmatmul.mubr.bf16.gmra.mrb[12].mxu1 %v15869_v20  ;;  %v7534_v20 = vsel %vm16385_vm10, %v7529_v27, %v18112_v63  ;;  %v18130_v63 = vrot.slane %v7603_v23, 5  ;;  %v18136_v8 = vrot.slane %v7627_v31, 5  ;;  %v7633_v57 = vrot.slane %v7631_v10, 4  ;;  %v7490_v14 = vld [vmem:[#allocation2 + $0x44] sm:$0x1] }
 0x429   : > { %14777 = vmatprep.mubr.bf16.mxu1 %v15871_v40  ;;  %v18125_v40 = vrot.slane %v7552_v3, 4  ;;  %v7623_v0 = vrot.slane %v7621_v25, 5  ;;  %v7651_v45 = vshll.u32 %v7489_v16, 16  ;;  %v7655_v2 = vshrl.u32 %v7489_v16, 16  ;;  %v7494_v38 = vld [vmem:[#allocation2 + $0x54] sm:$0xf] }
 0x42a   : > { %v7610_v47 = vor.u32 %v7609_v51, %v18130_v63  ;;  %v7644_v4 = vrot.slane %v7642_v59, 4  ;;  %v7647_v27 = vrot.slane %v7645_v24, 5  ;;  %v18142_v3 = vrot.slane %v7600_v60, 4  ;;  %v7495_v35 = vld [vmem:[#allocation2 + $0x58] sm:$0xf] }
 0x42b   : > { %14806 = vmatpush3.bf16.msra.mxu1 %v15879_v56  ;;  %v7558_v46 = vsel %vm16385_vm10, %v18125_v40, %v18115_v11  ;;  %v7624_v37 = vor.u32 %v7623_v0, %v7620_v58  ;;  %v18144_v11 = vrot.slane %v7613_v28, 5  ;;  %v7675_v18 = vshll.u32 %v7492_v42, 16  ;;  %v7498_v6 = vld [vmem:[#allocation2 + $0x64] sm:$0xf]  ;;  %v7497_v31 = vld [vmem:[#allocation2 + $0x60] sm:$0xf] }
 0x42c   : > { %14807 = vmatprep.subr.bf16.mxu1 %v15882_v54  ;;  %v7679_v12 = vshrl.u32 %v7492_v42, 16  ;;  %v7611_v36 = vrot.slane %v7610_v47, 4  ;;  %v7634_v13 = vor.u32 %v7633_v57, %v18136_v8  ;;  %v7648_v23 = vor.u32 %v7647_v27, %v7644_v4  ;;  %v7500_v16 = vld [vmem:[#allocation2 + $0x6c] sm:$0xf]  ;;  %v7501_v59 = vld [vmem:[#allocation2 + $0x70] sm:$0xf] }
 0x42d   : > { %v7657_v22 = vrot.slane %v7655_v2, 4  ;;  %v7693_v40 = vshll.u32 %v7494_v38, 16  ;;  %v13459_v53 = vcombine.low %v7558_v46, %v7568_v52  ;;  %v7606_v55 = vsel %vm16385_vm10, %v18142_v3, %v18130_v63  ;;  %v15885_v63 = vld [vmem:[%s19241_s2 + $0x90] sm:$0xff]  }
 0x42e   : > { %v7703_v29 = vshrl.u32 %v7495_v35, 16  ;;  %v7616_v10 = vsel %vm16385_vm10, %v7611_v36, %v18144_v11  ;;  %v7635_v51 = vrot.slane %v7634_v13, 4  ;;  %v18169_v24 = vrot.slane %v7648_v23, 4  ;;  %v7504_v13 = vld [vmem:[#allocation2 + $0x7c] sm:$0xf] }
 0x42f   : > { %14808 = vmatpush3.bf16.msra.mxu1 %v15882_v54  ;;  %v7544_v54 = vsel %vm16385_vm10, %v7539_v7, %v7543_v32  ;;  %v7666_v7 = vshrl.u32 %v7491_v17, 16  ;;  %v7669_v32 = vshll.u32 %v7491_v17, 16  ;;  %v7714_v28 = vshrl.u32 %v7497_v31, 16 }
 0x430   : > { %14841 = vmatprep.subr.bf16.mxu1 %v18109_v43  ;;  %14778 = vmatmul.mubr.bf16.gmra.mrb[16].mxu1 %v15872_v5  ;;  %v7586_v5 = vor.u32 %v7585_v1, %v18117_v39  ;;  %v13458_v49 = vcombine.low %v7534_v20, %v7544_v54  ;;  %v18159_v20 = vrot.slane %v7675_v18, 5  ;;  %v7690_v54 = vshrl.u32 %v7494_v38, 16  ;;  %v15886_v18 = vld [vmem:[%s19241_s2 + $0x98] sm:$0xff]   ;;  %v7499_v38 = vld [vmem:[#allocation2 + $0x68] sm:$0x1] }
 0x431   : > { %14781 = vmatprep.mubr.bf16.mxu1 %v15874_v34  ;;  %v7591_v34 = vrot.slane %v7589_v19, 5  ;;  %v18151_v19 = vrot.slane %v7624_v37, 4  ;;  %v7668_v41 = vrot.slane %v7666_v7, 4  ;;  %v7671_v25 = vrot.slane %v7669_v32, 5 }
 0x432   : > { %v7587_v61 = vrot.slane %v7586_v5, 4  ;;  %v7699_v5 = vshll.u32 %v7495_v35, 16  ;;  %v7692_v42 = vrot.slane %v7690_v54, 4  ;;  %v7717_v46 = vshll.u32 %v7497_v31, 16 }
 0x433   : > { %v7672_v0 = vor.u32 %v7671_v25, %v7668_v41  ;;  %v7723_v57 = vshll.u32 %v7498_v6, 16  ;;  %v7727_v47 = vshrl.u32 %v7498_v6, 16  ;;  %v7741_v4 = vshll.u32 %v7500_v16, 16 }
 0x434   : > { %v7592_v1 = vsel %vm16385_vm10, %v7587_v61, %v7591_v34  ;;  %v7493_v34 = vld [vmem:[#allocation2 + $0x50] sm:$0x1]  ;;  %v18182_v60 = vrot.slane %v7699_v5, 5  ;;  %v7751_v27 = vshrl.u32 %v7501_v59, 16  ;;  %v13461_v7 = vcombine.low %v7606_v55, %v7616_v10  ;;  %v7502_v55 = vld [vmem:[#allocation2 + $0x74] sm:$0x1] }
 0x435   : > { %v7685_v2 = vshll.u32 %v7493_v34, 16  ;;  %v7716_v3 = vrot.slane %v7714_v28, 4  ;;  %v7719_v35 = vrot.slane %v7717_v46, 5  ;;  %v7771_v34 = vshll.u32 %v7504_v13, 16  ;;  %v7509_v28 = vld [vmem:[#allocation2 + $0x90] sm:$0xf] }
 0x436   : > { %v7753_v25 = vrot.slane %v7751_v27, 4  ;;  %v7813_v27 = vshll.u32 %v7509_v28, 16 }
 0x437   : > { %v7687_v36 = vrot.slane %v7685_v2, 5  ;;  %v7720_v5 = vor.u32 %v7719_v35, %v7716_v3 }
 0x438   : > { %14782 = vmatmul.mubr.bf16.gmra.mrb[20].mxu1 %v15875_v33  ;;  %v7577_v33 = vrot.slane %v7576_v9, 4  ;;  %v7681_v9 = vrot.slane %v7679_v12, 4 }
 0x439   : > { %14785 = vmatprep.mubr.bf16.mxu1 %v15877_v48  ;;  %v7487_v48 = vld [vmem:[#allocation2 + $0x38] sm:$0x1] }
 0x43a   : > { %v7582_v26 = vsel %vm16385_vm10, %v7577_v33, %v18117_v39  ;;  %v7637_v15 = vshll.u32 %v7487_v48, 16  ;;  %v15884_v39 = vld [vmem:[%s19241_s2 + $0x88] sm:$0xff]   ;;  %v7630_v33 = vsel %vm16385_vm10, %v18151_v19, %v18136_v8  ;;  %v7682_v61 = vor.u32 %v7681_v9, %v18159_v20  ;;  %v7496_v48 = vld [vmem:[#allocation2 + $0x5c] sm:$0x1] }
 0x43b   : > { %v13460_v50 = vcombine.low %v7582_v26, %v7592_v1  ;;  %v7747_v8 = vshll.u32 %v7501_v59, 16  ;;  %v18190_v26 = vrot.slane %v7723_v57, 5  ;;  %v7729_v1 = vrot.slane %v7727_v47, 4  ;;  %v7510_v57 = vld [vmem:[#allocation2 + $0x94] sm:$0xf] }
 0x43c   : > { %v7639_v30 = vrot.slane %v7637_v15, 5  ;;  %v7683_v32 = vrot.slane %v7682_v61, 4  ;;  %v7709_v19 = vshll.u32 %v7496_v48, 16  ;;  %v15888_v61 = vld [vmem:[%s19241_s2 + $0xa8] sm:$0xff]   ;;  %v7823_v3 = vshrl.u32 %v7510_v57, 16 }
 0x43d   : > { %v18196_v41 = vrot.slane %v7747_v8, 5  ;;  %v7730_v6 = vor.u32 %v7729_v1, %v18190_v26  ;;  %v7810_v8 = vshrl.u32 %v7509_v28, 16 }
 0x43e   : > { %v7640_v37 = vsel %vm16385_vm10, %v7635_v51, %v7639_v30  ;;  %v7711_v31 = vrot.slane %v7709_v19, 5 }
 0x43f   : > { %v13462_v15 = vcombine.low %v7630_v33, %v7640_v37  ;;  %v7754_v51 = vor.u32 %v7753_v25, %v18196_v41  ;;  %v7757_v33 = vshll.u32 %v7502_v55, 16  ;;  %v7511_v55 = vld [vmem:[#allocation2 + $0x98] sm:$0x1] }
 0x440   : > { %14786 = vmatmul.mubr.bf16.gmra.mrb[24].mxu1 %v15878_v62  ;;  %v18154_v62 = vrot.slane %v7651_v45, 5  ;;  %v7673_v45 = vrot.slane %v7672_v0, 4 }
 0x441   : > { %14789 = vmatprep.mubr.bf16.mxu1 %v15880_v44  ;;  %v7661_v44 = vshll.u32 %v7490_v14, 16  ;;  %v7738_v14 = vshrl.u32 %v7500_v16, 16  ;;  %v7755_v37 = vrot.slane %v7754_v51, 4 }
 0x442   : > { %v7658_v58 = vor.u32 %v7657_v22, %v18154_v62  ;;  %v7654_v12 = vsel %vm16385_vm10, %v18169_v24, %v18154_v62  ;;  %v7743_v22 = vrot.slane %v7741_v4, 5  ;;  %v7678_v54 = vsel %vm16385_vm10, %v7673_v45, %v18159_v20  ;;  %v7506_v24 = vld [vmem:[#allocation2 + $0x84] sm:$0xf] }
 0x443   : > { %v18171_v17 = vrot.slane %v7661_v44, 5  ;;  %v7740_v23 = vrot.slane %v7738_v14, 4  ;;  %v7786_v45 = vshrl.u32 %v7506_v24, 16  ;;  %v7789_v2 = vshll.u32 %v7506_v24, 16 }
 0x445   : > { %v7744_v10 = vor.u32 %v7743_v22, %v7740_v23  ;;  %v7812_v23 = vrot.slane %v7810_v8, 4  ;;  %v7815_v22 = vrot.slane %v7813_v27, 5 }
 0x447   : > { %v7745_v47 = vrot.slane %v7744_v10, 4  ;;  %v7516_v10 = vld [vmem:[#allocation2 + $0xac] sm:$0xf] }
 0x448   : > { %14790 = vmatmul.mubr.bf16.gmra.mrb[28].mxu1 %v15881_v21  ;;  %v7695_v21 = vrot.slane %v7693_v40, 5  ;;  %v7733_v40 = vshll.u32 %v7499_v38, 16  ;;  %v7871_v28 = vshrl.u32 %v7516_v10, 16 }
 0x449   : > { %14809 = vmatprep.mubr.bf16.mxu1 %v13458_v49  ;;  %v7705_v49 = vrot.slane %v7703_v29, 4  ;;  %v7775_v29 = vshrl.u32 %v7504_v13, 16 }
 0x44a   : > { %v7696_v52 = vor.u32 %v7695_v21, %v7692_v42  ;;  %v7735_v59 = vrot.slane %v7733_v40, 5  ;;  %v7721_v42 = vrot.slane %v7720_v5, 4  ;;  %v7731_v21 = vrot.slane %v7730_v6, 4 }
 0x44b   : > { %v7706_v11 = vor.u32 %v7705_v49, %v18182_v60  ;;  %v7777_v46 = vrot.slane %v7775_v29, 4 }
 0x44c   : > { %v18204_v62 = vrot.slane %v7696_v52, 4  ;;  %v7819_v52 = vshll.u32 %v7510_v57, 16 }
 0x44d   : > { %v18208_v9 = vrot.slane %v7706_v11, 4  ;;  %v15889_v11 = vld [vmem:[%s19241_s2 + $0xb0] sm:$0xff]  }
 0x44e   : > { %v7702_v16 = vsel %vm16385_vm10, %v18204_v62, %v18182_v60  ;;  %v18225_v60 = vrot.slane %v7771_v34, 5  ;;  %v7816_v34 = vor.u32 %v7815_v22, %v7812_v23 }
 0x450   : > { %14810 = vmatmul.mubr.bf16.vlgmr.msra.gmra.mrb[0].mxu1 %v13459_v53  ;;  %v7688_v53 = vsel %vm16385_vm10, %v7683_v32, %v7687_v36  ;;  %v7759_v32 = vrot.slane %v7757_v33, 5  ;;  %v7778_v35 = vor.u32 %v7777_v46, %v18225_v60  ;;  %v7791_v36 = vrot.slane %v7789_v2, 5 }
 0x451   : > { %14813 = vmatprep.mubr.bf16.mxu1 %v13460_v50  ;;  %14842 = vmatpush3.bf16.msra.mxu1 %v18109_v43  ;;  %v7659_v43 = vrot.slane %v7658_v58, 4  ;;  %v15887_v50 = vld [vmem:[%s19241_s2 + $0xa0] sm:$0xff]   ;;  %v13464_v0 = vcombine.low %v7678_v54, %v7688_v53  ;;  %v7512_v54 = vld [vmem:[#allocation2 + $0x9c] sm:$0xf]  ;;  %v7817_v46 = vrot.slane %v7816_v34, 4 }
 0x452   : > { %14843 = vmatprep.subr.bf16.mxu1 %v15884_v39  ;;  %v7779_v53 = vrot.slane %v7778_v35, 4  ;;  %v7834_v29 = vshrl.u32 %v7512_v54, 16  ;;  %v7514_v35 = vld [vmem:[#allocation2 + $0xa4] sm:$0x1]  ;;  %v7520_v34 = vld [vmem:[#allocation2 + $0xbc] sm:$0x1] }
 0x453   : > { %v7664_v44 = vsel %vm16385_vm10, %v7659_v43, %v18171_v17  ;;  %v7507_v17 = vld [vmem:[#allocation2 + $0x88] sm:$0xf]  ;;  %v7505_v43 = vld [vmem:[#allocation2 + $0x80] sm:$0x1] }
 0x454   : > { %v13463_v58 = vcombine.low %v7654_v12, %v7664_v44  ;;  %v7795_v14 = vshll.u32 %v7507_v17, 16  ;;  %v7799_v4 = vshrl.u32 %v7507_v17, 16  ;;  %v7781_v1 = vshll.u32 %v7505_v43, 16 }
 0x455   : > { %14844 = vmatpush3.bf16.msra.mxu1 %v15884_v39  ;;  %v7503_v39 = vld [vmem:[#allocation2 + $0x78] sm:$0xf]  ;;  %v7788_v12 = vrot.slane %v7786_v45, 4  ;;  %v7825_v44 = vrot.slane %v7823_v3, 4  ;;  %v7836_v57 = vrot.slane %v7834_v29, 4 }
 0x456   : > { %14845 = vmatprep.subr.bf16.mxu1 %v15885_v63  ;;  %v7762_v30 = vshrl.u32 %v7503_v39, 16  ;;  %v7765_v20 = vshll.u32 %v7503_v39, 16  ;;  %v18241_v19 = vrot.slane %v7795_v14, 5  ;;  %v7801_v13 = vrot.slane %v7799_v4, 4  ;;  %v7519_v4 = vld [vmem:[#allocation2 + $0xb8] sm:$0xf] }
 0x457   : > { %v18243_v39 = vrot.slane %v7819_v52, 5  ;;  %v7783_v6 = vrot.slane %v7781_v1, 5  ;;  %v7518_v52 = vld [vmem:[#allocation2 + $0xb4] sm:$0xf]  ;;  %v7895_v23 = vshrl.u32 %v7519_v4, 16 }
 0x458   : > { %14814 = vmatmul.mubr.bf16.gmra.mrb[4].mxu1 %v13461_v7  ;;  %v7764_v48 = vrot.slane %v7762_v30, 4  ;;  %v7767_v49 = vrot.slane %v7765_v20, 5  ;;  %v7726_v7 = vsel %vm16385_vm10, %v7721_v42, %v18190_v26  ;;  %v7760_v26 = vsel %vm16385_vm10, %v7755_v37, %v7759_v32 }
 0x459   : > { %14817 = vmatprep.mubr.bf16.mxu1 %v13462_v15  ;;  %14846 = vmatpush3.bf16.msra.mxu1 %v15885_v63  ;;  %v7712_v63 = vsel %vm16385_vm10, %v18208_v9, %v7711_v31  ;;  %v7750_v15 = vsel %vm16385_vm10, %v7745_v47, %v18196_v41  ;;  %v15890_v41 = vld [vmem:[%s19241_s2 + $0xb8] sm:$0xff]   ;;  %v7513_v9 = vld [vmem:[#allocation2 + $0xa0] sm:$0xf]  ;;  %v7792_v30 = vor.u32 %v7791_v36, %v7788_v12  ;;  %v7515_v31 = vld [vmem:[#allocation2 + $0xa8] sm:$0xf]  ;;  %v7829_v42 = vshll.u32 %v7511_v55, 16 }
 0x45a   : > { %14847 = vmatprep.subr.bf16.mxu1 %v15886_v18  ;;  %v7768_v38 = vor.u32 %v7767_v49, %v7764_v48  ;;  %v13465_v25 = vcombine.low %v7702_v16, %v7712_v63  ;;  %v13467_v5 = vcombine.low %v7750_v15, %v7760_v26  ;;  %v7802_v20 = vor.u32 %v7801_v13, %v18241_v19  ;;  %v7517_v26 = vld [vmem:[#allocation2 + $0xb0] sm:$0x1] }
 0x45b   : > { %v7826_v51 = vor.u32 %v7825_v44, %v18243_v39  ;;  %v7847_v16 = vshrl.u32 %v7513_v9, 16  ;;  %v7784_v17 = vsel %vm16385_vm10, %v7779_v53, %v7783_v6  ;;  %v7861_v33 = vshll.u32 %v7515_v31, 16  ;;  %v8292_v6 = vld [vmem:[#allocation2 + $0x4] sm:$0xf] }
 0x45c   : > { %v7769_v40 = vrot.slane %v7768_v38, 4  ;;  %v7793_v48 = vrot.slane %v7792_v30, 4  ;;  %v7803_v49 = vrot.slane %v7802_v20, 4  ;;  %v7831_v14 = vrot.slane %v7829_v42, 5 }
 0x45d   : > { %14848 = vmatpush3.bf16.msra.mxu1 %v15886_v18  ;;  %v7736_v18 = vsel %vm16385_vm10, %v7731_v21, %v7735_v59  ;;  %v18253_v59 = vld [vmem:[%s19241_s2 + $0xc0] sm:$0xff]   ;;  %v7858_v21 = vshrl.u32 %v7515_v31, 16  ;;  %v7827_v47 = vrot.slane %v7826_v51, 4  ;;  %v7849_v45 = vrot.slane %v7847_v16, 4  ;;  %v8293_v16 = vld [vmem:[#allocation2 + $0x8] sm:$0x1] }
 0x45e   : > { %14849 = vmatprep.subr.bf16.mxu1 %v15887_v50  ;;  %v13466_v62 = vcombine.low %v7726_v7, %v7736_v18  ;;  %v7774_v24 = vsel %vm16385_vm10, %v7769_v40, %v18225_v60  ;;  %v7863_v27 = vrot.slane %v7861_v33, 5  ;;  %v7873_v32 = vrot.slane %v7871_v28, 4 }
 0x45f   : > { %v13468_v60 = vcombine.low %v7774_v24, %v7784_v17  ;;  %v7860_v8 = vrot.slane %v7858_v21, 4  ;;  %v7798_v3 = vsel %vm16385_vm10, %v7793_v48, %v18241_v19  ;;  %v7822_v18 = vsel %vm16385_vm10, %v7817_v46, %v18243_v39  ;;  %v8295_v46 = vld [vmem:[#allocation2 + $0x10] sm:$0xf] }
 0x460   : > { %14818 = vmatmul.mubr.bf16.gmra.mrb[8].mxu1 %v13463_v58  ;;  %v7837_v58 = vshll.u32 %v7512_v54, 16  ;;  %v7832_v38 = vsel %vm16385_vm10, %v7827_v47, %v7831_v14  ;;  %v7882_v12 = vshrl.u32 %v7518_v52, 16  ;;  %v7885_v36 = vshll.u32 %v7518_v52, 16  ;;  %v8298_v47 = vld [vmem:[#allocation2 + $0x1c] sm:$0xf] }
 0x461   : > { %14821 = vmatprep.mubr.bf16.mxu1 %v13464_v0  ;;  %14850 = vmatpush3.bf16.msra.mxu1 %v15887_v50  ;;  %v7508_v50 = vld [vmem:[#allocation2 + $0x8c] sm:$0x1]  ;;  %v7843_v0 = vshll.u32 %v7513_v9, 16  ;;  %v7891_v13 = vshll.u32 %v7519_v4, 16  ;;  %v7864_v22 = vor.u32 %v7863_v27, %v7860_v8  ;;  %v7853_v44 = vshll.u32 %v7514_v35, 16 }
 0x462   : > { %14851 = vmatprep.subr.bf16.mxu1 %v15888_v61  ;;  %v7805_v63 = vshll.u32 %v7508_v50, 16  ;;  %v7839_v37 = vrot.slane %v7837_v58, 5  ;;  %v13470_v54 = vcombine.low %v7822_v18, %v7832_v38  ;;  %v7877_v40 = vshll.u32 %v7517_v26, 16  ;;  %v8301_v38 = vld [vmem:[#allocation2 + $0x28] sm:$0xf] }
 0x463   : > { %v7845_v43 = vrot.slane %v7843_v0, 5  ;;  %v7884_v39 = vrot.slane %v7882_v12, 4  ;;  %v7887_v53 = vrot.slane %v7885_v36, 5  ;;  %v7893_v9 = vrot.slane %v7891_v13, 5  ;;  %v8291_v0 = vld [vmem:[#allocation2] sm:$0xe] }
 0x464   : > { %v7807_v2 = vrot.slane %v7805_v63, 5  ;;  %v7840_v1 = vor.u32 %v7839_v37, %v7836_v57  ;;  %v7865_v50 = vrot.slane %v7864_v22, 4  ;;  %v7855_v30 = vrot.slane %v7853_v44, 5 }
 0x465   : > { %14852 = vmatpush3.bf16.msra.mxu1 %v15888_v61  ;;  %v7867_v61 = vshll.u32 %v7516_v10, 16  ;;  %v7850_v15 = vor.u32 %v7849_v45, %v7845_v43  ;;  %v7879_v20 = vrot.slane %v7877_v40, 5  ;;  %v8389_v29 = vrot.slane %v8292_v6, 5  ;;  %v8307_v6 = vld [vmem:[#allocation2 + $0x40] sm:$0xf] }
 0x466   : > { %14853 = vmatprep.subr.bf16.mxu1 %v15889_v11  ;;  %v7888_v51 = vor.u32 %v7887_v53, %v7884_v39  ;;  %v7901_v63 = vshll.u32 %v7520_v34, 16  ;;  %v13482_v21 = vrot.slane %v8291_v0, 9  ;;  %v8396_v14 = vrot.slane %v8295_v46, 5  ;;  %v8303_v53 = vld [vmem:[#allocation2 + $0x30] sm:$0xe] }
 0x467   : > { %v7869_v7 = vrot.slane %v7867_v61, 5  ;;  %v8391_v33 = vrot.slane %v8389_v29, 4  ;;  %v8392_v61 = vrot.slane %v8293_v16, 5  ;;  %v8403_v4 = vrot.slane %v8298_v47, 5 }
 0x468   : > { %14822 = vmatmul.mubr.bf16.gmra.mrb[12].mxu1 %v13465_v25  ;;  %v7889_v48 = vrot.slane %v7888_v51, 4  ;;  %v7903_v57 = vrot.slane %v7901_v63, 5  ;;  %v8398_v52 = vrot.slane %v8396_v14, 4  ;;  %v8410_v13 = vrot.slane %v8301_v38, 5  ;;  %v15894_v63 = vld [vmem:[%s19241_s2 + $0xd8] sm:$0xff]  }
 0x469   : > { %14825 = vmatprep.mubr.bf16.mxu1 %v13466_v62  ;;  %14854 = vmatpush3.bf16.msra.mxu1 %v15889_v11  ;;  %v7808_v11 = vsel %vm16385_vm10, %v7803_v49, %v7807_v2  ;;  %v7874_v19 = vor.u32 %v7873_v32, %v7869_v7  ;;  %v7851_v62 = vrot.slane %v7850_v15, 4  ;;  %v7870_v24 = vsel %vm16385_vm10, %v7865_v50, %v7869_v7  ;;  %v8294_v7 = vld [vmem:[#allocation2 + $0xc] sm:$0xe]  ;;  %v8296_v32 = vld [vmem:[#allocation2 + $0x14] sm:$0x1] }
 0x46a   : > { %14855 = vmatprep.subr.bf16.mxu1 %v15890_v41  ;;  %v13469_v25 = vcombine.low %v7798_v3, %v7808_v11  ;;  %v8393_v45 = vsel %vm16609_vm13, %v8391_v33, %v8392_v61  ;;  %v8297_v3 = vld [vmem:[#allocation2 + $0x18] sm:$0xe]  ;;  %v8299_v11 = vld [vmem:[#allocation2 + $0x20] sm:$0x1]  ;;  %v8405_v18 = vrot.slane %v8403_v4, 4  ;;  %v13483_v35 = vrot.slane %v8294_v7, 9 }
 0x46b   : > { %v7875_v55 = vrot.slane %v7874_v19, 4  ;;  %v7856_v10 = vsel %vm16385_vm10, %v7851_v62, %v7855_v30  ;;  %v8304_v15 = vld [vmem:[#allocation2 + $0x34] sm:$0xf]  ;;  %v13484_v26 = vrot.slane %v8297_v3, 9  ;;  %v8406_v12 = vrot.slane %v8299_v11, 5  ;;  %v15892_v62 = vld [vmem:[%s19241_s2 + $0xc8] sm:$0xff]  }
 0x46c   : > { %v8417_v22 = vrot.slane %v8304_v15, 5  ;;  %v8397_v19 = vsel %vm16609_vm13, %v13483_v35, %v8396_v14  ;;  %v8412_v39 = vrot.slane %v8410_v13, 4  ;;  %v8310_v30 = vld [vmem:[#allocation2 + $0x4c] sm:$0xf]  ;;  %v8309_v33 = vld [vmem:[#allocation2 + $0x48] sm:$0xe] }
 0x46d   : > { %14856 = vmatpush3.bf16.msra.mxu1 %v15890_v41  ;;  %v7841_v41 = vrot.slane %v7840_v1, 4  ;;  %v7880_v17 = vsel %vm16385_vm10, %v7875_v55, %v7879_v20  ;;  %v8399_v1 = vrot.slane %v8296_v32, 5  ;;  %v8404_v44 = vsel %vm16609_vm13, %v13484_v26, %v8403_v4  ;;  %v8311_v61 = vld [vmem:[#allocation2 + $0x50] sm:$0x1]  ;;  %v8314_v7 = vld [vmem:[#allocation2 + $0x5c] sm:$0x1] }
 0x46e   : > { %14889 = vmatprep.subr.bf16.mxu1 %v18253_v59  ;;  %v13472_v28 = vcombine.low %v7870_v24, %v7880_v17  ;;  %v13486_v20 = vrot.slane %v8303_v53, 9  ;;  %v8306_v24 = vld [vmem:[#allocation2 + $0x3c] sm:$0xe]  ;;  %v8308_v17 = vld [vmem:[#allocation2 + $0x44] sm:$0x1]  ;;  %v13488_v47 = vrot.slane %v8309_v33, 9 }
 0x46f   : > { %v7846_v31 = vsel %vm16385_vm10, %v7841_v41, %v7845_v43  ;;  %v8390_v43 = vsel %vm16609_vm13, %v13482_v21, %v8389_v29  ;;  %v8400_v36 = vsel %vm16609_vm13, %v8398_v52, %v8399_v1  ;;  %v8302_v41 = vld [vmem:[#allocation2 + $0x2c] sm:$0x1]  ;;  %v15893_v29 = vld [vmem:[%s19241_s2 + $0xd0] sm:$0xff]   ;;  %v8427_v46 = vrot.slane %v8308_v17, 5  ;;  %v8315_v32 = vld [vmem:[#allocation2 + $0x60] sm:$0xe] }
 0x470   : > { %14826 = vmatmul.mubr.bf16.gmra.mrb[16].mxu1 %v13467_v5  ;;  %v7897_v5 = vrot.slane %v7895_v23, 4  ;;  %v13471_v42 = vcombine.low %v7846_v31, %v7856_v10  ;;  %v13514_v8 = vcombine.low %v8390_v43, %v8393_v45  ;;  %v8407_v23 = vsel %vm16609_vm13, %v8405_v18, %v8406_v12  ;;  %v15895_v45 = vld [vmem:[%s19241_s2 + $0xe0] sm:$0xff]   ;;  %v8317_v11 = vld [vmem:[#allocation2 + $0x68] sm:$0x1]  ;;  %v8319_v15 = vld [vmem:[#allocation2 + $0x70] sm:$0xf] }
 0x471   : > { %14829 = vmatprep.mubr.bf16.mxu1 %v13468_v60  ;;  %v7894_v60 = vsel %vm16385_vm10, %v7889_v48, %v7893_v9  ;;  %v13516_v40 = vcombine.low %v8404_v44, %v8407_v23  ;;  %v8413_v55 = vrot.slane %v8302_v41, 5  ;;  %v8424_v10 = vrot.slane %v8307_v6, 5  ;;  %v8313_v48 = vld [vmem:[#allocation2 + $0x58] sm:$0xf]  ;;  %v15896_v18 = vld [vmem:[%s19241_s2 + $0xe8] sm:$0xff]  }
 0x472   : > { %v7898_v58 = vor.u32 %v7897_v5, %v7893_v9  ;;  %v8305_v9 = vld [vmem:[#allocation2 + $0x38] sm:$0x1]  ;;  %v8419_v5 = vrot.slane %v8417_v22, 4  ;;  %v8418_v16 = vsel %vm16609_vm13, %v13486_v20, %v8417_v22  ;;  %v8434_v43 = vrot.slane %v8311_v61, 5  ;;  %v15897_v22 = vld [vmem:[%s19241_s2 + $0xf0] sm:$0xff]  }
 0x473   : > { %v8420_v34 = vrot.slane %v8305_v9, 5  ;;  %v8414_v31 = vsel %vm16609_vm13, %v8412_v39, %v8413_v55  ;;  %v8426_v21 = vrot.slane %v8424_v10, 4  ;;  %v8441_v12 = vrot.slane %v8314_v7, 5  ;;  %v8321_v39 = vld [vmem:[#allocation2 + $0x78] sm:$0xe] }
 0x474   : > { %v7899_v49 = vrot.slane %v7898_v58, 4  ;;  %v8431_v58 = vrot.slane %v8310_v30, 5  ;;  %v8448_v23 = vrot.slane %v8317_v11, 5  ;;  %v15898_v6 = vld [vmem:[%s19241_s2 + $0xf8] sm:$0xff]   ;;  %v8325_v20 = vld [vmem:[#allocation2 + $0x88] sm:$0xf] }
 0x475   : > { %v8421_v51 = vsel %vm16609_vm13, %v8419_v5, %v8420_v34  ;;  %v8323_v5 = vld [vmem:[#allocation2 + $0x80] sm:$0x1]  ;;  %v8328_v34 = vld [vmem:[#allocation2 + $0x94] sm:$0xf]  ;;  %v8332_v11 = vld [vmem:[#allocation2 + $0xa4] sm:$0x1] }
 0x476   : > { %v7904_v2 = vsel %vm16385_vm10, %v7899_v49, %v7903_v57  ;;  %v13487_v49 = vrot.slane %v8306_v24, 9  ;;  %v8316_v57 = vld [vmem:[#allocation2 + $0x64] sm:$0xf]  ;;  %v8432_v3 = vsel %vm16609_vm13, %v13488_v47, %v8431_v58  ;;  %v8473_v17 = vrot.slane %v8328_v34, 5  ;;  %v15904_v34 = vld [vmem:[%s19241_s2 + $0x108] sm:$0xff]  }
 0x477   : > { %v13473_v27 = vcombine.low %v7894_v60, %v7904_v2  ;;  %v8428_v60 = vsel %vm16609_vm13, %v8426_v21, %v8427_v46  ;;  %v8438_v2 = vrot.slane %v8313_v48, 5  ;;  %v8445_v4 = vrot.slane %v8316_v57, 5  ;;  %v8324_v24 = vld [vmem:[#allocation2 + $0x84] sm:$0xe]  ;;  %v8327_v21 = vld [vmem:[#allocation2 + $0x90] sm:$0xe] }
 0x478   : > { %14830 = vmatmul.mubr.bf16.gmra.mrb[20].mxu1 %v13469_v25  ;;  %v13515_v25 = vcombine.low %v8397_v19, %v8400_v36  ;;  %v8322_v36 = vld [vmem:[#allocation2 + $0x7c] sm:$0xf]  ;;  %v8475_v46 = vrot.slane %v8473_v17, 4  ;;  %v8331_v57 = vld [vmem:[#allocation2 + $0xa0] sm:$0xf]  ;;  %v13493_v47 = vrot.slane %v8324_v24, 9 }
 0x479   : > { %14833 = vmatprep.mubr.bf16.mxu1 %v13470_v54  ;;  %v8300_v54 = vld [vmem:[#allocation2 + $0x24] sm:$0xe]  ;;  %v8440_v35 = vrot.slane %v8438_v2, 4  ;;  %v8447_v1 = vrot.slane %v8445_v4, 4  ;;  %v8459_v41 = vrot.slane %v8322_v36, 5  ;;  %v8483_v36 = vrot.slane %v8332_v11, 5 }
 0x47a   : > { %v13485_v50 = vrot.slane %v8300_v54, 9  ;;  %v8318_v54 = vld [vmem:[#allocation2 + $0x6c] sm:$0xe]  ;;  %v15908_v24 = vld [vmem:[#allocation2 + $0x54] sm:$0xff]   ;;  %v9342_v11 = vld [vmem:[#allocation2 + $0x28] sm:$0xf] }
 0x47b   : > { %v8442_v19 = vsel %vm16609_vm13, %v8440_v35, %v8441_v12  ;;  %v8449_v44 = vsel %vm16609_vm13, %v8447_v1, %v8448_v23  ;;  %v8461_v30 = vrot.slane %v8459_v41, 4  ;;  %v8333_v35 = vld [vmem:[#allocation2 + $0xa8] sm:$0xe]  ;;  %v8335_v1 = vld [vmem:[#allocation2 + $0xb0] sm:$0x1] }
 0x47c   : > { %v8490_v23 = vrot.slane %v8335_v1, 5 }
 0x480   : > { %14834 = vmatmul.mubr.bf16.gmra.mrb[24].mxu1 %v13471_v42  ;;  %v13518_v42 = vcombine.low %v8418_v16, %v8421_v51  ;;  %v13492_v51 = vrot.slane %v8321_v39, 9 }
 0x481   : > { %14837 = vmatprep.mubr.bf16.mxu1 %v13472_v28  ;;  %v8433_v28 = vrot.slane %v8431_v58, 4  ;;  %v8462_v58 = vrot.slane %v8323_v5, 5 }
 0x482   : > { %v8460_v61 = vsel %vm16609_vm13, %v13492_v51, %v8459_v41  ;;  %v15903_v51 = vld [vmem:[#allocation2 + $0x30] sm:$0xff]  }
 0x483   : > { %v8435_v14 = vsel %vm16609_vm13, %v8433_v28, %v8434_v43  ;;  %v8463_v16 = vsel %vm16609_vm13, %v8461_v30, %v8462_v58  ;;  %v8329_v28 = vld [vmem:[#allocation2 + $0x98] sm:$0x1]  ;;  %v15899_v30 = vld [vmem:[#allocation2 + $0xc] sm:$0xff]  }
 0x484   : > { %v13520_v38 = vcombine.low %v8432_v3, %v8435_v14  ;;  %v13524_v48 = vcombine.low %v8460_v61, %v8463_v16  ;;  %v8330_v3 = vld [vmem:[#allocation2 + $0x9c] sm:$0xe]  ;;  %v15916_v16 = vld [vmem:[%s19241_s2 + $0x128] sm:$0xff]  }
 0x485   : > { %v13495_v12 = vrot.slane %v8330_v3, 9  ;;  %v15910_v58 = vld [vmem:[%s19241_s2 + $0x118] sm:$0xff]  }
 0x486   : > { %v15912_v61 = vld [vmem:[#allocation2 + $0x78] sm:$0xff]  }
 0x488   : > { %14838 = vmatmul.mubr.bf16.gmra.mrb[28].mxu1 %v13473_v27  ;;  %v8312_v27 = vld [vmem:[#allocation2 + $0x54] sm:$0xe] }
 0x489   : > { %14857 = vmatprep.mubr.bf16.mxu1 %v13514_v8  ;;  %v8425_v8 = vsel %vm16609_vm13, %v13487_v49, %v8424_v10  ;;  %v13489_v26 = vrot.slane %v8312_v27, 9  ;;  %v18344_v10 = vld [vmem:[%s19241_s2 + $0x100] sm:$0xff]  }
 0x48a   : > { %v13519_v52 = vcombine.low %v8425_v8, %v8428_v60  ;;  %v13494_v60 = vrot.slane %v8327_v21, 9  ;;  %v15911_v21 = vld [vmem:[#allocation2 + $0x6c] sm:$0xff]  }
 0x490   : > { %14858 = vmatmul.mubr.bf16.vlgmr.msra.gmra.mrb[0].mxu1 %v13515_v25  ;;  %v8452_v25 = vrot.slane %v8319_v15, 5 }
 0x491   : > { %14861 = vmatprep.mubr.bf16.mxu1 %v13516_v40  ;;  %14890 = vmatpush3.bf16.msra.mxu1 %v18253_v59  ;;  %v8411_v59 = vsel %vm16609_vm13, %v13485_v50, %v8410_v13  ;;  %v13490_v13 = vrot.slane %v8315_v32, 9  ;;  %v8320_v40 = vld [vmem:[#allocation2 + $0x74] sm:$0x1] }
 0x492   : > { %14891 = vmatprep.subr.bf16.mxu1 %v15892_v62  ;;  %v13517_v0 = vcombine.low %v8411_v59, %v8414_v31  ;;  %v8454_v55 = vrot.slane %v8452_v25, 4  ;;  %v8455_v31 = vrot.slane %v8320_v40, 5  ;;  %v8338_v40 = vld [vmem:[#allocation2 + $0xbc] sm:$0x1] }
 0x493   : > { %v8446_v9 = vsel %vm16609_vm13, %v13490_v13, %v8445_v4  ;;  %v8480_v4 = vrot.slane %v8331_v57, 5  ;;  %v13496_v13 = vrot.slane %v8333_v35, 9  ;;  %v8497_v5 = vrot.slane %v8338_v40, 5  ;;  %v9339_v57 = vld [vmem:[#allocation2 + $0x1c] sm:$0xf] }
 0x494   : > { %v13522_v50 = vcombine.low %v8446_v9, %v8449_v44  ;;  %v8456_v59 = vsel %vm16609_vm13, %v8454_v55, %v8455_v31  ;;  %v15907_v31 = vld [vmem:[%s19241_s2 + $0x110] sm:$0xff]  }
 0x495   : > { %14892 = vmatpush3.bf16.msra.mxu1 %v15892_v62  ;;  %v8439_v62 = vsel %vm16609_vm13, %v13489_v26, %v8438_v2  ;;  %v8476_v2 = vrot.slane %v8329_v28, 5  ;;  %v8337_v26 = vld [vmem:[#allocation2 + $0xb8] sm:$0xf]  ;;  %v8481_v44 = vsel %vm16609_vm13, %v13495_v12, %v8480_v4  ;;  %v9335_v28 = vld [vmem:[#allocation2 + $0xc] sm:$0xf] }
 0x496   : > { %14893 = vmatprep.subr.bf16.mxu1 %v15893_v29  ;;  %v13521_v53 = vcombine.low %v8439_v62, %v8442_v19  ;;  %v8494_v19 = vrot.slane %v8337_v26, 5  ;;  %v8336_v62 = vld [vmem:[#allocation2 + $0xb4] sm:$0xe]  ;;  %v9337_v26 = vld [vmem:[#allocation2 + $0x14] sm:$0x1] }
 0x497   : > { %v8477_v8 = vsel %vm16609_vm13, %v8475_v46, %v8476_v2  ;;  %v13497_v9 = vrot.slane %v8336_v62, 9  ;;  %v9338_v46 = vld [vmem:[#allocation2 + $0x18] sm:$0xf] }
 0x498   : > { %14862 = vmatmul.mubr.bf16.gmra.mrb[4].mxu1 %v13517_v0  ;;  %v8466_v0 = vrot.slane %v8325_v20, 5  ;;  %v15900_v20 = vld [vmem:[#allocation2 + $0x18] sm:$0xff]   ;;  %v9408_v2 = vshrl.u32 %v9338_v46, 16 }
 0x499   : > { %14865 = vmatprep.mubr.bf16.mxu1 %v13518_v42  ;;  %14894 = vmatpush3.bf16.msra.mxu1 %v15893_v29  ;;  %v13491_v29 = vrot.slane %v8318_v54, 9  ;;  %v8326_v42 = vld [vmem:[#allocation2 + $0x8c] sm:$0x1] }
 0x49a   : > { %14895 = vmatprep.subr.bf16.mxu1 %v15894_v63  ;;  %v8468_v49 = vrot.slane %v8466_v0, 4  ;;  %v8469_v43 = vrot.slane %v8326_v42, 5  ;;  %v8467_v7 = vsel %vm16609_vm13, %v13493_v47, %v8466_v0  ;;  %v15906_v0 = vld [vmem:[#allocation2 + $0x48] sm:$0xff]   ;;  %v15922_v42 = vld [vmem:[%s19241_s2 + $0x138] sm:$0xff]   ;;  %v9384_v47 = vshrl.u32 %v9335_v28, 16 }
 0x49b   : > { %v9410_v35 = vrot.slane %v9408_v2, 4 }
 0x49c   : > { %v8470_v14 = vsel %vm16609_vm13, %v8468_v49, %v8469_v43  ;;  %v9336_v49 = vld [vmem:[#allocation2 + $0x10] sm:$0xf]  ;;  %v9387_v43 = vshll.u32 %v9335_v28, 16 }
 0x49d   : > { %14896 = vmatpush3.bf16.msra.mxu1 %v15894_v63  ;;  %v8453_v63 = vsel %vm16609_vm13, %v13491_v29, %v8452_v25  ;;  %v13525_v32 = vcombine.low %v8467_v7, %v8470_v14  ;;  %v15902_v29 = vld [vmem:[#allocation2 + $0x24] sm:$0xff]   ;;  %v9411_v14 = vshll.u32 %v9338_v46, 16  ;;  %v15915_v7 = vld [vmem:[#allocation2 + $0x90] sm:$0xff]  }
 0x49e   : > { %14897 = vmatprep.subr.bf16.mxu1 %v15895_v45  ;;  %v13523_v33 = vcombine.low %v8453_v63, %v8456_v59  ;;  %v15905_v59 = vld [vmem:[#allocation2 + $0x3c] sm:$0xff]   ;;  %v9389_v3 = vrot.slane %v9387_v43, 5 }
 0x49f   : > { %v15909_v63 = vld [vmem:[#allocation2 + $0x60] sm:$0xff]   ;;  %v9413_v1 = vrot.slane %v9411_v14, 5 }
 0x4a0   : > { %14866 = vmatmul.mubr.bf16.gmra.mrb[8].mxu1 %v13519_v52  ;;  %v8474_v52 = vsel %vm16609_vm13, %v13494_v60, %v8473_v17  ;;  %v15919_v17 = vld [vmem:[%s19241_s2 + $0x130] sm:$0xff]   ;;  %v9397_v60 = vshrl.u32 %v9336_v49, 16 }
 0x4a1   : > { %14869 = vmatprep.mubr.bf16.mxu1 %v13520_v38  ;;  %14898 = vmatpush3.bf16.msra.mxu1 %v15895_v45  ;;  %v8334_v45 = vld [vmem:[#allocation2 + $0xac] sm:$0xf]  ;;  %v8482_v38 = vrot.slane %v8480_v4, 4  ;;  %v9417_v4 = vshll.u32 %v9339_v57, 16 }
 0x4a2   : > { %14899 = vmatprep.subr.bf16.mxu1 %v15896_v18  ;;  %v8487_v27 = vrot.slane %v8334_v45, 5  ;;  %v9393_v45 = vshll.u32 %v9336_v49, 16 }
 0x4a3   : > { %v18405_v12 = vrot.slane %v9417_v4, 5  ;;  %v9346_v4 = vld [vmem:[#allocation2 + $0x38] sm:$0x1] }
 0x4a4   : > { %v8489_v15 = vrot.slane %v8487_v27, 4  ;;  %v8488_v41 = vsel %vm16609_vm13, %v13496_v13, %v8487_v27  ;;  %v9341_v27 = vld [vmem:[#allocation2 + $0x24] sm:$0xf] }
 0x4a5   : > { %14900 = vmatpush3.bf16.msra.mxu1 %v15896_v18  ;;  %v13526_v18 = vcombine.low %v8474_v52, %v8477_v8  ;;  %v9421_v8 = vshrl.u32 %v9339_v57, 16  ;;  %v9386_v52 = vrot.slane %v9384_v47, 4  ;;  %v9432_v13 = vshrl.u32 %v9341_v27, 16 }
 0x4a6   : > { %14901 = vmatprep.subr.bf16.mxu1 %v15897_v22  ;;  %v8491_v25 = vsel %vm16609_vm13, %v8489_v15, %v8490_v23  ;;  %v9344_v15 = vld [vmem:[#allocation2 + $0x30] sm:$0xf]  ;;  %v9435_v23 = vshll.u32 %v9341_v27, 16 }
 0x4a7   : > { %v13528_v39 = vcombine.low %v8488_v41, %v8491_v25  ;;  %v9441_v25 = vshll.u32 %v9342_v11, 16  ;;  %v9459_v41 = vshll.u32 %v9344_v15, 16  ;;  %v9390_v62 = vor.u32 %v9389_v3, %v9386_v52  ;;  %v9350_v52 = vld [vmem:[#allocation2 + $0x48] sm:$0xf]  ;;  %v9351_v3 = vld [vmem:[#allocation2 + $0x4c] sm:$0xf] }
 0x4a8   : > { %14870 = vmatmul.mubr.bf16.gmra.mrb[12].mxu1 %v13521_v53  ;;  %v8496_v53 = vrot.slane %v8494_v19, 4 }
 0x4a9   : > { %14873 = vmatprep.mubr.bf16.mxu1 %v13522_v50  ;;  %14902 = vmatpush3.bf16.msra.mxu1 %v15897_v22  ;;  %v8484_v22 = vsel %vm16609_vm13, %v8482_v38, %v8483_v36  ;;  %v8495_v50 = vsel %vm16609_vm13, %v13497_v9, %v8494_v19  ;;  %v9399_v38 = vrot.slane %v9397_v60, 4  ;;  %v9423_v36 = vrot.slane %v9421_v8, 4  ;;  %v9340_v19 = vld [vmem:[#allocation2 + $0x20] sm:$0x1] }
 0x4aa   : > { %14903 = vmatprep.subr.bf16.mxu1 %v15898_v6  ;;  %v13527_v54 = vcombine.low %v8481_v44, %v8484_v22  ;;  %v9345_v22 = vld [vmem:[#allocation2 + $0x34] sm:$0xf]  ;;  %v9445_v44 = vshrl.u32 %v9342_v11, 16 }
 0x4ab   : > { %v9424_v9 = vor.u32 %v9423_v36, %v18405_v12 }
 0x4ad   : > { %14904 = vmatpush3.bf16.msra.mxu1 %v15898_v6  ;;  %v8498_v6 = vsel %vm16609_vm13, %v8496_v53, %v8497_v5  ;;  %v9414_v53 = vor.u32 %v9413_v1, %v9410_v35  ;;  %v9434_v5 = vrot.slane %v9432_v13, 4  ;;  %v9353_v1 = vld [vmem:[#allocation2 + $0x54] sm:$0xf]  ;;  %v9475_v13 = vshll.u32 %v9346_v4, 16 }
 0x4ae   : > { %14937 = vmatprep.subr.bf16.mxu1 %v18344_v10  ;;  %v13529_v55 = vcombine.low %v8495_v50, %v8498_v6  ;;  %v9437_v6 = vrot.slane %v9435_v23, 5  ;;  %v9465_v50 = vshll.u32 %v9345_v22, 16  ;;  %v15921_v23 = vld [vmem:[#allocation2 + $0xc0] sm:$0xff]  }
 0x4b0   : > { %14874 = vmatmul.mubr.bf16.gmra.mrb[16].mxu1 %v13523_v33  ;;  %v18400_v33 = vld [vmem:[%s19241_s2 + $0x140] sm:$0xff]  }
 0x4b1   : > { %14877 = vmatprep.mubr.bf16.mxu1 %v13524_v48  ;;  %v15914_v48 = vld [vmem:[#allocation2 + $0x84] sm:$0xff]  }
 0x4b8   : > { %14878 = vmatmul.mubr.bf16.gmra.mrb[20].mxu1 %v13525_v32  ;;  %v15917_v32 = vld [vmem:[#allocation2 + $0x9c] sm:$0xff]  }
 0x4b9   : > { %14881 = vmatprep.mubr.bf16.mxu1 %v13526_v18  ;;  %v18403_v18 = vrot.slane %v9393_v45, 5 }
 0x4bb   : > { %v9400_v40 = vor.u32 %v9399_v38, %v18403_v18 }
 0x4c0   : > { %14882 = vmatmul.mubr.bf16.gmra.mrb[24].mxu1 %v13527_v54  ;;  %v9456_v54 = vshrl.u32 %v9344_v15, 16 }
 0x4c1   : > { %14885 = vmatprep.mubr.bf16.mxu1 %v13528_v39  ;;  %v9403_v39 = vshll.u32 %v9337_v26, 16 }
 0x4c8   : > { %14886 = vmatmul.mubr.bf16.gmra.mrb[28].mxu1 %v13529_v55  ;;  %v9427_v55 = vshll.u32 %v9340_v19, 16  ;;  %v9349_v19 = vld [vmem:[#allocation2 + $0x44] sm:$0x1] }
 0x4c9   : > { %14905 = vmatprep.mubr.bf16.mxu1 %v15899_v30  ;;  %v9469_v30 = vshrl.u32 %v9345_v22, 16 }
 0x4ca   : > { %v9429_v47 = vrot.slane %v9427_v55, 5 }
 0x4d0   : > { %14906 = vmatmul.mubr.bf16.vlgmr.msra.gmra.mrb[0].mxu1 %v15900_v20  ;;  %v9347_v20 = vld [vmem:[#allocation2 + $0x3c] sm:$0xf] }
 0x4d1   : > { %14909 = vmatprep.mubr.bf16.mxu1 %v15902_v29  ;;  %14938 = vmatpush3.bf16.msra.mxu1 %v18344_v10  ;;  %v15913_v10 = vld [vmem:[%s19241_s2 + $0x120] sm:$0xff]   ;;  %v9447_v29 = vrot.slane %v9445_v44, 4  ;;  %v9480_v28 = vshrl.u32 %v9347_v20, 16  ;;  %v9483_v49 = vshll.u32 %v9347_v20, 16  ;;  %v9507_v44 = vshll.u32 %v9350_v52, 16 }
 0x4d2   : > { %14939 = vmatprep.subr.bf16.mxu1 %v15904_v34  ;;  %v9499_v20 = vshll.u32 %v9349_v19, 16 }
 0x4d3   : > { %v9485_v38 = vrot.slane %v9483_v49, 5 }
 0x4d5   : > { %14940 = vmatpush3.bf16.msra.mxu1 %v15904_v34  ;;  %v18409_v34 = vrot.slane %v9441_v25, 5  ;;  %v9504_v25 = vshrl.u32 %v9350_v52, 16 }
 0x4d6   : > { %14941 = vmatprep.subr.bf16.mxu1 %v15907_v31 }
 0x4d7   : > { %v9448_v43 = vor.u32 %v9447_v29, %v18409_v34  ;;  %v9352_v29 = vld [vmem:[#allocation2 + $0x50] sm:$0x1] }
 0x4d8   : > { %14910 = vmatmul.mubr.bf16.gmra.mrb[4].mxu1 %v15903_v51  ;;  %v9461_v51 = vrot.slane %v9459_v41, 5  ;;  %v9517_v41 = vshrl.u32 %v9351_v3, 16 }
 0x4d9   : > { %14913 = vmatprep.mubr.bf16.mxu1 %v15905_v59  ;;  %14942 = vmatpush3.bf16.msra.mxu1 %v15907_v31  ;;  %v9458_v31 = vrot.slane %v9456_v54, 4  ;;  %v15918_v59 = vld [vmem:[#allocation2 + $0xa8] sm:$0xff]   ;;  %v9449_v26 = vrot.slane %v9448_v43, 4  ;;  %v9513_v54 = vshll.u32 %v9351_v3, 16  ;;  %v9355_v3 = vld [vmem:[#allocation2 + $0x5c] sm:$0x1] }
 0x4da   : > { %14943 = vmatprep.subr.bf16.mxu1 %v15910_v58 }
 0x4db   : > { %v9462_v45 = vor.u32 %v9461_v51, %v9458_v31  ;;  %v9356_v31 = vld [vmem:[#allocation2 + $0x60] sm:$0xf]  ;;  %v9506_v51 = vrot.slane %v9504_v25, 4 }
 0x4dd   : > { %14944 = vmatpush3.bf16.msra.mxu1 %v15910_v58  ;;  %v9348_v58 = vld [vmem:[#allocation2 + $0x40] sm:$0xf]  ;;  %v9463_v36 = vrot.slane %v9462_v45, 4 }
 0x4de   : > { %14945 = vmatprep.subr.bf16.mxu1 %v15913_v10  ;;  %v9489_v46 = vshll.u32 %v9348_v58, 16  ;;  %v9493_v57 = vshrl.u32 %v9348_v58, 16  ;;  %v9509_v58 = vrot.slane %v9507_v44, 5  ;;  %v9547_v44 = vshll.u32 %v9355_v3, 16  ;;  %v9368_v3 = vld [vmem:[#allocation2 + $0x90] sm:$0xf] }
 0x4e0   : > { %14914 = vmatmul.mubr.bf16.gmra.mrb[8].mxu1 %v15906_v0  ;;  %v9401_v0 = vrot.slane %v9400_v40, 4  ;;  %v9495_v35 = vrot.slane %v9493_v57, 4  ;;  %v9528_v40 = vshrl.u32 %v9353_v1, 16  ;;  %v15924_v57 = vld [vmem:[%s19241_s2 + $0x148] sm:$0xff]   ;;  %v9510_v43 = vor.u32 %v9509_v58, %v9506_v51 }
 0x4e1   : > { %14917 = vmatprep.mubr.bf16.mxu1 %v15908_v24  ;;  %14946 = vmatpush3.bf16.msra.mxu1 %v15913_v10  ;;  %v9391_v10 = vrot.slane %v9390_v62, 4  ;;  %v9415_v24 = vrot.slane %v9414_v53, 4  ;;  %v9354_v62 = vld [vmem:[#allocation2 + $0x58] sm:$0xf] }
 0x4e2   : > { %14947 = vmatprep.subr.bf16.mxu1 %v15916_v16 }
 0x4e3   : > { %v9396_v60 = vsel %vm16385_vm10, %v9391_v10, %v18403_v18  ;;  %v9420_v8 = vsel %vm16385_vm10, %v9415_v24, %v18405_v12  ;;  %v18425_v18 = vrot.slane %v9489_v46, 5  ;;  %v9357_v10 = vld [vmem:[#allocation2 + $0x64] sm:$0xf]  ;;  %v9530_v24 = vrot.slane %v9528_v40, 4 }
 0x4e4   : > { %v9561_v49 = vshll.u32 %v9357_v10, 16  ;;  %v9565_v46 = vshrl.u32 %v9357_v10, 16  ;;  %v9365_v10 = vld [vmem:[#allocation2 + $0x84] sm:$0xf] }
 0x4e5   : > { %14948 = vmatpush3.bf16.msra.mxu1 %v15916_v16  ;;  %v9405_v16 = vrot.slane %v9403_v39, 5  ;;  %v9531_v39 = vshll.u32 %v9353_v1, 16 }
 0x4e6   : > { %14949 = vmatprep.subr.bf16.mxu1 %v15919_v17  ;;  %v18454_v1 = vrot.slane %v9561_v49, 5 }
 0x4e7   : > { %v9406_v2 = vsel %vm16385_vm10, %v9401_v0, %v9405_v16  ;;  %v18436_v0 = vrot.slane %v9513_v54, 5  ;;  %v9519_v16 = vrot.slane %v9517_v41, 4  ;;  %v9358_v54 = vld [vmem:[#allocation2 + $0x68] sm:$0x1] }
 0x4e8   : > { %14918 = vmatmul.mubr.bf16.gmra.mrb[12].mxu1 %v15909_v63  ;;  %v9425_v63 = vrot.slane %v9424_v9, 4  ;;  %v13594_v15 = vcombine.low %v9396_v60, %v9406_v2 }
 0x4e9   : > { %14921 = vmatprep.mubr.bf16.mxu1 %v15911_v21  ;;  %14950 = vmatpush3.bf16.msra.mxu1 %v15919_v17  ;;  %v15920_v17 = vld [vmem:[#allocation2 + $0xb4] sm:$0xff]   ;;  %v9438_v21 = vor.u32 %v9437_v6, %v9434_v5  ;;  %v9496_v6 = vor.u32 %v9495_v35, %v18425_v18 }
 0x4ea   : > { %14951 = vmatprep.subr.bf16.mxu1 %v15922_v42  ;;  %v9430_v27 = vsel %vm16385_vm10, %v9425_v63, %v9429_v47  ;;  %v9501_v47 = vrot.slane %v9499_v20, 5 }
 0x4eb   : > { %v13595_v12 = vcombine.low %v9420_v8, %v9430_v27  ;;  %v9359_v8 = vld [vmem:[#allocation2 + $0x6c] sm:$0xf] }
 0x4ed   : > { %14952 = vmatpush3.bf16.msra.mxu1 %v15922_v42  ;;  %v9343_v42 = vld [vmem:[#allocation2 + $0x2c] sm:$0x1] }
 0x4ee   : > { %14985 = vmatprep.subr.bf16.mxu1 %v18400_v33  ;;  %v9451_v14 = vshll.u32 %v9343_v42, 16 }
 0x4f0   : > { %14922 = vmatmul.mubr.bf16.gmra.mrb[16].mxu1 %v15912_v61  ;;  %v18411_v61 = vrot.slane %v9465_v50, 5  ;;  %v9453_v22 = vrot.slane %v9451_v14, 5  ;;  %v9520_v14 = vor.u32 %v9519_v16, %v18436_v0 }
 0x4f1   : > { %14925 = vmatprep.mubr.bf16.mxu1 %v15914_v48  ;;  %v9471_v48 = vrot.slane %v9469_v30, 4  ;;  %v9477_v30 = vrot.slane %v9475_v13, 5 }
 0x4f2   : > { %v9454_v50 = vsel %vm16385_vm10, %v9449_v26, %v9453_v22  ;;  %v9468_v55 = vsel %vm16385_vm10, %v9463_v36, %v18411_v61  ;;  %v9362_v26 = vld [vmem:[#allocation2 + $0x78] sm:$0xf]  ;;  %v9511_v36 = vrot.slane %v9510_v43, 4  ;;  %v9363_v22 = vld [vmem:[#allocation2 + $0x7c] sm:$0xf]  ;;  %v9521_v25 = vrot.slane %v9520_v14, 4 }
 0x4f3   : > { %v9472_v11 = vor.u32 %v9471_v48, %v18411_v61  ;;  %v9523_v61 = vshll.u32 %v9352_v29, 16  ;;  %v9555_v48 = vshll.u32 %v9356_v31, 16  ;;  %v9600_v40 = vshrl.u32 %v9362_v26, 16  ;;  %v9364_v43 = vld [vmem:[#allocation2 + $0x80] sm:$0x1] }
 0x4f5   : > { %v9473_v9 = vrot.slane %v9472_v11, 4  ;;  %v18451_v52 = vrot.slane %v9523_v61, 5  ;;  %v9360_v11 = vld [vmem:[#allocation2 + $0x70] sm:$0xf]  ;;  %v9557_v35 = vrot.slane %v9555_v48, 5 }
 0x4f6   : > { %v9585_v41 = vshll.u32 %v9360_v11, 16 }
 0x4f7   : > { %v9478_v63 = vsel %vm16385_vm10, %v9473_v9, %v9477_v30  ;;  %v15926_v30 = vld [vmem:[%s19241_s2 + $0x158] sm:$0xff]   ;;  %v9526_v51 = vsel %vm16385_vm10, %v9521_v25, %v18451_v52 }
 0x4f8   : > { %14926 = vmatmul.mubr.bf16.gmra.mrb[20].mxu1 %v15915_v7  ;;  %v9439_v7 = vrot.slane %v9438_v21, 4  ;;  %v9497_v21 = vrot.slane %v9496_v6, 4  ;;  %v13597_v27 = vcombine.low %v9468_v55, %v9478_v63  ;;  %v9613_v6 = vshrl.u32 %v9363_v22, 16 }
 0x4f9   : > { %14929 = vmatprep.mubr.bf16.mxu1 %v15917_v32  ;;  %v9482_v32 = vrot.slane %v9480_v28, 4  ;;  %v9552_v28 = vshrl.u32 %v9356_v31, 16  ;;  %v9571_v55 = vshll.u32 %v9358_v54, 16  ;;  %v9516_v31 = vsel %vm16385_vm10, %v9511_v36, %v18436_v0  ;;  %v15928_v36 = vld [vmem:[%s19241_s2 + $0x168] sm:$0xff]  }
 0x4fa   : > { %v9444_v53 = vsel %vm16385_vm10, %v9439_v7, %v18409_v34  ;;  %v9541_v34 = vshrl.u32 %v9354_v62, 16  ;;  %v18473_v16 = vrot.slane %v9585_v41, 5  ;;  %v9367_v41 = vld [vmem:[#allocation2 + $0x8c] sm:$0x1] }
 0x4fb   : > { %v9486_v5 = vor.u32 %v9485_v38, %v9482_v32  ;;  %v13596_v2 = vcombine.low %v9444_v53, %v9454_v50  ;;  %v9502_v32 = vsel %vm16385_vm10, %v9497_v21, %v9501_v47  ;;  %v9554_v38 = vrot.slane %v9552_v28, 4  ;;  %v15927_v47 = vld [vmem:[%s19241_s2 + $0x160] sm:$0xff]  }
 0x4fc   : > { %v9543_v60 = vrot.slane %v9541_v34, 4  ;;  %v9361_v34 = vld [vmem:[#allocation2 + $0x74] sm:$0x1]  ;;  %v9615_v28 = vrot.slane %v9613_v6, 4  ;;  %v9573_v49 = vrot.slane %v9571_v55, 5 }
 0x4fd   : > { %v9487_v42 = vrot.slane %v9486_v5, 4  ;;  %v9558_v53 = vor.u32 %v9557_v35, %v9554_v38  ;;  %v9609_v5 = vshll.u32 %v9363_v22, 16  ;;  %v9372_v22 = vld [vmem:[#allocation2 + $0xa0] sm:$0xf] }
 0x4fe   : > { %v9685_v6 = vshrl.u32 %v9372_v22, 16 }
 0x4ff   : > { %v9492_v7 = vsel %vm16385_vm10, %v9487_v42, %v18425_v18  ;;  %v15925_v18 = vld [vmem:[%s19241_s2 + $0x150] sm:$0xff]   ;;  %v9366_v42 = vld [vmem:[#allocation2 + $0x88] sm:$0xf]  ;;  %v9559_v0 = vrot.slane %v9558_v53, 4  ;;  %v18475_v61 = vrot.slane %v9609_v5, 5  ;;  %v9681_v5 = vshll.u32 %v9372_v22, 16 }
 0x500   : > { %14930 = vmatmul.mubr.bf16.gmra.mrb[24].mxu1 %v15918_v59  ;;  %v9537_v59 = vshll.u32 %v9354_v62, 16  ;;  %v13598_v19 = vcombine.low %v9492_v7, %v9502_v32  ;;  %v9589_v62 = vshrl.u32 %v9360_v11, 16  ;;  %v9637_v14 = vshrl.u32 %v9366_v42, 16  ;;  %v9369_v11 = vld [vmem:[#allocation2 + $0x94] sm:$0xf] }
 0x501   : > { %14933 = vmatprep.mubr.bf16.mxu1 %v15920_v17  ;;  %v9533_v17 = vrot.slane %v9531_v39, 5  ;;  %v9603_v39 = vshll.u32 %v9362_v26, 16  ;;  %v9564_v7 = vsel %vm16385_vm10, %v9559_v0, %v18454_v1  ;;  %v9616_v52 = vor.u32 %v9615_v28, %v18475_v61 }
 0x502   : > { %v18443_v45 = vrot.slane %v9537_v59, 5  ;;  %v9549_v59 = vrot.slane %v9547_v44, 5  ;;  %v9619_v26 = vshll.u32 %v9364_v43, 16  ;;  %v9648_v44 = vshrl.u32 %v9368_v3, 16  ;;  %v9370_v43 = vld [vmem:[#allocation2 + $0x98] sm:$0x1] }
 0x503   : > { %v9534_v4 = vor.u32 %v9533_v17, %v9530_v24  ;;  %v9591_v24 = vrot.slane %v9589_v62, 4  ;;  %v9602_v17 = vrot.slane %v9600_v40, 4  ;;  %v9605_v63 = vrot.slane %v9603_v39, 5 }
 0x504   : > { %v9544_v13 = vor.u32 %v9543_v60, %v18443_v45  ;;  %v9627_v60 = vshll.u32 %v9365_v10, 16  ;;  %v9617_v54 = vrot.slane %v9616_v52, 4  ;;  %v9651_v62 = vshll.u32 %v9368_v3, 16 }
 0x505   : > { %v9657_v40 = vshll.u32 %v9369_v11, 16  ;;  %v9661_v39 = vshrl.u32 %v9369_v11, 16  ;;  %v18510_v0 = vrot.slane %v9681_v5, 5  ;;  %v18520_v11 = vld [vmem:[%s19241_s2 + $0x180] sm:$0xff]  }
 0x506   : > { %v9545_v50 = vrot.slane %v9544_v13, 4 }
 0x508   : > { %14934 = vmatmul.mubr.bf16.gmra.mrb[28].mxu1 %v15921_v23  ;;  %v9576_v23 = vshrl.u32 %v9359_v8, 16  ;;  %v9550_v48 = vsel %vm16385_vm10, %v9545_v50, %v9549_v59  ;;  %v15929_v50 = vld [vmem:[%s19241_s2 + $0x170] sm:$0xff]   ;;  %v9650_v59 = vrot.slane %v9648_v44, 4 }
 0x509   : > { %14953 = vmatprep.mubr.bf16.mxu1 %v13594_v15  ;;  %v9567_v15 = vrot.slane %v9565_v46, 4 }
 0x50a   : > { %v9578_v20 = vrot.slane %v9576_v23, 4 }
 0x50b   : > { %v9568_v9 = vor.u32 %v9567_v15, %v18454_v1  ;;  %v9629_v1 = vrot.slane %v9627_v60, 5 }
 0x50d   : > { %v9569_v21 = vrot.slane %v9568_v9, 4 }
 0x50f   : > { %v9574_v32 = vsel %vm16385_vm10, %v9569_v21, %v9573_v49  ;;  %v9687_v21 = vrot.slane %v9685_v6, 4 }
 0x510   : > { %14954 = vmatmul.mubr.bf16.vlgmr.msra.gmra.mrb[0].mxu1 %v13595_v12  ;;  %v9579_v12 = vshll.u32 %v9359_v8, 16  ;;  %v9606_v8 = vor.u32 %v9605_v63, %v9602_v17  ;;  %v9374_v17 = vld [vmem:[#allocation2 + $0xa8] sm:$0xf] }
 0x511   : > { %14957 = vmatprep.mubr.bf16.mxu1 %v13596_v2  ;;  %14986 = vmatpush3.bf16.msra.mxu1 %v18400_v33  ;;  %v9535_v33 = vrot.slane %v9534_v4, 4  ;;  %v9633_v2 = vshll.u32 %v9366_v42, 16  ;;  %v9592_v4 = vor.u32 %v9591_v24, %v18473_v16  ;;  %v18508_v24 = vrot.slane %v9657_v40, 5 }
 0x512   : > { %14987 = vmatprep.subr.bf16.mxu1 %v15924_v57  ;;  %v9581_v29 = vrot.slane %v9579_v12, 5  ;;  %v9639_v12 = vrot.slane %v9637_v14, 4  ;;  %v9696_v14 = vshrl.u32 %v9374_v17, 16 }
 0x513   : > { %v9540_v58 = vsel %vm16385_vm10, %v9535_v33, %v18443_v45  ;;  %v9624_v45 = vshrl.u32 %v9365_v10, 16  ;;  %v18492_v23 = vrot.slane %v9633_v2, 5  ;;  %v9593_v25 = vrot.slane %v9592_v4, 4 }
 0x514   : > { %v9582_v46 = vor.u32 %v9581_v29, %v9578_v20  ;;  %v13600_v38 = vcombine.low %v9540_v58, %v9550_v48  ;;  %v9607_v33 = vrot.slane %v9606_v8, 4  ;;  %v9643_v58 = vshll.u32 %v9367_v41, 16  ;;  %v9377_v8 = vld [vmem:[#allocation2 + $0xb4] sm:$0xf] }
 0x515   : > { %14988 = vmatpush3.bf16.msra.mxu1 %v15924_v57  ;;  %v9595_v57 = vshll.u32 %v9361_v34, 16  ;;  %v9626_v13 = vrot.slane %v9624_v45, 4  ;;  %v9640_v29 = vor.u32 %v9639_v12, %v18492_v23  ;;  %v9653_v10 = vrot.slane %v9651_v62, 5  ;;  %v9373_v45 = vld [vmem:[#allocation2 + $0xa4] sm:$0x1] }
 0x516   : > { %14989 = vmatprep.subr.bf16.mxu1 %v15925_v18  ;;  %v9583_v35 = vrot.slane %v9582_v46, 4  ;;  %v9375_v46 = vld [vmem:[#allocation2 + $0xac] sm:$0xf]  ;;  %v9699_v4 = vshll.u32 %v9374_v17, 16 }
 0x517   : > { %v9597_v15 = vrot.slane %v9595_v57, 5  ;;  %v9630_v20 = vor.u32 %v9629_v1, %v9626_v13  ;;  %v9641_v49 = vrot.slane %v9640_v29, 4  ;;  %v9654_v60 = vor.u32 %v9653_v10, %v9650_v59  ;;  %v9379_v59 = vld [vmem:[#allocation2 + $0xbc] sm:$0x1] }
 0x518   : > { %14958 = vmatmul.mubr.bf16.gmra.mrb[4].mxu1 %v13597_v27  ;;  %v13599_v27 = vcombine.low %v9516_v31, %v9526_v51  ;;  %v9588_v55 = vsel %vm16385_vm10, %v9583_v35, %v18473_v16  ;;  %v9612_v51 = vsel %vm16385_vm10, %v9607_v33, %v18475_v61  ;;  %v9663_v16 = vrot.slane %v9661_v39, 4  ;;  %v15930_v61 = vld [vmem:[%s19241_s2 + $0x178] sm:$0xff]   ;;  %v9380_v39 = vld [vmem:[#allocation2 + $0xc0] sm:$0xf] }
 0x519   : > { %14961 = vmatprep.mubr.bf16.mxu1 %v13598_v19  ;;  %14990 = vmatpush3.bf16.msra.mxu1 %v15925_v18  ;;  %v9371_v18 = vld [vmem:[#allocation2 + $0x9c] sm:$0xf]  ;;  %v13601_v19 = vcombine.low %v9564_v7, %v9574_v32  ;;  %v9598_v31 = vsel %vm16385_vm10, %v9593_v25, %v9597_v15  ;;  %v9631_v48 = vrot.slane %v9630_v20, 4  ;;  %v9688_v32 = vor.u32 %v9687_v21, %v18510_v0 }
 0x51a   : > { %14991 = vmatprep.subr.bf16.mxu1 %v15926_v30  ;;  %v9672_v53 = vshrl.u32 %v9371_v18, 16  ;;  %v9675_v9 = vshll.u32 %v9371_v18, 16  ;;  %v13602_v28 = vcombine.low %v9588_v55, %v9598_v31  ;;  %v9664_v2 = vor.u32 %v9663_v16, %v18508_v24  ;;  %v9376_v31 = vld [vmem:[#allocation2 + $0xb0] sm:$0x1] }
 0x51b   : > { %v9705_v52 = vshll.u32 %v9375_v46, 16  ;;  %v9709_v3 = vshrl.u32 %v9375_v46, 16  ;;  %v9667_v15 = vshll.u32 %v9370_v43, 16  ;;  %v9723_v18 = vshll.u32 %v9377_v8, 16 }
 0x51c   : > { %v9674_v63 = vrot.slane %v9672_v53, 4  ;;  %v9677_v42 = vrot.slane %v9675_v9, 5  ;;  %v9655_v12 = vrot.slane %v9654_v60, 4  ;;  %v9665_v22 = vrot.slane %v9664_v2, 4  ;;  %v10154_v2 = vld [vmem:[#allocation2 + $0x10] sm:$0xf] }
 0x51d   : > { %14992 = vmatpush3.bf16.msra.mxu1 %v15926_v30  ;;  %v9621_v30 = vrot.slane %v9619_v26, 5  ;;  %v9691_v26 = vshll.u32 %v9373_v45, 16  ;;  %v9701_v25 = vrot.slane %v9699_v4, 5  ;;  %v9689_v44 = vrot.slane %v9688_v32, 4  ;;  %v9382_v4 = vld [vmem:[#allocation2 + $0xc8] sm:$0x1] }
 0x51e   : > { %14993 = vmatprep.subr.bf16.mxu1 %v15927_v47  ;;  %v9678_v7 = vor.u32 %v9677_v42, %v9674_v63  ;;  %v9711_v41 = vrot.slane %v9709_v3, 4  ;;  %v9669_v62 = vrot.slane %v9667_v15, 5  ;;  %v9725_v9 = vrot.slane %v9723_v18, 5 }
 0x51f   : > { %v9622_v34 = vsel %vm16385_vm10, %v9617_v54, %v9621_v30  ;;  %v9707_v54 = vrot.slane %v9705_v52, 5  ;;  %v9693_v40 = vrot.slane %v9691_v26, 5  ;;  %v9660_v55 = vsel %vm16385_vm10, %v9655_v12, %v18508_v24 }
 0x520   : > { %14962 = vmatmul.mubr.bf16.gmra.mrb[8].mxu1 %v13599_v27  ;;  %v13603_v57 = vcombine.low %v9612_v51, %v9622_v34  ;;  %v9378_v27 = vld [vmem:[#allocation2 + $0xb8] sm:$0xf]  ;;  %v9679_v33 = vrot.slane %v9678_v7, 4  ;;  %v9670_v30 = vsel %vm16385_vm10, %v9665_v22, %v9669_v62  ;;  %v9744_v34 = vshrl.u32 %v9380_v39, 16  ;;  %v10157_v22 = vld [vmem:[#allocation2 + $0x1c] sm:$0xf] }
 0x521   : > { %14965 = vmatprep.mubr.bf16.mxu1 %v13600_v38  ;;  %14994 = vmatpush3.bf16.msra.mxu1 %v15927_v47  ;;  %v9645_v47 = vrot.slane %v9643_v58, 5  ;;  %v9636_v38 = vsel %vm16385_vm10, %v9631_v48, %v18492_v23  ;;  %v9729_v13 = vshll.u32 %v9378_v27, 16  ;;  %v9733_v1 = vshrl.u32 %v9378_v27, 16 }
 0x522   : > { %14995 = vmatprep.subr.bf16.mxu1 %v15928_v36  ;;  %v9684_v20 = vsel %vm16385_vm10, %v9679_v33, %v18510_v0  ;;  %v9694_v29 = vsel %vm16385_vm10, %v9689_v44, %v9693_v40  ;;  %v9712_v58 = vor.u32 %v9711_v41, %v9707_v54  ;;  %v9747_v10 = vshll.u32 %v9380_v39, 16 }
 0x523   : > { %v9646_v35 = vsel %vm16385_vm10, %v9641_v49, %v9645_v47  ;;  %v9731_v5 = vrot.slane %v9729_v13, 5  ;;  %v9735_v6 = vrot.slane %v9733_v1, 4  ;;  %v13605_v42 = vcombine.low %v9660_v55, %v9670_v30  ;;  %v10153_v13 = vld [vmem:[#allocation2 + $0xc] sm:$0xe]  ;;  %v10155_v1 = vld [vmem:[#allocation2 + $0x14] sm:$0x1] }
 0x524   : > { %v13604_v23 = vcombine.low %v9636_v38, %v9646_v35  ;;  %v9715_v21 = vshll.u32 %v9376_v31, 16  ;;  %v9713_v48 = vrot.slane %v9712_v58, 4  ;;  %v9739_v49 = vshll.u32 %v9379_v59, 16  ;;  %v10159_v55 = vld [vmem:[#allocation2 + $0x24] sm:$0xe] }
 0x525   : > { %14996 = vmatpush3.bf16.msra.mxu1 %v15928_v36  ;;  %v9720_v36 = vshrl.u32 %v9377_v8, 16  ;;  %v9736_v24 = vor.u32 %v9735_v6, %v9731_v5  ;;  %v9746_v0 = vrot.slane %v9744_v34, 4  ;;  %v9749_v46 = vrot.slane %v9747_v10, 5  ;;  %v10161_v30 = vld [vmem:[#allocation2 + $0x2c] sm:$0x1] }
 0x526   : > { %14997 = vmatprep.subr.bf16.mxu1 %v15929_v50  ;;  %v9717_v60 = vrot.slane %v9715_v21, 5  ;;  %v10251_v38 = vrot.slane %v10154_v2, 5  ;;  %v9763_v35 = vshll.u32 %v9382_v4, 16  ;;  %v13618_v33 = vrot.slane %v10153_v13, 9  ;;  %v10166_v58 = vld [vmem:[#allocation2 + $0x40] sm:$0xf] }
 0x527   : > { %v9722_v53 = vrot.slane %v9720_v36, 4  ;;  %v9737_v45 = vrot.slane %v9736_v24, 4  ;;  %v9750_v7 = vor.u32 %v9749_v46, %v9746_v0  ;;  %v10254_v44 = vrot.slane %v10155_v1, 5  ;;  %v10165_v46 = vld [vmem:[#allocation2 + $0x3c] sm:$0xe] }
 0x528   : > { %14966 = vmatmul.mubr.bf16.gmra.mrb[12].mxu1 %v13601_v19  ;;  %v9698_v19 = vrot.slane %v9696_v14, 4  ;;  %v9741_v14 = vrot.slane %v9739_v49, 5  ;;  %v9718_v27 = vsel %vm16385_vm10, %v9713_v48, %v9717_v60  ;;  %v10253_v12 = vrot.slane %v10251_v38, 4  ;;  %v15932_v48 = vld [vmem:[%s19241_s2 + $0x188] sm:$0xff]   ;;  %v10172_v2 = vld [vmem:[#allocation2 + $0x58] sm:$0xf] }
 0x529   : > { %14969 = vmatprep.mubr.bf16.mxu1 %v13602_v28  ;;  %14998 = vmatpush3.bf16.msra.mxu1 %v15929_v50  ;;  %v9381_v50 = vld [vmem:[#allocation2 + $0xc4] sm:$0xf]  ;;  %v9726_v63 = vor.u32 %v9725_v9, %v9722_v53  ;;  %v9751_v36 = vrot.slane %v9750_v7, 4  ;;  %v10252_v53 = vsel %vm16609_vm13, %v13618_v33, %v10251_v38  ;;  %v10156_v9 = vld [vmem:[#allocation2 + $0x18] sm:$0xe]  ;;  %v13620_v59 = vrot.slane %v10159_v55, 9 }
 0x52a   : > { %14999 = vmatprep.subr.bf16.mxu1 %v15930_v61  ;;  %v9702_v51 = vor.u32 %v9701_v25, %v9698_v19  ;;  %v9753_v16 = vshll.u32 %v9381_v50, 16  ;;  %v9757_v17 = vshrl.u32 %v9381_v50, 16  ;;  %v9742_v3 = vsel %vm16385_vm10, %v9737_v45, %v9741_v14  ;;  %v10160_v25 = vld [vmem:[#allocation2 + $0x28] sm:$0xf]  ;;  %v10171_v13 = vld [vmem:[#allocation2 + $0x54] sm:$0xe] }
 0x52b   : > { %v9727_v43 = vrot.slane %v9726_v63, 4  ;;  %v9765_v19 = vrot.slane %v9763_v35, 5  ;;  %v10255_v62 = vsel %vm16609_vm13, %v10253_v12, %v10254_v44  ;;  %v10265_v40 = vrot.slane %v10160_v25, 5  ;;  %v10168_v35 = vld [vmem:[#allocation2 + $0x48] sm:$0xe] }
 0x52c   : > { %v9703_v28 = vrot.slane %v9702_v51, 4  ;;  %v9759_v47 = vrot.slane %v9757_v17, 4  ;;  %v13650_v6 = vcombine.low %v10252_v53, %v10255_v62  ;;  %v13619_v31 = vrot.slane %v10156_v9, 9  ;;  %v10173_v1 = vld [vmem:[#allocation2 + $0x5c] sm:$0x1]  ;;  %v15936_v55 = vld [vmem:[%s19241_s2 + $0x1a8] sm:$0xff]  }
 0x52d   : > { %15000 = vmatpush3.bf16.msra.mxu1 %v15930_v61  ;;  %v13606_v61 = vcombine.low %v9684_v20, %v9694_v29  ;;  %v9732_v52 = vsel %vm16385_vm10, %v9727_v43, %v9731_v5  ;;  %v10158_v5 = vld [vmem:[#allocation2 + $0x20] sm:$0x1]  ;;  %v10267_v20 = vrot.slane %v10265_v40, 4  ;;  %v10163_v29 = vld [vmem:[#allocation2 + $0x34] sm:$0xf]  ;;  %v10268_v34 = vrot.slane %v10161_v30, 5 }
 0x52e   : > { %15033 = vmatprep.subr.bf16.mxu1 %v18520_v11  ;;  %v9708_v8 = vsel %vm16385_vm10, %v9703_v28, %v9707_v54  ;;  %v13608_v26 = vcombine.low %v9732_v52, %v9742_v3  ;;  %v10261_v51 = vrot.slane %v10158_v5, 5  ;;  %v10279_v63 = vrot.slane %v10166_v58, 5  ;;  %v10164_v28 = vld [vmem:[#allocation2 + $0x38] sm:$0x1]  ;;  %v10169_v43 = vld [vmem:[#allocation2 + $0x4c] sm:$0xf] }
 0x52f   : > { %v13607_v15 = vcombine.low %v9708_v8, %v9718_v27  ;;  %v10269_v17 = vsel %vm16609_vm13, %v10267_v20, %v10268_v34  ;;  %v10266_v21 = vsel %vm16609_vm13, %v13620_v59, %v10265_v40  ;;  %v10275_v60 = vrot.slane %v10164_v28, 5  ;;  %v15933_v8 = vld [vmem:[%s19241_s2 + $0x190] sm:$0xff]   ;;  %v10181_v58 = vld [vmem:[#allocation2 + $0x7c] sm:$0xf] }
 0x530   : > { %14970 = vmatmul.mubr.bf16.gmra.mrb[16].mxu1 %v13603_v57  ;;  %v9755_v57 = vrot.slane %v9753_v16, 5  ;;  %v10272_v16 = vrot.slane %v10163_v29, 5  ;;  %v13652_v49 = vcombine.low %v10266_v21, %v10269_v17  ;;  %v13622_v14 = vrot.slane %v10165_v46, 9  ;;  %v10178_v33 = vld [vmem:[#allocation2 + $0x70] sm:$0xf] }
 0x531   : > { %14973 = vmatprep.mubr.bf16.mxu1 %v13604_v23  ;;  %v10258_v23 = vrot.slane %v10157_v22, 5  ;;  %v10286_v7 = vrot.slane %v10169_v43, 5  ;;  %v10293_v52 = vrot.slane %v10172_v2, 5  ;;  %v10175_v22 = vld [vmem:[#allocation2 + $0x64] sm:$0xf]  ;;  %v13624_v44 = vrot.slane %v10171_v13, 9 }
 0x532   : > { %v9760_v32 = vor.u32 %v9759_v47, %v9755_v57  ;;  %v9756_v54 = vsel %vm16385_vm10, %v9751_v36, %v9755_v57  ;;  %v10274_v0 = vrot.slane %v10272_v16, 4  ;;  %v10167_v57 = vld [vmem:[#allocation2 + $0x44] sm:$0x1]  ;;  %v10281_v47 = vrot.slane %v10279_v63, 4  ;;  %v10177_v29 = vld [vmem:[#allocation2 + $0x6c] sm:$0xe] }
 0x533   : > { %v10260_v50 = vrot.slane %v10258_v23, 4  ;;  %v10259_v24 = vsel %vm16609_vm13, %v13619_v31, %v10258_v23  ;;  %v10282_v4 = vrot.slane %v10167_v57, 5  ;;  %v10280_v38 = vsel %vm16609_vm13, %v13622_v14, %v10279_v63  ;;  %v10179_v31 = vld [vmem:[#allocation2 + $0x74] sm:$0x1]  ;;  %v10182_v46 = vld [vmem:[#allocation2 + $0x80] sm:$0x1] }
 0x534   : > { %v9761_v18 = vrot.slane %v9760_v32, 4  ;;  %v10276_v27 = vsel %vm16609_vm13, %v10274_v0, %v10275_v60  ;;  %v10295_v12 = vrot.slane %v10293_v52, 4  ;;  %v10300_v62 = vrot.slane %v10175_v22, 5  ;;  %v15937_v63 = vld [vmem:[%s19241_s2 + $0x1b0] sm:$0xff]   ;;  %v10180_v0 = vld [vmem:[#allocation2 + $0x78] sm:$0xe] }
 0x535   : > { %v10262_v10 = vsel %vm16609_vm13, %v10260_v50, %v10261_v51  ;;  %v10283_v32 = vsel %vm16609_vm13, %v10281_v47, %v10282_v4  ;;  %v10294_v5 = vsel %vm16609_vm13, %v13624_v44, %v10293_v52  ;;  %v10176_v50 = vld [vmem:[#allocation2 + $0x68] sm:$0x1]  ;;  %v10310_v17 = vrot.slane %v10179_v31, 5  ;;  %v15938_v57 = vld [vmem:[%s19241_s2 + $0x1b8] sm:$0xff]   ;;  %v10185_v60 = vld [vmem:[#allocation2 + $0x8c] sm:$0x1] }
 0x536   : > { %v9766_v41 = vsel %vm16385_vm10, %v9761_v18, %v9765_v19  ;;  %v13654_v36 = vcombine.low %v10280_v38, %v10283_v32  ;;  %v10288_v18 = vrot.slane %v10286_v7, 4  ;;  %v13623_v19 = vrot.slane %v10168_v35, 9  ;;  %v10187_v14 = vld [vmem:[#allocation2 + $0x94] sm:$0xf]  ;;  %v18611_v52 = vld [vmem:[%s19241_s2 + $0x1c0] sm:$0xff]  }
 0x537   : > { %v13609_v39 = vcombine.low %v9756_v54, %v9766_v41  ;;  %v10296_v54 = vrot.slane %v10173_v1, 5  ;;  %v15935_v41 = vld [vmem:[%s19241_s2 + $0x1a0] sm:$0xff]   ;;  %v10302_v20 = vrot.slane %v10300_v62, 4  ;;  %v10303_v34 = vrot.slane %v10176_v50, 5  ;;  %v10188_v13 = vld [vmem:[#allocation2 + $0x98] sm:$0x1] }
 0x538   : > { %14974 = vmatmul.mubr.bf16.gmra.mrb[20].mxu1 %v13605_v42  ;;  %v13651_v42 = vcombine.low %v10259_v24, %v10262_v10  ;;  %v10287_v53 = vsel %vm16609_vm13, %v13623_v19, %v10286_v7  ;;  %v10184_v10 = vld [vmem:[#allocation2 + $0x88] sm:$0xf]  ;;  %v13627_v4 = vrot.slane %v10180_v0, 9  ;;  %v10324_v32 = vrot.slane %v10185_v60, 5  ;;  %v10189_v22 = vld [vmem:[#allocation2 + $0x9c] sm:$0xe] }
 0x539   : > { %14977 = vmatprep.mubr.bf16.mxu1 %v13606_v61  ;;  %v10162_v61 = vld [vmem:[#allocation2 + $0x30] sm:$0xe]  ;;  %v10297_v40 = vsel %vm16609_vm13, %v10295_v12, %v10296_v54  ;;  %v10304_v24 = vsel %vm16609_vm13, %v10302_v20, %v10303_v34  ;;  %v10191_v19 = vld [vmem:[#allocation2 + $0xa4] sm:$0x1]  ;;  %v10331_v54 = vrot.slane %v10188_v13, 5 }
 0x53a   : > { %v13621_v45 = vrot.slane %v10162_v61, 9  ;;  %v13656_v30 = vcombine.low %v10294_v5, %v10297_v40  ;;  %v10321_v61 = vrot.slane %v10184_v10, 5  ;;  %v10195_v31 = vld [vmem:[#allocation2 + $0xb4] sm:$0xe]  ;;  %v18667_v13 = vld [vmem:[%s19241_s2 + $0x200] sm:$0xff]  }
 0x53c   : > { %v10323_v2 = vrot.slane %v10321_v61, 4 }
 0x53e   : > { %v10325_v38 = vsel %vm16609_vm13, %v10323_v2, %v10324_v32  ;;  %v15939_v2 = vld [vmem:[#allocation2 + $0x18] sm:$0xff]  }
 0x53f   : > { %v15950_v32 = vld [vmem:[%s19241_s2 + $0x1d8] sm:$0xff]  }
 0x540   : > { %14978 = vmatmul.mubr.bf16.gmra.mrb[24].mxu1 %v13607_v15  ;;  %v10170_v15 = vld [vmem:[#allocation2 + $0x50] sm:$0x1] }
 0x541   : > { %14981 = vmatprep.mubr.bf16.mxu1 %v13608_v26  ;;  %v15934_v26 = vld [vmem:[%s19241_s2 + $0x198] sm:$0xff]   ;;  %v10289_v25 = vrot.slane %v10170_v15, 5 }
 0x543   : > { %v10290_v23 = vsel %vm16609_vm13, %v10288_v18, %v10289_v25  ;;  %v10186_v18 = vld [vmem:[#allocation2 + $0x90] sm:$0xe] }
 0x544   : > { %v13655_v9 = vcombine.low %v10287_v53, %v10290_v23  ;;  %v13629_v44 = vrot.slane %v10186_v18, 9  ;;  %v13630_v23 = vrot.slane %v10189_v22, 9  ;;  %v15951_v18 = vld [vmem:[#allocation2 + $0x78] sm:$0xff]   ;;  %v15952_v22 = vld [vmem:[#allocation2 + $0x84] sm:$0xff]  }
 0x548   : > { %14982 = vmatmul.mubr.bf16.gmra.mrb[28].mxu1 %v13609_v39  ;;  %v10307_v39 = vrot.slane %v10178_v33, 5  ;;  %v10193_v33 = vld [vmem:[#allocation2 + $0xac] sm:$0xf] }
 0x549   : > { %15001 = vmatprep.mubr.bf16.mxu1 %v13650_v6  ;;  %v10174_v6 = vld [vmem:[#allocation2 + $0x60] sm:$0xe] }
 0x54a   : > { %v10309_v51 = vrot.slane %v10307_v39, 4  ;;  %v13625_v59 = vrot.slane %v10174_v6, 9 }
 0x54c   : > { %v10311_v21 = vsel %vm16609_vm13, %v10309_v51, %v10310_v17  ;;  %v10301_v28 = vsel %vm16609_vm13, %v13625_v59, %v10300_v62  ;;  %v10338_v62 = vrot.slane %v10191_v19, 5  ;;  %v10197_v51 = vld [vmem:[#allocation2 + $0xbc] sm:$0x1]  ;;  %v10199_v59 = vld [vmem:[#allocation2 + $0xc4] sm:$0xf]  ;;  %v15954_v19 = vld [vmem:[#allocation2 + $0x90] sm:$0xff]  }
 0x54d   : > { %v10352_v17 = vrot.slane %v10197_v51, 5 }
 0x550   : > { %15002 = vmatmul.mubr.bf16.vlgmr.msra.gmra.mrb[0].mxu1 %v13651_v42  ;;  %v10314_v42 = vrot.slane %v10181_v58, 5 }
 0x551   : > { %15005 = vmatprep.mubr.bf16.mxu1 %v13652_v49  ;;  %15034 = vmatpush3.bf16.msra.mxu1 %v18520_v11  ;;  %v10273_v11 = vsel %vm16609_vm13, %v13621_v45, %v10272_v16  ;;  %v13626_v16 = vrot.slane %v10177_v29, 9  ;;  %v10183_v45 = vld [vmem:[#allocation2 + $0x84] sm:$0xe] }
 0x552   : > { %15035 = vmatprep.subr.bf16.mxu1 %v15932_v48  ;;  %v13653_v3 = vcombine.low %v10273_v11, %v10276_v27  ;;  %v10316_v43 = vrot.slane %v10314_v42, 4  ;;  %v10190_v27 = vld [vmem:[#allocation2 + $0xa0] sm:$0xf]  ;;  %v13628_v7 = vrot.slane %v10183_v45, 9  ;;  %v10315_v15 = vsel %vm16609_vm13, %v13627_v4, %v10314_v42  ;;  %v15944_v4 = vld [vmem:[%s19241_s2 + $0x1c8] sm:$0xff]  }
 0x553   : > { %v10308_v49 = vsel %vm16609_vm13, %v13626_v16, %v10307_v39  ;;  %v10335_v35 = vrot.slane %v10190_v27, 5  ;;  %v10342_v39 = vrot.slane %v10193_v33, 5  ;;  %v13632_v16 = vrot.slane %v10195_v31, 9  ;;  %v15947_v27 = vld [vmem:[%s19241_s2 + $0x1d0] sm:$0xff]  }
 0x554   : > { %v13658_v47 = vcombine.low %v10308_v49, %v10311_v21  ;;  %v10200_v49 = vld [vmem:[#allocation2 + $0xc8] sm:$0x1] }
 0x555   : > { %15036 = vmatpush3.bf16.msra.mxu1 %v15932_v48  ;;  %v13657_v48 = vcombine.low %v10301_v28, %v10304_v24  ;;  %v10337_v25 = vrot.slane %v10335_v35, 4  ;;  %v10336_v50 = vsel %vm16609_vm13, %v13630_v23, %v10335_v35  ;;  %v10344_v29 = vrot.slane %v10342_v39, 4  ;;  %v15948_v35 = vld [vmem:[#allocation2 + $0x60] sm:$0xff]  }
 0x556   : > { %15037 = vmatprep.subr.bf16.mxu1 %v15933_v8  ;;  %v10356_v24 = vrot.slane %v10199_v59, 5 }
 0x557   : > { %v10339_v53 = vsel %vm16609_vm13, %v10337_v25, %v10338_v62 }
 0x558   : > { %15006 = vmatmul.mubr.bf16.gmra.mrb[4].mxu1 %v13653_v3  ;;  %v10328_v3 = vrot.slane %v10187_v14, 5  ;;  %v13662_v20 = vcombine.low %v10336_v50, %v10339_v53  ;;  %v15940_v14 = vld [vmem:[#allocation2 + $0x24] sm:$0xff]   ;;  %v15955_v50 = vld [vmem:[#allocation2 + $0x9c] sm:$0xff]  }
 0x559   : > { %15009 = vmatprep.mubr.bf16.mxu1 %v13654_v36  ;;  %15038 = vmatpush3.bf16.msra.mxu1 %v15933_v8  ;;  %v10317_v8 = vrot.slane %v10182_v46, 5  ;;  %v10322_v36 = vsel %vm16609_vm13, %v13628_v7, %v10321_v61  ;;  %v10358_v46 = vrot.slane %v10356_v24, 4  ;;  %v15943_v7 = vld [vmem:[#allocation2 + $0x3c] sm:$0xff]  }
 0x55a   : > { %15039 = vmatprep.subr.bf16.mxu1 %v15934_v26  ;;  %v13660_v1 = vcombine.low %v10322_v36, %v10325_v38  ;;  %v10330_v12 = vrot.slane %v10328_v3, 4  ;;  %v10329_v5 = vsel %vm16609_vm13, %v13629_v44, %v10328_v3  ;;  %v15946_v3 = vld [vmem:[#allocation2 + $0x54] sm:$0xff]   ;;  %v15956_v38 = vld [vmem:[%s19241_s2 + $0x1e8] sm:$0xff]  }
 0x55b   : > { %v10318_v11 = vsel %vm16609_vm13, %v10316_v43, %v10317_v8  ;;  %v15942_v8 = vld [vmem:[#allocation2 + $0x30] sm:$0xff]   ;;  %v15962_v36 = vld [vmem:[%s19241_s2 + $0x1f8] sm:$0xff]  }
 0x55c   : > { %v10332_v40 = vsel %vm16609_vm13, %v10330_v12, %v10331_v54  ;;  %v11198_v12 = vld [vmem:[#allocation2 + $0x1c] sm:$0xf] }
 0x55d   : > { %15040 = vmatpush3.bf16.msra.mxu1 %v15934_v26  ;;  %v13659_v26 = vcombine.low %v10315_v15, %v10318_v11  ;;  %v13661_v6 = vcombine.low %v10329_v5, %v10332_v40  ;;  %v15945_v11 = vld [vmem:[#allocation2 + $0x48] sm:$0xff]   ;;  %v15959_v15 = vld [vmem:[%s19241_s2 + $0x1f0] sm:$0xff]   ;;  %v11255_v44 = vshll.u32 %v11198_v12, 16  ;;  %v11259_v54 = vshrl.u32 %v11198_v12, 16 }
 0x55e   : > { %15041 = vmatprep.subr.bf16.mxu1 %v15935_v41 }
 0x55f   : > { %v18670_v53 = vrot.slane %v11255_v44, 5 }
 0x560   : > { %15010 = vmatmul.mubr.bf16.gmra.mrb[8].mxu1 %v13655_v9 }
 0x561   : > { %15013 = vmatprep.mubr.bf16.mxu1 %v13656_v30  ;;  %15042 = vmatpush3.bf16.msra.mxu1 %v15935_v41  ;;  %v10196_v41 = vld [vmem:[#allocation2 + $0xb8] sm:$0xf]  ;;  %v10194_v30 = vld [vmem:[#allocation2 + $0xb0] sm:$0x1] }
 0x562   : > { %15043 = vmatprep.subr.bf16.mxu1 %v15936_v55  ;;  %v10349_v9 = vrot.slane %v10196_v41, 5  ;;  %v10345_v10 = vrot.slane %v10194_v30, 5  ;;  %v11200_v41 = vld [vmem:[#allocation2 + $0x24] sm:$0xf]  ;;  %v11204_v30 = vld [vmem:[#allocation2 + $0x34] sm:$0xf] }
 0x563   : > { %v11270_v40 = vshrl.u32 %v11200_v41, 16  ;;  %v11273_v5 = vshll.u32 %v11200_v41, 16 }
 0x564   : > { %v10351_v58 = vrot.slane %v10349_v9, 4  ;;  %v10350_v28 = vsel %vm16609_vm13, %v13632_v16, %v10349_v9  ;;  %v11261_v9 = vrot.slane %v11259_v54, 4  ;;  %v11208_v54 = vld [vmem:[#allocation2 + $0x44] sm:$0x1] }
 0x565   : > { %15044 = vmatpush3.bf16.msra.mxu1 %v15936_v55  ;;  %v10192_v55 = vld [vmem:[#allocation2 + $0xa8] sm:$0xe]  ;;  %v11272_v51 = vrot.slane %v11270_v40, 4  ;;  %v11275_v59 = vrot.slane %v11273_v5, 5  ;;  %v11213_v5 = vld [vmem:[#allocation2 + $0x58] sm:$0xf] }
 0x566   : > { %15045 = vmatprep.subr.bf16.mxu1 %v15937_v63  ;;  %v13631_v34 = vrot.slane %v10192_v55, 9  ;;  %v10353_v42 = vsel %vm16609_vm13, %v10351_v58, %v10352_v17  ;;  %v11203_v55 = vld [vmem:[#allocation2 + $0x30] sm:$0xf]  ;;  %v11262_v58 = vor.u32 %v11261_v9, %v18670_v53 }
 0x567   : > { %v13664_v0 = vcombine.low %v10350_v28, %v10353_v42  ;;  %v11294_v16 = vshrl.u32 %v11203_v55, 16  ;;  %v11297_v17 = vshll.u32 %v11203_v55, 16  ;;  %v11206_v42 = vld [vmem:[#allocation2 + $0x3c] sm:$0xf]  ;;  %v11207_v28 = vld [vmem:[#allocation2 + $0x40] sm:$0xf] }
 0x568   : > { %15014 = vmatmul.mubr.bf16.gmra.mrb[12].mxu1 %v13657_v48  ;;  %v10343_v21 = vsel %vm16609_vm13, %v13631_v34, %v10342_v39  ;;  %v10198_v48 = vld [vmem:[#allocation2 + $0xc0] sm:$0xe]  ;;  %v11199_v39 = vld [vmem:[#allocation2 + $0x20] sm:$0x1] }
 0x569   : > { %15017 = vmatprep.mubr.bf16.mxu1 %v13658_v47  ;;  %15046 = vmatpush3.bf16.msra.mxu1 %v15937_v63  ;;  %v10346_v63 = vsel %vm16609_vm13, %v10344_v29, %v10345_v10  ;;  %v10359_v47 = vrot.slane %v10200_v49, 5  ;;  %v11265_v31 = vshll.u32 %v11199_v39, 16  ;;  %v15958_v49 = vld [vmem:[#allocation2 + $0xb4] sm:$0xff]  }
 0x56a   : > { %15047 = vmatprep.subr.bf16.mxu1 %v15938_v57  ;;  %v13663_v61 = vcombine.low %v10343_v21, %v10346_v63  ;;  %v11303_v63 = vshll.u32 %v11204_v30, 16 }
 0x56b   : > { %v10360_v43 = vsel %vm16609_vm13, %v10358_v46, %v10359_v47  ;;  %v11276_v46 = vor.u32 %v11275_v59, %v11272_v51  ;;  %v11215_v59 = vld [vmem:[#allocation2 + $0x60] sm:$0xf] }
 0x56d   : > { %15048 = vmatpush3.bf16.msra.mxu1 %v15938_v57  ;;  %v13633_v57 = vrot.slane %v10198_v48, 9  ;;  %v11209_v48 = vld [vmem:[#allocation2 + $0x48] sm:$0xf] }
 0x56e   : > { %15081 = vmatprep.subr.bf16.mxu1 %v18611_v52 }
 0x56f   : > { %v10357_v45 = vsel %vm16609_vm13, %v13633_v57, %v10356_v24  ;;  %v11307_v24 = vshrl.u32 %v11204_v30, 16 }
 0x570   : > { %15018 = vmatmul.mubr.bf16.gmra.mrb[16].mxu1 %v13659_v26  ;;  %v13665_v60 = vcombine.low %v10357_v45, %v10360_v43  ;;  %v15949_v26 = vld [vmem:[#allocation2 + $0x6c] sm:$0xff]  }
 0x571   : > { %15021 = vmatprep.mubr.bf16.mxu1 %v13660_v1  ;;  %v11197_v1 = vld [vmem:[#allocation2 + $0x18] sm:$0xf]  ;;  %v11210_v43 = vld [vmem:[#allocation2 + $0x4c] sm:$0xf] }
 0x572   : > { %v11246_v25 = vshrl.u32 %v11197_v1, 16  ;;  %v11249_v33 = vshll.u32 %v11197_v1, 16  ;;  %v11202_v45 = vld [vmem:[#allocation2 + $0x2c] sm:$0x1] }
 0x573   : > { %v11289_v1 = vshll.u32 %v11202_v45, 16 }
 0x574   : > { %v11248_v23 = vrot.slane %v11246_v25, 4  ;;  %v11251_v62 = vrot.slane %v11249_v33, 5  ;;  %v11212_v33 = vld [vmem:[#allocation2 + $0x54] sm:$0xf] }
 0x575   : > { %v11291_v55 = vrot.slane %v11289_v1, 5  ;;  %v11366_v30 = vshrl.u32 %v11212_v33, 16 }
 0x576   : > { %v11252_v29 = vor.u32 %v11251_v62, %v11248_v23 }
 0x578   : > { %15022 = vmatmul.mubr.bf16.gmra.mrb[20].mxu1 %v13661_v6  ;;  %v11201_v6 = vld [vmem:[#allocation2 + $0x28] sm:$0xf]  ;;  %v11253_v21 = vrot.slane %v11252_v29, 4 }
 0x579   : > { %15025 = vmatprep.mubr.bf16.mxu1 %v13662_v20  ;;  %v15957_v20 = vld [vmem:[#allocation2 + $0xa8] sm:$0xff]   ;;  %v11279_v34 = vshll.u32 %v11201_v6, 16  ;;  %v11283_v10 = vshrl.u32 %v11201_v6, 16 }
 0x57a   : > { %v15961_v6 = vld [vmem:[#allocation2 + $0xcc] sm:$0xff]  }
 0x57b   : > { %v18673_v57 = vrot.slane %v11279_v34, 5  ;;  %v11285_v47 = vrot.slane %v11283_v10, 4  ;;  %v11337_v10 = vshll.u32 %v11208_v54, 16 }
 0x580   : > { %15026 = vmatmul.mubr.bf16.gmra.mrb[24].mxu1 %v13663_v61  ;;  %v11267_v61 = vrot.slane %v11265_v31, 5 }
 0x581   : > { %15029 = vmatprep.mubr.bf16.mxu1 %v13664_v0  ;;  %v11263_v0 = vrot.slane %v11262_v58, 4 }
 0x583   : > { %v11268_v12 = vsel %vm16385_vm10, %v11263_v0, %v11267_v61  ;;  %v11390_v0 = vshrl.u32 %v11215_v59, 16 }
 0x588   : > { %15030 = vmatmul.mubr.bf16.gmra.mrb[28].mxu1 %v13665_v60  ;;  %v11296_v60 = vrot.slane %v11294_v16, 4  ;;  %v11375_v16 = vshll.u32 %v11213_v5, 16 }
 0x589   : > { %15049 = vmatprep.mubr.bf16.mxu1 %v15939_v2  ;;  %v11299_v2 = vrot.slane %v11297_v17, 5  ;;  %v11379_v17 = vshrl.u32 %v11213_v5, 16 }
 0x590   : > { %15050 = vmatmul.mubr.bf16.vlgmr.msra.gmra.mrb[0].mxu1 %v15940_v14  ;;  %v18675_v14 = vrot.slane %v11303_v63, 5  ;;  %v11216_v63 = vld [vmem:[#allocation2 + $0x64] sm:$0xf] }
 0x591   : > { %15053 = vmatprep.mubr.bf16.mxu1 %v15942_v8  ;;  %15082 = vmatpush3.bf16.msra.mxu1 %v18611_v52  ;;  %v15953_v52 = vld [vmem:[%s19241_s2 + $0x1e0] sm:$0xff]   ;;  %v11205_v8 = vld [vmem:[#allocation2 + $0x38] sm:$0x1]  ;;  %v11403_v45 = vshrl.u32 %v11216_v63, 16 }
 0x592   : > { %15083 = vmatprep.subr.bf16.mxu1 %v15944_v4 }
 0x595   : > { %15084 = vmatpush3.bf16.msra.mxu1 %v15944_v4  ;;  %v11318_v4 = vshrl.u32 %v11206_v42, 16 }
 0x596   : > { %15085 = vmatprep.subr.bf16.mxu1 %v15947_v27 }
 0x597   : > { %v11320_v25 = vrot.slane %v11318_v4, 4  ;;  %v18701_v4 = vrot.slane %v11375_v16, 5 }
 0x598   : > { %15054 = vmatmul.mubr.bf16.gmra.mrb[4].mxu1 %v15943_v7  ;;  %v11321_v7 = vshll.u32 %v11206_v42, 16 }
 0x599   : > { %15057 = vmatprep.mubr.bf16.mxu1 %v15945_v11  ;;  %15086 = vmatpush3.bf16.msra.mxu1 %v15947_v27  ;;  %v11309_v27 = vrot.slane %v11307_v24, 4  ;;  %v11331_v11 = vshrl.u32 %v11207_v28, 16 }
 0x59a   : > { %15087 = vmatprep.subr.bf16.mxu1 %v15950_v32  ;;  %v11323_v41 = vrot.slane %v11321_v7, 5 }
 0x59b   : > { %v11310_v44 = vor.u32 %v11309_v27, %v18675_v14  ;;  %v11333_v62 = vrot.slane %v11331_v11, 4  ;;  %v11218_v27 = vld [vmem:[#allocation2 + $0x6c] sm:$0xf] }
 0x59c   : > { %v11324_v24 = vor.u32 %v11323_v41, %v11320_v25  ;;  %v11414_v1 = vshrl.u32 %v11218_v27, 16 }
 0x59d   : > { %15088 = vmatpush3.bf16.msra.mxu1 %v15950_v32  ;;  %v11327_v32 = vshll.u32 %v11207_v28, 16  ;;  %v11311_v34 = vrot.slane %v11310_v44, 4 }
 0x59e   : > { %15089 = vmatprep.subr.bf16.mxu1 %v15953_v52 }
 0x59f   : > { %v18686_v23 = vrot.slane %v11327_v32, 5  ;;  %v11325_v32 = vrot.slane %v11324_v24, 4 }
 0x5a0   : > { %15058 = vmatmul.mubr.bf16.gmra.mrb[8].mxu1 %v15946_v3  ;;  %v11342_v3 = vshrl.u32 %v11209_v48, 16 }
 0x5a1   : > { %15061 = vmatprep.mubr.bf16.mxu1 %v15948_v35  ;;  %15090 = vmatpush3.bf16.msra.mxu1 %v15953_v52  ;;  %v15960_v52 = vld [vmem:[#allocation2 + $0xc0] sm:$0xff]   ;;  %v11351_v35 = vshll.u32 %v11210_v43, 16  ;;  %v11334_v42 = vor.u32 %v11333_v62, %v18686_v23  ;;  %v11330_v41 = vsel %vm16385_vm10, %v11325_v32, %v18686_v23  ;;  %v11228_v32 = vld [vmem:[#allocation2 + $0x94] sm:$0xf] }
 0x5a2   : > { %15091 = vmatprep.subr.bf16.mxu1 %v15956_v38  ;;  %v11344_v40 = vrot.slane %v11342_v3, 4  ;;  %v11219_v3 = vld [vmem:[#allocation2 + $0x70] sm:$0xf] }
 0x5a3   : > { %v11335_v11 = vrot.slane %v11334_v42, 4  ;;  %v11423_v44 = vshll.u32 %v11219_v3, 16  ;;  %v11220_v42 = vld [vmem:[#allocation2 + $0x74] sm:$0x1] }
 0x5a5   : > { %15092 = vmatpush3.bf16.msra.mxu1 %v15956_v38  ;;  %v11345_v38 = vshll.u32 %v11209_v48, 16  ;;  %v11368_v48 = vrot.slane %v11366_v30, 4  ;;  %v11222_v30 = vld [vmem:[#allocation2 + $0x7c] sm:$0xf] }
 0x5a6   : > { %15093 = vmatprep.subr.bf16.mxu1 %v15959_v15 }
 0x5a7   : > { %v11347_v39 = vrot.slane %v11345_v38, 5 }
 0x5a8   : > { %15062 = vmatmul.mubr.bf16.gmra.mrb[12].mxu1 %v15949_v26  ;;  %v11258_v26 = vsel %vm16385_vm10, %v11253_v21, %v18670_v53  ;;  %v18688_v53 = vrot.slane %v11351_v35, 5  ;;  %v11211_v21 = vld [vmem:[#allocation2 + $0x50] sm:$0x1] }
 0x5a9   : > { %15065 = vmatprep.mubr.bf16.mxu1 %v15951_v18  ;;  %15094 = vmatpush3.bf16.msra.mxu1 %v15959_v15  ;;  %v11355_v15 = vshrl.u32 %v11210_v43, 16  ;;  %v11286_v18 = vor.u32 %v11285_v47, %v18673_v57  ;;  %v11348_v61 = vor.u32 %v11347_v39, %v11344_v40  ;;  %v11399_v43 = vshll.u32 %v11216_v63, 16  ;;  %v11217_v40 = vld [vmem:[#allocation2 + $0x68] sm:$0x1] }
 0x5aa   : > { %15095 = vmatprep.subr.bf16.mxu1 %v15962_v36  ;;  %v11427_v39 = vshrl.u32 %v11219_v3, 16  ;;  %v11451_v63 = vshrl.u32 %v11222_v30, 16 }
 0x5ab   : > { %v11357_v9 = vrot.slane %v11355_v15, 4  ;;  %v11287_v31 = vrot.slane %v11286_v18, 4  ;;  %v11392_v15 = vrot.slane %v11390_v0, 4  ;;  %v11405_v18 = vrot.slane %v11403_v45, 4  ;;  %v11225_v0 = vld [vmem:[#allocation2 + $0x88] sm:$0xf] }
 0x5ac   : > { %v11471_v3 = vshll.u32 %v11225_v0, 16 }
 0x5ad   : > { %15096 = vmatpush3.bf16.msra.mxu1 %v15962_v36  ;;  %v18680_v36 = vrot.slane %v11276_v46, 4  ;;  %v11358_v28 = vor.u32 %v11357_v9, %v18688_v53  ;;  %v11393_v46 = vshll.u32 %v11215_v59, 16  ;;  %v11221_v9 = vld [vmem:[#allocation2 + $0x78] sm:$0xf]  ;;  %v18728_v59 = vrot.slane %v11423_v44, 5 }
 0x5ae   : > { %15129 = vmatprep.subr.bf16.mxu1 %v18667_v13  ;;  %v11441_v16 = vshll.u32 %v11221_v9, 16 }
 0x5af   : > { %v11282_v29 = vsel %vm16385_vm10, %v18680_v36, %v18673_v57  ;;  %v11292_v57 = vsel %vm16385_vm10, %v11287_v31, %v11291_v55  ;;  %v11359_v38 = vrot.slane %v11358_v28, 4  ;;  %v18705_v36 = vrot.slane %v11399_v43, 5  ;;  %v15966_v43 = vld [vmem:[%s19241_s2 + $0x218] sm:$0xff]  }
 0x5b0   : > { %15066 = vmatmul.mubr.bf16.gmra.mrb[16].mxu1 %v15952_v22  ;;  %v11300_v22 = vor.u32 %v11299_v2, %v11296_v60  ;;  %v11339_v60 = vrot.slane %v11337_v10, 5  ;;  %v11361_v2 = vshll.u32 %v11211_v21, 16  ;;  %v11429_v10 = vrot.slane %v11427_v39, 4 }
 0x5b1   : > { %15069 = vmatprep.mubr.bf16.mxu1 %v15954_v19  ;;  %v11313_v19 = vshll.u32 %v11205_v8, 16  ;;  %v11381_v8 = vrot.slane %v11379_v17, 4  ;;  %v11447_v17 = vshll.u32 %v11222_v30, 16 }
 0x5b2   : > { %v11301_v51 = vrot.slane %v11300_v22, 4  ;;  %v13731_v22 = vcombine.low %v11282_v29, %v11292_v57  ;;  %v11363_v25 = vrot.slane %v11361_v2, 5  ;;  %v11340_v62 = vsel %vm16385_vm10, %v11335_v11, %v11339_v60  ;;  %v11227_v60 = vld [vmem:[#allocation2 + $0x90] sm:$0xf] }
 0x5b3   : > { %v11315_v58 = vrot.slane %v11313_v19, 5  ;;  %v15964_v19 = vld [vmem:[%s19241_s2 + $0x208] sm:$0xff]   ;;  %v11416_v29 = vrot.slane %v11414_v1, 4  ;;  %v11430_v2 = vor.u32 %v11429_v10, %v18728_v59  ;;  %v11486_v1 = vshrl.u32 %v11227_v60, 16 }
 0x5b4   : > { %v11306_v47 = vsel %vm16385_vm10, %v11301_v51, %v18675_v14  ;;  %v11214_v14 = vld [vmem:[#allocation2 + $0x5c] sm:$0x1]  ;;  %v11233_v10 = vld [vmem:[#allocation2 + $0xa8] sm:$0xf] }
 0x5b5   : > { %v11316_v7 = vsel %vm16385_vm10, %v11311_v34, %v11315_v58  ;;  %v11385_v55 = vshll.u32 %v11214_v14, 16  ;;  %v11409_v58 = vshll.u32 %v11217_v40, 16  ;;  %v11438_v34 = vshrl.u32 %v11221_v9, 16 }
 0x5b6   : > { %v13732_v54 = vcombine.low %v11306_v47, %v11316_v7  ;;  %v11453_v7 = vrot.slane %v11451_v63, 4  ;;  %v11433_v14 = vshll.u32 %v11220_v42, 16  ;;  %v18751_v40 = vrot.slane %v11471_v3, 5  ;;  %v11229_v42 = vld [vmem:[#allocation2 + $0x98] sm:$0x1] }
 0x5b7   : > { %v11387_v24 = vrot.slane %v11385_v55, 5  ;;  %v11411_v47 = vrot.slane %v11409_v58, 5  ;;  %v11440_v45 = vrot.slane %v11438_v34, 4  ;;  %v11231_v55 = vld [vmem:[#allocation2 + $0xa0] sm:$0xf]  ;;  %v11488_v30 = vrot.slane %v11486_v1, 4 }
 0x5b8   : > { %15070 = vmatmul.mubr.bf16.gmra.mrb[20].mxu1 %v15955_v50  ;;  %v13730_v50 = vcombine.low %v11258_v26, %v11268_v12  ;;  %v11395_v26 = vrot.slane %v11393_v46, 5  ;;  %v11417_v12 = vshll.u32 %v11218_v27, 16  ;;  %v18740_v27 = vrot.slane %v11447_v17, 5 }
 0x5b9   : > { %15073 = vmatprep.mubr.bf16.mxu1 %v15957_v20  ;;  %v11369_v20 = vshll.u32 %v11212_v33, 16  ;;  %v11382_v33 = vor.u32 %v11381_v8, %v18701_v4  ;;  %v11443_v8 = vrot.slane %v11441_v16, 5 }
 0x5ba   : > { %v11396_v23 = vor.u32 %v11395_v26, %v11392_v15  ;;  %v11419_v31 = vrot.slane %v11417_v12, 5  ;;  %v11489_v12 = vshll.u32 %v11227_v60, 16  ;;  %v11454_v44 = vor.u32 %v11453_v7, %v18740_v27 }
 0x5bb   : > { %v11383_v51 = vrot.slane %v11382_v33, 4  ;;  %v11444_v33 = vor.u32 %v11443_v8, %v11440_v45 }
 0x5bc   : > { %v11455_v16 = vrot.slane %v11454_v44, 4  ;;  %v11237_v44 = vld [vmem:[#allocation2 + $0xb8] sm:$0xf] }
 0x5bd   : > { %v11388_v57 = vsel %vm16385_vm10, %v11383_v51, %v11387_v24  ;;  %v11445_v58 = vrot.slane %v11444_v33, 4  ;;  %v11234_v24 = vld [vmem:[#allocation2 + $0xac] sm:$0xf] }
 0x5be   : > { %v11543_v45 = vshll.u32 %v11234_v24, 16  ;;  %v11547_v60 = vshrl.u32 %v11234_v24, 16 }
 0x5c0   : > { %15074 = vmatmul.mubr.bf16.gmra.mrb[24].mxu1 %v15958_v49  ;;  %v11371_v49 = vrot.slane %v11369_v20, 5  ;;  %v11406_v20 = vor.u32 %v11405_v18, %v18705_v36  ;;  %v15967_v18 = vld [vmem:[%s19241_s2 + $0x220] sm:$0xff]  }
 0x5c1   : > { %15077 = vmatprep.mubr.bf16.mxu1 %v15960_v52  ;;  %v11349_v52 = vrot.slane %v11348_v61, 4  ;;  %v11397_v61 = vrot.slane %v11396_v23, 4  ;;  %v11491_v23 = vrot.slane %v11489_v12, 5  ;;  %v18778_v12 = vrot.slane %v11543_v45, 5 }
 0x5c2   : > { %v11372_v35 = vor.u32 %v11371_v49, %v11368_v48  ;;  %v11407_v28 = vrot.slane %v11406_v20, 4  ;;  %v11420_v48 = vor.u32 %v11419_v31, %v11416_v29  ;;  %v11224_v49 = vld [vmem:[#allocation2 + $0x84] sm:$0xf]  ;;  %v15968_v31 = vld [vmem:[%s19241_s2 + $0x228] sm:$0xff]  }
 0x5c3   : > { %v11354_v5 = vsel %vm16385_vm10, %v11349_v52, %v18688_v53  ;;  %v15965_v53 = vld [vmem:[%s19241_s2 + $0x210] sm:$0xff]   ;;  %v11462_v11 = vshrl.u32 %v11224_v49, 16  ;;  %v11465_v52 = vshll.u32 %v11224_v49, 16 }
 0x5c4   : > { %v11412_v15 = vsel %vm16385_vm10, %v11407_v28, %v11411_v47  ;;  %v11421_v26 = vrot.slane %v11420_v48, 4  ;;  %v11519_v28 = vshll.u32 %v11231_v55, 16  ;;  %v11492_v48 = vor.u32 %v11491_v23, %v11488_v30 }
 0x5c6   : > { %v11426_v51 = vsel %vm16385_vm10, %v11421_v26, %v18728_v59  ;;  %v11523_v59 = vshrl.u32 %v11231_v55, 16  ;;  %v18773_v3 = vrot.slane %v11519_v28, 5 }
 0x5c8   : > { %15078 = vmatmul.mubr.bf16.gmra.mrb[28].mxu1 %v15961_v6  ;;  %v11364_v6 = vsel %vm16385_vm10, %v11359_v38, %v11363_v25  ;;  %v11475_v38 = vshrl.u32 %v11225_v0, 16  ;;  %v11431_v25 = vrot.slane %v11430_v2, 4  ;;  %v11534_v0 = vshrl.u32 %v11233_v10, 16 }
 0x5c9   : > { %15097 = vmatprep.mubr.bf16.mxu1 %v13730_v50  ;;  %v18721_v50 = vrot.slane %v11372_v35, 4  ;;  %v13734_v21 = vcombine.low %v11354_v5, %v11364_v6  ;;  %v11402_v35 = vsel %vm16385_vm10, %v11397_v61, %v18705_v36  ;;  %v11435_v6 = vrot.slane %v11433_v14, 5 }
 0x5ca   : > { %v11477_v39 = vrot.slane %v11475_v38, 4  ;;  %v13736_v5 = vcombine.low %v11402_v35, %v11412_v15  ;;  %v11525_v38 = vrot.slane %v11523_v59, 4  ;;  %v11493_v35 = vrot.slane %v11492_v48, 4 }
 0x5cb   : > { %v11378_v46 = vsel %vm16385_vm10, %v18721_v50, %v18701_v4  ;;  %v11223_v4 = vld [vmem:[#allocation2 + $0x80] sm:$0x1]  ;;  %v11230_v50 = vld [vmem:[#allocation2 + $0x9c] sm:$0xf]  ;;  %v11536_v26 = vrot.slane %v11534_v0, 4 }
 0x5cc   : > { %v11457_v36 = vshll.u32 %v11223_v4, 16  ;;  %v13735_v9 = vcombine.low %v11378_v46, %v11388_v57  ;;  %v11478_v63 = vor.u32 %v11477_v39, %v18751_v40  ;;  %v11513_v61 = vshll.u32 %v11230_v50, 16  ;;  %v15969_v57 = vld [vmem:[%s19241_s2 + $0x230] sm:$0xff]   ;;  %v11232_v4 = vld [vmem:[#allocation2 + $0xa4] sm:$0x1] }
 0x5cd   : > { %v11537_v46 = vshll.u32 %v11233_v10, 16  ;;  %v11239_v39 = vld [vmem:[#allocation2 + $0xc0] sm:$0xf]  ;;  %v11238_v0 = vld [vmem:[#allocation2 + $0xbc] sm:$0x1] }
 0x5ce   : > { %v11459_v34 = vrot.slane %v11457_v36, 5  ;;  %v11479_v7 = vrot.slane %v11478_v63, 4 }
 0x5cf   : > { %v11539_v14 = vrot.slane %v11537_v46, 5 }
 0x5d0   : > { %15098 = vmatmul.mubr.bf16.vlgmr.msra.gmra.mrb[0].mxu1 %v13731_v22  ;;  %v11495_v22 = vshll.u32 %v11228_v32, 16  ;;  %v11460_v2 = vsel %vm16385_vm10, %v11455_v16, %v11459_v34 }
 0x5d1   : > { %15101 = vmatprep.mubr.bf16.mxu1 %v13732_v54  ;;  %15130 = vmatpush3.bf16.msra.mxu1 %v18667_v13  ;;  %v13733_v13 = vcombine.low %v11330_v41, %v11340_v62  ;;  %v11226_v54 = vld [vmem:[#allocation2 + $0x8c] sm:$0x1]  ;;  %v11464_v41 = vrot.slane %v11462_v11, 4  ;;  %v11467_v62 = vrot.slane %v11465_v52, 5  ;;  %v11515_v52 = vrot.slane %v11513_v61, 5 }
 0x5d2   : > { %15131 = vmatprep.subr.bf16.mxu1 %v15964_v19  ;;  %v18753_v20 = vrot.slane %v11495_v22, 5  ;;  %v11549_v22 = vrot.slane %v11547_v60, 4  ;;  %v11243_v61 = vld [vmem:[#allocation2 + $0xd0] sm:$0xf] }
 0x5d3   : > { %v11468_v17 = vor.u32 %v11467_v62, %v11464_v41  ;;  %v11526_v41 = vor.u32 %v11525_v38, %v18773_v3  ;;  %v11529_v62 = vshll.u32 %v11232_v4, 16  ;;  %v11577_v38 = vshll.u32 %v11238_v0, 16  ;;  %v12018_v0 = vld [vmem:[#allocation2 + $0x24] sm:$0xe] }
 0x5d4   : > { %v11550_v30 = vor.u32 %v11549_v22, %v18778_v12 }
 0x5d5   : > { %15132 = vmatpush3.bf16.msra.mxu1 %v15964_v19  ;;  %v11499_v19 = vshrl.u32 %v11228_v32, 16  ;;  %v11469_v8 = vrot.slane %v11468_v17, 4  ;;  %v11505_v32 = vshll.u32 %v11229_v42, 16  ;;  %v11527_v16 = vrot.slane %v11526_v41, 4 }
 0x5d6   : > { %15133 = vmatprep.subr.bf16.mxu1 %v15965_v53  ;;  %v11531_v17 = vrot.slane %v11529_v62, 5  ;;  %v11551_v28 = vrot.slane %v11550_v30, 4 }
 0x5d7   : > { %v11501_v29 = vrot.slane %v11499_v19, 4  ;;  %v11236_v19 = vld [vmem:[#allocation2 + $0xb4] sm:$0xf]  ;;  %v11507_v33 = vrot.slane %v11505_v32, 5 }
 0x5d8   : > { %15102 = vmatmul.mubr.bf16.gmra.mrb[4].mxu1 %v13733_v13  ;;  %v11481_v13 = vshll.u32 %v11226_v54, 16  ;;  %v11558_v55 = vshrl.u32 %v11236_v19, 16  ;;  %v11561_v23 = vshll.u32 %v11236_v19, 16  ;;  %v11532_v4 = vsel %vm16385_vm10, %v11527_v16, %v11531_v17  ;;  %v12017_v16 = vld [vmem:[#allocation2 + $0x20] sm:$0x1] }
 0x5d9   : > { %15105 = vmatprep.mubr.bf16.mxu1 %v13734_v21  ;;  %15134 = vmatpush3.bf16.msra.mxu1 %v15965_v53  ;;  %v11436_v53 = vsel %vm16385_vm10, %v11431_v25, %v11435_v6  ;;  %v11510_v21 = vshrl.u32 %v11230_v50, 16  ;;  %v11502_v49 = vor.u32 %v11501_v29, %v18753_v20  ;;  %v11474_v25 = vsel %vm16385_vm10, %v11469_v8, %v18751_v40  ;;  %v11235_v6 = vld [vmem:[#allocation2 + $0xb0] sm:$0x1] }
 0x5da   : > { %15135 = vmatprep.subr.bf16.mxu1 %v15966_v43  ;;  %v13737_v47 = vcombine.low %v11426_v51, %v11436_v53  ;;  %v11483_v1 = vrot.slane %v11481_v13, 5  ;;  %v11540_v50 = vor.u32 %v11539_v14, %v11536_v26  ;;  %v11567_v29 = vshll.u32 %v11237_v44, 16 }
 0x5db   : > { %v11512_v11 = vrot.slane %v11510_v21, 4  ;;  %v11503_v15 = vrot.slane %v11502_v49, 4  ;;  %v11582_v51 = vshrl.u32 %v11239_v39, 16  ;;  %v11585_v53 = vshll.u32 %v11239_v39, 16  ;;  %v11242_v21 = vld [vmem:[#allocation2 + $0xcc] sm:$0xf] }
 0x5dc   : > { %v11484_v36 = vsel %vm16385_vm10, %v11479_v7, %v11483_v1  ;;  %v11541_v24 = vrot.slane %v11540_v50, 4  ;;  %v11560_v42 = vrot.slane %v11558_v55, 4  ;;  %v11563_v59 = vrot.slane %v11561_v23, 5 }
 0x5dd   : > { %15136 = vmatpush3.bf16.msra.mxu1 %v15966_v43  ;;  %v11450_v43 = vsel %vm16385_vm10, %v11445_v58, %v18740_v27  ;;  %v15970_v27 = vld [vmem:[%s19241_s2 + $0x238] sm:$0xff]   ;;  %v11516_v54 = vor.u32 %v11515_v52, %v11512_v11  ;;  %v11508_v40 = vsel %vm16385_vm10, %v11503_v15, %v11507_v33  ;;  %v13739_v63 = vcombine.low %v11474_v25, %v11484_v36  ;;  %v11244_v33 = vld [vmem:[#allocation2 + $0xd4] sm:$0x1] }
 0x5de   : > { %15137 = vmatprep.subr.bf16.mxu1 %v15967_v18  ;;  %v11569_v48 = vrot.slane %v11567_v29, 5  ;;  %v11584_v46 = vrot.slane %v11582_v51, 4  ;;  %v11606_v45 = vshrl.u32 %v11242_v21, 16  ;;  %v11609_v60 = vshll.u32 %v11242_v21, 16 }
 0x5df   : > { %v11517_v10 = vrot.slane %v11516_v54, 4  ;;  %v11619_v8 = vshrl.u32 %v11243_v61, 16  ;;  %v11564_v11 = vor.u32 %v11563_v59, %v11560_v42  ;;  %v11546_v15 = vsel %vm16385_vm10, %v11541_v24, %v18778_v12  ;;  %v12022_v24 = vld [vmem:[#allocation2 + $0x34] sm:$0xf] }
 0x5e0   : > { %15106 = vmatmul.mubr.bf16.gmra.mrb[8].mxu1 %v13735_v9  ;;  %v11240_v9 = vld [vmem:[#allocation2 + $0xc4] sm:$0xf]  ;;  %v11611_v1 = vrot.slane %v11609_v60, 5  ;;  %v11579_v12 = vrot.slane %v11577_v38, 5  ;;  %v12116_v21 = vrot.slane %v12017_v16, 5 }
 0x5e1   : > { %15109 = vmatprep.mubr.bf16.mxu1 %v13736_v5  ;;  %15138 = vmatpush3.bf16.msra.mxu1 %v15967_v18  ;;  %v13738_v18 = vcombine.low %v11450_v43, %v11460_v2  ;;  %v11498_v5 = vsel %vm16385_vm10, %v11493_v35, %v18753_v20  ;;  %v11591_v58 = vshll.u32 %v11240_v9, 16  ;;  %v11595_v34 = vshrl.u32 %v11240_v9, 16  ;;  %v11241_v35 = vld [vmem:[#allocation2 + $0xc8] sm:$0x1]  ;;  %v12025_v60 = vld [vmem:[#allocation2 + $0x40] sm:$0xf] }
 0x5e2   : > { %15139 = vmatprep.subr.bf16.mxu1 %v15968_v31  ;;  %v11553_v20 = vshll.u32 %v11235_v6, 16  ;;  %v13740_v13 = vcombine.low %v11498_v5, %v11508_v40  ;;  %v11615_v2 = vshll.u32 %v11243_v61, 16  ;;  %v11522_v7 = vsel %vm16385_vm10, %v11517_v10, %v18773_v3  ;;  %v12016_v40 = vld [vmem:[#allocation2 + $0x1c] sm:$0xf]  ;;  %v12015_v10 = vld [vmem:[#allocation2 + $0x18] sm:$0xe] }
 0x5e3   : > { %v11597_v43 = vrot.slane %v11595_v34, 4  ;;  %v11621_v22 = vrot.slane %v11619_v8, 4  ;;  %v13741_v19 = vcombine.low %v11522_v7, %v11532_v4  ;;  %v11601_v25 = vshll.u32 %v11241_v35, 16  ;;  %v12028_v7 = vld [vmem:[#allocation2 + $0x4c] sm:$0xf] }
 0x5e4   : > { %v11555_v32 = vrot.slane %v11553_v20, 5  ;;  %v11617_v3 = vrot.slane %v11615_v2, 5  ;;  %v11565_v36 = vrot.slane %v11564_v11, 4  ;;  %v11625_v5 = vshll.u32 %v11244_v33, 16  ;;  %v12019_v20 = vld [vmem:[#allocation2 + $0x28] sm:$0xf] }
 0x5e5   : > { %15140 = vmatpush3.bf16.msra.mxu1 %v15968_v31  ;;  %v11571_v31 = vshrl.u32 %v11237_v44, 16  ;;  %v11603_v6 = vrot.slane %v11601_v25, 5  ;;  %v12113_v29 = vrot.slane %v12016_v40, 5  ;;  %v13754_v42 = vrot.slane %v12015_v10, 9  ;;  %v12031_v33 = vld [vmem:[#allocation2 + $0x58] sm:$0xf] }
 0x5e6   : > { %15141 = vmatprep.subr.bf16.mxu1 %v15969_v57  ;;  %v11556_v26 = vsel %vm16385_vm10, %v11551_v28, %v11555_v32  ;;  %v11622_v9 = vor.u32 %v11621_v22, %v11617_v3  ;;  %v11570_v50 = vsel %vm16385_vm10, %v11565_v36, %v11569_v48  ;;  %v12120_v61 = vrot.slane %v12019_v20, 5  ;;  %v12027_v22 = vld [vmem:[#allocation2 + $0x48] sm:$0xe]  ;;  %v12040_v16 = vld [vmem:[#allocation2 + $0x7c] sm:$0xf] }
 0x5e7   : > { %v11573_v49 = vrot.slane %v11571_v31, 4  ;;  %v13742_v44 = vcombine.low %v11546_v15, %v11556_v26  ;;  %v12115_v17 = vrot.slane %v12113_v29, 4  ;;  %v13755_v2 = vrot.slane %v12018_v0, 9 }
 0x5e8   : > { %15110 = vmatmul.mubr.bf16.gmra.mrb[12].mxu1 %v13737_v47  ;;  %v11593_v47 = vrot.slane %v11591_v58, 5  ;;  %v11623_v51 = vrot.slane %v11622_v9, 4  ;;  %v12141_v35 = vrot.slane %v12028_v7, 5 }
 0x5e9   : > { %15113 = vmatprep.mubr.bf16.mxu1 %v13738_v18  ;;  %15142 = vmatpush3.bf16.msra.mxu1 %v15969_v57  ;;  %v11587_v57 = vrot.slane %v11585_v53, 5  ;;  %v11574_v52 = vor.u32 %v11573_v49, %v11569_v48  ;;  %v11608_v18 = vrot.slane %v11606_v45, 4  ;;  %v11627_v53 = vrot.slane %v11625_v5, 5  ;;  %v12023_v45 = vld [vmem:[#allocation2 + $0x38] sm:$0x1] }
 0x5ea   : > { %15143 = vmatprep.subr.bf16.mxu1 %v15970_v27  ;;  %v12117_v59 = vsel %vm16609_vm13, %v12115_v17, %v12116_v21  ;;  %v12127_v48 = vrot.slane %v12022_v24, 5  ;;  %v12114_v49 = vsel %vm16609_vm13, %v13754_v42, %v12113_v29  ;;  %v12130_v4 = vrot.slane %v12023_v45, 5 }
 0x5eb   : > { %v11588_v14 = vor.u32 %v11587_v57, %v11584_v46  ;;  %v11575_v54 = vrot.slane %v11574_v52, 4  ;;  %v11612_v39 = vor.u32 %v11611_v1, %v11608_v18  ;;  %v12020_v46 = vld [vmem:[#allocation2 + $0x2c] sm:$0x1]  ;;  %v13786_v57 = vcombine.low %v12114_v49, %v12117_v59  ;;  %v12026_v18 = vld [vmem:[#allocation2 + $0x44] sm:$0x1] }
 0x5ec   : > { %v12129_v56 = vrot.slane %v12127_v48, 4  ;;  %v12123_v8 = vrot.slane %v12020_v46, 5  ;;  %v12134_v52 = vrot.slane %v12025_v60, 5  ;;  %v12121_v15 = vsel %vm16609_vm13, %v13755_v2, %v12120_v61  ;;  %v12036_v59 = vld [vmem:[#allocation2 + $0x6c] sm:$0xe] }
 0x5ed   : > { %15144 = vmatpush3.bf16.msra.mxu1 %v15970_v27  ;;  %v11598_v27 = vor.u32 %v11597_v43, %v11593_v47  ;;  %v11589_v41 = vrot.slane %v11588_v14, 4  ;;  %v11580_v55 = vsel %vm16385_vm10, %v11575_v54, %v11579_v12  ;;  %v11613_v31 = vrot.slane %v11612_v39, 4  ;;  %v12021_v43 = vld [vmem:[#allocation2 + $0x30] sm:$0xe]  ;;  %v12034_v54 = vld [vmem:[#allocation2 + $0x64] sm:$0xf] }
 0x5ee   : > { %v13743_v58 = vcombine.low %v11570_v50, %v11580_v55  ;;  %v13756_v32 = vrot.slane %v12021_v43, 9  ;;  %v12131_v38 = vsel %vm16609_vm13, %v12129_v56, %v12130_v4  ;;  %v12143_v25 = vrot.slane %v12141_v35, 4  ;;  %v12030_v55 = vld [vmem:[#allocation2 + $0x54] sm:$0xe]  ;;  %v12039_v46 = vld [vmem:[#allocation2 + $0x78] sm:$0xe] }
 0x5ef   : > { %v11599_v62 = vrot.slane %v11598_v27, 4  ;;  %v11594_v30 = vsel %vm16385_vm10, %v11589_v41, %v11593_v47  ;;  %v12122_v47 = vrot.slane %v12120_v61, 4  ;;  %v12024_v27 = vld [vmem:[#allocation2 + $0x3c] sm:$0xe]  ;;  %v12137_v36 = vrot.slane %v12026_v18, 5 }
 0x5f0   : > { %15114 = vmatmul.mubr.bf16.gmra.mrb[16].mxu1 %v13739_v63  ;;  %v11618_v63 = vsel %vm16385_vm10, %v11613_v31, %v11617_v3  ;;  %v12128_v14 = vsel %vm16609_vm13, %v13756_v32, %v12127_v48  ;;  %v12136_v3 = vrot.slane %v12134_v52, 4  ;;  %v13758_v41 = vrot.slane %v12027_v22, 9  ;;  %v12033_v31 = vld [vmem:[#allocation2 + $0x60] sm:$0xe]  ;;  %v12038_v48 = vld [vmem:[#allocation2 + $0x74] sm:$0x1] }
 0x5f1   : > { %15117 = vmatprep.mubr.bf16.mxu1 %v13740_v13  ;;  %v11604_v23 = vsel %vm16385_vm10, %v11599_v62, %v11603_v6  ;;  %v11628_v13 = vsel %vm16385_vm10, %v11623_v51, %v11627_v53  ;;  %v12124_v11 = vsel %vm16609_vm13, %v12122_v47, %v12123_v8  ;;  %v13788_v1 = vcombine.low %v12128_v14, %v12131_v38  ;;  %v12035_v51 = vld [vmem:[#allocation2 + $0x68] sm:$0x1]  ;;  %v12046_v60 = vld [vmem:[#allocation2 + $0x94] sm:$0xf]  ;;  %v12045_v18 = vld [vmem:[#allocation2 + $0x90] sm:$0xe] }
 0x5f2   : > { %v13744_v34 = vcombine.low %v11594_v30, %v11604_v23  ;;  %v13745_v28 = vcombine.low %v11618_v63, %v11628_v13  ;;  %v13787_v26 = vcombine.low %v12121_v15, %v12124_v11  ;;  %v12138_v12 = vsel %vm16609_vm13, %v12136_v3, %v12137_v36  ;;  %v12032_v30 = vld [vmem:[#allocation2 + $0x5c] sm:$0x1]  ;;  %v12043_v43 = vld [vmem:[#allocation2 + $0x88] sm:$0xf]  ;;  %v12042_v15 = vld [vmem:[#allocation2 + $0x84] sm:$0xe] }
 0x5f3   : > { %v12148_v39 = vrot.slane %v12031_v33, 5  ;;  %v12155_v5 = vrot.slane %v12034_v54, 5  ;;  %v12142_v50 = vsel %vm16609_vm13, %v13758_v41, %v12141_v35  ;;  %v12151_v10 = vrot.slane %v12032_v30, 5  ;;  %v12049_v22 = vld [vmem:[#allocation2 + $0xa0] sm:$0xf] }
 0x5f4   : > { %v13760_v17 = vrot.slane %v12033_v31, 9  ;;  %v12158_v20 = vrot.slane %v12035_v51, 5  ;;  %v12169_v42 = vrot.slane %v12040_v16, 5  ;;  %v13761_v45 = vrot.slane %v12036_v59, 9  ;;  %v12052_v33 = vld [vmem:[#allocation2 + $0xac] sm:$0xf] }
 0x5f5   : > { %v12150_v29 = vrot.slane %v12148_v39, 4  ;;  %v12157_v53 = vrot.slane %v12155_v5, 4  ;;  %v12165_v56 = vrot.slane %v12038_v48, 5  ;;  %v13762_v2 = vrot.slane %v12039_v46, 9  ;;  %v12051_v30 = vld [vmem:[#allocation2 + $0xa8] sm:$0xe] }
 0x5f6   : > { %v12171_v47 = vrot.slane %v12169_v42, 4  ;;  %v12176_v32 = vrot.slane %v12043_v43, 5  ;;  %v12183_v11 = vrot.slane %v12046_v60, 5  ;;  %v12190_v41 = vrot.slane %v12049_v22, 5  ;;  %v12055_v31 = vld [vmem:[#allocation2 + $0xb8] sm:$0xf] }
 0x5f7   : > { %v12152_v63 = vsel %vm16609_vm13, %v12150_v29, %v12151_v10  ;;  %v12159_v24 = vsel %vm16609_vm13, %v12157_v53, %v12158_v20  ;;  %v12170_v35 = vsel %vm16609_vm13, %v13762_v2, %v12169_v42  ;;  %v12060_v60 = vld [vmem:[#allocation2 + $0xcc] sm:$0xe]  ;;  %v12062_v2 = vld [vmem:[#allocation2 + $0xd4] sm:$0x1] }
 0x5f8   : > { %15118 = vmatmul.mubr.bf16.gmra.mrb[20].mxu1 %v13741_v19  ;;  %v12029_v19 = vld [vmem:[#allocation2 + $0x50] sm:$0x1]  ;;  %v12185_v3 = vrot.slane %v12183_v11, 4 }
 0x5f9   : > { %15121 = vmatprep.mubr.bf16.mxu1 %v13742_v44  ;;  %v13757_v44 = vrot.slane %v12024_v27, 9  ;;  %v12144_v62 = vrot.slane %v12029_v19, 5  ;;  %v12178_v27 = vrot.slane %v12176_v32, 4  ;;  %v13763_v19 = vrot.slane %v12042_v15, 9 }
 0x5fb   : > { %v12145_v9 = vsel %vm16609_vm13, %v12143_v25, %v12144_v62  ;;  %v12135_v40 = vsel %vm16609_vm13, %v13757_v44, %v12134_v52  ;;  %v13764_v44 = vrot.slane %v12045_v18, 9 }
 0x5fc   : > { %v13789_v6 = vcombine.low %v12135_v40, %v12138_v12  ;;  %v13790_v23 = vcombine.low %v12142_v50, %v12145_v9  ;;  %v12197_v12 = vrot.slane %v12052_v33, 5  ;;  %v12048_v40 = vld [vmem:[#allocation2 + $0x9c] sm:$0xe] }
 0x5fd   : > { %v13765_v51 = vrot.slane %v12048_v40, 9 }
 0x5fe   : > { %v12199_v29 = vrot.slane %v12197_v12, 4 }
 0x600   : > { %15122 = vmatmul.mubr.bf16.gmra.mrb[24].mxu1 %v13743_v58  ;;  %v12037_v58 = vld [vmem:[#allocation2 + $0x70] sm:$0xf] }
 0x601   : > { %15125 = vmatprep.mubr.bf16.mxu1 %v13744_v34  ;;  %v13759_v34 = vrot.slane %v12030_v55, 9  ;;  %v12162_v13 = vrot.slane %v12037_v58, 5  ;;  %v12192_v55 = vrot.slane %v12190_v41, 4  ;;  %v12058_v58 = vld [vmem:[#allocation2 + $0xc4] sm:$0xf] }
 0x603   : > { %v12149_v21 = vsel %vm16609_vm13, %v13759_v34, %v12148_v39  ;;  %v12164_v0 = vrot.slane %v12162_v13, 4  ;;  %v12163_v52 = vsel %vm16609_vm13, %v13761_v45, %v12162_v13  ;;  %v12177_v39 = vsel %vm16609_vm13, %v13763_v19, %v12176_v32 }
 0x604   : > { %v13791_v61 = vcombine.low %v12149_v21, %v12152_v63  ;;  %v13766_v34 = vrot.slane %v12051_v30, 9  ;;  %v12211_v63 = vrot.slane %v12058_v58, 5  ;;  %v12191_v13 = vsel %vm16609_vm13, %v13765_v51, %v12190_v41  ;;  %v12054_v21 = vld [vmem:[#allocation2 + $0xb4] sm:$0xe] }
 0x605   : > { %v12166_v7 = vsel %vm16609_vm13, %v12164_v0, %v12165_v56  ;;  %v12059_v0 = vld [vmem:[#allocation2 + $0xc8] sm:$0x1] }
 0x606   : > { %v13793_v38 = vcombine.low %v12163_v52, %v12166_v7  ;;  %v12198_v42 = vsel %vm16609_vm13, %v13766_v34, %v12197_v12  ;;  %v12213_v46 = vrot.slane %v12211_v63, 4  ;;  %v12214_v56 = vrot.slane %v12059_v0, 5 }
 0x607   : > { %v12221_v52 = vrot.slane %v12062_v2, 5 }
 0x608   : > { %15126 = vmatmul.mubr.bf16.gmra.mrb[28].mxu1 %v13745_v28  ;;  %v12156_v28 = vsel %vm16609_vm13, %v13760_v17, %v12155_v5  ;;  %v12184_v5 = vsel %vm16609_vm13, %v13764_v44, %v12183_v11  ;;  %v12204_v17 = vrot.slane %v12055_v31, 5  ;;  %v12215_v7 = vsel %vm16609_vm13, %v12213_v46, %v12214_v56 }
 0x609   : > { %15145 = vmatprep.mubr.bf16.mxu1 %v13786_v57  ;;  %v13792_v49 = vcombine.low %v12156_v28, %v12159_v24  ;;  %v12041_v57 = vld [vmem:[#allocation2 + $0x80] sm:$0x1]  ;;  %v12061_v28 = vld [vmem:[#allocation2 + $0xd0] sm:$0xf] }
 0x60a   : > { %v12172_v8 = vrot.slane %v12041_v57, 5  ;;  %v12206_v48 = vrot.slane %v12204_v17, 4  ;;  %v13767_v57 = vrot.slane %v12054_v21, 9  ;;  %v12218_v43 = vrot.slane %v12061_v28, 5 }
 0x60c   : > { %v12173_v4 = vsel %vm16609_vm13, %v12171_v47, %v12172_v8  ;;  %v12205_v32 = vsel %vm16609_vm13, %v13767_v57, %v12204_v17  ;;  %v12220_v11 = vrot.slane %v12218_v43, 4 }
 0x60d   : > { %v13794_v14 = vcombine.low %v12170_v35, %v12173_v4  ;;  %v13769_v4 = vrot.slane %v12060_v60, 9 }
 0x610   : > { %15146 = vmatmul.mubr.bf16.vlgmr.msra.gmra.mrb[0].mxu1 %v13787_v26  ;;  %v12044_v26 = vld [vmem:[#allocation2 + $0x8c] sm:$0x1] }
 0x611   : > { %15149 = vmatprep.mubr.bf16.mxu1 %v13788_v1  ;;  %v12047_v1 = vld [vmem:[#allocation2 + $0x98] sm:$0x1]  ;;  %v12179_v25 = vrot.slane %v12044_v26, 5  ;;  %v12219_v26 = vsel %vm16609_vm13, %v13769_v4, %v12218_v43 }
 0x612   : > { %v12186_v36 = vrot.slane %v12047_v1, 5 }
 0x613   : > { %v12180_v54 = vsel %vm16609_vm13, %v12178_v27, %v12179_v25 }
 0x614   : > { %v12187_v62 = vsel %vm16609_vm13, %v12185_v3, %v12186_v36  ;;  %v13795_v9 = vcombine.low %v12177_v39, %v12180_v54 }
 0x615   : > { %v13796_v50 = vcombine.low %v12184_v5, %v12187_v62 }
 0x618   : > { %15150 = vmatmul.mubr.bf16.gmra.mrb[4].mxu1 %v13789_v6  ;;  %v12050_v6 = vld [vmem:[#allocation2 + $0xa4] sm:$0x1] }
 0x619   : > { %15153 = vmatprep.mubr.bf16.mxu1 %v13790_v23  ;;  %v12053_v23 = vld [vmem:[#allocation2 + $0xb0] sm:$0x1]  ;;  %v12193_v53 = vrot.slane %v12050_v6, 5 }
 0x61a   : > { %v12200_v10 = vrot.slane %v12053_v23, 5 }
 0x61b   : > { %v12194_v16 = vsel %vm16609_vm13, %v12192_v55, %v12193_v53 }
 0x61c   : > { %v12201_v20 = vsel %vm16609_vm13, %v12199_v29, %v12200_v10  ;;  %v13797_v24 = vcombine.low %v12191_v13, %v12194_v16 }
 0x61d   : > { %v13798_v59 = vcombine.low %v12198_v42, %v12201_v20 }
 0x620   : > { %15154 = vmatmul.mubr.bf16.gmra.mrb[8].mxu1 %v13791_v61  ;;  %v12056_v61 = vld [vmem:[#allocation2 + $0xbc] sm:$0x1] }
 0x621   : > { %15157 = vmatprep.mubr.bf16.mxu1 %v13792_v49  ;;  %v12057_v49 = vld [vmem:[#allocation2 + $0xc0] sm:$0xe]  ;;  %v12207_v47 = vrot.slane %v12056_v61, 5 }
 0x622   : > { %v13768_v45 = vrot.slane %v12057_v49, 9 }
 0x623   : > { %v12208_v8 = vsel %vm16609_vm13, %v12206_v48, %v12207_v47 }
 0x624   : > { %v12212_v35 = vsel %vm16609_vm13, %v13768_v45, %v12211_v63 }
 0x625   : > { %v13800_v15 = vcombine.low %v12212_v35, %v12215_v7 }
 0x628   : > { %15158 = vmatmul.mubr.bf16.gmra.mrb[12].mxu1 %v13793_v38  ;;  %v13799_v38 = vcombine.low %v12205_v32, %v12208_v8 }
 0x629   : > { %15161 = vmatprep.mubr.bf16.mxu1 %v13794_v14  ;;  %v12222_v14 = vsel %vm16609_vm13, %v12220_v11, %v12221_v52 }
 0x62a   : > { %v13801_v27 = vcombine.low %v12219_v26, %v12222_v14 }
 0x630   : > { %15162 = vmatmul.mubr.bf16.gmra.mrb[16].mxu1 %v13795_v9 }
 0x631   : > { %15165 = vmatprep.mubr.bf16.mxu1 %v13796_v50 }
 0x638   : > { %15166 = vmatmul.mubr.bf16.gmra.mrb[20].mxu1 %v13797_v24 }
 0x639   : > { %15169 = vmatprep.mubr.bf16.mxu1 %v13798_v59 }
 0x640   : > { %15170 = vmatmul.mubr.bf16.gmra.mrb[24].mxu1 %v13799_v38 }
 0x641   : > { %15173 = vmatprep.mubr.bf16.mxu1 %v13800_v15 }
 0x648   : > { %15174 = vmatmul.mubr.bf16.gmra.mrb[28].mxu1 %v13801_v27 }
 0x6e3   : > { %v18878_v18 = vpop.f32.mrb[0].mxu1 }
 0x6e4   : > { %v18880_v1 = vpop.f32.mrb[1].mxu1 }
 0x6e5   : > { %v18882_v3 = vpop.f32.mrb[2].mxu1 }
 0x6e6   : > { %v18884_v22 = vpop.f32.mrb[3].mxu1 }
 0x6e7   : > { %v12641_v19 = vadd.f32 %v18884_v22, %v18880_v1 }
 0x6e9   : > { %v12642_v25 = vadd.f32 %v18878_v18, %v12641_v19 }
 0x6eb   : > { %v18889_v33 = vpop.f32.mrb[4].mxu1  ;;  %v12643_v37 = vadd.f32 %v18882_v3, %v12642_v25 }
 0x6ec   : > { %v18892_v44 = vpop.f32.mrb[5].mxu1 }
 0x6ed   : > { %v12644_v36 = vadd.f32 %v12643_v37, %v18892_v44  ;;  %v18895_v54 = vpop.f32.mrb[6].mxu1 }
 0x6ee   : > { %v18897_v41 = vpop.f32.mrb[7].mxu1 }
 0x6ef   : > { %v12645_v62 = vadd.f32 %v12644_v36, %v18897_v41 }
 0x6f1   : > { %v12646_v12 = vadd.f32 %v18889_v33, %v12645_v62 }
 0x6f3   : > { %v18901_v39 = vpop.f32.mrb[8].mxu1  ;;  %v12647_v9 = vadd.f32 %v18895_v54, %v12646_v12 }
 0x6f4   : > { %v12418_v5 = vpop.f32.mrb[9].mxu1 }
 0x6f5   : > { %v12648_v40 = vadd.f32 %v12647_v9, %v12418_v5  ;;  %v18904_v6 = vpop.f32.mrb[10].mxu1 }
 0x6f6   : > { %v12421_v50 = vpop.f32.mrb[11].mxu1 }
 0x6f7   : > { %v12649_v55 = vadd.f32 %v12648_v40, %v12421_v50 }
 0x6f9   : > { %v12650_v30 = vadd.f32 %v18901_v39, %v12649_v55 }
 0x6fb   : > { %v15159_v23 = vpop.f32.mrb[12].mxu1  ;;  %v12651_v29 = vadd.f32 %v18904_v6, %v12650_v30 }
 0x6fc   : > { %v12434_v31 = vpop.f32.mrb[13].mxu1 }
 0x6fd   : > { %v12652_v51 = vadd.f32 %v12651_v29, %v12434_v31  ;;  %v15160_v53 = vpop.f32.mrb[14].mxu1 }
 0x6fe   : > { %v12437_v58 = vpop.f32.mrb[15].mxu1 }
 0x6ff   : > { %v12653_v34 = vadd.f32 %v12652_v51, %v12437_v58 }
 0x701   : > { %v12654_v10 = vadd.f32 %v15159_v23, %v12653_v34 }
 0x703   : > { %v15163_v16 = vpop.f32.mrb[16].mxu1  ;;  %v12655_v17 = vadd.f32 %v15160_v53, %v12654_v10 }
 0x704   : > { %v12450_v20 = vpop.f32.mrb[17].mxu1 }
 0x705   : > { %v12656_v63 = vadd.f32 %v12655_v17, %v12450_v20  ;;  %v15164_v13 = vpop.f32.mrb[18].mxu1 }
 0x706   : > { %v12453_v24 = vpop.f32.mrb[19].mxu1 }
 0x707   : > { %v12657_v42 = vadd.f32 %v12656_v63, %v12453_v24 }
 0x709   : > { %v12658_v21 = vadd.f32 %v15163_v16, %v12657_v42 }
 0x70b   : > { %v15167_v61 = vpop.f32.mrb[20].mxu1  ;;  %v12659_v28 = vadd.f32 %v15164_v13, %v12658_v21 }
 0x70c   : > { %v12466_v59 = vpop.f32.mrb[21].mxu1 }
 0x70d   : > { %v12660_v48 = vadd.f32 %v12659_v28, %v12466_v59  ;;  %v15168_v49 = vpop.f32.mrb[22].mxu1 }
 0x70e   : > { %v12469_v0 = vpop.f32.mrb[23].mxu1 }
 0x70f   : > { %v12661_v46 = vadd.f32 %v12660_v48, %v12469_v0 }
 0x711   : > { %v12662_v57 = vadd.f32 %v15167_v61, %v12661_v46 }
 0x713   : > { %v15171_v47 = vpop.f32.mrb[24].mxu1  ;;  %v12663_v43 = vadd.f32 %v15168_v49, %v12662_v57 }
 0x714   : > { %v12482_v45 = vpop.f32.mrb[25].mxu1 }
 0x715   : > { %v12664_v56 = vadd.f32 %v12663_v43, %v12482_v45  ;;  %v15172_v60 = vpop.f32.mrb[26].mxu1 }
 0x716   : > { %v12485_v2 = vpop.f32.mrb[27].mxu1 }
 0x717   : > { %v12665_v8 = vadd.f32 %v12664_v56, %v12485_v2 }
 0x719   : > { %v12666_v7 = vadd.f32 %v15171_v47, %v12665_v8 }
 0x71b   : > { %v15175_v32 = vpop.f32.mrb[28].mxu1  ;;  %v12667_v4 = vadd.f32 %v15172_v60, %v12666_v7 }
 0x71c   : > { %v12498_v11 = vpop.f32.mrb[29].mxu1 }
 0x71d   : > { %v12668_v52 = vadd.f32 %v12667_v4, %v12498_v11  ;;  %v15176_v38 = vpop.f32.mrb[30].mxu1 }
 0x71e   : > { %v12501_v35 = vpop.f32.mrb[31].mxu1 }
 0x71f   : > { %v12669_v15 = vadd.f32 %v12668_v52, %v12501_v35 }
 0x721   : > { %v12670_v26 = vadd.f32 %v15175_v32, %v12669_v15 }
 0x723   : > { %v12671_v14 = vadd.f32 %v15176_v38, %v12670_v26 }
 0x725   : > { %v12672_v27 = vrot.slane %v12671_v14, 4 }
 0x727   : > { %v12673_v19 = vadd.f32 %v12672_v27, %v12671_v14 }
 0x729   : > { %v12674_v25 = vrot.slane %v12673_v19, 2 }
 0x72b   : > { %v12675_v37 = vadd.f32 %v12674_v25, %v12673_v19 }
 0x72d   : > { %v12676_v36 = vrot.slane %v12675_v37, 1 }
 0x72f   : > { %v12677_v62 = vadd.f32 %v12676_v36, %v12675_v37 }
 0x731   : > { %v12678_v12 = vmul.f32 0.00390625, %v12677_v62 }
 0x733   : > { %v18909_v9 = vsub.f32 %v18880_v1, %v12678_v12  ;;  %v18912_v40 = vsub.f32 %v18884_v22, %v12678_v12  ;;  %v18915_v55 = vsub.f32 %v18878_v18, %v12678_v12  ;;  %v18918_v30 = vsub.f32 %v18882_v3, %v12678_v12 }
 0x734   : > { %v18921_v29 = vsub.f32 %v18892_v44, %v12678_v12  ;;  %v18924_v51 = vsub.f32 %v18897_v41, %v12678_v12  ;;  %v18927_v34 = vsub.f32 %v18889_v33, %v12678_v12  ;;  %v18930_v1 = vsub.f32 %v18895_v54, %v12678_v12 }
 0x735   : > { %v18932_v22 = vsub.f32 %v12418_v5, %v12678_v12  ;;  %v18934_v10 = vsub.f32 %v12421_v50, %v12678_v12  ;;  %v18937_v18 = vsub.f32 %v18901_v39, %v12678_v12  ;;  %v18940_v3 = vsub.f32 %v18904_v6, %v12678_v12 }
 0x736   : > { %v18942_v44 = vsub.f32 %v12434_v31, %v12678_v12  ;;  %v18944_v41 = vsub.f32 %v12437_v58, %v12678_v12  ;;  %v18946_v17 = vsub.f32 %v15159_v23, %v12678_v12  ;;  %v18948_v33 = vsub.f32 %v15160_v53, %v12678_v12 }
 0x737   : > { %v18950_v54 = vsub.f32 %v12450_v20, %v12678_v12  ;;  %v18952_v5 = vsub.f32 %v12453_v24, %v12678_v12  ;;  %v18954_v50 = vsub.f32 %v15163_v16, %v12678_v12  ;;  %v18956_v63 = vsub.f32 %v15164_v13, %v12678_v12 }
 0x738   : > { %v18958_v39 = vsub.f32 %v12466_v59, %v12678_v12  ;;  %v18960_v6 = vsub.f32 %v12469_v0, %v12678_v12  ;;  %v18962_v31 = vsub.f32 %v15167_v61, %v12678_v12  ;;  %v18964_v58 = vsub.f32 %v15168_v49, %v12678_v12 }
 0x739   : > { %v18966_v23 = vsub.f32 %v12482_v45, %v12678_v12  ;;  %v18968_v53 = vsub.f32 %v12485_v2, %v12678_v12  ;;  %v18970_v20 = vsub.f32 %v15171_v47, %v12678_v12  ;;  %v18972_v24 = vsub.f32 %v15172_v60, %v12678_v12 }
 0x73a   : > { %v18974_v16 = vsub.f32 %v12498_v11, %v12678_v12  ;;  %v18976_v13 = vsub.f32 %v12501_v35, %v12678_v12  ;;  %v18978_v42 = vsub.f32 %v15175_v32, %v12678_v12  ;;  %v18980_v21 = vsub.f32 %v15176_v38, %v12678_v12 }
 0x73b   : > { %v12711_v61 = vmul.f32 %v18909_v9, %v18909_v9  ;;  %v12712_v28 = vmul.f32 %v18912_v40, %v18912_v40  ;;  %v12713_v59 = vmul.f32 %v18915_v55, %v18915_v55  ;;  %v12714_v49 = vmul.f32 %v18918_v30, %v18918_v30 }
 0x73c   : > { %v12715_v46 = vmul.f32 %v18921_v29, %v18921_v29  ;;  %v12716_v47 = vmul.f32 %v18924_v51, %v18924_v51  ;;  %v12717_v45 = vmul.f32 %v18927_v34, %v18927_v34  ;;  %v12718_v60 = vmul.f32 %v18930_v1, %v18930_v1 }
 0x73d   : > { %v12743_v48 = vadd.f32 %v12712_v28, %v12711_v61  ;;  %v12719_v8 = vmul.f32 %v18932_v22, %v18932_v22  ;;  %v12720_v32 = vmul.f32 %v18934_v10, %v18934_v10  ;;  %v12721_v11 = vmul.f32 %v18937_v18, %v18937_v18 }
 0x73e   : > { %v12722_v38 = vmul.f32 %v18940_v3, %v18940_v3  ;;  %v12723_v15 = vmul.f32 %v18942_v44, %v18942_v44  ;;  %v12724_v14 = vmul.f32 %v18944_v41, %v18944_v41  ;;  %v12725_v19 = vmul.f32 %v18946_v17, %v18946_v17 }
 0x73f   : > { %v12744_v0 = vadd.f32 %v12743_v48, %v12713_v59  ;;  %v12726_v37 = vmul.f32 %v18948_v33, %v18948_v33  ;;  %v12727_v62 = vmul.f32 %v18950_v54, %v18950_v54  ;;  %v12728_v61 = vmul.f32 %v18952_v5, %v18952_v5 }
 0x740   : > { %v12729_v59 = vmul.f32 %v18954_v50, %v18954_v50 }
 0x741   : > { %v12745_v57 = vadd.f32 %v12744_v0, %v12714_v49  ;;  %v12730_v49 = vmul.f32 %v18956_v63, %v18956_v63 }
 0x743   : > { %v12746_v43 = vadd.f32 %v12745_v57, %v12715_v46  ;;  %v12731_v46 = vmul.f32 %v18958_v39, %v18958_v39 }
 0x745   : > { %v12747_v56 = vadd.f32 %v12746_v43, %v12716_v47  ;;  %v12732_v47 = vmul.f32 %v18960_v6, %v18960_v6 }
 0x747   : > { %v12748_v2 = vadd.f32 %v12747_v56, %v12717_v45  ;;  %v12733_v45 = vmul.f32 %v18962_v31, %v18962_v31 }
 0x749   : > { %v12749_v7 = vadd.f32 %v12748_v2, %v12718_v60  ;;  %v12734_v60 = vmul.f32 %v18964_v58, %v18964_v58 }
 0x74b   : > { %v12750_v4 = vadd.f32 %v12749_v7, %v12719_v8  ;;  %v12735_v8 = vmul.f32 %v18966_v23, %v18966_v23 }
 0x74d   : > { %v12751_v52 = vadd.f32 %v12750_v4, %v12720_v32  ;;  %v12736_v32 = vmul.f32 %v18968_v53, %v18968_v53 }
 0x74f   : > { %v12752_v35 = vadd.f32 %v12751_v52, %v12721_v11  ;;  %v12737_v11 = vmul.f32 %v18970_v20, %v18970_v20 }
 0x751   : > { %v12753_v26 = vadd.f32 %v12752_v35, %v12722_v38  ;;  %v12738_v38 = vmul.f32 %v18972_v24, %v18972_v24 }
 0x753   : > { %v12754_v27 = vadd.f32 %v12753_v26, %v12723_v15  ;;  %v12739_v15 = vmul.f32 %v18974_v16, %v18974_v16 }
 0x755   : > { %v12755_v25 = vadd.f32 %v12754_v27, %v12724_v14  ;;  %v12740_v14 = vmul.f32 %v18976_v13, %v18976_v13 }
 0x757   : > { %v12756_v36 = vadd.f32 %v12755_v25, %v12725_v19  ;;  %v12741_v19 = vmul.f32 %v18978_v42, %v18978_v42 }
 0x759   : > { %v12757_v12 = vadd.f32 %v12756_v36, %v12726_v37  ;;  %v12742_v37 = vmul.f32 %v18980_v21, %v18980_v21 }
 0x75b   : > { %v12758_v28 = vadd.f32 %v12757_v12, %v12727_v62 }
 0x75d   : > { %v12759_v48 = vadd.f32 %v12758_v28, %v12728_v61 }
 0x75f   : > { %v12760_v0 = vadd.f32 %v12759_v48, %v12729_v59 }
 0x761   : > { %v12761_v57 = vadd.f32 %v12760_v0, %v12730_v49 }
 0x763   : > { %v12762_v43 = vadd.f32 %v12761_v57, %v12731_v46 }
 0x765   : > { %v12763_v56 = vadd.f32 %v12762_v43, %v12732_v47 }
 0x767   : > { %v12764_v2 = vadd.f32 %v12763_v56, %v12733_v45 }
 0x769   : > { %v12765_v7 = vadd.f32 %v12764_v2, %v12734_v60 }
 0x76b   : > { %v12766_v4 = vadd.f32 %v12765_v7, %v12735_v8 }
 0x76d   : > { %v12767_v52 = vadd.f32 %v12766_v4, %v12736_v32  ;;  %v15975_v32 = vld [vmem:[%s16160_s7 + $0xe8] sm:$0xff] }
 0x76f   : > { %v12768_v35 = vadd.f32 %v12767_v52, %v12737_v11  ;;  %v15979_v52 = vld [vmem:[%s16160_s7 + $0x18] sm:$0xff] }
 0x771   : > { %v12769_v26 = vadd.f32 %v12768_v35, %v12738_v38  ;;  %v15980_v38 = vld [vmem:[%s16160_s7 + $0x20] sm:$0xff]  ;;  %v15981_v35 = vld [vmem:[%s16160_s7 + $0x28] sm:$0xff] }
 0x773   : > { %v12770_v27 = vadd.f32 %v12769_v26, %v12739_v15  ;;  %v15982_v15 = vld [vmem:[%s16160_s7 + $0x30] sm:$0xff] }
 0x775   : > { %v12771_v25 = vadd.f32 %v12770_v27, %v12740_v14  ;;  %v15983_v14 = vld [vmem:[%s16160_s7 + $0x38] sm:$0xff] }
 0x777   : > { %v12772_v36 = vadd.f32 %v12771_v25, %v12741_v19  ;;  %v15984_v19 = vld [vmem:[%s16160_s7 + $0x40] sm:$0xff] }
 0x779   : > { %v12773_v62 = vadd.f32 %v12772_v36, %v12742_v37  ;;  %v15985_v37 = vld [vmem:[%s16160_s7 + $0x48] sm:$0xff] }
 0x77b   : > { %v12774_v12 = vrot.slane %v12773_v62, 4 }
 0x77d   : > { %v12775_v61 = vadd.f32 %v12774_v12, %v12773_v62  ;;  %v15986_v62 = vld [vmem:[%s16160_s7 + $0x50] sm:$0xff] }
 0x77f   : > { %v12776_v28 = vrot.slane %v12775_v61, 2 }
 0x781   : > { %v12777_v59 = vadd.f32 %v12776_v28, %v12775_v61  ;;  %v15987_v61 = vld [vmem:[%s16160_s7 + $0x58] sm:$0xff] }
 0x783   : > { %v12778_v48 = vrot.slane %v12777_v59, 1 }
 0x785   : > { %v12779_v49 = vadd.f32 %v12778_v48, %v12777_v59  ;;  %v15988_v59 = vld [vmem:[%s16160_s7 + $0x60] sm:$0xff] }
 0x787   : > { %v12780_v0 = vmul.f32 0.00390625, %v12779_v49  ;;  %v15989_v49 = vld [vmem:[%s16160_s7 + $0x68] sm:$0xff] }
 0x789   : > { %v12781_v46 = vadd.f32 1e-05, %v12780_v0 }
 0x78b   : > { %15973 = vrsqrt.f32 %v12781_v46  ;;  %v15990_v46 = vld [vmem:[%s16160_s7 + $0x70] sm:$0xff] }
 0x795   : > { %v15974_v57 = vpop.eup %15973 }
 0x796   : > { %v12812_v47 = vmul.f32 %v15974_v57, %v18976_v13  ;;  %v12783_v43 = vmul.f32 %v15974_v57, %v18909_v9  ;;  %v12784_v45 = vmul.f32 %v15974_v57, %v18912_v40  ;;  %v12785_v56 = vmul.f32 %v15974_v57, %v18915_v55 }
 0x797   : > { %v12786_v60 = vmul.f32 %v15974_v57, %v18918_v30  ;;  %v12787_v2 = vmul.f32 %v15974_v57, %v18921_v29  ;;  %v12788_v8 = vmul.f32 %v15974_v57, %v18924_v51  ;;  %v12789_v7 = vmul.f32 %v15974_v57, %v18927_v34 }
 0x798   : > { %v12844_v4 = vadd.f32 %v15975_v32, %v12812_v47  ;;  %v12790_v11 = vmul.f32 %v15974_v57, %v18930_v1  ;;  %v12791_v13 = vmul.f32 %v15974_v57, %v18932_v22  ;;  %v12792_v9 = vmul.f32 %v15974_v57, %v18934_v10  ;;  %v15991_v47 = vld [vmem:[%s16160_s7 + $0x78] sm:$0xff] }
 0x799   : > { %v12793_v40 = vmul.f32 %v15974_v57, %v18937_v18  ;;  %v12794_v55 = vmul.f32 %v15974_v57, %v18940_v3  ;;  %v12795_v30 = vmul.f32 %v15974_v57, %v18942_v44  ;;  %v12796_v29 = vmul.f32 %v15974_v57, %v18944_v41  ;;  %v15995_v32 = vld [vmem:[%s16160_s7 + $0x98] sm:$0xff] }
 0x79a   : > { %12876 = vst [vmem:[%s19065_s29 + $0xe8] sm:$0xff] %v12844_v4  ;;  %v12797_v51 = vmul.f32 %v15974_v57, %v18946_v17  ;;  %v12798_v34 = vmul.f32 %v15974_v57, %v18948_v33  ;;  %v12799_v1 = vmul.f32 %v15974_v57, %v18950_v54  ;;  %v12800_v22 = vmul.f32 %v15974_v57, %v18952_v5 }
 0x79b   : > { %v12801_v10 = vmul.f32 %v15974_v57, %v18954_v50  ;;  %v19074_v18 = vmul.f32 %v15974_v57, %v18956_v63  ;;  %v19077_v3 = vmul.f32 %v15974_v57, %v18958_v39  ;;  %v19080_v44 = vmul.f32 %v15974_v57, %v18960_v6 }
 0x79c   : > { %v19083_v41 = vmul.f32 %v15974_v57, %v18962_v31  ;;  %v19086_v17 = vmul.f32 %v15974_v57, %v18964_v58  ;;  %v19089_v33 = vmul.f32 %v15974_v57, %v18966_v23  ;;  %v19092_v54 = vmul.f32 %v15974_v57, %v18968_v53  ;;  %v15976_v31 = vld [vmem:[%s16160_s7] sm:$0xff]  ;;  %v15977_v23 = vld [vmem:[%s16160_s7 + $0x8] sm:$0xff] }
 0x79d   : > { %v19095_v5 = vmul.f32 %v15974_v57, %v18970_v20  ;;  %v19098_v50 = vmul.f32 %v15974_v57, %v18972_v24  ;;  %v19101_v63 = vmul.f32 %v15974_v57, %v18974_v16  ;;  %v19104_v39 = vmul.f32 %v15974_v57, %v18978_v42  ;;  %v15978_v20 = vld [vmem:[%s16160_s7 + $0x10] sm:$0xff] }
 0x79e   : > { %v19107_v6 = vmul.f32 %v15974_v57, %v18980_v21  ;;  %v12815_v58 = vadd.f32 %v15976_v31, %v12783_v43  ;;  %v12816_v53 = vadd.f32 %v15977_v23, %v12784_v45  ;;  %v12817_v24 = vadd.f32 %v15978_v20, %v12785_v56  ;;  %v15992_v45 = vld [vmem:[%s16160_s7 + $0x80] sm:$0xff]  ;;  %v16006_v31 = vld [vmem:[%s16160_s7 + $0xf8] sm:$0xff] }
 0x79f   : > { %v12818_v16 = vadd.f32 %v15979_v52, %v12786_v60  ;;  %v12819_v42 = vadd.f32 %v15980_v38, %v12787_v2  ;;  %v12820_v21 = vadd.f32 %v15981_v35, %v12788_v8  ;;  %v12821_v26 = vadd.f32 %v15982_v15, %v12789_v7  ;;  %v15993_v60 = vld [vmem:[%s16160_s7 + $0x88] sm:$0xff]  ;;  %v15994_v8 = vld [vmem:[%s16160_s7 + $0x90] sm:$0xff] }
 0x7a0   : > { %v12822_v27 = vadd.f32 %v15983_v14, %v12790_v11  ;;  %v12823_v25 = vadd.f32 %v15984_v19, %v12791_v13  ;;  %v12824_v36 = vadd.f32 %v15985_v37, %v12792_v9  ;;  %v12825_v12 = vadd.f32 %v15986_v62, %v12793_v40  ;;  %12847 = vst [vmem:[%s19065_s29] sm:$0xff] %v12815_v58  ;;  %v15996_v11 = vld [vmem:[%s16160_s7 + $0xa0] sm:$0xff]  ;;  %v15997_v9 = vld [vmem:[%s16160_s7 + $0xa8] sm:$0xff] }
 0x7a1   : > { %12848 = vst [vmem:[%s19065_s29 + $0x8] sm:$0xff] %v12816_v53  ;;  %12849 = vst [vmem:[%s19065_s29 + $0x10] sm:$0xff] %v12817_v24  ;;  %v12826_v28 = vadd.f32 %v15987_v61, %v12794_v55  ;;  %v12827_v48 = vadd.f32 %v15988_v59, %v12795_v30  ;;  %v12828_v0 = vadd.f32 %v15989_v49, %v12796_v29  ;;  %v15998_v55 = vld [vmem:[%s16160_s7 + $0xb0] sm:$0xff]  ;;  %v15999_v29 = vld [vmem:[%s16160_s7 + $0xb8] sm:$0xff] }
 0x7a2   : > { %v12829_v57 = vadd.f32 %v15990_v46, %v12797_v51  ;;  %12850 = vst [vmem:[%s19065_s29 + $0x18] sm:$0xff] %v12818_v16  ;;  %12851 = vst [vmem:[%s19065_s29 + $0x20] sm:$0xff] %v12819_v42  ;;  %v12830_v43 = vadd.f32 %v15991_v47, %v12798_v34  ;;  %v12831_v56 = vadd.f32 %v15992_v45, %v12799_v1  ;;  %v16000_v34 = vld [vmem:[%s16160_s7 + $0xc0] sm:$0xff] }
 0x7a3   : > { %12852 = vst [vmem:[%s19065_s29 + $0x28] sm:$0xff] %v12820_v21  ;;  %12853 = vst [vmem:[%s19065_s29 + $0x30] sm:$0xff] %v12821_v26  ;;  %v12832_v2 = vadd.f32 %v15993_v60, %v12800_v22  ;;  %v12833_v7 = vadd.f32 %v15994_v8, %v12801_v10  ;;  %v12834_v4 = vadd.f32 %v15995_v32, %v19074_v18  ;;  %v16001_v22 = vld [vmem:[%s16160_s7 + $0xc8] sm:$0xff]  ;;  %v16002_v18 = vld [vmem:[%s16160_s7 + $0xd0] sm:$0xff] }
 0x7a4   : > { %12854 = vst [vmem:[%s19065_s29 + $0x38] sm:$0xff] %v12822_v27  ;;  %12855 = vst [vmem:[%s19065_s29 + $0x40] sm:$0xff] %v12823_v25  ;;  %v12835_v13 = vadd.f32 %v15996_v11, %v19077_v3  ;;  %v12836_v40 = vadd.f32 %v15997_v9, %v19080_v44  ;;  %v12837_v30 = vadd.f32 %v15998_v55, %v19083_v41  ;;  %v16003_v44 = vld [vmem:[%s16160_s7 + $0xd8] sm:$0xff] }
 0x7a5   : > { %12856 = vst [vmem:[%s19065_s29 + $0x48] sm:$0xff] %v12824_v36  ;;  %12857 = vst [vmem:[%s19065_s29 + $0x50] sm:$0xff] %v12825_v12  ;;  %v12838_v51 = vadd.f32 %v15999_v29, %v19086_v17  ;;  %v12839_v1 = vadd.f32 %v16000_v34, %v19089_v33  ;;  %v12840_v10 = vadd.f32 %v16001_v22, %v19092_v54  ;;  %v16004_v17 = vld [vmem:[%s16160_s7 + $0xe0] sm:$0xff]  ;;  %v16005_v54 = vld [vmem:[%s16160_s7 + $0xf0] sm:$0xff]  ;;  %s16007_s7 = scalar_lea.vmem %s19174_s4, 4096 }
 0x7a6   : > { %12858 = vst [vmem:[%s19065_s29 + $0x58] sm:$0xff] %v12826_v28  ;;  %12859 = vst [vmem:[%s19065_s29 + $0x60] sm:$0xff] %v12827_v48  ;;  %v12841_v3 = vadd.f32 %v16002_v18, %v19095_v5  ;;  %v12842_v41 = vadd.f32 %v16003_v44, %v19098_v50  ;;  %v12843_v33 = vadd.f32 %v16004_v17, %v19101_v63  ;;  %p16008_p11 = scmp.ne.s32.totalorder %s19174_s4, %s16007_s7  ;;  %p16015_p1 = scmp.lt.s32.totalorder %s16013_s11, %s16007_s7 }
 0x7a7   : > { %12860 = vst [vmem:[%s19065_s29 + $0x68] sm:$0xff] %v12828_v0  ;;  %12861 = vst [vmem:[%s19065_s29 + $0x70] sm:$0xff] %v12829_v57  ;;  %v12845_v5 = vadd.f32 %v16005_v54, %v19104_v39  ;;  %v12846_v58 = vadd.f32 %v16006_v31, %v19107_v6 }
 0x7a8   : > { %12862 = vst [vmem:[%s19065_s29 + $0x78] sm:$0xff] %v12830_v43  ;;  %12863 = vst [vmem:[%s19065_s29 + $0x80] sm:$0xff] %v12831_v56  ;;  %p16009_p12 = pnand %p16008_p11, %p16133_p5  ;;  %p16016_p2 = por %p16015_p1, %p16014_p0 }
 0x7a9   : > { %12864 = vst [vmem:[%s19065_s29 + $0x88] sm:$0xff] %v12832_v2  ;;  %12865 = vst [vmem:[%s19065_s29 + $0x90] sm:$0xff] %v12833_v7 }
 0x7aa   : > { %12866 = vst [vmem:[%s19065_s29 + $0x98] sm:$0xff] %v12834_v4  ;;  %12867 = vst [vmem:[%s19065_s29 + $0xa0] sm:$0xff] %v12835_v13  ;;  %p16010_p13 = pneg %p16009_p12 }
 0x7ab   : > { %12868 = vst [vmem:[%s19065_s29 + $0xa8] sm:$0xff] %v12836_v40  ;;  %12869 = vst [vmem:[%s19065_s29 + $0xb0] sm:$0xff] %v12837_v30 }
 0x7ac   : > { %12870 = vst [vmem:[%s19065_s29 + $0xb8] sm:$0xff] %v12838_v51  ;;  %12871 = vst [vmem:[%s19065_s29 + $0xc0] sm:$0xff] %v12839_v1  ;;  %p16017_p3 = pnand %p16016_p2, %p16010_p13 }
 0x7ad   : > { %12872 = vst [vmem:[%s19065_s29 + $0xc8] sm:$0xff] %v12840_v10  ;;  %12873 = vst [vmem:[%s19065_s29 + $0xd0] sm:$0xff] %v12841_v3 }
 0x7ae   : > { %12874 = vst [vmem:[%s19065_s29 + $0xd8] sm:$0xff] %v12842_v41  ;;  %12875 = vst [vmem:[%s19065_s29 + $0xe0] sm:$0xff] %v12843_v33 }
 0x7af   : > { %12877 = vst [vmem:[%s19065_s29 + $0xf0] sm:$0xff] %v12845_v5  ;;  %12878 = vst [vmem:[%s19065_s29 + $0xf8] sm:$0xff] %v12846_v58 }
 0x7b0   : > { %16020 = shalt.err (!%p16017_p3)
}
 0x7b1   : > { %s16021_s17 = scalar_lea.hbm %s19170_s8, 4096  ;;  %s16025_s24 = scalar_lea.hbm %s19242_s3, 8192 }
 0x7b2   : > { %p16022_p4 = scmp.ne.s32.totalorder %s19170_s8, %s16021_s17  ;;  %p16026_p9 = scmp.lt.u32.totalorder %s19170_s8, %s19242_s3 }
 0x7b3   : > { %p16027_p10 = scmp.lt.u32.totalorder %s16025_s24, %s16021_s17  ;;  %p16029_p12 = scmp.lt.u32.totalorder %s16021_s17, %s19170_s8 }
 0x7b4   : > { %p16023_p7 = pnand %p16022_p4, %p16133_p5 }
 0x7b5   : > { %p16028_p11 = por %p16027_p10, %p16026_p9 }
 0x7b6   : > { %p16024_p8 = pneg %p16023_p7 }
 0x7b7   : > { %p16030_p13 = por %p16029_p12, %p16028_p11 }
 0x7b9   : > { %p16031_p0 = pnand %p16030_p13, %p16024_p8 }
 0x7bb   : > { %16034 = shalt.err (!%p16031_p0)
}
 0x7bc   : > { %s16073_s27 = smov 128   ;;  %s16074_s28 = smov 8  }
 0x7bd   : > { %15689 = dma.vmem_to_hbm [thread:$0]  (%p16133_p5), %s19174_s4, 4096, %s19170_s8, %s19198_s16, %s16073_s27, %s16073_s27, %s16074_s28  }
 0x7be PF: > { %p15695_p1 = scmp.ge.s32.totalorder %s16069_s15, 2  ;;  %s12908_s29 = sand.u32 1, %s16057_s12  }
 0x7bf   : > { %s12909_s30 = scalar_lea.sflag [#allocation5], %s12908_s29 }
 0x7c0   : > { %p15692_p2 = pnand %p15695_p1, %p16137_p6 }
 0x7c2   : > { %16052 = dma.done.wait (!%p15692_p2), %s12909_s30, 4096  }
 0x7c3   : > { %16054 = vsyncadd (!%p15692_p2), %s12909_s30, 4294963200  ;;  %p13_p3 = scmp.ge.s32.totalorder %s16120_s18, 4   ;;  %s19312_s12 = smov %s16061_s13 }
 0x7c4   : > { %s19313_s13 = smov %s16065_s14  ;;  %s19314_s14 = smov %s16131_s21 }
 0x7c5   : > { %s19315_s15 = smov %s16120_s18  ;;  %15 = sbr.rel (!%p13_p3) target bundleno = 3 (0x3), region = 85 }
 0x7cc   :  { %12914 = vsyncpa [#allocation5], 1 }
 0x7cd   :  { %12916 = vsyncpa [#allocation5 + $0x1], 1 }

</bundles_post_ra>
